<compile_context>
chip_gen: v7x
topology: tpu7x:2x2x1
jax: 0.10.0
libtpu: 0.0.40
codegen_flags: <defaults>
</compile_context>

<pallas_src>
import numpy as np
import jax
import jax.numpy as jnp
from jax.experimental import pallas as pl
from jax.experimental.pallas import tpu as pltpu

PI = np.pi


# ----------------------------------------------------------------------------
# Deterministic filter construction (faithful port of Hough.__init__ helpers).
# Host-side numpy, done once.
# ----------------------------------------------------------------------------
def _generate_grid(h, w):
    xs = np.tile(np.arange(w, dtype=np.float32), h)        # x.repeat(h)
    ys = np.repeat(np.arange(h, dtype=np.float32), w)      # y.repeat(w,1).t().view(-1)
    return np.stack([xs, ys], axis=1)


def _calculate_logmap(im_size, center, angle=90, R2_list=(4, 64, 256, 1024)):
    points = _generate_grid(im_size[0], im_size[1])
    total_angles = 360 / angle
    y_dif = points[:, 1] - float(center[0])
    x_dif = points[:, 0] - float(center[1])
    sum_of_squares = x_dif * x_dif + y_dif * y_dif
    arc_angle = (np.arctan2(y_dif, x_dif) * 180.0 / PI).astype(np.int64)
    arc_angle = np.where(arc_angle < 0, arc_angle + 360, arc_angle)
    angle_id = (arc_angle / angle).astype(np.int64) + 1
    c_region = np.full(sum_of_squares.shape, len(R2_list), dtype=np.int64)
    for i in range(len(R2_list) - 1, -1, -1):
        c_region = np.where(sum_of_squares <= R2_list[i], i, c_region)
    results = angle_id + (c_region - 1) * total_angles
    results = np.where(results < 0, 0.0, results)
    return results.reshape(im_size[0], im_size[1])


def _prepare_deconv_filters(region_num=9, vote_field_size=17):
    vote_center = (64, 64)
    logmap = _calculate_logmap((128, 128), vote_center)
    num_oh = int(logmap.max() + 1)
    onehot = np.eye(num_oh, dtype=np.float32)[logmap.astype(np.int64)]   # (128,128,num_oh)
    onehot = onehot[:, :, :region_num]
    sums = onehot.sum(axis=(0, 1))
    weights = onehot / np.clip(sums, 1.0, None)
    half = int(vote_field_size / 2)
    start = 63 - half + 1
    stop = 63 + half + 2
    filt = weights[start:stop, start:stop, :].transpose(2, 0, 1)          # (R, K, K)
    return filt.reshape(region_num, 1, vote_field_size, vote_field_size).astype(np.float32)


def _build_lane_toeplitz(w_flip, W):
    """Banded matrices B of shape (K, R*W, W).

    B[u, r*W + xi, xo] = w_flip[r, u, xi - xo + pad]  if the tap lands inside the
    kernel support, else 0.  Multiplying a region-concatenated row slab by B[u]
    performs the lane (W-axis) and region contractions for tap u on the MXU; the
    W boundary is handled by construction (zeros outside the band/image).
    """
    R, K, _ = w_flip.shape
    pad = K // 2
    xi = np.arange(W)[:, None]
    xo = np.arange(W)[None, :]
    v = xi - xo + pad                      # (W, W) tap index
    valid = (v >= 0) & (v < K)
    vc = np.clip(v, 0, K - 1)
    out = np.zeros((K, R * W, W), np.float32)
    for u in range(K):
        for r in range(R):
            out[u, r * W:(r + 1) * W, :] = np.where(valid, w_flip[r, u][vc], 0.0)
    return out


# ----------------------------------------------------------------------------
# Pallas kernel: one (batch, class-block) step of the vote aggregation.
# ----------------------------------------------------------------------------
def _make_hough_kernel(R, C_blk, H, W, K):
    pad = K // 2
    Hp = H + K - 1          # padded slab height per class
    RW = R * W

    def kernel(x_ref, b_ref, o_ref, xpad_ref):
        # x_ref:    (R, C_blk, H, W)     input voting planes (HBM dtype, usually f32)
        # b_ref:    (K, RW, W)           per-tap banded weight matrices (resident)
        # o_ref:    (C_blk, H, W)        float32 heatmap block
        # xpad_ref: (C_blk*Hp, RW)       scratch: H-padded, region-concatenated slab
        #                                 in the MXU compute dtype (bf16 by default)

        # ---- Stage: cast to compute dtype, concat regions on lanes, zero H-pad rows.
        # Pure VMEM traffic; no host-side transpose / pad / astype pass over HBM.
        zero_strip = jnp.zeros((pad, RW), xpad_ref.dtype)
        for c in range(C_blk):
            base = c * Hp
            xpad_ref[base:base + pad, :] = zero_strip
            xpad_ref[base + pad + H:base + Hp, :] = zero_strip
            for r in range(R):
                xpad_ref[base + pad:base + pad + H, r * W:(r + 1) * W] = (
                    x_ref[r, c].astype(xpad_ref.dtype))

        # ---- Init accumulator (the output block itself).
        o_ref[...] = jnp.zeros_like(o_ref)

        # ---- K taps, statically unrolled.  One merged-M matmul per tap:
        #        (C_blk*Hp, RW) @ (RW, W) -> (C_blk*Hp, W)   f32 accumulation on MXU,
        # then accumulate the statically u-shifted (H, W) slice of the RESULT per class
        # (shift on a small f32 value; the big bf16 LHS slab stays sublane-aligned).
        for u in range(K):
            w_u = b_ref[u]                                          # (RW, W)
            full = jnp.dot(xpad_ref[...], w_u,
                           preferred_element_type=jnp.float32)      # (C_blk*Hp, W) f32
            for c in range(C_blk):
                s = c * Hp + u
                o_ref[c] += full[s:s + H, :]

    return kernel


# ----------------------------------------------------------------------------
# Wrapper module.
# ----------------------------------------------------------------------------
class HoughPallas:
    def __init__(self, angle=90, R2_list=(4, 64, 256, 1024), num_classes=80,
                 region_num=9, vote_field_size=17, class_block=8,
                 compute_dtype=jnp.bfloat16, vmem_limit_bytes=48 * 1024 * 1024):
        self.angle = angle
        self.R2_list = R2_list
        self.num_classes = num_classes
        self.region_num = region_num
        self.vote_field_size = vote_field_size
        self.class_block = class_block            # classes per grid step (8 and 16 divide 80)
        self.compute_dtype = compute_dtype        # bf16 operands, f32 accumulation (default)
        self.vmem_limit_bytes = vmem_limit_bytes  # explicit scoped-VMEM ceiling (all gens)
        # (R, 1, K, K), matching nn.ConvTranspose2d weight layout
        self.deconv_filters = _prepare_deconv_filters(region_num, vote_field_size)
        # conv_transpose(stride=1, pad=K//2)  ==  same-correlation with flipped kernel
        self.w_flip = np.ascontiguousarray(
            self.deconv_filters[:, 0, ::-1, ::-1]).astype(np.float32)       # (R, K, K)
        self._bmat_cache = {}
        self._call_cache = {}
        self._single_buffer_weights = True        # downgraded automatically if unsupported

    def _pick_class_block(self, C):
        for cb in range(min(self.class_block, C), 0, -1):
            if C % cb == 0:
                return cb
        return 1

    def _toeplitz(self, W):
        if W not in self._bmat_cache:
            bm = _build_lane_toeplitz(self.w_flip, W)                        # (K, R*W, W)
            self._bmat_cache[W] = jnp.asarray(bm, self.compute_dtype)
        return self._bmat_cache[W]

    def _build_call(self, B, C, H, W, C_blk, single_buffer_weights):
        R, K = self.region_num, self.vote_field_size
        Hp = H + K - 1
        RW = R * W
        kernel = _make_hough_kernel(R, C_blk, H, W, K)

        if single_buffer_weights:
            # Constant index_map -> DMA'd once and resident; a single buffer avoids
            # wasting another ~5 MiB (bf16) on a pointless double buffer.
            w_spec = pl.BlockSpec((K, RW, W), lambda b, c: (0, 0, 0),
                                  pipeline_mode=pl.Buffered(1))
        else:
            w_spec = pl.BlockSpec((K, RW, W), lambda b, c: (0, 0, 0))

        return pl.pallas_call(
            kernel,
            out_shape=jax.ShapeDtypeStruct((B, C, H, W), jnp.float32),
            grid=(B, C // C_blk),
            in_specs=[
                pl.BlockSpec((None, R, C_blk, H, W), lambda b, c: (b, 0, c, 0, 0)),
                w_spec,
            ],
            out_specs=pl.BlockSpec((None, C_blk, H, W), lambda b, c: (b, c, 0, 0)),
            scratch_shapes=[pltpu.VMEM((C_blk * Hp, RW), self.compute_dtype)],
            compiler_params=pltpu.CompilerParams(
                dimension_semantics=("parallel", "parallel"),
                vmem_limit_bytes=self.vmem_limit_bytes),
        )

    def __call__(self, voting_map):
        B, ch, H, W = voting_map.shape
        R, C = self.region_num, self.num_classes
        assert ch == R * C
        C_blk = self._pick_class_block(C)
        bmat = self._toeplitz(W)

        # Free reshape only — no transpose pass, no host-side padding, no host astype
        # (the bf16 cast happens inside the kernel during the VMEM staging copy).
        x = voting_map.reshape(B, R, C, H, W)

        key = (B, C, H, W, C_blk)
        if key in self._call_cache:
            return self._call_cache[key](x, bmat)

        last_err = None
        modes = (True, False) if self._single_buffer_weights else (False,)
        for single_buf in modes:
            try:
                call = self._build_call(B, C, H, W, C_blk, single_buf)
                out = call(x, bmat)
            except Exception as err:   # e.g. pl.Buffered(1) unsupported -> retry plain spec
                last_err = err
                continue
            self._single_buffer_weights = single_buf
            self._call_cache[key] = call
            return out
        raise last_err


# ----------------------------------------------------------------------------
# Pure-numpy reference: direct transcription of ConvTranspose2d scatter semantics.
# ----------------------------------------------------------------------------
def _reference_forward(voting_map, deconv_filters, region_num, num_classes, K):
    B, ch, H, W = voting_map.shape
    pad = K // 2
    vm = voting_map.reshape(B, region_num, num_classes, H, W)
    Wk = deconv_filters[:, 0]                                # (R, K, K)
    heat = np.zeros((B, num_classes, H, W), np.float32)
    for c in range(num_classes):
        x = vm[:, :, c]                                      # (B, R, H, W)
        out_full = np.zeros((B, H + K - 1, W + K - 1), np.float64)
        for a in range(H):
            for b in range(W):
                out_full[:, a:a + K, b:b + K] += np.einsum(
                    'br,rij->bij', x[:, :, a, b].astype(np.float64),
                    Wk.astype(np.float64))
        heat[:, c] = out_full[:, pad:pad + H, pad:pad + W].astype(np.float32)
    return heat


if __name__ == "__main__":
    B, num_classes, region_num, H, W = 2, 4, 9, 16, 16
    vote_field_size = 17

    key = jax.random.PRNGKey(0)
    x = jax.random.normal(key, (B, region_num * num_classes, H, W), dtype=jnp.float32)

    # Strict numerical validation of the kernel structure on the f32 path.
    hough_f32 = HoughPallas(num_classes=num_classes, region_num=region_num,
                            vote_field_size=vote_field_size, class_block=2,
                            compute_dtype=jnp.float32)
    heat_f32 = jax.block_until_ready(hough_f32(x))
    assert heat_f32.shape == (B, num_classes, H, W)
    assert heat_f32.dtype == jnp.float32

    ref = _reference_forward(np.asarray(x), hough_f32.deconv_filters,
                             region_num, num_classes, vote_field_size)
    if not np.allclose(np.asarray(heat_f32), ref, rtol=1e-4, atol=1e-4):
        max_err = float(np.max(np.abs(np.asarray(heat_f32) - ref)))
        raise AssertionError(
            f"f32 Pallas Hough output does not match reference (max abs err {max_err})")

    # Production default: bf16 MXU operands, f32 accumulation (looser tolerance).
    hough_bf16 = HoughPallas(num_classes=num_classes, region_num=region_num,
                             vote_field_size=vote_field_size)
    heat_bf16 = jax.block_until_ready(hough_bf16(x))
    assert heat_bf16.shape == (B, num_classes, H, W)
    if not np.allclose(np.asarray(heat_bf16), ref, rtol=2e-2, atol=1e-2):
        max_err = float(np.max(np.abs(np.asarray(heat_bf16) - ref)))
        raise AssertionError(
            f"bf16 Pallas Hough output does not match reference (max abs err {max_err})")

    print("KERNEL_OK")
</pallas_src>

<mosaic_0001>
module attributes {stable_mosaic.version = 11 : i64} {
  func.func @kernel(%arg0: i32, %arg1: i32, %arg2: memref<1x9x2x16x16xf32, #tpu.memory_space<vmem>>, %arg3: memref<17x144x16xf32, #tpu.memory_space<vmem>>, %arg4: memref<1x2x16x16xf32, #tpu.memory_space<vmem>>, %arg5: memref<64x144xf32, #tpu.memory_space<vmem>>) attributes {dimension_semantics = [#tpu.dimension_semantics<parallel>, #tpu.dimension_semantics<parallel>], iteration_bounds = array<i64: 2, 2>, scalar_prefetch = 0 : i64, scratch_operands = 1 : i64, tpu.core_type = #tpu.core_type<tc>, window_params = [{transform_indices = @transform_0, window_bounds = array<i64: 1, 9, 2, 16, 16>}, {pipeline_mode = #tpu.pipeline_mode<synchronous>, transform_indices = @transform_1, window_bounds = array<i64: 17, 144, 16>}, {transform_indices = @transform_2, window_bounds = array<i64: 1, 2, 16, 16>}]} {
    %cst = arith.constant 0.000000e+00 : f32
    %0 = vector.broadcast %cst : f32 to vector<8x144xf32>
    %c0 = arith.constant 0 : index
    %c0_0 = arith.constant 0 : index
    %1 = vector.load %arg5[%c0, %c0_0] : memref<64x144xf32, #tpu.memory_space<vmem>>, vector<8x144xf32>
    tpu.vector_store %arg5[%c0, %c0_0], %0 {strides = array<i32>} : memref<64x144xf32, #tpu.memory_space<vmem>>, vector<8x144xf32>,
    %c24 = arith.constant 24 : index
    %c0_1 = arith.constant 0 : index
    %2 = vector.load %arg5[%c24, %c0_1] : memref<64x144xf32, #tpu.memory_space<vmem>>, vector<8x144xf32>
    tpu.vector_store %arg5[%c24, %c0_1], %0 {strides = array<i32>} : memref<64x144xf32, #tpu.memory_space<vmem>>, vector<8x144xf32>,
    %c0_2 = arith.constant 0 : index
    %c0_3 = arith.constant 0 : index
    %c0_4 = arith.constant 0 : index
    %c0_5 = arith.constant 0 : index
    %c0_6 = arith.constant 0 : index
    %3 = vector.load %arg2[%c0_2, %c0_3, %c0_4, %c0_5, %c0_6] : memref<1x9x2x16x16xf32, #tpu.memory_space<vmem>>, vector<1x1x1x16x16xf32>
    %4 = vector.shape_cast %3 : vector<1x1x1x16x16xf32> to vector<16x16xf32>
    %c8 = arith.constant 8 : index
    %c0_7 = arith.constant 0 : index
    %5 = vector.load %arg5[%c8, %c0_7] : memref<64x144xf32, #tpu.memory_space<vmem>>, vector<16x16xf32>
    tpu.vector_store %arg5[%c8, %c0_7], %4 {strides = array<i32>} : memref<64x144xf32, #tpu.memory_space<vmem>>, vector<16x16xf32>,
    %c0_8 = arith.constant 0 : index
    %c1 = arith.constant 1 : index
    %c0_9 = arith.constant 0 : index
    %c0_10 = arith.constant 0 : index
    %c0_11 = arith.constant 0 : index
    %6 = vector.load %arg2[%c0_8, %c1, %c0_9, %c0_10, %c0_11] : memref<1x9x2x16x16xf32, #tpu.memory_space<vmem>>, vector<1x1x1x16x16xf32>
    %7 = vector.shape_cast %6 : vector<1x1x1x16x16xf32> to vector<16x16xf32>
    %c8_12 = arith.constant 8 : index
    %c16 = arith.constant 16 : index
    %8 = vector.load %arg5[%c8_12, %c16] : memref<64x144xf32, #tpu.memory_space<vmem>>, vector<16x16xf32>
    tpu.vector_store %arg5[%c8_12, %c16], %7 {strides = array<i32>} : memref<64x144xf32, #tpu.memory_space<vmem>>, vector<16x16xf32>,
    %c0_13 = arith.constant 0 : index
    %c2 = arith.constant 2 : index
    %c0_14 = arith.constant 0 : index
    %c0_15 = arith.constant 0 : index
    %c0_16 = arith.constant 0 : index
    %9 = vector.load %arg2[%c0_13, %c2, %c0_14, %c0_15, %c0_16] : memref<1x9x2x16x16xf32, #tpu.memory_space<vmem>>, vector<1x1x1x16x16xf32>
    %10 = vector.shape_cast %9 : vector<1x1x1x16x16xf32> to vector<16x16xf32>
    %c8_17 = arith.constant 8 : index
    %c32 = arith.constant 32 : index
    %11 = vector.load %arg5[%c8_17, %c32] : memref<64x144xf32, #tpu.memory_space<vmem>>, vector<16x16xf32>
    tpu.vector_store %arg5[%c8_17, %c32], %10 {strides = array<i32>} : memref<64x144xf32, #tpu.memory_space<vmem>>, vector<16x16xf32>,
    %c0_18 = arith.constant 0 : index
    %c3 = arith.constant 3 : index
    %c0_19 = arith.constant 0 : index
    %c0_20 = arith.constant 0 : index
    %c0_21 = arith.constant 0 : index
    %12 = vector.load %arg2[%c0_18, %c3, %c0_19, %c0_20, %c0_21] : memref<1x9x2x16x16xf32, #tpu.memory_space<vmem>>, vector<1x1x1x16x16xf32>
    %13 = vector.shape_cast %12 : vector<1x1x1x16x16xf32> to vector<16x16xf32>
    %c8_22 = arith.constant 8 : index
    %c48 = arith.constant 48 : index
    %14 = vector.load %arg5[%c8_22, %c48] : memref<64x144xf32, #tpu.memory_space<vmem>>, vector<16x16xf32>
    tpu.vector_store %arg5[%c8_22, %c48], %13 {strides = array<i32>} : memref<64x144xf32, #tpu.memory_space<vmem>>, vector<16x16xf32>,
    %c0_23 = arith.constant 0 : index
    %c4 = arith.constant 4 : index
    %c0_24 = arith.constant 0 : index
    %c0_25 = arith.constant 0 : index
    %c0_26 = arith.constant 0 : index
    %15 = vector.load %arg2[%c0_23, %c4, %c0_24, %c0_25, %c0_26] : memref<1x9x2x16x16xf32, #tpu.memory_space<vmem>>, vector<1x1x1x16x16xf32>
    %16 = vector.shape_cast %15 : vector<1x1x1x16x16xf32> to vector<16x16xf32>
    %c8_27 = arith.constant 8 : index
    %c64 = arith.constant 64 : index
    %17 = vector.load %arg5[%c8_27, %c64] : memref<64x144xf32, #tpu.memory_space<vmem>>, vector<16x16xf32>
    tpu.vector_store %arg5[%c8_27, %c64], %16 {strides = array<i32>} : memref<64x144xf32, #tpu.memory_space<vmem>>, vector<16x16xf32>,
    %c0_28 = arith.constant 0 : index
    %c5 = arith.constant 5 : index
    %c0_29 = arith.constant 0 : index
    %c0_30 = arith.constant 0 : index
    %c0_31 = arith.constant 0 : index
    %18 = vector.load %arg2[%c0_28, %c5, %c0_29, %c0_30, %c0_31] : memref<1x9x2x16x16xf32, #tpu.memory_space<vmem>>, vector<1x1x1x16x16xf32>
    %19 = vector.shape_cast %18 : vector<1x1x1x16x16xf32> to vector<16x16xf32>
    %c8_32 = arith.constant 8 : index
    %c80 = arith.constant 80 : index
    %20 = vector.load %arg5[%c8_32, %c80] : memref<64x144xf32, #tpu.memory_space<vmem>>, vector<16x16xf32>
    tpu.vector_store %arg5[%c8_32, %c80], %19 {strides = array<i32>} : memref<64x144xf32, #tpu.memory_space<vmem>>, vector<16x16xf32>,
    %c0_33 = arith.constant 0 : index
    %c6 = arith.constant 6 : index
    %c0_34 = arith.constant 0 : index
    %c0_35 = arith.constant 0 : index
    %c0_36 = arith.constant 0 : index
    %21 = vector.load %arg2[%c0_33, %c6, %c0_34, %c0_35, %c0_36] : memref<1x9x2x16x16xf32, #tpu.memory_space<vmem>>, vector<1x1x1x16x16xf32>
    %22 = vector.shape_cast %21 : vector<1x1x1x16x16xf32> to vector<16x16xf32>
    %c8_37 = arith.constant 8 : index
    %c96 = arith.constant 96 : index
    %23 = vector.load %arg5[%c8_37, %c96] : memref<64x144xf32, #tpu.memory_space<vmem>>, vector<16x16xf32>
    tpu.vector_store %arg5[%c8_37, %c96], %22 {strides = array<i32>} : memref<64x144xf32, #tpu.memory_space<vmem>>, vector<16x16xf32>,
    %c0_38 = arith.constant 0 : index
    %c7 = arith.constant 7 : index
    %c0_39 = arith.constant 0 : index
    %c0_40 = arith.constant 0 : index
    %c0_41 = arith.constant 0 : index
    %24 = vector.load %arg2[%c0_38, %c7, %c0_39, %c0_40, %c0_41] : memref<1x9x2x16x16xf32, #tpu.memory_space<vmem>>, vector<1x1x1x16x16xf32>
    %25 = vector.shape_cast %24 : vector<1x1x1x16x16xf32> to vector<16x16xf32>
    %c8_42 = arith.constant 8 : index
    %c112 = arith.constant 112 : index
    %26 = vector.load %arg5[%c8_42, %c112] : memref<64x144xf32, #tpu.memory_space<vmem>>, vector<16x16xf32>
    tpu.vector_store %arg5[%c8_42, %c112], %25 {strides = array<i32>} : memref<64x144xf32, #tpu.memory_space<vmem>>, vector<16x16xf32>,
    %c0_43 = arith.constant 0 : index
    %c8_44 = arith.constant 8 : index
    %c0_45 = arith.constant 0 : index
    %c0_46 = arith.constant 0 : index
    %c0_47 = arith.constant 0 : index
    %27 = vector.load %arg2[%c0_43, %c8_44, %c0_45, %c0_46, %c0_47] : memref<1x9x2x16x16xf32, #tpu.memory_space<vmem>>, vector<1x1x1x16x16xf32>
    %28 = vector.shape_cast %27 : vector<1x1x1x16x16xf32> to vector<16x16xf32>
    %c8_48 = arith.constant 8 : index
    %c128 = arith.constant 128 : index
    %29 = vector.load %arg5[%c8_48, %c128] : memref<64x144xf32, #tpu.memory_space<vmem>>, vector<16x16xf32>
    tpu.vector_store %arg5[%c8_48, %c128], %28 {strides = array<i32>} : memref<64x144xf32, #tpu.memory_space<vmem>>, vector<16x16xf32>,
    %c32_49 = arith.constant 32 : index
    %c0_50 = arith.constant 0 : index
    %30 = vector.load %arg5[%c32_49, %c0_50] : memref<64x144xf32, #tpu.memory_space<vmem>>, vector<8x144xf32>
    tpu.vector_store %arg5[%c32_49, %c0_50], %0 {strides = array<i32>} : memref<64x144xf32, #tpu.memory_space<vmem>>, vector<8x144xf32>,
    %c56 = arith.constant 56 : index
    %c0_51 = arith.constant 0 : index
    %31 = vector.load %arg5[%c56, %c0_51] : memref<64x144xf32, #tpu.memory_space<vmem>>, vector<8x144xf32>
    tpu.vector_store %arg5[%c56, %c0_51], %0 {strides = array<i32>} : memref<64x144xf32, #tpu.memory_space<vmem>>, vector<8x144xf32>,
    %c0_52 = arith.constant 0 : index
    %c0_53 = arith.constant 0 : index
    %c1_54 = arith.constant 1 : index
    %c0_55 = arith.constant 0 : index
    %c0_56 = arith.constant 0 : index
    %32 = vector.load %arg2[%c0_52, %c0_53, %c1_54, %c0_55, %c0_56] : memref<1x9x2x16x16xf32, #tpu.memory_space<vmem>>, vector<1x1x1x16x16xf32>
    %33 = vector.shape_cast %32 : vector<1x1x1x16x16xf32> to vector<16x16xf32>
    %c40 = arith.constant 40 : index
    %c0_57 = arith.constant 0 : index
    %34 = vector.load %arg5[%c40, %c0_57] : memref<64x144xf32, #tpu.memory_space<vmem>>, vector<16x16xf32>
    tpu.vector_store %arg5[%c40, %c0_57], %33 {strides = array<i32>} : memref<64x144xf32, #tpu.memory_space<vmem>>, vector<16x16xf32>,
    %c0_58 = arith.constant 0 : index
    %c1_59 = arith.constant 1 : index
    %c1_60 = arith.constant 1 : index
    %c0_61 = arith.constant 0 : index
    %c0_62 = arith.constant 0 : index
    %35 = vector.load %arg2[%c0_58, %c1_59, %c1_60, %c0_61, %c0_62] : memref<1x9x2x16x16xf32, #tpu.memory_space<vmem>>, vector<1x1x1x16x16xf32>
    %36 = vector.shape_cast %35 : vector<1x1x1x16x16xf32> to vector<16x16xf32>
    %c40_63 = arith.constant 40 : index
    %c16_64 = arith.constant 16 : index
    %37 = vector.load %arg5[%c40_63, %c16_64] : memref<64x144xf32, #tpu.memory_space<vmem>>, vector<16x16xf32>
    tpu.vector_store %arg5[%c40_63, %c16_64], %36 {strides = array<i32>} : memref<64x144xf32, #tpu.memory_space<vmem>>, vector<16x16xf32>,
    %c0_65 = arith.constant 0 : index
    %c2_66 = arith.constant 2 : index
    %c1_67 = arith.constant 1 : index
    %c0_68 = arith.constant 0 : index
    %c0_69 = arith.constant 0 : index
    %38 = vector.load %arg2[%c0_65, %c2_66, %c1_67, %c0_68, %c0_69] : memref<1x9x2x16x16xf32, #tpu.memory_space<vmem>>, vector<1x1x1x16x16xf32>
    %39 = vector.shape_cast %38 : vector<1x1x1x16x16xf32> to vector<16x16xf32>
    %c40_70 = arith.constant 40 : index
    %c32_71 = arith.constant 32 : index
    %40 = vector.load %arg5[%c40_70, %c32_71] : memref<64x144xf32, #tpu.memory_space<vmem>>, vector<16x16xf32>
    tpu.vector_store %arg5[%c40_70, %c32_71], %39 {strides = array<i32>} : memref<64x144xf32, #tpu.memory_space<vmem>>, vector<16x16xf32>,
    %c0_72 = arith.constant 0 : index
    %c3_73 = arith.constant 3 : index
    %c1_74 = arith.constant 1 : index
    %c0_75 = arith.constant 0 : index
    %c0_76 = arith.constant 0 : index
    %41 = vector.load %arg2[%c0_72, %c3_73, %c1_74, %c0_75, %c0_76] : memref<1x9x2x16x16xf32, #tpu.memory_space<vmem>>, vector<1x1x1x16x16xf32>
    %42 = vector.shape_cast %41 : vector<1x1x1x16x16xf32> to vector<16x16xf32>
    %c40_77 = arith.constant 40 : index
    %c48_78 = arith.constant 48 : index
    %43 = vector.load %arg5[%c40_77, %c48_78] : memref<64x144xf32, #tpu.memory_space<vmem>>, vector<16x16xf32>
    tpu.vector_store %arg5[%c40_77, %c48_78], %42 {strides = array<i32>} : memref<64x144xf32, #tpu.memory_space<vmem>>, vector<16x16xf32>,
    %c0_79 = arith.constant 0 : index
    %c4_80 = arith.constant 4 : index
    %c1_81 = arith.constant 1 : index
    %c0_82 = arith.constant 0 : index
    %c0_83 = arith.constant 0 : index
    %44 = vector.load %arg2[%c0_79, %c4_80, %c1_81, %c0_82, %c0_83] : memref<1x9x2x16x16xf32, #tpu.memory_space<vmem>>, vector<1x1x1x16x16xf32>
    %45 = vector.shape_cast %44 : vector<1x1x1x16x16xf32> to vector<16x16xf32>
    %c40_84 = arith.constant 40 : index
    %c64_85 = arith.constant 64 : index
    %46 = vector.load %arg5[%c40_84, %c64_85] : memref<64x144xf32, #tpu.memory_space<vmem>>, vector<16x16xf32>
    tpu.vector_store %arg5[%c40_84, %c64_85], %45 {strides = array<i32>} : memref<64x144xf32, #tpu.memory_space<vmem>>, vector<16x16xf32>,
    %c0_86 = arith.constant 0 : index
    %c5_87 = arith.constant 5 : index
    %c1_88 = arith.constant 1 : index
    %c0_89 = arith.constant 0 : index
    %c0_90 = arith.constant 0 : index
    %47 = vector.load %arg2[%c0_86, %c5_87, %c1_88, %c0_89, %c0_90] : memref<1x9x2x16x16xf32, #tpu.memory_space<vmem>>, vector<1x1x1x16x16xf32>
    %48 = vector.shape_cast %47 : vector<1x1x1x16x16xf32> to vector<16x16xf32>
    %c40_91 = arith.constant 40 : index
    %c80_92 = arith.constant 80 : index
    %49 = vector.load %arg5[%c40_91, %c80_92] : memref<64x144xf32, #tpu.memory_space<vmem>>, vector<16x16xf32>
    tpu.vector_store %arg5[%c40_91, %c80_92], %48 {strides = array<i32>} : memref<64x144xf32, #tpu.memory_space<vmem>>, vector<16x16xf32>,
    %c0_93 = arith.constant 0 : index
    %c6_94 = arith.constant 6 : index
    %c1_95 = arith.constant 1 : index
    %c0_96 = arith.constant 0 : index
    %c0_97 = arith.constant 0 : index
    %50 = vector.load %arg2[%c0_93, %c6_94, %c1_95, %c0_96, %c0_97] : memref<1x9x2x16x16xf32, #tpu.memory_space<vmem>>, vector<1x1x1x16x16xf32>
    %51 = vector.shape_cast %50 : vector<1x1x1x16x16xf32> to vector<16x16xf32>
    %c40_98 = arith.constant 40 : index
    %c96_99 = arith.constant 96 : index
    %52 = vector.load %arg5[%c40_98, %c96_99] : memref<64x144xf32, #tpu.memory_space<vmem>>, vector<16x16xf32>
    tpu.vector_store %arg5[%c40_98, %c96_99], %51 {strides = array<i32>} : memref<64x144xf32, #tpu.memory_space<vmem>>, vector<16x16xf32>,
    %c0_100 = arith.constant 0 : index
    %c7_101 = arith.constant 7 : index
    %c1_102 = arith.constant 1 : index
    %c0_103 = arith.constant 0 : index
    %c0_104 = arith.constant 0 : index
    %53 = vector.load %arg2[%c0_100, %c7_101, %c1_102, %c0_103, %c0_104] : memref<1x9x2x16x16xf32, #tpu.memory_space<vmem>>, vector<1x1x1x16x16xf32>
    %54 = vector.shape_cast %53 : vector<1x1x1x16x16xf32> to vector<16x16xf32>
    %c40_105 = arith.constant 40 : index
    %c112_106 = arith.constant 112 : index
    %55 = vector.load %arg5[%c40_105, %c112_106] : memref<64x144xf32, #tpu.memory_space<vmem>>, vector<16x16xf32>
    tpu.vector_store %arg5[%c40_105, %c112_106], %54 {strides = array<i32>} : memref<64x144xf32, #tpu.memory_space<vmem>>, vector<16x16xf32>,
    %c0_107 = arith.constant 0 : index
    %c8_108 = arith.constant 8 : index
    %c1_109 = arith.constant 1 : index
    %c0_110 = arith.constant 0 : index
    %c0_111 = arith.constant 0 : index
    %56 = vector.load %arg2[%c0_107, %c8_108, %c1_109, %c0_110, %c0_111] : memref<1x9x2x16x16xf32, #tpu.memory_space<vmem>>, vector<1x1x1x16x16xf32>
    %57 = vector.shape_cast %56 : vector<1x1x1x16x16xf32> to vector<16x16xf32>
    %c40_112 = arith.constant 40 : index
    %c128_113 = arith.constant 128 : index
    %58 = vector.load %arg5[%c40_112, %c128_113] : memref<64x144xf32, #tpu.memory_space<vmem>>, vector<16x16xf32>
    tpu.vector_store %arg5[%c40_112, %c128_113], %57 {strides = array<i32>} : memref<64x144xf32, #tpu.memory_space<vmem>>, vector<16x16xf32>,
    %cst_114 = arith.constant 0.000000e+00 : f32
    %59 = vector.broadcast %cst_114 : f32 to vector<2x16x16xf32>
    %c0_115 = arith.constant 0 : index
    %c0_116 = arith.constant 0 : index
    %c0_117 = arith.constant 0 : index
    %c0_118 = arith.constant 0 : index
    %60 = vector.load %arg4[%c0_115, %c0_116, %c0_117, %c0_118] : memref<1x2x16x16xf32, #tpu.memory_space<vmem>>, vector<1x2x16x16xf32>
    %61 = vector.shape_cast %60 : vector<1x2x16x16xf32> to vector<2x16x16xf32>
    %62 = vector.shape_cast %59 : vector<2x16x16xf32> to vector<1x2x16x16xf32>
    tpu.vector_store %arg4[%c0_115, %c0_116, %c0_117, %c0_118], %62 {strides = array<i32>} : memref<1x2x16x16xf32, #tpu.memory_space<vmem>>, vector<1x2x16x16xf32>,
    %c0_119 = arith.constant 0 : index
    %c0_120 = arith.constant 0 : index
    %c0_121 = arith.constant 0 : index
    %63 = vector.load %arg3[%c0_119, %c0_120, %c0_121] : memref<17x144x16xf32, #tpu.memory_space<vmem>>, vector<1x144x16xf32>
    %64 = vector.shape_cast %63 : vector<1x144x16xf32> to vector<144x16xf32>
    %c0_122 = arith.constant 0 : index
    %c0_123 = arith.constant 0 : index
    %65 = vector.load %arg5[%c0_122, %c0_123] : memref<64x144xf32, #tpu.memory_space<vmem>>, vector<64x144xf32>
    %cst_124 = arith.constant dense<0.000000e+00> : vector<64x16xf32>
    %66 = tpu.matmul %65, %64, %cst_124 {dimension_numbers = #tpu.dot_dimension_numbers<[1], [0], [0], [1], [0, 0, 1, 1], [], []>} : vector<64x144xf32>, vector<144x16xf32>, vector<64x16xf32> -> vector<64x16xf32>
    %c0_125 = arith.constant 0 : index
    %c0_126 = arith.constant 0 : index
    %c0_127 = arith.constant 0 : index
    %c0_128 = arith.constant 0 : index
    %67 = vector.load %arg4[%c0_125, %c0_126, %c0_127, %c0_128] : memref<1x2x16x16xf32, #tpu.memory_space<vmem>>, vector<1x1x16x16xf32>
    %68 = vector.shape_cast %67 : vector<1x1x16x16xf32> to vector<16x16xf32>
    %69 = vector.extract_strided_slice %66 {offsets = [0, 0], sizes = [16, 16], strides = [1, 1]} : vector<64x16xf32> to vector<16x16xf32>
    %70 = arith.addf %68, %69 : vector<16x16xf32>
    %c0_129 = arith.constant 0 : index
    %c0_130 = arith.constant 0 : index
    %c0_131 = arith.constant 0 : index
    %c0_132 = arith.constant 0 : index
    %71 = vector.load %arg4[%c0_129, %c0_130, %c0_131, %c0_132] : memref<1x2x16x16xf32, #tpu.memory_space<vmem>>, vector<1x1x16x16xf32>
    %72 = vector.shape_cast %71 : vector<1x1x16x16xf32> to vector<16x16xf32>
    %73 = vector.shape_cast %70 : vector<16x16xf32> to vector<1x1x16x16xf32>
    tpu.vector_store %arg4[%c0_129, %c0_130, %c0_131, %c0_132], %73 {strides = array<i32>} : memref<1x2x16x16xf32, #tpu.memory_space<vmem>>, vector<1x1x16x16xf32>,
    %c0_133 = arith.constant 0 : index
    %c1_134 = arith.constant 1 : index
    %c0_135 = arith.constant 0 : index
    %c0_136 = arith.constant 0 : index
    %74 = vector.load %arg4[%c0_133, %c1_134, %c0_135, %c0_136] : memref<1x2x16x16xf32, #tpu.memory_space<vmem>>, vector<1x1x16x16xf32>
    %75 = vector.shape_cast %74 : vector<1x1x16x16xf32> to vector<16x16xf32>
    %76 = vector.extract_strided_slice %66 {offsets = [32, 0], sizes = [16, 16], strides = [1, 1]} : vector<64x16xf32> to vector<16x16xf32>
    %77 = arith.addf %75, %76 : vector<16x16xf32>
    %c0_137 = arith.constant 0 : index
    %c1_138 = arith.constant 1 : index
    %c0_139 = arith.constant 0 : index
    %c0_140 = arith.constant 0 : index
    %78 = vector.load %arg4[%c0_137, %c1_138, %c0_139, %c0_140] : memref<1x2x16x16xf32, #tpu.memory_space<vmem>>, vector<1x1x16x16xf32>
    %79 = vector.shape_cast %78 : vector<1x1x16x16xf32> to vector<16x16xf32>
    %80 = vector.shape_cast %77 : vector<16x16xf32> to vector<1x1x16x16xf32>
    tpu.vector_store %arg4[%c0_137, %c1_138, %c0_139, %c0_140], %80 {strides = array<i32>} : memref<1x2x16x16xf32, #tpu.memory_space<vmem>>, vector<1x1x16x16xf32>,
    %c1_141 = arith.constant 1 : index
    %c0_142 = arith.constant 0 : index
    %c0_143 = arith.constant 0 : index
    %81 = vector.load %arg3[%c1_141, %c0_142, %c0_143] : memref<17x144x16xf32, #tpu.memory_space<vmem>>, vector<1x144x16xf32>
    %82 = vector.shape_cast %81 : vector<1x144x16xf32> to vector<144x16xf32>
    %c0_144 = arith.constant 0 : index
    %c0_145 = arith.constant 0 : index
    %83 = vector.load %arg5[%c0_144, %c0_145] : memref<64x144xf32, #tpu.memory_space<vmem>>, vector<64x144xf32>
    %cst_146 = arith.constant dense<0.000000e+00> : vector<64x16xf32>
    %84 = tpu.matmul %83, %82, %cst_146 {dimension_numbers = #tpu.dot_dimension_numbers<[1], [0], [0], [1], [0, 0, 1, 1], [], []>} : vector<64x144xf32>, vector<144x16xf32>, vector<64x16xf32> -> vector<64x16xf32>
    %c0_147 = arith.constant 0 : index
    %c0_148 = arith.constant 0 : index
    %c0_149 = arith.constant 0 : index
    %c0_150 = arith.constant 0 : index
    %85 = vector.load %arg4[%c0_147, %c0_148, %c0_149, %c0_150] : memref<1x2x16x16xf32, #tpu.memory_space<vmem>>, vector<1x1x16x16xf32>
    %86 = vector.shape_cast %85 : vector<1x1x16x16xf32> to vector<16x16xf32>
    %87 = vector.extract_strided_slice %84 {offsets = [1, 0], sizes = [16, 16], strides = [1, 1]} : vector<64x16xf32> to vector<16x16xf32>
    %88 = arith.addf %86, %87 : vector<16x16xf32>
    %c0_151 = arith.constant 0 : index
    %c0_152 = arith.constant 0 : index
    %c0_153 = arith.constant 0 : index
    %c0_154 = arith.constant 0 : index
    %89 = vector.load %arg4[%c0_151, %c0_152, %c0_153, %c0_154] : memref<1x2x16x16xf32, #tpu.memory_space<vmem>>, vector<1x1x16x16xf32>
    %90 = vector.shape_cast %89 : vector<1x1x16x16xf32> to vector<16x16xf32>
    %91 = vector.shape_cast %88 : vector<16x16xf32> to vector<1x1x16x16xf32>
    tpu.vector_store %arg4[%c0_151, %c0_152, %c0_153, %c0_154], %91 {strides = array<i32>} : memref<1x2x16x16xf32, #tpu.memory_space<vmem>>, vector<1x1x16x16xf32>,
    %c0_155 = arith.constant 0 : index
    %c1_156 = arith.constant 1 : index
    %c0_157 = arith.constant 0 : index
    %c0_158 = arith.constant 0 : index
    %92 = vector.load %arg4[%c0_155, %c1_156, %c0_157, %c0_158] : memref<1x2x16x16xf32, #tpu.memory_space<vmem>>, vector<1x1x16x16xf32>
    %93 = vector.shape_cast %92 : vector<1x1x16x16xf32> to vector<16x16xf32>
    %94 = vector.extract_strided_slice %84 {offsets = [33, 0], sizes = [16, 16], strides = [1, 1]} : vector<64x16xf32> to vector<16x16xf32>
    %95 = arith.addf %93, %94 : vector<16x16xf32>
    %c0_159 = arith.constant 0 : index
    %c1_160 = arith.constant 1 : index
    %c0_161 = arith.constant 0 : index
    %c0_162 = arith.constant 0 : index
    %96 = vector.load %arg4[%c0_159, %c1_160, %c0_161, %c0_162] : memref<1x2x16x16xf32, #tpu.memory_space<vmem>>, vector<1x1x16x16xf32>
    %97 = vector.shape_cast %96 : vector<1x1x16x16xf32> to vector<16x16xf32>
    %98 = vector.shape_cast %95 : vector<16x16xf32> to vector<1x1x16x16xf32>
    tpu.vector_store %arg4[%c0_159, %c1_160, %c0_161, %c0_162], %98 {strides = array<i32>} : memref<1x2x16x16xf32, #tpu.memory_space<vmem>>, vector<1x1x16x16xf32>,
    %c2_163 = arith.constant 2 : index
    %c0_164 = arith.constant 0 : index
    %c0_165 = arith.constant 0 : index
    %99 = vector.load %arg3[%c2_163, %c0_164, %c0_165] : memref<17x144x16xf32, #tpu.memory_space<vmem>>, vector<1x144x16xf32>
    %100 = vector.shape_cast %99 : vector<1x144x16xf32> to vector<144x16xf32>
    %c0_166 = arith.constant 0 : index
    %c0_167 = arith.constant 0 : index
    %101 = vector.load %arg5[%c0_166, %c0_167] : memref<64x144xf32, #tpu.memory_space<vmem>>, vector<64x144xf32>
    %cst_168 = arith.constant dense<0.000000e+00> : vector<64x16xf32>
    %102 = tpu.matmul %101, %100, %cst_168 {dimension_numbers = #tpu.dot_dimension_numbers<[1], [0], [0], [1], [0, 0, 1, 1], [], []>} : vector<64x144xf32>, vector<144x16xf32>, vector<64x16xf32> -> vector<64x16xf32>
    %c0_169 = arith.constant 0 : index
    %c0_170 = arith.constant 0 : index
    %c0_171 = arith.constant 0 : index
    %c0_172 = arith.constant 0 : index
    %103 = vector.load %arg4[%c0_169, %c0_170, %c0_171, %c0_172] : memref<1x2x16x16xf32, #tpu.memory_space<vmem>>, vector<1x1x16x16xf32>
    %104 = vector.shape_cast %103 : vector<1x1x16x16xf32> to vector<16x16xf32>
    %105 = vector.extract_strided_slice %102 {offsets = [2, 0], sizes = [16, 16], strides = [1, 1]} : vector<64x16xf32> to vector<16x16xf32>
    %106 = arith.addf %104, %105 : vector<16x16xf32>
    %c0_173 = arith.constant 0 : index
    %c0_174 = arith.constant 0 : index
    %c0_175 = arith.constant 0 : index
    %c0_176 = arith.constant 0 : index
    %107 = vector.load %arg4[%c0_173, %c0_174, %c0_175, %c0_176] : memref<1x2x16x16xf32, #tpu.memory_space<vmem>>, vector<1x1x16x16xf32>
    %108 = vector.shape_cast %107 : vector<1x1x16x16xf32> to vector<16x16xf32>
    %109 = vector.shape_cast %106 : vector<16x16xf32> to vector<1x1x16x16xf32>
    tpu.vector_store %arg4[%c0_173, %c0_174, %c0_175, %c0_176], %109 {strides = array<i32>} : memref<1x2x16x16xf32, #tpu.memory_space<vmem>>, vector<1x1x16x16xf32>,
    %c0_177 = arith.constant 0 : index
    %c1_178 = arith.constant 1 : index
    %c0_179 = arith.constant 0 : index
    %c0_180 = arith.constant 0 : index
    %110 = vector.load %arg4[%c0_177, %c1_178, %c0_179, %c0_180] : memref<1x2x16x16xf32, #tpu.memory_space<vmem>>, vector<1x1x16x16xf32>
    %111 = vector.shape_cast %110 : vector<1x1x16x16xf32> to vector<16x16xf32>
    %112 = vector.extract_strided_slice %102 {offsets = [34, 0], sizes = [16, 16], strides = [1, 1]} : vector<64x16xf32> to vector<16x16xf32>
    %113 = arith.addf %111, %112 : vector<16x16xf32>
    %c0_181 = arith.constant 0 : index
    %c1_182 = arith.constant 1 : index
    %c0_183 = arith.constant 0 : index
    %c0_184 = arith.constant 0 : index
    %114 = vector.load %arg4[%c0_181, %c1_182, %c0_183, %c0_184] : memref<1x2x16x16xf32, #tpu.memory_space<vmem>>, vector<1x1x16x16xf32>
    %115 = vector.shape_cast %114 : vector<1x1x16x16xf32> to vector<16x16xf32>
    %116 = vector.shape_cast %113 : vector<16x16xf32> to vector<1x1x16x16xf32>
    tpu.vector_store %arg4[%c0_181, %c1_182, %c0_183, %c0_184], %116 {strides = array<i32>} : memref<1x2x16x16xf32, #tpu.memory_space<vmem>>, vector<1x1x16x16xf32>,
    %c3_185 = arith.constant 3 : index
    %c0_186 = arith.constant 0 : index
    %c0_187 = arith.constant 0 : index
    %117 = vector.load %arg3[%c3_185, %c0_186, %c0_187] : memref<17x144x16xf32, #tpu.memory_space<vmem>>, vector<1x144x16xf32>
    %118 = vector.shape_cast %117 : vector<1x144x16xf32> to vector<144x16xf32>
    %c0_188 = arith.constant 0 : index
    %c0_189 = arith.constant 0 : index
    %119 = vector.load %arg5[%c0_188, %c0_189] : memref<64x144xf32, #tpu.memory_space<vmem>>, vector<64x144xf32>
    %cst_190 = arith.constant dense<0.000000e+00> : vector<64x16xf32>
    %120 = tpu.matmul %119, %118, %cst_190 {dimension_numbers = #tpu.dot_dimension_numbers<[1], [0], [0], [1], [0, 0, 1, 1], [], []>} : vector<64x144xf32>, vector<144x16xf32>, vector<64x16xf32> -> vector<64x16xf32>
    %c0_191 = arith.constant 0 : index
    %c0_192 = arith.constant 0 : index
    %c0_193 = arith.constant 0 : index
    %c0_194 = arith.constant 0 : index
    %121 = vector.load %arg4[%c0_191, %c0_192, %c0_193, %c0_194] : memref<1x2x16x16xf32, #tpu.memory_space<vmem>>, vector<1x1x16x16xf32>
    %122 = vector.shape_cast %121 : vector<1x1x16x16xf32> to vector<16x16xf32>
    %123 = vector.extract_strided_slice %120 {offsets = [3, 0], sizes = [16, 16], strides = [1, 1]} : vector<64x16xf32> to vector<16x16xf32>
    %124 = arith.addf %122, %123 : vector<16x16xf32>
    %c0_195 = arith.constant 0 : index
    %c0_196 = arith.constant 0 : index
    %c0_197 = arith.constant 0 : index
    %c0_198 = arith.constant 0 : index
    %125 = vector.load %arg4[%c0_195, %c0_196, %c0_197, %c0_198] : memref<1x2x16x16xf32, #tpu.memory_space<vmem>>, vector<1x1x16x16xf32>
    %126 = vector.shape_cast %125 : vector<1x1x16x16xf32> to vector<16x16xf32>
    %127 = vector.shape_cast %124 : vector<16x16xf32> to vector<1x1x16x16xf32>
    tpu.vector_store %arg4[%c0_195, %c0_196, %c0_197, %c0_198], %127 {strides = array<i32>} : memref<1x2x16x16xf32, #tpu.memory_space<vmem>>, vector<1x1x16x16xf32>,
    %c0_199 = arith.constant 0 : index
    %c1_200 = arith.constant 1 : index
    %c0_201 = arith.constant 0 : index
    %c0_202 = arith.constant 0 : index
    %128 = vector.load %arg4[%c0_199, %c1_200, %c0_201, %c0_202] : memref<1x2x16x16xf32, #tpu.memory_space<vmem>>, vector<1x1x16x16xf32>
    %129 = vector.shape_cast %128 : vector<1x1x16x16xf32> to vector<16x16xf32>
    %130 = vector.extract_strided_slice %120 {offsets = [35, 0], sizes = [16, 16], strides = [1, 1]} : vector<64x16xf32> to vector<16x16xf32>
    %131 = arith.addf %129, %130 : vector<16x16xf32>
    %c0_203 = arith.constant 0 : index
    %c1_204 = arith.constant 1 : index
    %c0_205 = arith.constant 0 : index
    %c0_206 = arith.constant 0 : index
    %132 = vector.load %arg4[%c0_203, %c1_204, %c0_205, %c0_206] : memref<1x2x16x16xf32, #tpu.memory_space<vmem>>, vector<1x1x16x16xf32>
    %133 = vector.shape_cast %132 : vector<1x1x16x16xf32> to vector<16x16xf32>
    %134 = vector.shape_cast %131 : vector<16x16xf32> to vector<1x1x16x16xf32>
    tpu.vector_store %arg4[%c0_203, %c1_204, %c0_205, %c0_206], %134 {strides = array<i32>} : memref<1x2x16x16xf32, #tpu.memory_space<vmem>>, vector<1x1x16x16xf32>,
    %c4_207 = arith.constant 4 : index
    %c0_208 = arith.constant 0 : index
    %c0_209 = arith.constant 0 : index
    %135 = vector.load %arg3[%c4_207, %c0_208, %c0_209] : memref<17x144x16xf32, #tpu.memory_space<vmem>>, vector<1x144x16xf32>
    %136 = vector.shape_cast %135 : vector<1x144x16xf32> to vector<144x16xf32>
    %c0_210 = arith.constant 0 : index
    %c0_211 = arith.constant 0 : index
    %137 = vector.load %arg5[%c0_210, %c0_211] : memref<64x144xf32, #tpu.memory_space<vmem>>, vector<64x144xf32>
    %cst_212 = arith.constant dense<0.000000e+00> : vector<64x16xf32>
    %138 = tpu.matmul %137, %136, %cst_212 {dimension_numbers = #tpu.dot_dimension_numbers<[1], [0], [0], [1], [0, 0, 1, 1], [], []>} : vector<64x144xf32>, vector<144x16xf32>, vector<64x16xf32> -> vector<64x16xf32>
    %c0_213 = arith.constant 0 : index
    %c0_214 = arith.constant 0 : index
    %c0_215 = arith.constant 0 : index
    %c0_216 = arith.constant 0 : index
    %139 = vector.load %arg4[%c0_213, %c0_214, %c0_215, %c0_216] : memref<1x2x16x16xf32, #tpu.memory_space<vmem>>, vector<1x1x16x16xf32>
    %140 = vector.shape_cast %139 : vector<1x1x16x16xf32> to vector<16x16xf32>
    %141 = vector.extract_strided_slice %138 {offsets = [4, 0], sizes = [16, 16], strides = [1, 1]} : vector<64x16xf32> to vector<16x16xf32>
    %142 = arith.addf %140, %141 : vector<16x16xf32>
    %c0_217 = arith.constant 0 : index
    %c0_218 = arith.constant 0 : index
    %c0_219 = arith.constant 0 : index
    %c0_220 = arith.constant 0 : index
    %143 = vector.load %arg4[%c0_217, %c0_218, %c0_219, %c0_220] : memref<1x2x16x16xf32, #tpu.memory_space<vmem>>, vector<1x1x16x16xf32>
    %144 = vector.shape_cast %143 : vector<1x1x16x16xf32> to vector<16x16xf32>
    %145 = vector.shape_cast %142 : vector<16x16xf32> to vector<1x1x16x16xf32>
    tpu.vector_store %arg4[%c0_217, %c0_218, %c0_219, %c0_220], %145 {strides = array<i32>} : memref<1x2x16x16xf32, #tpu.memory_space<vmem>>, vector<1x1x16x16xf32>,
    %c0_221 = arith.constant 0 : index
    %c1_222 = arith.constant 1 : index
    %c0_223 = arith.constant 0 : index
    %c0_224 = arith.constant 0 : index
    %146 = vector.load %arg4[%c0_221, %c1_222, %c0_223, %c0_224] : memref<1x2x16x16xf32, #tpu.memory_space<vmem>>, vector<1x1x16x16xf32>
    %147 = vector.shape_cast %146 : vector<1x1x16x16xf32> to vector<16x16xf32>
    %148 = vector.extract_strided_slice %138 {offsets = [36, 0], sizes = [16, 16], strides = [1, 1]} : vector<64x16xf32> to vector<16x16xf32>
    %149 = arith.addf %147, %148 : vector<16x16xf32>
    %c0_225 = arith.constant 0 : index
    %c1_226 = arith.constant 1 : index
    %c0_227 = arith.constant 0 : index
    %c0_228 = arith.constant 0 : index
    %150 = vector.load %arg4[%c0_225, %c1_226, %c0_227, %c0_228] : memref<1x2x16x16xf32, #tpu.memory_space<vmem>>, vector<1x1x16x16xf32>
    %151 = vector.shape_cast %150 : vector<1x1x16x16xf32> to vector<16x16xf32>
    %152 = vector.shape_cast %149 : vector<16x16xf32> to vector<1x1x16x16xf32>
    tpu.vector_store %arg4[%c0_225, %c1_226, %c0_227, %c0_228], %152 {strides = array<i32>} : memref<1x2x16x16xf32, #tpu.memory_space<vmem>>, vector<1x1x16x16xf32>,
    %c5_229 = arith.constant 5 : index
    %c0_230 = arith.constant 0 : index
    %c0_231 = arith.constant 0 : index
    %153 = vector.load %arg3[%c5_229, %c0_230, %c0_231] : memref<17x144x16xf32, #tpu.memory_space<vmem>>, vector<1x144x16xf32>
    %154 = vector.shape_cast %153 : vector<1x144x16xf32> to vector<144x16xf32>
    %c0_232 = arith.constant 0 : index
    %c0_233 = arith.constant 0 : index
    %155 = vector.load %arg5[%c0_232, %c0_233] : memref<64x144xf32, #tpu.memory_space<vmem>>, vector<64x144xf32>
    %cst_234 = arith.constant dense<0.000000e+00> : vector<64x16xf32>
    %156 = tpu.matmul %155, %154, %cst_234 {dimension_numbers = #tpu.dot_dimension_numbers<[1], [0], [0], [1], [0, 0, 1, 1], [], []>} : vector<64x144xf32>, vector<144x16xf32>, vector<64x16xf32> -> vector<64x16xf32>
    %c0_235 = arith.constant 0 : index
    %c0_236 = arith.constant 0 : index
    %c0_237 = arith.constant 0 : index
    %c0_238 = arith.constant 0 : index
    %157 = vector.load %arg4[%c0_235, %c0_236, %c0_237, %c0_238] : memref<1x2x16x16xf32, #tpu.memory_space<vmem>>, vector<1x1x16x16xf32>
    %158 = vector.shape_cast %157 : vector<1x1x16x16xf32> to vector<16x16xf32>
    %159 = vector.extract_strided_slice %156 {offsets = [5, 0], sizes = [16, 16], strides = [1, 1]} : vector<64x16xf32> to vector<16x16xf32>
    %160 = arith.addf %158, %159 : vector<16x16xf32>
    %c0_239 = arith.constant 0 : index
    %c0_240 = arith.constant 0 : index
    %c0_241 = arith.constant 0 : index
    %c0_242 = arith.constant 0 : index
    %161 = vector.load %arg4[%c0_239, %c0_240, %c0_241, %c0_242] : memref<1x2x16x16xf32, #tpu.memory_space<vmem>>, vector<1x1x16x16xf32>
    %162 = vector.shape_cast %161 : vector<1x1x16x16xf32> to vector<16x16xf32>
    %163 = vector.shape_cast %160 : vector<16x16xf32> to vector<1x1x16x16xf32>
    tpu.vector_store %arg4[%c0_239, %c0_240, %c0_241, %c0_242], %163 {strides = array<i32>} : memref<1x2x16x16xf32, #tpu.memory_space<vmem>>, vector<1x1x16x16xf32>,
    %c0_243 = arith.constant 0 : index
    %c1_244 = arith.constant 1 : index
    %c0_245 = arith.constant 0 : index
    %c0_246 = arith.constant 0 : index
    %164 = vector.load %arg4[%c0_243, %c1_244, %c0_245, %c0_246] : memref<1x2x16x16xf32, #tpu.memory_space<vmem>>, vector<1x1x16x16xf32>
    %165 = vector.shape_cast %164 : vector<1x1x16x16xf32> to vector<16x16xf32>
    %166 = vector.extract_strided_slice %156 {offsets = [37, 0], sizes = [16, 16], strides = [1, 1]} : vector<64x16xf32> to vector<16x16xf32>
    %167 = arith.addf %165, %166 : vector<16x16xf32>
    %c0_247 = arith.constant 0 : index
    %c1_248 = arith.constant 1 : index
    %c0_249 = arith.constant 0 : index
    %c0_250 = arith.constant 0 : index
    %168 = vector.load %arg4[%c0_247, %c1_248, %c0_249, %c0_250] : memref<1x2x16x16xf32, #tpu.memory_space<vmem>>, vector<1x1x16x16xf32>
    %169 = vector.shape_cast %168 : vector<1x1x16x16xf32> to vector<16x16xf32>
    %170 = vector.shape_cast %167 : vector<16x16xf32> to vector<1x1x16x16xf32>
    tpu.vector_store %arg4[%c0_247, %c1_248, %c0_249, %c0_250], %170 {strides = array<i32>} : memref<1x2x16x16xf32, #tpu.memory_space<vmem>>, vector<1x1x16x16xf32>,
    %c6_251 = arith.constant 6 : index
    %c0_252 = arith.constant 0 : index
    %c0_253 = arith.constant 0 : index
    %171 = vector.load %arg3[%c6_251, %c0_252, %c0_253] : memref<17x144x16xf32, #tpu.memory_space<vmem>>, vector<1x144x16xf32>
    %172 = vector.shape_cast %171 : vector<1x144x16xf32> to vector<144x16xf32>
    %c0_254 = arith.constant 0 : index
    %c0_255 = arith.constant 0 : index
    %173 = vector.load %arg5[%c0_254, %c0_255] : memref<64x144xf32, #tpu.memory_space<vmem>>, vector<64x144xf32>
    %cst_256 = arith.constant dense<0.000000e+00> : vector<64x16xf32>
    %174 = tpu.matmul %173, %172, %cst_256 {dimension_numbers = #tpu.dot_dimension_numbers<[1], [0], [0], [1], [0, 0, 1, 1], [], []>} : vector<64x144xf32>, vector<144x16xf32>, vector<64x16xf32> -> vector<64x16xf32>
    %c0_257 = arith.constant 0 : index
    %c0_258 = arith.constant 0 : index
    %c0_259 = arith.constant 0 : index
    %c0_260 = arith.constant 0 : index
    %175 = vector.load %arg4[%c0_257, %c0_258, %c0_259, %c0_260] : memref<1x2x16x16xf32, #tpu.memory_space<vmem>>, vector<1x1x16x16xf32>
    %176 = vector.shape_cast %175 : vector<1x1x16x16xf32> to vector<16x16xf32>
    %177 = vector.extract_strided_slice %174 {offsets = [6, 0], sizes = [16, 16], strides = [1, 1]} : vector<64x16xf32> to vector<16x16xf32>
    %178 = arith.addf %176, %177 : vector<16x16xf32>
    %c0_261 = arith.constant 0 : index
    %c0_262 = arith.constant 0 : index
    %c0_263 = arith.constant 0 : index
    %c0_264 = arith.constant 0 : index
    %179 = vector.load %arg4[%c0_261, %c0_262, %c0_263, %c0_264] : memref<1x2x16x16xf32, #tpu.memory_space<vmem>>, vector<1x1x16x16xf32>
    %180 = vector.shape_cast %179 : vector<1x1x16x16xf32> to vector<16x16xf32>
    %181 = vector.shape_cast %178 : vector<16x16xf32> to vector<1x1x16x16xf32>
    tpu.vector_store %arg4[%c0_261, %c0_262, %c0_263, %c0_264], %181 {strides = array<i32>} : memref<1x2x16x16xf32, #tpu.memory_space<vmem>>, vector<1x1x16x16xf32>,
    %c0_265 = arith.constant 0 : index
    %c1_266 = arith.constant 1 : index
    %c0_267 = arith.constant 0 : index
    %c0_268 = arith.constant 0 : index
    %182 = vector.load %arg4[%c0_265, %c1_266, %c0_267, %c0_268] : memref<1x2x16x16xf32, #tpu.memory_space<vmem>>, vector<1x1x16x16xf32>
    %183 = vector.shape_cast %182 : vector<1x1x16x16xf32> to vector<16x16xf32>
    %184 = vector.extract_strided_slice %174 {offsets = [38, 0], sizes = [16, 16], strides = [1, 1]} : vector<64x16xf32> to vector<16x16xf32>
    %185 = arith.addf %183, %184 : vector<16x16xf32>
    %c0_269 = arith.constant 0 : index
    %c1_270 = arith.constant 1 : index
    %c0_271 = arith.constant 0 : index
    %c0_272 = arith.constant 0 : index
    %186 = vector.load %arg4[%c0_269, %c1_270, %c0_271, %c0_272] : memref<1x2x16x16xf32, #tpu.memory_space<vmem>>, vector<1x1x16x16xf32>
    %187 = vector.shape_cast %186 : vector<1x1x16x16xf32> to vector<16x16xf32>
    %188 = vector.shape_cast %185 : vector<16x16xf32> to vector<1x1x16x16xf32>
    tpu.vector_store %arg4[%c0_269, %c1_270, %c0_271, %c0_272], %188 {strides = array<i32>} : memref<1x2x16x16xf32, #tpu.memory_space<vmem>>, vector<1x1x16x16xf32>,
    %c7_273 = arith.constant 7 : index
    %c0_274 = arith.constant 0 : index
    %c0_275 = arith.constant 0 : index
    %189 = vector.load %arg3[%c7_273, %c0_274, %c0_275] : memref<17x144x16xf32, #tpu.memory_space<vmem>>, vector<1x144x16xf32>
    %190 = vector.shape_cast %189 : vector<1x144x16xf32> to vector<144x16xf32>
    %c0_276 = arith.constant 0 : index
    %c0_277 = arith.constant 0 : index
    %191 = vector.load %arg5[%c0_276, %c0_277] : memref<64x144xf32, #tpu.memory_space<vmem>>, vector<64x144xf32>
    %cst_278 = arith.constant dense<0.000000e+00> : vector<64x16xf32>
    %192 = tpu.matmul %191, %190, %cst_278 {dimension_numbers = #tpu.dot_dimension_numbers<[1], [0], [0], [1], [0, 0, 1, 1], [], []>} : vector<64x144xf32>, vector<144x16xf32>, vector<64x16xf32> -> vector<64x16xf32>
    %c0_279 = arith.constant 0 : index
    %c0_280 = arith.constant 0 : index
    %c0_281 = arith.constant 0 : index
    %c0_282 = arith.constant 0 : index
    %193 = vector.load %arg4[%c0_279, %c0_280, %c0_281, %c0_282] : memref<1x2x16x16xf32, #tpu.memory_space<vmem>>, vector<1x1x16x16xf32>
    %194 = vector.shape_cast %193 : vector<1x1x16x16xf32> to vector<16x16xf32>
    %195 = vector.extract_strided_slice %192 {offsets = [7, 0], sizes = [16, 16], strides = [1, 1]} : vector<64x16xf32> to vector<16x16xf32>
    %196 = arith.addf %194, %195 : vector<16x16xf32>
    %c0_283 = arith.constant 0 : index
    %c0_284 = arith.constant 0 : index
    %c0_285 = arith.constant 0 : index
    %c0_286 = arith.constant 0 : index
    %197 = vector.load %arg4[%c0_283, %c0_284, %c0_285, %c0_286] : memref<1x2x16x16xf32, #tpu.memory_space<vmem>>, vector<1x1x16x16xf32>
    %198 = vector.shape_cast %197 : vector<1x1x16x16xf32> to vector<16x16xf32>
    %199 = vector.shape_cast %196 : vector<16x16xf32> to vector<1x1x16x16xf32>
    tpu.vector_store %arg4[%c0_283, %c0_284, %c0_285, %c0_286], %199 {strides = array<i32>} : memref<1x2x16x16xf32, #tpu.memory_space<vmem>>, vector<1x1x16x16xf32>,
    %c0_287 = arith.constant 0 : index
    %c1_288 = arith.constant 1 : index
    %c0_289 = arith.constant 0 : index
    %c0_290 = arith.constant 0 : index
    %200 = vector.load %arg4[%c0_287, %c1_288, %c0_289, %c0_290] : memref<1x2x16x16xf32, #tpu.memory_space<vmem>>, vector<1x1x16x16xf32>
    %201 = vector.shape_cast %200 : vector<1x1x16x16xf32> to vector<16x16xf32>
    %202 = vector.extract_strided_slice %192 {offsets = [39, 0], sizes = [16, 16], strides = [1, 1]} : vector<64x16xf32> to vector<16x16xf32>
    %203 = arith.addf %201, %202 : vector<16x16xf32>
    %c0_291 = arith.constant 0 : index
    %c1_292 = arith.constant 1 : index
    %c0_293 = arith.constant 0 : index
    %c0_294 = arith.constant 0 : index
    %204 = vector.load %arg4[%c0_291, %c1_292, %c0_293, %c0_294] : memref<1x2x16x16xf32, #tpu.memory_space<vmem>>, vector<1x1x16x16xf32>
    %205 = vector.shape_cast %204 : vector<1x1x16x16xf32> to vector<16x16xf32>
    %206 = vector.shape_cast %203 : vector<16x16xf32> to vector<1x1x16x16xf32>
    tpu.vector_store %arg4[%c0_291, %c1_292, %c0_293, %c0_294], %206 {strides = array<i32>} : memref<1x2x16x16xf32, #tpu.memory_space<vmem>>, vector<1x1x16x16xf32>,
    %c8_295 = arith.constant 8 : index
    %c0_296 = arith.constant 0 : index
    %c0_297 = arith.constant 0 : index
    %207 = vector.load %arg3[%c8_295, %c0_296, %c0_297] : memref<17x144x16xf32, #tpu.memory_space<vmem>>, vector<1x144x16xf32>
    %208 = vector.shape_cast %207 : vector<1x144x16xf32> to vector<144x16xf32>
    %c0_298 = arith.constant 0 : index
    %c0_299 = arith.constant 0 : index
    %209 = vector.load %arg5[%c0_298, %c0_299] : memref<64x144xf32, #tpu.memory_space<vmem>>, vector<64x144xf32>
    %cst_300 = arith.constant dense<0.000000e+00> : vector<64x16xf32>
    %210 = tpu.matmul %209, %208, %cst_300 {dimension_numbers = #tpu.dot_dimension_numbers<[1], [0], [0], [1], [0, 0, 1, 1], [], []>} : vector<64x144xf32>, vector<144x16xf32>, vector<64x16xf32> -> vector<64x16xf32>
    %c0_301 = arith.constant 0 : index
    %c0_302 = arith.constant 0 : index
    %c0_303 = arith.constant 0 : index
    %c0_304 = arith.constant 0 : index
    %211 = vector.load %arg4[%c0_301, %c0_302, %c0_303, %c0_304] : memref<1x2x16x16xf32, #tpu.memory_space<vmem>>, vector<1x1x16x16xf32>
    %212 = vector.shape_cast %211 : vector<1x1x16x16xf32> to vector<16x16xf32>
    %213 = vector.extract_strided_slice %210 {offsets = [8, 0], sizes = [16, 16], strides = [1, 1]} : vector<64x16xf32> to vector<16x16xf32>
    %214 = arith.addf %212, %213 : vector<16x16xf32>
    %c0_305 = arith.constant 0 : index
    %c0_306 = arith.constant 0 : index
    %c0_307 = arith.constant 0 : index
    %c0_308 = arith.constant 0 : index
    %215 = vector.load %arg4[%c0_305, %c0_306, %c0_307, %c0_308] : memref<1x2x16x16xf32, #tpu.memory_space<vmem>>, vector<1x1x16x16xf32>
    %216 = vector.shape_cast %215 : vector<1x1x16x16xf32> to vector<16x16xf32>
    %217 = vector.shape_cast %214 : vector<16x16xf32> to vector<1x1x16x16xf32>
    tpu.vector_store %arg4[%c0_305, %c0_306, %c0_307, %c0_308], %217 {strides = array<i32>} : memref<1x2x16x16xf32, #tpu.memory_space<vmem>>, vector<1x1x16x16xf32>,
    %c0_309 = arith.constant 0 : index
    %c1_310 = arith.constant 1 : index
    %c0_311 = arith.constant 0 : index
    %c0_312 = arith.constant 0 : index
    %218 = vector.load %arg4[%c0_309, %c1_310, %c0_311, %c0_312] : memref<1x2x16x16xf32, #tpu.memory_space<vmem>>, vector<1x1x16x16xf32>
    %219 = vector.shape_cast %218 : vector<1x1x16x16xf32> to vector<16x16xf32>
    %220 = vector.extract_strided_slice %210 {offsets = [40, 0], sizes = [16, 16], strides = [1, 1]} : vector<64x16xf32> to vector<16x16xf32>
    %221 = arith.addf %219, %220 : vector<16x16xf32>
    %c0_313 = arith.constant 0 : index
    %c1_314 = arith.constant 1 : index
    %c0_315 = arith.constant 0 : index
    %c0_316 = arith.constant 0 : index
    %222 = vector.load %arg4[%c0_313, %c1_314, %c0_315, %c0_316] : memref<1x2x16x16xf32, #tpu.memory_space<vmem>>, vector<1x1x16x16xf32>
    %223 = vector.shape_cast %222 : vector<1x1x16x16xf32> to vector<16x16xf32>
    %224 = vector.shape_cast %221 : vector<16x16xf32> to vector<1x1x16x16xf32>
    tpu.vector_store %arg4[%c0_313, %c1_314, %c0_315, %c0_316], %224 {strides = array<i32>} : memref<1x2x16x16xf32, #tpu.memory_space<vmem>>, vector<1x1x16x16xf32>,
    %c9 = arith.constant 9 : index
    %c0_317 = arith.constant 0 : index
    %c0_318 = arith.constant 0 : index
    %225 = vector.load %arg3[%c9, %c0_317, %c0_318] : memref<17x144x16xf32, #tpu.memory_space<vmem>>, vector<1x144x16xf32>
    %226 = vector.shape_cast %225 : vector<1x144x16xf32> to vector<144x16xf32>
    %c0_319 = arith.constant 0 : index
    %c0_320 = arith.constant 0 : index
    %227 = vector.load %arg5[%c0_319, %c0_320] : memref<64x144xf32, #tpu.memory_space<vmem>>, vector<64x144xf32>
    %cst_321 = arith.constant dense<0.000000e+00> : vector<64x16xf32>
    %228 = tpu.matmul %227, %226, %cst_321 {dimension_numbers = #tpu.dot_dimension_numbers<[1], [0], [0], [1], [0, 0, 1, 1], [], []>} : vector<64x144xf32>, vector<144x16xf32>, vector<64x16xf32> -> vector<64x16xf32>
    %c0_322 = arith.constant 0 : index
    %c0_323 = arith.constant 0 : index
    %c0_324 = arith.constant 0 : index
    %c0_325 = arith.constant 0 : index
    %229 = vector.load %arg4[%c0_322, %c0_323, %c0_324, %c0_325] : memref<1x2x16x16xf32, #tpu.memory_space<vmem>>, vector<1x1x16x16xf32>
    %230 = vector.shape_cast %229 : vector<1x1x16x16xf32> to vector<16x16xf32>
    %231 = vector.extract_strided_slice %228 {offsets = [9, 0], sizes = [16, 16], strides = [1, 1]} : vector<64x16xf32> to vector<16x16xf32>
    %232 = arith.addf %230, %231 : vector<16x16xf32>
    %c0_326 = arith.constant 0 : index
    %c0_327 = arith.constant 0 : index
    %c0_328 = arith.constant 0 : index
    %c0_329 = arith.constant 0 : index
    %233 = vector.load %arg4[%c0_326, %c0_327, %c0_328, %c0_329] : memref<1x2x16x16xf32, #tpu.memory_space<vmem>>, vector<1x1x16x16xf32>
    %234 = vector.shape_cast %233 : vector<1x1x16x16xf32> to vector<16x16xf32>
    %235 = vector.shape_cast %232 : vector<16x16xf32> to vector<1x1x16x16xf32>
    tpu.vector_store %arg4[%c0_326, %c0_327, %c0_328, %c0_329], %235 {strides = array<i32>} : memref<1x2x16x16xf32, #tpu.memory_space<vmem>>, vector<1x1x16x16xf32>,
    %c0_330 = arith.constant 0 : index
    %c1_331 = arith.constant 1 : index
    %c0_332 = arith.constant 0 : index
    %c0_333 = arith.constant 0 : index
    %236 = vector.load %arg4[%c0_330, %c1_331, %c0_332, %c0_333] : memref<1x2x16x16xf32, #tpu.memory_space<vmem>>, vector<1x1x16x16xf32>
    %237 = vector.shape_cast %236 : vector<1x1x16x16xf32> to vector<16x16xf32>
    %238 = vector.extract_strided_slice %228 {offsets = [41, 0], sizes = [16, 16], strides = [1, 1]} : vector<64x16xf32> to vector<16x16xf32>
    %239 = arith.addf %237, %238 : vector<16x16xf32>
    %c0_334 = arith.constant 0 : index
    %c1_335 = arith.constant 1 : index
    %c0_336 = arith.constant 0 : index
    %c0_337 = arith.constant 0 : index
    %240 = vector.load %arg4[%c0_334, %c1_335, %c0_336, %c0_337] : memref<1x2x16x16xf32, #tpu.memory_space<vmem>>, vector<1x1x16x16xf32>
    %241 = vector.shape_cast %240 : vector<1x1x16x16xf32> to vector<16x16xf32>
    %242 = vector.shape_cast %239 : vector<16x16xf32> to vector<1x1x16x16xf32>
    tpu.vector_store %arg4[%c0_334, %c1_335, %c0_336, %c0_337], %242 {strides = array<i32>} : memref<1x2x16x16xf32, #tpu.memory_space<vmem>>, vector<1x1x16x16xf32>,
    %c10 = arith.constant 10 : index
    %c0_338 = arith.constant 0 : index
    %c0_339 = arith.constant 0 : index
    %243 = vector.load %arg3[%c10, %c0_338, %c0_339] : memref<17x144x16xf32, #tpu.memory_space<vmem>>, vector<1x144x16xf32>
    %244 = vector.shape_cast %243 : vector<1x144x16xf32> to vector<144x16xf32>
    %c0_340 = arith.constant 0 : index
    %c0_341 = arith.constant 0 : index
    %245 = vector.load %arg5[%c0_340, %c0_341] : memref<64x144xf32, #tpu.memory_space<vmem>>, vector<64x144xf32>
    %cst_342 = arith.constant dense<0.000000e+00> : vector<64x16xf32>
    %246 = tpu.matmul %245, %244, %cst_342 {dimension_numbers = #tpu.dot_dimension_numbers<[1], [0], [0], [1], [0, 0, 1, 1], [], []>} : vector<64x144xf32>, vector<144x16xf32>, vector<64x16xf32> -> vector<64x16xf32>
    %c0_343 = arith.constant 0 : index
    %c0_344 = arith.constant 0 : index
    %c0_345 = arith.constant 0 : index
    %c0_346 = arith.constant 0 : index
    %247 = vector.load %arg4[%c0_343, %c0_344, %c0_345, %c0_346] : memref<1x2x16x16xf32, #tpu.memory_space<vmem>>, vector<1x1x16x16xf32>
    %248 = vector.shape_cast %247 : vector<1x1x16x16xf32> to vector<16x16xf32>
    %249 = vector.extract_strided_slice %246 {offsets = [10, 0], sizes = [16, 16], strides = [1, 1]} : vector<64x16xf32> to vector<16x16xf32>
    %250 = arith.addf %248, %249 : vector<16x16xf32>
    %c0_347 = arith.constant 0 : index
    %c0_348 = arith.constant 0 : index
    %c0_349 = arith.constant 0 : index
    %c0_350 = arith.constant 0 : index
    %251 = vector.load %arg4[%c0_347, %c0_348, %c0_349, %c0_350] : memref<1x2x16x16xf32, #tpu.memory_space<vmem>>, vector<1x1x16x16xf32>
    %252 = vector.shape_cast %251 : vector<1x1x16x16xf32> to vector<16x16xf32>
    %253 = vector.shape_cast %250 : vector<16x16xf32> to vector<1x1x16x16xf32>
    tpu.vector_store %arg4[%c0_347, %c0_348, %c0_349, %c0_350], %253 {strides = array<i32>} : memref<1x2x16x16xf32, #tpu.memory_space<vmem>>, vector<1x1x16x16xf32>,
    %c0_351 = arith.constant 0 : index
    %c1_352 = arith.constant 1 : index
    %c0_353 = arith.constant 0 : index
    %c0_354 = arith.constant 0 : index
    %254 = vector.load %arg4[%c0_351, %c1_352, %c0_353, %c0_354] : memref<1x2x16x16xf32, #tpu.memory_space<vmem>>, vector<1x1x16x16xf32>
    %255 = vector.shape_cast %254 : vector<1x1x16x16xf32> to vector<16x16xf32>
    %256 = vector.extract_strided_slice %246 {offsets = [42, 0], sizes = [16, 16], strides = [1, 1]} : vector<64x16xf32> to vector<16x16xf32>
    %257 = arith.addf %255, %256 : vector<16x16xf32>
    %c0_355 = arith.constant 0 : index
    %c1_356 = arith.constant 1 : index
    %c0_357 = arith.constant 0 : index
    %c0_358 = arith.constant 0 : index
    %258 = vector.load %arg4[%c0_355, %c1_356, %c0_357, %c0_358] : memref<1x2x16x16xf32, #tpu.memory_space<vmem>>, vector<1x1x16x16xf32>
    %259 = vector.shape_cast %258 : vector<1x1x16x16xf32> to vector<16x16xf32>
    %260 = vector.shape_cast %257 : vector<16x16xf32> to vector<1x1x16x16xf32>
    tpu.vector_store %arg4[%c0_355, %c1_356, %c0_357, %c0_358], %260 {strides = array<i32>} : memref<1x2x16x16xf32, #tpu.memory_space<vmem>>, vector<1x1x16x16xf32>,
    %c11 = arith.constant 11 : index
    %c0_359 = arith.constant 0 : index
    %c0_360 = arith.constant 0 : index
    %261 = vector.load %arg3[%c11, %c0_359, %c0_360] : memref<17x144x16xf32, #tpu.memory_space<vmem>>, vector<1x144x16xf32>
    %262 = vector.shape_cast %261 : vector<1x144x16xf32> to vector<144x16xf32>
    %c0_361 = arith.constant 0 : index
    %c0_362 = arith.constant 0 : index
    %263 = vector.load %arg5[%c0_361, %c0_362] : memref<64x144xf32, #tpu.memory_space<vmem>>, vector<64x144xf32>
    %cst_363 = arith.constant dense<0.000000e+00> : vector<64x16xf32>
    %264 = tpu.matmul %263, %262, %cst_363 {dimension_numbers = #tpu.dot_dimension_numbers<[1], [0], [0], [1], [0, 0, 1, 1], [], []>} : vector<64x144xf32>, vector<144x16xf32>, vector<64x16xf32> -> vector<64x16xf32>
    %c0_364 = arith.constant 0 : index
    %c0_365 = arith.constant 0 : index
    %c0_366 = arith.constant 0 : index
    %c0_367 = arith.constant 0 : index
    %265 = vector.load %arg4[%c0_364, %c0_365, %c0_366, %c0_367] : memref<1x2x16x16xf32, #tpu.memory_space<vmem>>, vector<1x1x16x16xf32>
    %266 = vector.shape_cast %265 : vector<1x1x16x16xf32> to vector<16x16xf32>
    %267 = vector.extract_strided_slice %264 {offsets = [11, 0], sizes = [16, 16], strides = [1, 1]} : vector<64x16xf32> to vector<16x16xf32>
    %268 = arith.addf %266, %267 : vector<16x16xf32>
    %c0_368 = arith.constant 0 : index
    %c0_369 = arith.constant 0 : index
    %c0_370 = arith.constant 0 : index
    %c0_371 = arith.constant 0 : index
    %269 = vector.load %arg4[%c0_368, %c0_369, %c0_370, %c0_371] : memref<1x2x16x16xf32, #tpu.memory_space<vmem>>, vector<1x1x16x16xf32>
    %270 = vector.shape_cast %269 : vector<1x1x16x16xf32> to vector<16x16xf32>
    %271 = vector.shape_cast %268 : vector<16x16xf32> to vector<1x1x16x16xf32>
    tpu.vector_store %arg4[%c0_368, %c0_369, %c0_370, %c0_371], %271 {strides = array<i32>} : memref<1x2x16x16xf32, #tpu.memory_space<vmem>>, vector<1x1x16x16xf32>,
    %c0_372 = arith.constant 0 : index
    %c1_373 = arith.constant 1 : index
    %c0_374 = arith.constant 0 : index
    %c0_375 = arith.constant 0 : index
    %272 = vector.load %arg4[%c0_372, %c1_373, %c0_374, %c0_375] : memref<1x2x16x16xf32, #tpu.memory_space<vmem>>, vector<1x1x16x16xf32>
    %273 = vector.shape_cast %272 : vector<1x1x16x16xf32> to vector<16x16xf32>
    %274 = vector.extract_strided_slice %264 {offsets = [43, 0], sizes = [16, 16], strides = [1, 1]} : vector<64x16xf32> to vector<16x16xf32>
    %275 = arith.addf %273, %274 : vector<16x16xf32>
    %c0_376 = arith.constant 0 : index
    %c1_377 = arith.constant 1 : index
    %c0_378 = arith.constant 0 : index
    %c0_379 = arith.constant 0 : index
    %276 = vector.load %arg4[%c0_376, %c1_377, %c0_378, %c0_379] : memref<1x2x16x16xf32, #tpu.memory_space<vmem>>, vector<1x1x16x16xf32>
    %277 = vector.shape_cast %276 : vector<1x1x16x16xf32> to vector<16x16xf32>
    %278 = vector.shape_cast %275 : vector<16x16xf32> to vector<1x1x16x16xf32>
    tpu.vector_store %arg4[%c0_376, %c1_377, %c0_378, %c0_379], %278 {strides = array<i32>} : memref<1x2x16x16xf32, #tpu.memory_space<vmem>>, vector<1x1x16x16xf32>,
    %c12 = arith.constant 12 : index
    %c0_380 = arith.constant 0 : index
    %c0_381 = arith.constant 0 : index
    %279 = vector.load %arg3[%c12, %c0_380, %c0_381] : memref<17x144x16xf32, #tpu.memory_space<vmem>>, vector<1x144x16xf32>
    %280 = vector.shape_cast %279 : vector<1x144x16xf32> to vector<144x16xf32>
    %c0_382 = arith.constant 0 : index
    %c0_383 = arith.constant 0 : index
    %281 = vector.load %arg5[%c0_382, %c0_383] : memref<64x144xf32, #tpu.memory_space<vmem>>, vector<64x144xf32>
    %cst_384 = arith.constant dense<0.000000e+00> : vector<64x16xf32>
    %282 = tpu.matmul %281, %280, %cst_384 {dimension_numbers = #tpu.dot_dimension_numbers<[1], [0], [0], [1], [0, 0, 1, 1], [], []>} : vector<64x144xf32>, vector<144x16xf32>, vector<64x16xf32> -> vector<64x16xf32>
    %c0_385 = arith.constant 0 : index
    %c0_386 = arith.constant 0 : index
    %c0_387 = arith.constant 0 : index
    %c0_388 = arith.constant 0 : index
    %283 = vector.load %arg4[%c0_385, %c0_386, %c0_387, %c0_388] : memref<1x2x16x16xf32, #tpu.memory_space<vmem>>, vector<1x1x16x16xf32>
    %284 = vector.shape_cast %283 : vector<1x1x16x16xf32> to vector<16x16xf32>
    %285 = vector.extract_strided_slice %282 {offsets = [12, 0], sizes = [16, 16], strides = [1, 1]} : vector<64x16xf32> to vector<16x16xf32>
    %286 = arith.addf %284, %285 : vector<16x16xf32>
    %c0_389 = arith.constant 0 : index
    %c0_390 = arith.constant 0 : index
    %c0_391 = arith.constant 0 : index
    %c0_392 = arith.constant 0 : index
    %287 = vector.load %arg4[%c0_389, %c0_390, %c0_391, %c0_392] : memref<1x2x16x16xf32, #tpu.memory_space<vmem>>, vector<1x1x16x16xf32>
    %288 = vector.shape_cast %287 : vector<1x1x16x16xf32> to vector<16x16xf32>
    %289 = vector.shape_cast %286 : vector<16x16xf32> to vector<1x1x16x16xf32>
    tpu.vector_store %arg4[%c0_389, %c0_390, %c0_391, %c0_392], %289 {strides = array<i32>} : memref<1x2x16x16xf32, #tpu.memory_space<vmem>>, vector<1x1x16x16xf32>,
    %c0_393 = arith.constant 0 : index
    %c1_394 = arith.constant 1 : index
    %c0_395 = arith.constant 0 : index
    %c0_396 = arith.constant 0 : index
    %290 = vector.load %arg4[%c0_393, %c1_394, %c0_395, %c0_396] : memref<1x2x16x16xf32, #tpu.memory_space<vmem>>, vector<1x1x16x16xf32>
    %291 = vector.shape_cast %290 : vector<1x1x16x16xf32> to vector<16x16xf32>
    %292 = vector.extract_strided_slice %282 {offsets = [44, 0], sizes = [16, 16], strides = [1, 1]} : vector<64x16xf32> to vector<16x16xf32>
    %293 = arith.addf %291, %292 : vector<16x16xf32>
    %c0_397 = arith.constant 0 : index
    %c1_398 = arith.constant 1 : index
    %c0_399 = arith.constant 0 : index
    %c0_400 = arith.constant 0 : index
    %294 = vector.load %arg4[%c0_397, %c1_398, %c0_399, %c0_400] : memref<1x2x16x16xf32, #tpu.memory_space<vmem>>, vector<1x1x16x16xf32>
    %295 = vector.shape_cast %294 : vector<1x1x16x16xf32> to vector<16x16xf32>
    %296 = vector.shape_cast %293 : vector<16x16xf32> to vector<1x1x16x16xf32>
    tpu.vector_store %arg4[%c0_397, %c1_398, %c0_399, %c0_400], %296 {strides = array<i32>} : memref<1x2x16x16xf32, #tpu.memory_space<vmem>>, vector<1x1x16x16xf32>,
    %c13 = arith.constant 13 : index
    %c0_401 = arith.constant 0 : index
    %c0_402 = arith.constant 0 : index
    %297 = vector.load %arg3[%c13, %c0_401, %c0_402] : memref<17x144x16xf32, #tpu.memory_space<vmem>>, vector<1x144x16xf32>
    %298 = vector.shape_cast %297 : vector<1x144x16xf32> to vector<144x16xf32>
    %c0_403 = arith.constant 0 : index
    %c0_404 = arith.constant 0 : index
    %299 = vector.load %arg5[%c0_403, %c0_404] : memref<64x144xf32, #tpu.memory_space<vmem>>, vector<64x144xf32>
    %cst_405 = arith.constant dense<0.000000e+00> : vector<64x16xf32>
    %300 = tpu.matmul %299, %298, %cst_405 {dimension_numbers = #tpu.dot_dimension_numbers<[1], [0], [0], [1], [0, 0, 1, 1], [], []>} : vector<64x144xf32>, vector<144x16xf32>, vector<64x16xf32> -> vector<64x16xf32>
    %c0_406 = arith.constant 0 : index
    %c0_407 = arith.constant 0 : index
    %c0_408 = arith.constant 0 : index
    %c0_409 = arith.constant 0 : index
    %301 = vector.load %arg4[%c0_406, %c0_407, %c0_408, %c0_409] : memref<1x2x16x16xf32, #tpu.memory_space<vmem>>, vector<1x1x16x16xf32>
    %302 = vector.shape_cast %301 : vector<1x1x16x16xf32> to vector<16x16xf32>
    %303 = vector.extract_strided_slice %300 {offsets = [13, 0], sizes = [16, 16], strides = [1, 1]} : vector<64x16xf32> to vector<16x16xf32>
    %304 = arith.addf %302, %303 : vector<16x16xf32>
    %c0_410 = arith.constant 0 : index
    %c0_411 = arith.constant 0 : index
    %c0_412 = arith.constant 0 : index
    %c0_413 = arith.constant 0 : index
    %305 = vector.load %arg4[%c0_410, %c0_411, %c0_412, %c0_413] : memref<1x2x16x16xf32, #tpu.memory_space<vmem>>, vector<1x1x16x16xf32>
    %306 = vector.shape_cast %305 : vector<1x1x16x16xf32> to vector<16x16xf32>
    %307 = vector.shape_cast %304 : vector<16x16xf32> to vector<1x1x16x16xf32>
    tpu.vector_store %arg4[%c0_410, %c0_411, %c0_412, %c0_413], %307 {strides = array<i32>} : memref<1x2x16x16xf32, #tpu.memory_space<vmem>>, vector<1x1x16x16xf32>,
    %c0_414 = arith.constant 0 : index
    %c1_415 = arith.constant 1 : index
    %c0_416 = arith.constant 0 : index
    %c0_417 = arith.constant 0 : index
    %308 = vector.load %arg4[%c0_414, %c1_415, %c0_416, %c0_417] : memref<1x2x16x16xf32, #tpu.memory_space<vmem>>, vector<1x1x16x16xf32>
    %309 = vector.shape_cast %308 : vector<1x1x16x16xf32> to vector<16x16xf32>
    %310 = vector.extract_strided_slice %300 {offsets = [45, 0], sizes = [16, 16], strides = [1, 1]} : vector<64x16xf32> to vector<16x16xf32>
    %311 = arith.addf %309, %310 : vector<16x16xf32>
    %c0_418 = arith.constant 0 : index
    %c1_419 = arith.constant 1 : index
    %c0_420 = arith.constant 0 : index
    %c0_421 = arith.constant 0 : index
    %312 = vector.load %arg4[%c0_418, %c1_419, %c0_420, %c0_421] : memref<1x2x16x16xf32, #tpu.memory_space<vmem>>, vector<1x1x16x16xf32>
    %313 = vector.shape_cast %312 : vector<1x1x16x16xf32> to vector<16x16xf32>
    %314 = vector.shape_cast %311 : vector<16x16xf32> to vector<1x1x16x16xf32>
    tpu.vector_store %arg4[%c0_418, %c1_419, %c0_420, %c0_421], %314 {strides = array<i32>} : memref<1x2x16x16xf32, #tpu.memory_space<vmem>>, vector<1x1x16x16xf32>,
    %c14 = arith.constant 14 : index
    %c0_422 = arith.constant 0 : index
    %c0_423 = arith.constant 0 : index
    %315 = vector.load %arg3[%c14, %c0_422, %c0_423] : memref<17x144x16xf32, #tpu.memory_space<vmem>>, vector<1x144x16xf32>
    %316 = vector.shape_cast %315 : vector<1x144x16xf32> to vector<144x16xf32>
    %c0_424 = arith.constant 0 : index
    %c0_425 = arith.constant 0 : index
    %317 = vector.load %arg5[%c0_424, %c0_425] : memref<64x144xf32, #tpu.memory_space<vmem>>, vector<64x144xf32>
    %cst_426 = arith.constant dense<0.000000e+00> : vector<64x16xf32>
    %318 = tpu.matmul %317, %316, %cst_426 {dimension_numbers = #tpu.dot_dimension_numbers<[1], [0], [0], [1], [0, 0, 1, 1], [], []>} : vector<64x144xf32>, vector<144x16xf32>, vector<64x16xf32> -> vector<64x16xf32>
    %c0_427 = arith.constant 0 : index
    %c0_428 = arith.constant 0 : index
    %c0_429 = arith.constant 0 : index
    %c0_430 = arith.constant 0 : index
    %319 = vector.load %arg4[%c0_427, %c0_428, %c0_429, %c0_430] : memref<1x2x16x16xf32, #tpu.memory_space<vmem>>, vector<1x1x16x16xf32>
    %320 = vector.shape_cast %319 : vector<1x1x16x16xf32> to vector<16x16xf32>
    %321 = vector.extract_strided_slice %318 {offsets = [14, 0], sizes = [16, 16], strides = [1, 1]} : vector<64x16xf32> to vector<16x16xf32>
    %322 = arith.addf %320, %321 : vector<16x16xf32>
    %c0_431 = arith.constant 0 : index
    %c0_432 = arith.constant 0 : index
    %c0_433 = arith.constant 0 : index
    %c0_434 = arith.constant 0 : index
    %323 = vector.load %arg4[%c0_431, %c0_432, %c0_433, %c0_434] : memref<1x2x16x16xf32, #tpu.memory_space<vmem>>, vector<1x1x16x16xf32>
    %324 = vector.shape_cast %323 : vector<1x1x16x16xf32> to vector<16x16xf32>
    %325 = vector.shape_cast %322 : vector<16x16xf32> to vector<1x1x16x16xf32>
    tpu.vector_store %arg4[%c0_431, %c0_432, %c0_433, %c0_434], %325 {strides = array<i32>} : memref<1x2x16x16xf32, #tpu.memory_space<vmem>>, vector<1x1x16x16xf32>,
    %c0_435 = arith.constant 0 : index
    %c1_436 = arith.constant 1 : index
    %c0_437 = arith.constant 0 : index
    %c0_438 = arith.constant 0 : index
    %326 = vector.load %arg4[%c0_435, %c1_436, %c0_437, %c0_438] : memref<1x2x16x16xf32, #tpu.memory_space<vmem>>, vector<1x1x16x16xf32>
    %327 = vector.shape_cast %326 : vector<1x1x16x16xf32> to vector<16x16xf32>
    %328 = vector.extract_strided_slice %318 {offsets = [46, 0], sizes = [16, 16], strides = [1, 1]} : vector<64x16xf32> to vector<16x16xf32>
    %329 = arith.addf %327, %328 : vector<16x16xf32>
    %c0_439 = arith.constant 0 : index
    %c1_440 = arith.constant 1 : index
    %c0_441 = arith.constant 0 : index
    %c0_442 = arith.constant 0 : index
    %330 = vector.load %arg4[%c0_439, %c1_440, %c0_441, %c0_442] : memref<1x2x16x16xf32, #tpu.memory_space<vmem>>, vector<1x1x16x16xf32>
    %331 = vector.shape_cast %330 : vector<1x1x16x16xf32> to vector<16x16xf32>
    %332 = vector.shape_cast %329 : vector<16x16xf32> to vector<1x1x16x16xf32>
    tpu.vector_store %arg4[%c0_439, %c1_440, %c0_441, %c0_442], %332 {strides = array<i32>} : memref<1x2x16x16xf32, #tpu.memory_space<vmem>>, vector<1x1x16x16xf32>,
    %c15 = arith.constant 15 : index
    %c0_443 = arith.constant 0 : index
    %c0_444 = arith.constant 0 : index
    %333 = vector.load %arg3[%c15, %c0_443, %c0_444] : memref<17x144x16xf32, #tpu.memory_space<vmem>>, vector<1x144x16xf32>
    %334 = vector.shape_cast %333 : vector<1x144x16xf32> to vector<144x16xf32>
    %c0_445 = arith.constant 0 : index
    %c0_446 = arith.constant 0 : index
    %335 = vector.load %arg5[%c0_445, %c0_446] : memref<64x144xf32, #tpu.memory_space<vmem>>, vector<64x144xf32>
    %cst_447 = arith.constant dense<0.000000e+00> : vector<64x16xf32>
    %336 = tpu.matmul %335, %334, %cst_447 {dimension_numbers = #tpu.dot_dimension_numbers<[1], [0], [0], [1], [0, 0, 1, 1], [], []>} : vector<64x144xf32>, vector<144x16xf32>, vector<64x16xf32> -> vector<64x16xf32>
    %c0_448 = arith.constant 0 : index
    %c0_449 = arith.constant 0 : index
    %c0_450 = arith.constant 0 : index
    %c0_451 = arith.constant 0 : index
    %337 = vector.load %arg4[%c0_448, %c0_449, %c0_450, %c0_451] : memref<1x2x16x16xf32, #tpu.memory_space<vmem>>, vector<1x1x16x16xf32>
    %338 = vector.shape_cast %337 : vector<1x1x16x16xf32> to vector<16x16xf32>
    %339 = vector.extract_strided_slice %336 {offsets = [15, 0], sizes = [16, 16], strides = [1, 1]} : vector<64x16xf32> to vector<16x16xf32>
    %340 = arith.addf %338, %339 : vector<16x16xf32>
    %c0_452 = arith.constant 0 : index
    %c0_453 = arith.constant 0 : index
    %c0_454 = arith.constant 0 : index
    %c0_455 = arith.constant 0 : index
    %341 = vector.load %arg4[%c0_452, %c0_453, %c0_454, %c0_455] : memref<1x2x16x16xf32, #tpu.memory_space<vmem>>, vector<1x1x16x16xf32>
    %342 = vector.shape_cast %341 : vector<1x1x16x16xf32> to vector<16x16xf32>
    %343 = vector.shape_cast %340 : vector<16x16xf32> to vector<1x1x16x16xf32>
    tpu.vector_store %arg4[%c0_452, %c0_453, %c0_454, %c0_455], %343 {strides = array<i32>} : memref<1x2x16x16xf32, #tpu.memory_space<vmem>>, vector<1x1x16x16xf32>,
    %c0_456 = arith.constant 0 : index
    %c1_457 = arith.constant 1 : index
    %c0_458 = arith.constant 0 : index
    %c0_459 = arith.constant 0 : index
    %344 = vector.load %arg4[%c0_456, %c1_457, %c0_458, %c0_459] : memref<1x2x16x16xf32, #tpu.memory_space<vmem>>, vector<1x1x16x16xf32>
    %345 = vector.shape_cast %344 : vector<1x1x16x16xf32> to vector<16x16xf32>
    %346 = vector.extract_strided_slice %336 {offsets = [47, 0], sizes = [16, 16], strides = [1, 1]} : vector<64x16xf32> to vector<16x16xf32>
    %347 = arith.addf %345, %346 : vector<16x16xf32>
    %c0_460 = arith.constant 0 : index
    %c1_461 = arith.constant 1 : index
    %c0_462 = arith.constant 0 : index
    %c0_463 = arith.constant 0 : index
    %348 = vector.load %arg4[%c0_460, %c1_461, %c0_462, %c0_463] : memref<1x2x16x16xf32, #tpu.memory_space<vmem>>, vector<1x1x16x16xf32>
    %349 = vector.shape_cast %348 : vector<1x1x16x16xf32> to vector<16x16xf32>
    %350 = vector.shape_cast %347 : vector<16x16xf32> to vector<1x1x16x16xf32>
    tpu.vector_store %arg4[%c0_460, %c1_461, %c0_462, %c0_463], %350 {strides = array<i32>} : memref<1x2x16x16xf32, #tpu.memory_space<vmem>>, vector<1x1x16x16xf32>,
    %c16_464 = arith.constant 16 : index
    %c0_465 = arith.constant 0 : index
    %c0_466 = arith.constant 0 : index
    %351 = vector.load %arg3[%c16_464, %c0_465, %c0_466] : memref<17x144x16xf32, #tpu.memory_space<vmem>>, vector<1x144x16xf32>
    %352 = vector.shape_cast %351 : vector<1x144x16xf32> to vector<144x16xf32>
    %c0_467 = arith.constant 0 : index
    %c0_468 = arith.constant 0 : index
    %353 = vector.load %arg5[%c0_467, %c0_468] : memref<64x144xf32, #tpu.memory_space<vmem>>, vector<64x144xf32>
    %cst_469 = arith.constant dense<0.000000e+00> : vector<64x16xf32>
    %354 = tpu.matmul %353, %352, %cst_469 {dimension_numbers = #tpu.dot_dimension_numbers<[1], [0], [0], [1], [0, 0, 1, 1], [], []>} : vector<64x144xf32>, vector<144x16xf32>, vector<64x16xf32> -> vector<64x16xf32>
    %c0_470 = arith.constant 0 : index
    %c0_471 = arith.constant 0 : index
    %c0_472 = arith.constant 0 : index
    %c0_473 = arith.constant 0 : index
    %355 = vector.load %arg4[%c0_470, %c0_471, %c0_472, %c0_473] : memref<1x2x16x16xf32, #tpu.memory_space<vmem>>, vector<1x1x16x16xf32>
    %356 = vector.shape_cast %355 : vector<1x1x16x16xf32> to vector<16x16xf32>
    %357 = vector.extract_strided_slice %354 {offsets = [16, 0], sizes = [16, 16], strides = [1, 1]} : vector<64x16xf32> to vector<16x16xf32>
    %358 = arith.addf %356, %357 : vector<16x16xf32>
    %c0_474 = arith.constant 0 : index
    %c0_475 = arith.constant 0 : index
    %c0_476 = arith.constant 0 : index
    %c0_477 = arith.constant 0 : index
    %359 = vector.load %arg4[%c0_474, %c0_475, %c0_476, %c0_477] : memref<1x2x16x16xf32, #tpu.memory_space<vmem>>, vector<1x1x16x16xf32>
    %360 = vector.shape_cast %359 : vector<1x1x16x16xf32> to vector<16x16xf32>
    %361 = vector.shape_cast %358 : vector<16x16xf32> to vector<1x1x16x16xf32>
    tpu.vector_store %arg4[%c0_474, %c0_475, %c0_476, %c0_477], %361 {strides = array<i32>} : memref<1x2x16x16xf32, #tpu.memory_space<vmem>>, vector<1x1x16x16xf32>,
    %c0_478 = arith.constant 0 : index
    %c1_479 = arith.constant 1 : index
    %c0_480 = arith.constant 0 : index
    %c0_481 = arith.constant 0 : index
    %362 = vector.load %arg4[%c0_478, %c1_479, %c0_480, %c0_481] : memref<1x2x16x16xf32, #tpu.memory_space<vmem>>, vector<1x1x16x16xf32>
    %363 = vector.shape_cast %362 : vector<1x1x16x16xf32> to vector<16x16xf32>
    %364 = vector.extract_strided_slice %354 {offsets = [48, 0], sizes = [16, 16], strides = [1, 1]} : vector<64x16xf32> to vector<16x16xf32>
    %365 = arith.addf %363, %364 : vector<16x16xf32>
    %c0_482 = arith.constant 0 : index
    %c1_483 = arith.constant 1 : index
    %c0_484 = arith.constant 0 : index
    %c0_485 = arith.constant 0 : index
    %366 = vector.load %arg4[%c0_482, %c1_483, %c0_484, %c0_485] : memref<1x2x16x16xf32, #tpu.memory_space<vmem>>, vector<1x1x16x16xf32>
    %367 = vector.shape_cast %366 : vector<1x1x16x16xf32> to vector<16x16xf32>
    %368 = vector.shape_cast %365 : vector<16x16xf32> to vector<1x1x16x16xf32>
    tpu.vector_store %arg4[%c0_482, %c1_483, %c0_484, %c0_485], %368 {strides = array<i32>} : memref<1x2x16x16xf32, #tpu.memory_space<vmem>>, vector<1x1x16x16xf32>,
    return
  }
  func.func @transform_0(%arg0: i32, %arg1: i32) -> (i32, i32, i32, i32, i32) {
    %c0_i32 = arith.constant 0 : i32
    %c0_i32_0 = arith.constant 0 : i32
    %c0_i32_1 = arith.constant 0 : i32
    %c0_i32_2 = arith.constant 0 : i32
    return %arg0, %c0_i32, %arg1, %c0_i32_0, %c0_i32_1 : i32, i32, i32, i32, i32
  }
  func.func @transform_1(%arg0: i32, %arg1: i32) -> (i32, i32, i32) {
    %c0_i32 = arith.constant 0 : i32
    %c0_i32_0 = arith.constant 0 : i32
    %c0_i32_1 = arith.constant 0 : i32
    %c0_i32_2 = arith.constant 0 : i32
    return %c0_i32, %c0_i32_0, %c0_i32_1 : i32, i32, i32
  }
  func.func @transform_2(%arg0: i32, %arg1: i32) -> (i32, i32, i32, i32) {
    %c0_i32 = arith.constant 0 : i32
    %c0_i32_0 = arith.constant 0 : i32
    %c0_i32_1 = arith.constant 0 : i32
    return %arg0, %arg1, %c0_i32, %c0_i32_0 : i32, i32, i32, i32
  }
}

module attributes {stable_mosaic.version = 11 : i64} {
  func.func @kernel(%arg0: i32, %arg1: i32, %arg2: memref<1x9x2x16x16xf32, #tpu.memory_space<vmem>>, %arg3: memref<17x144x16xf32, #tpu.memory_space<vmem>>, %arg4: memref<1x2x16x16xf32, #tpu.memory_space<vmem>>, %arg5: memref<64x144xf32, #tpu.memory_space<vmem>>) attributes {dimension_semantics = [#tpu.dimension_semantics<parallel>, #tpu.dimension_semantics<parallel>], iteration_bounds = array<i64: 2, 2>, scalar_prefetch = 0 : i64, scratch_operands = 1 : i64, tpu.core_type = #tpu.core_type<tc>, window_params = [{transform_indices = @transform_0, window_bounds = array<i64: 1, 9, 2, 16, 16>}, {pipeline_mode = #tpu.pipeline_mode<synchronous>, transform_indices = @transform_1, window_bounds = array<i64: 17, 144, 16>}, {transform_indices = @transform_2, window_bounds = array<i64: 1, 2, 16, 16>}]} {
    %cst = arith.constant 0.000000e+00 : f32
    %0 = vector.broadcast %cst : f32 to vector<8x144xf32>
    %c0 = arith.constant 0 : index
    %c0_0 = arith.constant 0 : index
    %1 = vector.load %arg5[%c0, %c0_0] : memref<64x144xf32, #tpu.memory_space<vmem>>, vector<8x144xf32>
    tpu.vector_store %arg5[%c0, %c0_0], %0 {strides = array<i32>} : memref<64x144xf32, #tpu.memory_space<vmem>>, vector<8x144xf32>,
    %c24 = arith.constant 24 : index
    %c0_1 = arith.constant 0 : index
    %2 = vector.load %arg5[%c24, %c0_1] : memref<64x144xf32, #tpu.memory_space<vmem>>, vector<8x144xf32>
    tpu.vector_store %arg5[%c24, %c0_1], %0 {strides = array<i32>} : memref<64x144xf32, #tpu.memory_space<vmem>>, vector<8x144xf32>,
    %c0_2 = arith.constant 0 : index
    %c0_3 = arith.constant 0 : index
    %c0_4 = arith.constant 0 : index
    %c0_5 = arith.constant 0 : index
    %c0_6 = arith.constant 0 : index
    %3 = vector.load %arg2[%c0_2, %c0_3, %c0_4, %c0_5, %c0_6] : memref<1x9x2x16x16xf32, #tpu.memory_space<vmem>>, vector<1x1x1x16x16xf32>
    %4 = vector.shape_cast %3 : vector<1x1x1x16x16xf32> to vector<16x16xf32>
    %c8 = arith.constant 8 : index
    %c0_7 = arith.constant 0 : index
    %5 = vector.load %arg5[%c8, %c0_7] : memref<64x144xf32, #tpu.memory_space<vmem>>, vector<16x16xf32>
    tpu.vector_store %arg5[%c8, %c0_7], %4 {strides = array<i32>} : memref<64x144xf32, #tpu.memory_space<vmem>>, vector<16x16xf32>,
    %c0_8 = arith.constant 0 : index
    %c1 = arith.constant 1 : index
    %c0_9 = arith.constant 0 : index
    %c0_10 = arith.constant 0 : index
    %c0_11 = arith.constant 0 : index
    %6 = vector.load %arg2[%c0_8, %c1, %c0_9, %c0_10, %c0_11] : memref<1x9x2x16x16xf32, #tpu.memory_space<vmem>>, vector<1x1x1x16x16xf32>
    %7 = vector.shape_cast %6 : vector<1x1x1x16x16xf32> to vector<16x16xf32>
    %c8_12 = arith.constant 8 : index
    %c16 = arith.constant 16 : index
    %8 = vector.load %arg5[%c8_12, %c16] : memref<64x144xf32, #tpu.memory_space<vmem>>, vector<16x16xf32>
    tpu.vector_store %arg5[%c8_12, %c16], %7 {strides = array<i32>} : memref<64x144xf32, #tpu.memory_space<vmem>>, vector<16x16xf32>,
    %c0_13 = arith.constant 0 : index
    %c2 = arith.constant 2 : index
    %c0_14 = arith.constant 0 : index
    %c0_15 = arith.constant 0 : index
    %c0_16 = arith.constant 0 : index
    %9 = vector.load %arg2[%c0_13, %c2, %c0_14, %c0_15, %c0_16] : memref<1x9x2x16x16xf32, #tpu.memory_space<vmem>>, vector<1x1x1x16x16xf32>
    %10 = vector.shape_cast %9 : vector<1x1x1x16x16xf32> to vector<16x16xf32>
    %c8_17 = arith.constant 8 : index
    %c32 = arith.constant 32 : index
    %11 = vector.load %arg5[%c8_17, %c32] : memref<64x144xf32, #tpu.memory_space<vmem>>, vector<16x16xf32>
    tpu.vector_store %arg5[%c8_17, %c32], %10 {strides = array<i32>} : memref<64x144xf32, #tpu.memory_space<vmem>>, vector<16x16xf32>,
    %c0_18 = arith.constant 0 : index
    %c3 = arith.constant 3 : index
    %c0_19 = arith.constant 0 : index
    %c0_20 = arith.constant 0 : index
    %c0_21 = arith.constant 0 : index
    %12 = vector.load %arg2[%c0_18, %c3, %c0_19, %c0_20, %c0_21] : memref<1x9x2x16x16xf32, #tpu.memory_space<vmem>>, vector<1x1x1x16x16xf32>
    %13 = vector.shape_cast %12 : vector<1x1x1x16x16xf32> to vector<16x16xf32>
    %c8_22 = arith.constant 8 : index
    %c48 = arith.constant 48 : index
    %14 = vector.load %arg5[%c8_22, %c48] : memref<64x144xf32, #tpu.memory_space<vmem>>, vector<16x16xf32>
    tpu.vector_store %arg5[%c8_22, %c48], %13 {strides = array<i32>} : memref<64x144xf32, #tpu.memory_space<vmem>>, vector<16x16xf32>,
    %c0_23 = arith.constant 0 : index
    %c4 = arith.constant 4 : index
    %c0_24 = arith.constant 0 : index
    %c0_25 = arith.constant 0 : index
    %c0_26 = arith.constant 0 : index
    %15 = vector.load %arg2[%c0_23, %c4, %c0_24, %c0_25, %c0_26] : memref<1x9x2x16x16xf32, #tpu.memory_space<vmem>>, vector<1x1x1x16x16xf32>
    %16 = vector.shape_cast %15 : vector<1x1x1x16x16xf32> to vector<16x16xf32>
    %c8_27 = arith.constant 8 : index
    %c64 = arith.constant 64 : index
    %17 = vector.load %arg5[%c8_27, %c64] : memref<64x144xf32, #tpu.memory_space<vmem>>, vector<16x16xf32>
    tpu.vector_store %arg5[%c8_27, %c64], %16 {strides = array<i32>} : memref<64x144xf32, #tpu.memory_space<vmem>>, vector<16x16xf32>,
    %c0_28 = arith.constant 0 : index
    %c5 = arith.constant 5 : index
    %c0_29 = arith.constant 0 : index
    %c0_30 = arith.constant 0 : index
    %c0_31 = arith.constant 0 : index
    %18 = vector.load %arg2[%c0_28, %c5, %c0_29, %c0_30, %c0_31] : memref<1x9x2x16x16xf32, #tpu.memory_space<vmem>>, vector<1x1x1x16x16xf32>
    %19 = vector.shape_cast %18 : vector<1x1x1x16x16xf32> to vector<16x16xf32>
    %c8_32 = arith.constant 8 : index
    %c80 = arith.constant 80 : index
    %20 = vector.load %arg5[%c8_32, %c80] : memref<64x144xf32, #tpu.memory_space<vmem>>, vector<16x16xf32>
    tpu.vector_store %arg5[%c8_32, %c80], %19 {strides = array<i32>} : memref<64x144xf32, #tpu.memory_space<vmem>>, vector<16x16xf32>,
    %c0_33 = arith.constant 0 : index
    %c6 = arith.constant 6 : index
    %c0_34 = arith.constant 0 : index
    %c0_35 = arith.constant 0 : index
    %c0_36 = arith.constant 0 : index
    %21 = vector.load %arg2[%c0_33, %c6, %c0_34, %c0_35, %c0_36] : memref<1x9x2x16x16xf32, #tpu.memory_space<vmem>>, vector<1x1x1x16x16xf32>
    %22 = vector.shape_cast %21 : vector<1x1x1x16x16xf32> to vector<16x16xf32>
    %c8_37 = arith.constant 8 : index
    %c96 = arith.constant 96 : index
    %23 = vector.load %arg5[%c8_37, %c96] : memref<64x144xf32, #tpu.memory_space<vmem>>, vector<16x16xf32>
    tpu.vector_store %arg5[%c8_37, %c96], %22 {strides = array<i32>} : memref<64x144xf32, #tpu.memory_space<vmem>>, vector<16x16xf32>,
    %c0_38 = arith.constant 0 : index
    %c7 = arith.constant 7 : index
    %c0_39 = arith.constant 0 : index
    %c0_40 = arith.constant 0 : index
    %c0_41 = arith.constant 0 : index
    %24 = vector.load %arg2[%c0_38, %c7, %c0_39, %c0_40, %c0_41] : memref<1x9x2x16x16xf32, #tpu.memory_space<vmem>>, vector<1x1x1x16x16xf32>
    %25 = vector.shape_cast %24 : vector<1x1x1x16x16xf32> to vector<16x16xf32>
    %c8_42 = arith.constant 8 : index
    %c112 = arith.constant 112 : index
    %26 = vector.load %arg5[%c8_42, %c112] : memref<64x144xf32, #tpu.memory_space<vmem>>, vector<16x16xf32>
    tpu.vector_store %arg5[%c8_42, %c112], %25 {strides = array<i32>} : memref<64x144xf32, #tpu.memory_space<vmem>>, vector<16x16xf32>,
    %c0_43 = arith.constant 0 : index
    %c8_44 = arith.constant 8 : index
    %c0_45 = arith.constant 0 : index
    %c0_46 = arith.constant 0 : index
    %c0_47 = arith.constant 0 : index
    %27 = vector.load %arg2[%c0_43, %c8_44, %c0_45, %c0_46, %c0_47] : memref<1x9x2x16x16xf32, #tpu.memory_space<vmem>>, vector<1x1x1x16x16xf32>
    %28 = vector.shape_cast %27 : vector<1x1x1x16x16xf32> to vector<16x16xf32>
    %c8_48 = arith.constant 8 : index
    %c128 = arith.constant 128 : index
    %29 = vector.load %arg5[%c8_48, %c128] : memref<64x144xf32, #tpu.memory_space<vmem>>, vector<16x16xf32>
    tpu.vector_store %arg5[%c8_48, %c128], %28 {strides = array<i32>} : memref<64x144xf32, #tpu.memory_space<vmem>>, vector<16x16xf32>,
    %c32_49 = arith.constant 32 : index
    %c0_50 = arith.constant 0 : index
    %30 = vector.load %arg5[%c32_49, %c0_50] : memref<64x144xf32, #tpu.memory_space<vmem>>, vector<8x144xf32>
    tpu.vector_store %arg5[%c32_49, %c0_50], %0 {strides = array<i32>} : memref<64x144xf32, #tpu.memory_space<vmem>>, vector<8x144xf32>,
    %c56 = arith.constant 56 : index
    %c0_51 = arith.constant 0 : index
    %31 = vector.load %arg5[%c56, %c0_51] : memref<64x144xf32, #tpu.memory_space<vmem>>, vector<8x144xf32>
    tpu.vector_store %arg5[%c56, %c0_51], %0 {strides = array<i32>} : memref<64x144xf32, #tpu.memory_space<vmem>>, vector<8x144xf32>,
    %c0_52 = arith.constant 0 : index
    %c0_53 = arith.constant 0 : index
    %c1_54 = arith.constant 1 : index
    %c0_55 = arith.constant 0 : index
    %c0_56 = arith.constant 0 : index
    %32 = vector.load %arg2[%c0_52, %c0_53, %c1_54, %c0_55, %c0_56] : memref<1x9x2x16x16xf32, #tpu.memory_space<vmem>>, vector<1x1x1x16x16xf32>
    %33 = vector.shape_cast %32 : vector<1x1x1x16x16xf32> to vector<16x16xf32>
    %c40 = arith.constant 40 : index
    %c0_57 = arith.constant 0 : index
    %34 = vector.load %arg5[%c40, %c0_57] : memref<64x144xf32, #tpu.memory_space<vmem>>, vector<16x16xf32>
    tpu.vector_store %arg5[%c40, %c0_57], %33 {strides = array<i32>} : memref<64x144xf32, #tpu.memory_space<vmem>>, vector<16x16xf32>,
    %c0_58 = arith.constant 0 : index
    %c1_59 = arith.constant 1 : index
    %c1_60 = arith.constant 1 : index
    %c0_61 = arith.constant 0 : index
    %c0_62 = arith.constant 0 : index
    %35 = vector.load %arg2[%c0_58, %c1_59, %c1_60, %c0_61, %c0_62] : memref<1x9x2x16x16xf32, #tpu.memory_space<vmem>>, vector<1x1x1x16x16xf32>
    %36 = vector.shape_cast %35 : vector<1x1x1x16x16xf32> to vector<16x16xf32>
    %c40_63 = arith.constant 40 : index
    %c16_64 = arith.constant 16 : index
    %37 = vector.load %arg5[%c40_63, %c16_64] : memref<64x144xf32, #tpu.memory_space<vmem>>, vector<16x16xf32>
    tpu.vector_store %arg5[%c40_63, %c16_64], %36 {strides = array<i32>} : memref<64x144xf32, #tpu.memory_space<vmem>>, vector<16x16xf32>,
    %c0_65 = arith.constant 0 : index
    %c2_66 = arith.constant 2 : index
    %c1_67 = arith.constant 1 : index
    %c0_68 = arith.constant 0 : index
    %c0_69 = arith.constant 0 : index
    %38 = vector.load %arg2[%c0_65, %c2_66, %c1_67, %c0_68, %c0_69] : memref<1x9x2x16x16xf32, #tpu.memory_space<vmem>>, vector<1x1x1x16x16xf32>
    %39 = vector.shape_cast %38 : vector<1x1x1x16x16xf32> to vector<16x16xf32>
    %c40_70 = arith.constant 40 : index
    %c32_71 = arith.constant 32 : index
    %40 = vector.load %arg5[%c40_70, %c32_71] : memref<64x144xf32, #tpu.memory_space<vmem>>, vector<16x16xf32>
    tpu.vector_store %arg5[%c40_70, %c32_71], %39 {strides = array<i32>} : memref<64x144xf32, #tpu.memory_space<vmem>>, vector<16x16xf32>,
    %c0_72 = arith.constant 0 : index
    %c3_73 = arith.constant 3 : index
    %c1_74 = arith.constant 1 : index
    %c0_75 = arith.constant 0 : index
    %c0_76 = arith.constant 0 : index
    %41 = vector.load %arg2[%c0_72, %c3_73, %c1_74, %c0_75, %c0_76] : memref<1x9x2x16x16xf32, #tpu.memory_space<vmem>>, vector<1x1x1x16x16xf32>
    %42 = vector.shape_cast %41 : vector<1x1x1x16x16xf32> to vector<16x16xf32>
    %c40_77 = arith.constant 40 : index
    %c48_78 = arith.constant 48 : index
    %43 = vector.load %arg5[%c40_77, %c48_78] : memref<64x144xf32, #tpu.memory_space<vmem>>, vector<16x16xf32>
    tpu.vector_store %arg5[%c40_77, %c48_78], %42 {strides = array<i32>} : memref<64x144xf32, #tpu.memory_space<vmem>>, vector<16x16xf32>,
    %c0_79 = arith.constant 0 : index
    %c4_80 = arith.constant 4 : index
    %c1_81 = arith.constant 1 : index
    %c0_82 = arith.constant 0 : index
    %c0_83 = arith.constant 0 : index
    %44 = vector.load %arg2[%c0_79, %c4_80, %c1_81, %c0_82, %c0_83] : memref<1x9x2x16x16xf32, #tpu.memory_space<vmem>>, vector<1x1x1x16x16xf32>
    %45 = vector.shape_cast %44 : vector<1x1x1x16x16xf32> to vector<16x16xf32>
    %c40_84 = arith.constant 40 : index
    %c64_85 = arith.constant 64 : index
    %46 = vector.load %arg5[%c40_84, %c64_85] : memref<64x144xf32, #tpu.memory_space<vmem>>, vector<16x16xf32>
    tpu.vector_store %arg5[%c40_84, %c64_85], %45 {strides = array<i32>} : memref<64x144xf32, #tpu.memory_space<vmem>>, vector<16x16xf32>,
    %c0_86 = arith.constant 0 : index
    %c5_87 = arith.constant 5 : index
    %c1_88 = arith.constant 1 : index
    %c0_89 = arith.constant 0 : index
    %c0_90 = arith.constant 0 : index
    %47 = vector.load %arg2[%c0_86, %c5_87, %c1_88, %c0_89, %c0_90] : memref<1x9x2x16x16xf32, #tpu.memory_space<vmem>>, vector<1x1x1x16x16xf32>
    %48 = vector.shape_cast %47 : vector<1x1x1x16x16xf32> to vector<16x16xf32>
    %c40_91 = arith.constant 40 : index
    %c80_92 = arith.constant 80 : index
    %49 = vector.load %arg5[%c40_91, %c80_92] : memref<64x144xf32, #tpu.memory_space<vmem>>, vector<16x16xf32>
    tpu.vector_store %arg5[%c40_91, %c80_92], %48 {strides = array<i32>} : memref<64x144xf32, #tpu.memory_space<vmem>>, vector<16x16xf32>,
    %c0_93 = arith.constant 0 : index
    %c6_94 = arith.constant 6 : index
    %c1_95 = arith.constant 1 : index
    %c0_96 = arith.constant 0 : index
    %c0_97 = arith.constant 0 : index
    %50 = vector.load %arg2[%c0_93, %c6_94, %c1_95, %c0_96, %c0_97] : memref<1x9x2x16x16xf32, #tpu.memory_space<vmem>>, vector<1x1x1x16x16xf32>
    %51 = vector.shape_cast %50 : vector<1x1x1x16x16xf32> to vector<16x16xf32>
    %c40_98 = arith.constant 40 : index
    %c96_99 = arith.constant 96 : index
    %52 = vector.load %arg5[%c40_98, %c96_99] : memref<64x144xf32, #tpu.memory_space<vmem>>, vector<16x16xf32>
    tpu.vector_store %arg5[%c40_98, %c96_99], %51 {strides = array<i32>} : memref<64x144xf32, #tpu.memory_space<vmem>>, vector<16x16xf32>,
    %c0_100 = arith.constant 0 : index
    %c7_101 = arith.constant 7 : index
    %c1_102 = arith.constant 1 : index
    %c0_103 = arith.constant 0 : index
    %c0_104 = arith.constant 0 : index
    %53 = vector.load %arg2[%c0_100, %c7_101, %c1_102, %c0_103, %c0_104] : memref<1x9x2x16x16xf32, #tpu.memory_space<vmem>>, vector<1x1x1x16x16xf32>
    %54 = vector.shape_cast %53 : vector<1x1x1x16x16xf32> to vector<16x16xf32>
    %c40_105 = arith.constant 40 : index
    %c112_106 = arith.constant 112 : index
    %55 = vector.load %arg5[%c40_105, %c112_106] : memref<64x144xf32, #tpu.memory_space<vmem>>, vector<16x16xf32>
    tpu.vector_store %arg5[%c40_105, %c112_106], %54 {strides = array<i32>} : memref<64x144xf32, #tpu.memory_space<vmem>>, vector<16x16xf32>,
    %c0_107 = arith.constant 0 : index
    %c8_108 = arith.constant 8 : index
    %c1_109 = arith.constant 1 : index
    %c0_110 = arith.constant 0 : index
    %c0_111 = arith.constant 0 : index
    %56 = vector.load %arg2[%c0_107, %c8_108, %c1_109, %c0_110, %c0_111] : memref<1x9x2x16x16xf32, #tpu.memory_space<vmem>>, vector<1x1x1x16x16xf32>
    %57 = vector.shape_cast %56 : vector<1x1x1x16x16xf32> to vector<16x16xf32>
    %c40_112 = arith.constant 40 : index
    %c128_113 = arith.constant 128 : index
    %58 = vector.load %arg5[%c40_112, %c128_113] : memref<64x144xf32, #tpu.memory_space<vmem>>, vector<16x16xf32>
    tpu.vector_store %arg5[%c40_112, %c128_113], %57 {strides = array<i32>} : memref<64x144xf32, #tpu.memory_space<vmem>>, vector<16x16xf32>,
    %cst_114 = arith.constant 0.000000e+00 : f32
    %59 = vector.broadcast %cst_114 : f32 to vector<2x16x16xf32>
    %c0_115 = arith.constant 0 : index
    %c0_116 = arith.constant 0 : index
    %c0_117 = arith.constant 0 : index
    %c0_118 = arith.constant 0 : index
    %60 = vector.load %arg4[%c0_115, %c0_116, %c0_117, %c0_118] : memref<1x2x16x16xf32, #tpu.memory_space<vmem>>, vector<1x2x16x16xf32>
    %61 = vector.shape_cast %60 : vector<1x2x16x16xf32> to vector<2x16x16xf32>
    %62 = vector.shape_cast %59 : vector<2x16x16xf32> to vector<1x2x16x16xf32>
    tpu.vector_store %arg4[%c0_115, %c0_116, %c0_117, %c0_118], %62 {strides = array<i32>} : memref<1x2x16x16xf32, #tpu.memory_space<vmem>>, vector<1x2x16x16xf32>,
    %c0_119 = arith.constant 0 : index
    %c0_120 = arith.constant 0 : index
    %c0_121 = arith.constant 0 : index
    %63 = vector.load %arg3[%c0_119, %c0_120, %c0_121] : memref<17x144x16xf32, #tpu.memory_space<vmem>>, vector<1x144x16xf32>
    %64 = vector.shape_cast %63 : vector<1x144x16xf32> to vector<144x16xf32>
    %c0_122 = arith.constant 0 : index
    %c0_123 = arith.constant 0 : index
    %65 = vector.load %arg5[%c0_122, %c0_123] : memref<64x144xf32, #tpu.memory_space<vmem>>, vector<64x144xf32>
    %cst_124 = arith.constant dense<0.000000e+00> : vector<64x16xf32>
    %66 = tpu.matmul %65, %64, %cst_124 {dimension_numbers = #tpu.dot_dimension_numbers<[1], [0], [0], [1], [0, 0, 1, 1], [], []>} : vector<64x144xf32>, vector<144x16xf32>, vector<64x16xf32> -> vector<64x16xf32>
    %c0_125 = arith.constant 0 : index
    %c0_126 = arith.constant 0 : index
    %c0_127 = arith.constant 0 : index
    %c0_128 = arith.constant 0 : index
    %67 = vector.load %arg4[%c0_125, %c0_126, %c0_127, %c0_128] : memref<1x2x16x16xf32, #tpu.memory_space<vmem>>, vector<1x1x16x16xf32>
    %68 = vector.shape_cast %67 : vector<1x1x16x16xf32> to vector<16x16xf32>
    %69 = vector.extract_strided_slice %66 {offsets = [0, 0], sizes = [16, 16], strides = [1, 1]} : vector<64x16xf32> to vector<16x16xf32>
    %70 = arith.addf %68, %69 : vector<16x16xf32>
    %c0_129 = arith.constant 0 : index
    %c0_130 = arith.constant 0 : index
    %c0_131 = arith.constant 0 : index
    %c0_132 = arith.constant 0 : index
    %71 = vector.load %arg4[%c0_129, %c0_130, %c0_131, %c0_132] : memref<1x2x16x16xf32, #tpu.memory_space<vmem>>, vector<1x1x16x16xf32>
    %72 = vector.shape_cast %71 : vector<1x1x16x16xf32> to vector<16x16xf32>
    %73 = vector.shape_cast %70 : vector<16x16xf32> to vector<1x1x16x16xf32>
    tpu.vector_store %arg4[%c0_129, %c0_130, %c0_131, %c0_132], %73 {strides = array<i32>} : memref<1x2x16x16xf32, #tpu.memory_space<vmem>>, vector<1x1x16x16xf32>,
    %c0_133 = arith.constant 0 : index
    %c1_134 = arith.constant 1 : index
    %c0_135 = arith.constant 0 : index
    %c0_136 = arith.constant 0 : index
    %74 = vector.load %arg4[%c0_133, %c1_134, %c0_135, %c0_136] : memref<1x2x16x16xf32, #tpu.memory_space<vmem>>, vector<1x1x16x16xf32>
    %75 = vector.shape_cast %74 : vector<1x1x16x16xf32> to vector<16x16xf32>
    %76 = vector.extract_strided_slice %66 {offsets = [32, 0], sizes = [16, 16], strides = [1, 1]} : vector<64x16xf32> to vector<16x16xf32>
    %77 = arith.addf %75, %76 : vector<16x16xf32>
    %c0_137 = arith.constant 0 : index
    %c1_138 = arith.constant 1 : index
    %c0_139 = arith.constant 0 : index
    %c0_140 = arith.constant 0 : index
    %78 = vector.load %arg4[%c0_137, %c1_138, %c0_139, %c0_140] : memref<1x2x16x16xf32, #tpu.memory_space<vmem>>, vector<1x1x16x16xf32>
    %79 = vector.shape_cast %78 : vector<1x1x16x16xf32> to vector<16x16xf32>
    %80 = vector.shape_cast %77 : vector<16x16xf32> to vector<1x1x16x16xf32>
    tpu.vector_store %arg4[%c0_137, %c1_138, %c0_139, %c0_140], %80 {strides = array<i32>} : memref<1x2x16x16xf32, #tpu.memory_space<vmem>>, vector<1x1x16x16xf32>,
    %c1_141 = arith.constant 1 : index
    %c0_142 = arith.constant 0 : index
    %c0_143 = arith.constant 0 : index
    %81 = vector.load %arg3[%c1_141, %c0_142, %c0_143] : memref<17x144x16xf32, #tpu.memory_space<vmem>>, vector<1x144x16xf32>
    %82 = vector.shape_cast %81 : vector<1x144x16xf32> to vector<144x16xf32>
    %c0_144 = arith.constant 0 : index
    %c0_145 = arith.constant 0 : index
    %83 = vector.load %arg5[%c0_144, %c0_145] : memref<64x144xf32, #tpu.memory_space<vmem>>, vector<64x144xf32>
    %cst_146 = arith.constant dense<0.000000e+00> : vector<64x16xf32>
    %84 = tpu.matmul %83, %82, %cst_146 {dimension_numbers = #tpu.dot_dimension_numbers<[1], [0], [0], [1], [0, 0, 1, 1], [], []>} : vector<64x144xf32>, vector<144x16xf32>, vector<64x16xf32> -> vector<64x16xf32>
    %c0_147 = arith.constant 0 : index
    %c0_148 = arith.constant 0 : index
    %c0_149 = arith.constant 0 : index
    %c0_150 = arith.constant 0 : index
    %85 = vector.load %arg4[%c0_147, %c0_148, %c0_149, %c0_150] : memref<1x2x16x16xf32, #tpu.memory_space<vmem>>, vector<1x1x16x16xf32>
    %86 = vector.shape_cast %85 : vector<1x1x16x16xf32> to vector<16x16xf32>
    %87 = vector.extract_strided_slice %84 {offsets = [1, 0], sizes = [16, 16], strides = [1, 1]} : vector<64x16xf32> to vector<16x16xf32>
    %88 = arith.addf %86, %87 : vector<16x16xf32>
    %c0_151 = arith.constant 0 : index
    %c0_152 = arith.constant 0 : index
    %c0_153 = arith.constant 0 : index
    %c0_154 = arith.constant 0 : index
    %89 = vector.load %arg4[%c0_151, %c0_152, %c0_153, %c0_154] : memref<1x2x16x16xf32, #tpu.memory_space<vmem>>, vector<1x1x16x16xf32>
    %90 = vector.shape_cast %89 : vector<1x1x16x16xf32> to vector<16x16xf32>
    %91 = vector.shape_cast %88 : vector<16x16xf32> to vector<1x1x16x16xf32>
    tpu.vector_store %arg4[%c0_151, %c0_152, %c0_153, %c0_154], %91 {strides = array<i32>} : memref<1x2x16x16xf32, #tpu.memory_space<vmem>>, vector<1x1x16x16xf32>,
    %c0_155 = arith.constant 0 : index
    %c1_156 = arith.constant 1 : index
    %c0_157 = arith.constant 0 : index
    %c0_158 = arith.constant 0 : index
    %92 = vector.load %arg4[%c0_155, %c1_156, %c0_157, %c0_158] : memref<1x2x16x16xf32, #tpu.memory_space<vmem>>, vector<1x1x16x16xf32>
    %93 = vector.shape_cast %92 : vector<1x1x16x16xf32> to vector<16x16xf32>
    %94 = vector.extract_strided_slice %84 {offsets = [33, 0], sizes = [16, 16], strides = [1, 1]} : vector<64x16xf32> to vector<16x16xf32>
    %95 = arith.addf %93, %94 : vector<16x16xf32>
    %c0_159 = arith.constant 0 : index
    %c1_160 = arith.constant 1 : index
    %c0_161 = arith.constant 0 : index
    %c0_162 = arith.constant 0 : index
    %96 = vector.load %arg4[%c0_159, %c1_160, %c0_161, %c0_162] : memref<1x2x16x16xf32, #tpu.memory_space<vmem>>, vector<1x1x16x16xf32>
    %97 = vector.shape_cast %96 : vector<1x1x16x16xf32> to vector<16x16xf32>
    %98 = vector.shape_cast %95 : vector<16x16xf32> to vector<1x1x16x16xf32>
    tpu.vector_store %arg4[%c0_159, %c1_160, %c0_161, %c0_162], %98 {strides = array<i32>} : memref<1x2x16x16xf32, #tpu.memory_space<vmem>>, vector<1x1x16x16xf32>,
    %c2_163 = arith.constant 2 : index
    %c0_164 = arith.constant 0 : index
    %c0_165 = arith.constant 0 : index
    %99 = vector.load %arg3[%c2_163, %c0_164, %c0_165] : memref<17x144x16xf32, #tpu.memory_space<vmem>>, vector<1x144x16xf32>
    %100 = vector.shape_cast %99 : vector<1x144x16xf32> to vector<144x16xf32>
    %c0_166 = arith.constant 0 : index
    %c0_167 = arith.constant 0 : index
    %101 = vector.load %arg5[%c0_166, %c0_167] : memref<64x144xf32, #tpu.memory_space<vmem>>, vector<64x144xf32>
    %cst_168 = arith.constant dense<0.000000e+00> : vector<64x16xf32>
    %102 = tpu.matmul %101, %100, %cst_168 {dimension_numbers = #tpu.dot_dimension_numbers<[1], [0], [0], [1], [0, 0, 1, 1], [], []>} : vector<64x144xf32>, vector<144x16xf32>, vector<64x16xf32> -> vector<64x16xf32>
    %c0_169 = arith.constant 0 : index
    %c0_170 = arith.constant 0 : index
    %c0_171 = arith.constant 0 : index
    %c0_172 = arith.constant 0 : index
    %103 = vector.load %arg4[%c0_169, %c0_170, %c0_171, %c0_172] : memref<1x2x16x16xf32, #tpu.memory_space<vmem>>, vector<1x1x16x16xf32>
    %104 = vector.shape_cast %103 : vector<1x1x16x16xf32> to vector<16x16xf32>
    %105 = vector.extract_strided_slice %102 {offsets = [2, 0], sizes = [16, 16], strides = [1, 1]} : vector<64x16xf32> to vector<16x16xf32>
    %106 = arith.addf %104, %105 : vector<16x16xf32>
    %c0_173 = arith.constant 0 : index
    %c0_174 = arith.constant 0 : index
    %c0_175 = arith.constant 0 : index
    %c0_176 = arith.constant 0 : index
    %107 = vector.load %arg4[%c0_173, %c0_174, %c0_175, %c0_176] : memref<1x2x16x16xf32, #tpu.memory_space<vmem>>, vector<1x1x16x16xf32>
    %108 = vector.shape_cast %107 : vector<1x1x16x16xf32> to vector<16x16xf32>
    %109 = vector.shape_cast %106 : vector<16x16xf32> to vector<1x1x16x16xf32>
    tpu.vector_store %arg4[%c0_173, %c0_174, %c0_175, %c0_176], %109 {strides = array<i32>} : memref<1x2x16x16xf32, #tpu.memory_space<vmem>>, vector<1x1x16x16xf32>,
    %c0_177 = arith.constant 0 : index
    %c1_178 = arith.constant 1 : index
    %c0_179 = arith.constant 0 : index
    %c0_180 = arith.constant 0 : index
    %110 = vector.load %arg4[%c0_177, %c1_178, %c0_179, %c0_180] : memref<1x2x16x16xf32, #tpu.memory_space<vmem>>, vector<1x1x16x16xf32>
    %111 = vector.shape_cast %110 : vector<1x1x16x16xf32> to vector<16x16xf32>
    %112 = vector.extract_strided_slice %102 {offsets = [34, 0], sizes = [16, 16], strides = [1, 1]} : vector<64x16xf32> to vector<16x16xf32>
    %113 = arith.addf %111, %112 : vector<16x16xf32>
    %c0_181 = arith.constant 0 : index
    %c1_182 = arith.constant 1 : index
    %c0_183 = arith.constant 0 : index
    %c0_184 = arith.constant 0 : index
    %114 = vector.load %arg4[%c0_181, %c1_182, %c0_183, %c0_184] : memref<1x2x16x16xf32, #tpu.memory_space<vmem>>, vector<1x1x16x16xf32>
    %115 = vector.shape_cast %114 : vector<1x1x16x16xf32> to vector<16x16xf32>
    %116 = vector.shape_cast %113 : vector<16x16xf32> to vector<1x1x16x16xf32>
    tpu.vector_store %arg4[%c0_181, %c1_182, %c0_183, %c0_184], %116 {strides = array<i32>} : memref<1x2x16x16xf32, #tpu.memory_space<vmem>>, vector<1x1x16x16xf32>,
    %c3_185 = arith.constant 3 : index
    %c0_186 = arith.constant 0 : index
    %c0_187 = arith.constant 0 : index
    %117 = vector.load %arg3[%c3_185, %c0_186, %c0_187] : memref<17x144x16xf32, #tpu.memory_space<vmem>>, vector<1x144x16xf32>
    %118 = vector.shape_cast %117 : vector<1x144x16xf32> to vector<144x16xf32>
    %c0_188 = arith.constant 0 : index
    %c0_189 = arith.constant 0 : index
    %119 = vector.load %arg5[%c0_188, %c0_189] : memref<64x144xf32, #tpu.memory_space<vmem>>, vector<64x144xf32>
    %cst_190 = arith.constant dense<0.000000e+00> : vector<64x16xf32>
    %120 = tpu.matmul %119, %118, %cst_190 {dimension_numbers = #tpu.dot_dimension_numbers<[1], [0], [0], [1], [0, 0, 1, 1], [], []>} : vector<64x144xf32>, vector<144x16xf32>, vector<64x16xf32> -> vector<64x16xf32>
    %c0_191 = arith.constant 0 : index
    %c0_192 = arith.constant 0 : index
    %c0_193 = arith.constant 0 : index
    %c0_194 = arith.constant 0 : index
    %121 = vector.load %arg4[%c0_191, %c0_192, %c0_193, %c0_194] : memref<1x2x16x16xf32, #tpu.memory_space<vmem>>, vector<1x1x16x16xf32>
    %122 = vector.shape_cast %121 : vector<1x1x16x16xf32> to vector<16x16xf32>
    %123 = vector.extract_strided_slice %120 {offsets = [3, 0], sizes = [16, 16], strides = [1, 1]} : vector<64x16xf32> to vector<16x16xf32>
    %124 = arith.addf %122, %123 : vector<16x16xf32>
    %c0_195 = arith.constant 0 : index
    %c0_196 = arith.constant 0 : index
    %c0_197 = arith.constant 0 : index
    %c0_198 = arith.constant 0 : index
    %125 = vector.load %arg4[%c0_195, %c0_196, %c0_197, %c0_198] : memref<1x2x16x16xf32, #tpu.memory_space<vmem>>, vector<1x1x16x16xf32>
    %126 = vector.shape_cast %125 : vector<1x1x16x16xf32> to vector<16x16xf32>
    %127 = vector.shape_cast %124 : vector<16x16xf32> to vector<1x1x16x16xf32>
    tpu.vector_store %arg4[%c0_195, %c0_196, %c0_197, %c0_198], %127 {strides = array<i32>} : memref<1x2x16x16xf32, #tpu.memory_space<vmem>>, vector<1x1x16x16xf32>,
    %c0_199 = arith.constant 0 : index
    %c1_200 = arith.constant 1 : index
    %c0_201 = arith.constant 0 : index
    %c0_202 = arith.constant 0 : index
    %128 = vector.load %arg4[%c0_199, %c1_200, %c0_201, %c0_202] : memref<1x2x16x16xf32, #tpu.memory_space<vmem>>, vector<1x1x16x16xf32>
    %129 = vector.shape_cast %128 : vector<1x1x16x16xf32> to vector<16x16xf32>
    %130 = vector.extract_strided_slice %120 {offsets = [35, 0], sizes = [16, 16], strides = [1, 1]} : vector<64x16xf32> to vector<16x16xf32>
    %131 = arith.addf %129, %130 : vector<16x16xf32>
    %c0_203 = arith.constant 0 : index
    %c1_204 = arith.constant 1 : index
    %c0_205 = arith.constant 0 : index
    %c0_206 = arith.constant 0 : index
    %132 = vector.load %arg4[%c0_203, %c1_204, %c0_205, %c0_206] : memref<1x2x16x16xf32, #tpu.memory_space<vmem>>, vector<1x1x16x16xf32>
    %133 = vector.shape_cast %132 : vector<1x1x16x16xf32> to vector<16x16xf32>
    %134 = vector.shape_cast %131 : vector<16x16xf32> to vector<1x1x16x16xf32>
    tpu.vector_store %arg4[%c0_203, %c1_204, %c0_205, %c0_206], %134 {strides = array<i32>} : memref<1x2x16x16xf32, #tpu.memory_space<vmem>>, vector<1x1x16x16xf32>,
    %c4_207 = arith.constant 4 : index
    %c0_208 = arith.constant 0 : index
    %c0_209 = arith.constant 0 : index
    %135 = vector.load %arg3[%c4_207, %c0_208, %c0_209] : memref<17x144x16xf32, #tpu.memory_space<vmem>>, vector<1x144x16xf32>
    %136 = vector.shape_cast %135 : vector<1x144x16xf32> to vector<144x16xf32>
    %c0_210 = arith.constant 0 : index
    %c0_211 = arith.constant 0 : index
    %137 = vector.load %arg5[%c0_210, %c0_211] : memref<64x144xf32, #tpu.memory_space<vmem>>, vector<64x144xf32>
    %cst_212 = arith.constant dense<0.000000e+00> : vector<64x16xf32>
    %138 = tpu.matmul %137, %136, %cst_212 {dimension_numbers = #tpu.dot_dimension_numbers<[1], [0], [0], [1], [0, 0, 1, 1], [], []>} : vector<64x144xf32>, vector<144x16xf32>, vector<64x16xf32> -> vector<64x16xf32>
    %c0_213 = arith.constant 0 : index
    %c0_214 = arith.constant 0 : index
    %c0_215 = arith.constant 0 : index
    %c0_216 = arith.constant 0 : index
    %139 = vector.load %arg4[%c0_213, %c0_214, %c0_215, %c0_216] : memref<1x2x16x16xf32, #tpu.memory_space<vmem>>, vector<1x1x16x16xf32>
    %140 = vector.shape_cast %139 : vector<1x1x16x16xf32> to vector<16x16xf32>
    %141 = vector.extract_strided_slice %138 {offsets = [4, 0], sizes = [16, 16], strides = [1, 1]} : vector<64x16xf32> to vector<16x16xf32>
    %142 = arith.addf %140, %141 : vector<16x16xf32>
    %c0_217 = arith.constant 0 : index
    %c0_218 = arith.constant 0 : index
    %c0_219 = arith.constant 0 : index
    %c0_220 = arith.constant 0 : index
    %143 = vector.load %arg4[%c0_217, %c0_218, %c0_219, %c0_220] : memref<1x2x16x16xf32, #tpu.memory_space<vmem>>, vector<1x1x16x16xf32>
    %144 = vector.shape_cast %143 : vector<1x1x16x16xf32> to vector<16x16xf32>
    %145 = vector.shape_cast %142 : vector<16x16xf32> to vector<1x1x16x16xf32>
    tpu.vector_store %arg4[%c0_217, %c0_218, %c0_219, %c0_220], %145 {strides = array<i32>} : memref<1x2x16x16xf32, #tpu.memory_space<vmem>>, vector<1x1x16x16xf32>,
    %c0_221 = arith.constant 0 : index
    %c1_222 = arith.constant 1 : index
    %c0_223 = arith.constant 0 : index
    %c0_224 = arith.constant 0 : index
    %146 = vector.load %arg4[%c0_221, %c1_222, %c0_223, %c0_224] : memref<1x2x16x16xf32, #tpu.memory_space<vmem>>, vector<1x1x16x16xf32>
    %147 = vector.shape_cast %146 : vector<1x1x16x16xf32> to vector<16x16xf32>
    %148 = vector.extract_strided_slice %138 {offsets = [36, 0], sizes = [16, 16], strides = [1, 1]} : vector<64x16xf32> to vector<16x16xf32>
    %149 = arith.addf %147, %148 : vector<16x16xf32>
    %c0_225 = arith.constant 0 : index
    %c1_226 = arith.constant 1 : index
    %c0_227 = arith.constant 0 : index
    %c0_228 = arith.constant 0 : index
    %150 = vector.load %arg4[%c0_225, %c1_226, %c0_227, %c0_228] : memref<1x2x16x16xf32, #tpu.memory_space<vmem>>, vector<1x1x16x16xf32>
    %151 = vector.shape_cast %150 : vector<1x1x16x16xf32> to vector<16x16xf32>
    %152 = vector.shape_cast %149 : vector<16x16xf32> to vector<1x1x16x16xf32>
    tpu.vector_store %arg4[%c0_225, %c1_226, %c0_227, %c0_228], %152 {strides = array<i32>} : memref<1x2x16x16xf32, #tpu.memory_space<vmem>>, vector<1x1x16x16xf32>,
    %c5_229 = arith.constant 5 : index
    %c0_230 = arith.constant 0 : index
    %c0_231 = arith.constant 0 : index
    %153 = vector.load %arg3[%c5_229, %c0_230, %c0_231] : memref<17x144x16xf32, #tpu.memory_space<vmem>>, vector<1x144x16xf32>
    %154 = vector.shape_cast %153 : vector<1x144x16xf32> to vector<144x16xf32>
    %c0_232 = arith.constant 0 : index
    %c0_233 = arith.constant 0 : index
    %155 = vector.load %arg5[%c0_232, %c0_233] : memref<64x144xf32, #tpu.memory_space<vmem>>, vector<64x144xf32>
    %cst_234 = arith.constant dense<0.000000e+00> : vector<64x16xf32>
    %156 = tpu.matmul %155, %154, %cst_234 {dimension_numbers = #tpu.dot_dimension_numbers<[1], [0], [0], [1], [0, 0, 1, 1], [], []>} : vector<64x144xf32>, vector<144x16xf32>, vector<64x16xf32> -> vector<64x16xf32>
    %c0_235 = arith.constant 0 : index
    %c0_236 = arith.constant 0 : index
    %c0_237 = arith.constant 0 : index
    %c0_238 = arith.constant 0 : index
    %157 = vector.load %arg4[%c0_235, %c0_236, %c0_237, %c0_238] : memref<1x2x16x16xf32, #tpu.memory_space<vmem>>, vector<1x1x16x16xf32>
    %158 = vector.shape_cast %157 : vector<1x1x16x16xf32> to vector<16x16xf32>
    %159 = vector.extract_strided_slice %156 {offsets = [5, 0], sizes = [16, 16], strides = [1, 1]} : vector<64x16xf32> to vector<16x16xf32>
    %160 = arith.addf %158, %159 : vector<16x16xf32>
    %c0_239 = arith.constant 0 : index
    %c0_240 = arith.constant 0 : index
    %c0_241 = arith.constant 0 : index
    %c0_242 = arith.constant 0 : index
    %161 = vector.load %arg4[%c0_239, %c0_240, %c0_241, %c0_242] : memref<1x2x16x16xf32, #tpu.memory_space<vmem>>, vector<1x1x16x16xf32>
    %162 = vector.shape_cast %161 : vector<1x1x16x16xf32> to vector<16x16xf32>
    %163 = vector.shape_cast %160 : vector<16x16xf32> to vector<1x1x16x16xf32>
    tpu.vector_store %arg4[%c0_239, %c0_240, %c0_241, %c0_242], %163 {strides = array<i32>} : memref<1x2x16x16xf32, #tpu.memory_space<vmem>>, vector<1x1x16x16xf32>,
    %c0_243 = arith.constant 0 : index
    %c1_244 = arith.constant 1 : index
    %c0_245 = arith.constant 0 : index
    %c0_246 = arith.constant 0 : index
    %164 = vector.load %arg4[%c0_243, %c1_244, %c0_245, %c0_246] : memref<1x2x16x16xf32, #tpu.memory_space<vmem>>, vector<1x1x16x16xf32>
    %165 = vector.shape_cast %164 : vector<1x1x16x16xf32> to vector<16x16xf32>
    %166 = vector.extract_strided_slice %156 {offsets = [37, 0], sizes = [16, 16], strides = [1, 1]} : vector<64x16xf32> to vector<16x16xf32>
    %167 = arith.addf %165, %166 : vector<16x16xf32>
    %c0_247 = arith.constant 0 : index
    %c1_248 = arith.constant 1 : index
    %c0_249 = arith.constant 0 : index
    %c0_250 = arith.constant 0 : index
    %168 = vector.load %arg4[%c0_247, %c1_248, %c0_249, %c0_250] : memref<1x2x16x16xf32, #tpu.memory_space<vmem>>, vector<1x1x16x16xf32>
    %169 = vector.shape_cast %168 : vector<1x1x16x16xf32> to vector<16x16xf32>
    %170 = vector.shape_cast %167 : vector<16x16xf32> to vector<1x1x16x16xf32>
    tpu.vector_store %arg4[%c0_247, %c1_248, %c0_249, %c0_250], %170 {strides = array<i32>} : memref<1x2x16x16xf32, #tpu.memory_space<vmem>>, vector<1x1x16x16xf32>,
    %c6_251 = arith.constant 6 : index
    %c0_252 = arith.constant 0 : index
    %c0_253 = arith.constant 0 : index
    %171 = vector.load %arg3[%c6_251, %c0_252, %c0_253] : memref<17x144x16xf32, #tpu.memory_space<vmem>>, vector<1x144x16xf32>
    %172 = vector.shape_cast %171 : vector<1x144x16xf32> to vector<144x16xf32>
    %c0_254 = arith.constant 0 : index
    %c0_255 = arith.constant 0 : index
    %173 = vector.load %arg5[%c0_254, %c0_255] : memref<64x144xf32, #tpu.memory_space<vmem>>, vector<64x144xf32>
    %cst_256 = arith.constant dense<0.000000e+00> : vector<64x16xf32>
    %174 = tpu.matmul %173, %172, %cst_256 {dimension_numbers = #tpu.dot_dimension_numbers<[1], [0], [0], [1], [0, 0, 1, 1], [], []>} : vector<64x144xf32>, vector<144x16xf32>, vector<64x16xf32> -> vector<64x16xf32>
    %c0_257 = arith.constant 0 : index
    %c0_258 = arith.constant 0 : index
    %c0_259 = arith.constant 0 : index
    %c0_260 = arith.constant 0 : index
    %175 = vector.load %arg4[%c0_257, %c0_258, %c0_259, %c0_260] : memref<1x2x16x16xf32, #tpu.memory_space<vmem>>, vector<1x1x16x16xf32>
    %176 = vector.shape_cast %175 : vector<1x1x16x16xf32> to vector<16x16xf32>
    %177 = vector.extract_strided_slice %174 {offsets = [6, 0], sizes = [16, 16], strides = [1, 1]} : vector<64x16xf32> to vector<16x16xf32>
    %178 = arith.addf %176, %177 : vector<16x16xf32>
    %c0_261 = arith.constant 0 : index
    %c0_262 = arith.constant 0 : index
    %c0_263 = arith.constant 0 : index
    %c0_264 = arith.constant 0 : index
    %179 = vector.load %arg4[%c0_261, %c0_262, %c0_263, %c0_264] : memref<1x2x16x16xf32, #tpu.memory_space<vmem>>, vector<1x1x16x16xf32>
    %180 = vector.shape_cast %179 : vector<1x1x16x16xf32> to vector<16x16xf32>
    %181 = vector.shape_cast %178 : vector<16x16xf32> to vector<1x1x16x16xf32>
    tpu.vector_store %arg4[%c0_261, %c0_262, %c0_263, %c0_264], %181 {strides = array<i32>} : memref<1x2x16x16xf32, #tpu.memory_space<vmem>>, vector<1x1x16x16xf32>,
    %c0_265 = arith.constant 0 : index
    %c1_266 = arith.constant 1 : index
    %c0_267 = arith.constant 0 : index
    %c0_268 = arith.constant 0 : index
    %182 = vector.load %arg4[%c0_265, %c1_266, %c0_267, %c0_268] : memref<1x2x16x16xf32, #tpu.memory_space<vmem>>, vector<1x1x16x16xf32>
    %183 = vector.shape_cast %182 : vector<1x1x16x16xf32> to vector<16x16xf32>
    %184 = vector.extract_strided_slice %174 {offsets = [38, 0], sizes = [16, 16], strides = [1, 1]} : vector<64x16xf32> to vector<16x16xf32>
    %185 = arith.addf %183, %184 : vector<16x16xf32>
    %c0_269 = arith.constant 0 : index
    %c1_270 = arith.constant 1 : index
    %c0_271 = arith.constant 0 : index
    %c0_272 = arith.constant 0 : index
    %186 = vector.load %arg4[%c0_269, %c1_270, %c0_271, %c0_272] : memref<1x2x16x16xf32, #tpu.memory_space<vmem>>, vector<1x1x16x16xf32>
    %187 = vector.shape_cast %186 : vector<1x1x16x16xf32> to vector<16x16xf32>
    %188 = vector.shape_cast %185 : vector<16x16xf32> to vector<1x1x16x16xf32>
    tpu.vector_store %arg4[%c0_269, %c1_270, %c0_271, %c0_272], %188 {strides = array<i32>} : memref<1x2x16x16xf32, #tpu.memory_space<vmem>>, vector<1x1x16x16xf32>,
    %c7_273 = arith.constant 7 : index
    %c0_274 = arith.constant 0 : index
    %c0_275 = arith.constant 0 : index
    %189 = vector.load %arg3[%c7_273, %c0_274, %c0_275] : memref<17x144x16xf32, #tpu.memory_space<vmem>>, vector<1x144x16xf32>
    %190 = vector.shape_cast %189 : vector<1x144x16xf32> to vector<144x16xf32>
    %c0_276 = arith.constant 0 : index
    %c0_277 = arith.constant 0 : index
    %191 = vector.load %arg5[%c0_276, %c0_277] : memref<64x144xf32, #tpu.memory_space<vmem>>, vector<64x144xf32>
    %cst_278 = arith.constant dense<0.000000e+00> : vector<64x16xf32>
    %192 = tpu.matmul %191, %190, %cst_278 {dimension_numbers = #tpu.dot_dimension_numbers<[1], [0], [0], [1], [0, 0, 1, 1], [], []>} : vector<64x144xf32>, vector<144x16xf32>, vector<64x16xf32> -> vector<64x16xf32>
    %c0_279 = arith.constant 0 : index
    %c0_280 = arith.constant 0 : index
    %c0_281 = arith.constant 0 : index
    %c0_282 = arith.constant 0 : index
    %193 = vector.load %arg4[%c0_279, %c0_280, %c0_281, %c0_282] : memref<1x2x16x16xf32, #tpu.memory_space<vmem>>, vector<1x1x16x16xf32>
    %194 = vector.shape_cast %193 : vector<1x1x16x16xf32> to vector<16x16xf32>
    %195 = vector.extract_strided_slice %192 {offsets = [7, 0], sizes = [16, 16], strides = [1, 1]} : vector<64x16xf32> to vector<16x16xf32>
    %196 = arith.addf %194, %195 : vector<16x16xf32>
    %c0_283 = arith.constant 0 : index
    %c0_284 = arith.constant 0 : index
    %c0_285 = arith.constant 0 : index
    %c0_286 = arith.constant 0 : index
    %197 = vector.load %arg4[%c0_283, %c0_284, %c0_285, %c0_286] : memref<1x2x16x16xf32, #tpu.memory_space<vmem>>, vector<1x1x16x16xf32>
    %198 = vector.shape_cast %197 : vector<1x1x16x16xf32> to vector<16x16xf32>
    %199 = vector.shape_cast %196 : vector<16x16xf32> to vector<1x1x16x16xf32>
    tpu.vector_store %arg4[%c0_283, %c0_284, %c0_285, %c0_286], %199 {strides = array<i32>} : memref<1x2x16x16xf32, #tpu.memory_space<vmem>>, vector<1x1x16x16xf32>,
    %c0_287 = arith.constant 0 : index
    %c1_288 = arith.constant 1 : index
    %c0_289 = arith.constant 0 : index
    %c0_290 = arith.constant 0 : index
    %200 = vector.load %arg4[%c0_287, %c1_288, %c0_289, %c0_290] : memref<1x2x16x16xf32, #tpu.memory_space<vmem>>, vector<1x1x16x16xf32>
    %201 = vector.shape_cast %200 : vector<1x1x16x16xf32> to vector<16x16xf32>
    %202 = vector.extract_strided_slice %192 {offsets = [39, 0], sizes = [16, 16], strides = [1, 1]} : vector<64x16xf32> to vector<16x16xf32>
    %203 = arith.addf %201, %202 : vector<16x16xf32>
    %c0_291 = arith.constant 0 : index
    %c1_292 = arith.constant 1 : index
    %c0_293 = arith.constant 0 : index
    %c0_294 = arith.constant 0 : index
    %204 = vector.load %arg4[%c0_291, %c1_292, %c0_293, %c0_294] : memref<1x2x16x16xf32, #tpu.memory_space<vmem>>, vector<1x1x16x16xf32>
    %205 = vector.shape_cast %204 : vector<1x1x16x16xf32> to vector<16x16xf32>
    %206 = vector.shape_cast %203 : vector<16x16xf32> to vector<1x1x16x16xf32>
    tpu.vector_store %arg4[%c0_291, %c1_292, %c0_293, %c0_294], %206 {strides = array<i32>} : memref<1x2x16x16xf32, #tpu.memory_space<vmem>>, vector<1x1x16x16xf32>,
    %c8_295 = arith.constant 8 : index
    %c0_296 = arith.constant 0 : index
    %c0_297 = arith.constant 0 : index
    %207 = vector.load %arg3[%c8_295, %c0_296, %c0_297] : memref<17x144x16xf32, #tpu.memory_space<vmem>>, vector<1x144x16xf32>
    %208 = vector.shape_cast %207 : vector<1x144x16xf32> to vector<144x16xf32>
    %c0_298 = arith.constant 0 : index
    %c0_299 = arith.constant 0 : index
    %209 = vector.load %arg5[%c0_298, %c0_299] : memref<64x144xf32, #tpu.memory_space<vmem>>, vector<64x144xf32>
    %cst_300 = arith.constant dense<0.000000e+00> : vector<64x16xf32>
    %210 = tpu.matmul %209, %208, %cst_300 {dimension_numbers = #tpu.dot_dimension_numbers<[1], [0], [0], [1], [0, 0, 1, 1], [], []>} : vector<64x144xf32>, vector<144x16xf32>, vector<64x16xf32> -> vector<64x16xf32>
    %c0_301 = arith.constant 0 : index
    %c0_302 = arith.constant 0 : index
    %c0_303 = arith.constant 0 : index
    %c0_304 = arith.constant 0 : index
    %211 = vector.load %arg4[%c0_301, %c0_302, %c0_303, %c0_304] : memref<1x2x16x16xf32, #tpu.memory_space<vmem>>, vector<1x1x16x16xf32>
    %212 = vector.shape_cast %211 : vector<1x1x16x16xf32> to vector<16x16xf32>
    %213 = vector.extract_strided_slice %210 {offsets = [8, 0], sizes = [16, 16], strides = [1, 1]} : vector<64x16xf32> to vector<16x16xf32>
    %214 = arith.addf %212, %213 : vector<16x16xf32>
    %c0_305 = arith.constant 0 : index
    %c0_306 = arith.constant 0 : index
    %c0_307 = arith.constant 0 : index
    %c0_308 = arith.constant 0 : index
    %215 = vector.load %arg4[%c0_305, %c0_306, %c0_307, %c0_308] : memref<1x2x16x16xf32, #tpu.memory_space<vmem>>, vector<1x1x16x16xf32>
    %216 = vector.shape_cast %215 : vector<1x1x16x16xf32> to vector<16x16xf32>
    %217 = vector.shape_cast %214 : vector<16x16xf32> to vector<1x1x16x16xf32>
    tpu.vector_store %arg4[%c0_305, %c0_306, %c0_307, %c0_308], %217 {strides = array<i32>} : memref<1x2x16x16xf32, #tpu.memory_space<vmem>>, vector<1x1x16x16xf32>,
    %c0_309 = arith.constant 0 : index
    %c1_310 = arith.constant 1 : index
    %c0_311 = arith.constant 0 : index
    %c0_312 = arith.constant 0 : index
    %218 = vector.load %arg4[%c0_309, %c1_310, %c0_311, %c0_312] : memref<1x2x16x16xf32, #tpu.memory_space<vmem>>, vector<1x1x16x16xf32>
    %219 = vector.shape_cast %218 : vector<1x1x16x16xf32> to vector<16x16xf32>
    %220 = vector.extract_strided_slice %210 {offsets = [40, 0], sizes = [16, 16], strides = [1, 1]} : vector<64x16xf32> to vector<16x16xf32>
    %221 = arith.addf %219, %220 : vector<16x16xf32>
    %c0_313 = arith.constant 0 : index
    %c1_314 = arith.constant 1 : index
    %c0_315 = arith.constant 0 : index
    %c0_316 = arith.constant 0 : index
    %222 = vector.load %arg4[%c0_313, %c1_314, %c0_315, %c0_316] : memref<1x2x16x16xf32, #tpu.memory_space<vmem>>, vector<1x1x16x16xf32>
    %223 = vector.shape_cast %222 : vector<1x1x16x16xf32> to vector<16x16xf32>
    %224 = vector.shape_cast %221 : vector<16x16xf32> to vector<1x1x16x16xf32>
    tpu.vector_store %arg4[%c0_313, %c1_314, %c0_315, %c0_316], %224 {strides = array<i32>} : memref<1x2x16x16xf32, #tpu.memory_space<vmem>>, vector<1x1x16x16xf32>,
    %c9 = arith.constant 9 : index
    %c0_317 = arith.constant 0 : index
    %c0_318 = arith.constant 0 : index
    %225 = vector.load %arg3[%c9, %c0_317, %c0_318] : memref<17x144x16xf32, #tpu.memory_space<vmem>>, vector<1x144x16xf32>
    %226 = vector.shape_cast %225 : vector<1x144x16xf32> to vector<144x16xf32>
    %c0_319 = arith.constant 0 : index
    %c0_320 = arith.constant 0 : index
    %227 = vector.load %arg5[%c0_319, %c0_320] : memref<64x144xf32, #tpu.memory_space<vmem>>, vector<64x144xf32>
    %cst_321 = arith.constant dense<0.000000e+00> : vector<64x16xf32>
    %228 = tpu.matmul %227, %226, %cst_321 {dimension_numbers = #tpu.dot_dimension_numbers<[1], [0], [0], [1], [0, 0, 1, 1], [], []>} : vector<64x144xf32>, vector<144x16xf32>, vector<64x16xf32> -> vector<64x16xf32>
    %c0_322 = arith.constant 0 : index
    %c0_323 = arith.constant 0 : index
    %c0_324 = arith.constant 0 : index
    %c0_325 = arith.constant 0 : index
    %229 = vector.load %arg4[%c0_322, %c0_323, %c0_324, %c0_325] : memref<1x2x16x16xf32, #tpu.memory_space<vmem>>, vector<1x1x16x16xf32>
    %230 = vector.shape_cast %229 : vector<1x1x16x16xf32> to vector<16x16xf32>
    %231 = vector.extract_strided_slice %228 {offsets = [9, 0], sizes = [16, 16], strides = [1, 1]} : vector<64x16xf32> to vector<16x16xf32>
    %232 = arith.addf %230, %231 : vector<16x16xf32>
    %c0_326 = arith.constant 0 : index
    %c0_327 = arith.constant 0 : index
    %c0_328 = arith.constant 0 : index
    %c0_329 = arith.constant 0 : index
    %233 = vector.load %arg4[%c0_326, %c0_327, %c0_328, %c0_329] : memref<1x2x16x16xf32, #tpu.memory_space<vmem>>, vector<1x1x16x16xf32>
    %234 = vector.shape_cast %233 : vector<1x1x16x16xf32> to vector<16x16xf32>
    %235 = vector.shape_cast %232 : vector<16x16xf32> to vector<1x1x16x16xf32>
    tpu.vector_store %arg4[%c0_326, %c0_327, %c0_328, %c0_329], %235 {strides = array<i32>} : memref<1x2x16x16xf32, #tpu.memory_space<vmem>>, vector<1x1x16x16xf32>,
    %c0_330 = arith.constant 0 : index
    %c1_331 = arith.constant 1 : index
    %c0_332 = arith.constant 0 : index
    %c0_333 = arith.constant 0 : index
    %236 = vector.load %arg4[%c0_330, %c1_331, %c0_332, %c0_333] : memref<1x2x16x16xf32, #tpu.memory_space<vmem>>, vector<1x1x16x16xf32>
    %237 = vector.shape_cast %236 : vector<1x1x16x16xf32> to vector<16x16xf32>
    %238 = vector.extract_strided_slice %228 {offsets = [41, 0], sizes = [16, 16], strides = [1, 1]} : vector<64x16xf32> to vector<16x16xf32>
    %239 = arith.addf %237, %238 : vector<16x16xf32>
    %c0_334 = arith.constant 0 : index
    %c1_335 = arith.constant 1 : index
    %c0_336 = arith.constant 0 : index
    %c0_337 = arith.constant 0 : index
    %240 = vector.load %arg4[%c0_334, %c1_335, %c0_336, %c0_337] : memref<1x2x16x16xf32, #tpu.memory_space<vmem>>, vector<1x1x16x16xf32>
    %241 = vector.shape_cast %240 : vector<1x1x16x16xf32> to vector<16x16xf32>
    %242 = vector.shape_cast %239 : vector<16x16xf32> to vector<1x1x16x16xf32>
    tpu.vector_store %arg4[%c0_334, %c1_335, %c0_336, %c0_337], %242 {strides = array<i32>} : memref<1x2x16x16xf32, #tpu.memory_space<vmem>>, vector<1x1x16x16xf32>,
    %c10 = arith.constant 10 : index
    %c0_338 = arith.constant 0 : index
    %c0_339 = arith.constant 0 : index
    %243 = vector.load %arg3[%c10, %c0_338, %c0_339] : memref<17x144x16xf32, #tpu.memory_space<vmem>>, vector<1x144x16xf32>
    %244 = vector.shape_cast %243 : vector<1x144x16xf32> to vector<144x16xf32>
    %c0_340 = arith.constant 0 : index
    %c0_341 = arith.constant 0 : index
    %245 = vector.load %arg5[%c0_340, %c0_341] : memref<64x144xf32, #tpu.memory_space<vmem>>, vector<64x144xf32>
    %cst_342 = arith.constant dense<0.000000e+00> : vector<64x16xf32>
    %246 = tpu.matmul %245, %244, %cst_342 {dimension_numbers = #tpu.dot_dimension_numbers<[1], [0], [0], [1], [0, 0, 1, 1], [], []>} : vector<64x144xf32>, vector<144x16xf32>, vector<64x16xf32> -> vector<64x16xf32>
    %c0_343 = arith.constant 0 : index
    %c0_344 = arith.constant 0 : index
    %c0_345 = arith.constant 0 : index
    %c0_346 = arith.constant 0 : index
    %247 = vector.load %arg4[%c0_343, %c0_344, %c0_345, %c0_346] : memref<1x2x16x16xf32, #tpu.memory_space<vmem>>, vector<1x1x16x16xf32>
    %248 = vector.shape_cast %247 : vector<1x1x16x16xf32> to vector<16x16xf32>
    %249 = vector.extract_strided_slice %246 {offsets = [10, 0], sizes = [16, 16], strides = [1, 1]} : vector<64x16xf32> to vector<16x16xf32>
    %250 = arith.addf %248, %249 : vector<16x16xf32>
    %c0_347 = arith.constant 0 : index
    %c0_348 = arith.constant 0 : index
    %c0_349 = arith.constant 0 : index
    %c0_350 = arith.constant 0 : index
    %251 = vector.load %arg4[%c0_347, %c0_348, %c0_349, %c0_350] : memref<1x2x16x16xf32, #tpu.memory_space<vmem>>, vector<1x1x16x16xf32>
    %252 = vector.shape_cast %251 : vector<1x1x16x16xf32> to vector<16x16xf32>
    %253 = vector.shape_cast %250 : vector<16x16xf32> to vector<1x1x16x16xf32>
    tpu.vector_store %arg4[%c0_347, %c0_348, %c0_349, %c0_350], %253 {strides = array<i32>} : memref<1x2x16x16xf32, #tpu.memory_space<vmem>>, vector<1x1x16x16xf32>,
    %c0_351 = arith.constant 0 : index
    %c1_352 = arith.constant 1 : index
    %c0_353 = arith.constant 0 : index
    %c0_354 = arith.constant 0 : index
    %254 = vector.load %arg4[%c0_351, %c1_352, %c0_353, %c0_354] : memref<1x2x16x16xf32, #tpu.memory_space<vmem>>, vector<1x1x16x16xf32>
    %255 = vector.shape_cast %254 : vector<1x1x16x16xf32> to vector<16x16xf32>
    %256 = vector.extract_strided_slice %246 {offsets = [42, 0], sizes = [16, 16], strides = [1, 1]} : vector<64x16xf32> to vector<16x16xf32>
    %257 = arith.addf %255, %256 : vector<16x16xf32>
    %c0_355 = arith.constant 0 : index
    %c1_356 = arith.constant 1 : index
    %c0_357 = arith.constant 0 : index
    %c0_358 = arith.constant 0 : index
    %258 = vector.load %arg4[%c0_355, %c1_356, %c0_357, %c0_358] : memref<1x2x16x16xf32, #tpu.memory_space<vmem>>, vector<1x1x16x16xf32>
    %259 = vector.shape_cast %258 : vector<1x1x16x16xf32> to vector<16x16xf32>
    %260 = vector.shape_cast %257 : vector<16x16xf32> to vector<1x1x16x16xf32>
    tpu.vector_store %arg4[%c0_355, %c1_356, %c0_357, %c0_358], %260 {strides = array<i32>} : memref<1x2x16x16xf32, #tpu.memory_space<vmem>>, vector<1x1x16x16xf32>,
    %c11 = arith.constant 11 : index
    %c0_359 = arith.constant 0 : index
    %c0_360 = arith.constant 0 : index
    %261 = vector.load %arg3[%c11, %c0_359, %c0_360] : memref<17x144x16xf32, #tpu.memory_space<vmem>>, vector<1x144x16xf32>
    %262 = vector.shape_cast %261 : vector<1x144x16xf32> to vector<144x16xf32>
    %c0_361 = arith.constant 0 : index
    %c0_362 = arith.constant 0 : index
    %263 = vector.load %arg5[%c0_361, %c0_362] : memref<64x144xf32, #tpu.memory_space<vmem>>, vector<64x144xf32>
    %cst_363 = arith.constant dense<0.000000e+00> : vector<64x16xf32>
    %264 = tpu.matmul %263, %262, %cst_363 {dimension_numbers = #tpu.dot_dimension_numbers<[1], [0], [0], [1], [0, 0, 1, 1], [], []>} : vector<64x144xf32>, vector<144x16xf32>, vector<64x16xf32> -> vector<64x16xf32>
    %c0_364 = arith.constant 0 : index
    %c0_365 = arith.constant 0 : index
    %c0_366 = arith.constant 0 : index
    %c0_367 = arith.constant 0 : index
    %265 = vector.load %arg4[%c0_364, %c0_365, %c0_366, %c0_367] : memref<1x2x16x16xf32, #tpu.memory_space<vmem>>, vector<1x1x16x16xf32>
    %266 = vector.shape_cast %265 : vector<1x1x16x16xf32> to vector<16x16xf32>
    %267 = vector.extract_strided_slice %264 {offsets = [11, 0], sizes = [16, 16], strides = [1, 1]} : vector<64x16xf32> to vector<16x16xf32>
    %268 = arith.addf %266, %267 : vector<16x16xf32>
    %c0_368 = arith.constant 0 : index
    %c0_369 = arith.constant 0 : index
    %c0_370 = arith.constant 0 : index
    %c0_371 = arith.constant 0 : index
    %269 = vector.load %arg4[%c0_368, %c0_369, %c0_370, %c0_371] : memref<1x2x16x16xf32, #tpu.memory_space<vmem>>, vector<1x1x16x16xf32>
    %270 = vector.shape_cast %269 : vector<1x1x16x16xf32> to vector<16x16xf32>
    %271 = vector.shape_cast %268 : vector<16x16xf32> to vector<1x1x16x16xf32>
    tpu.vector_store %arg4[%c0_368, %c0_369, %c0_370, %c0_371], %271 {strides = array<i32>} : memref<1x2x16x16xf32, #tpu.memory_space<vmem>>, vector<1x1x16x16xf32>,
    %c0_372 = arith.constant 0 : index
    %c1_373 = arith.constant 1 : index
    %c0_374 = arith.constant 0 : index
    %c0_375 = arith.constant 0 : index
    %272 = vector.load %arg4[%c0_372, %c1_373, %c0_374, %c0_375] : memref<1x2x16x16xf32, #tpu.memory_space<vmem>>, vector<1x1x16x16xf32>
    %273 = vector.shape_cast %272 : vector<1x1x16x16xf32> to vector<16x16xf32>
    %274 = vector.extract_strided_slice %264 {offsets = [43, 0], sizes = [16, 16], strides = [1, 1]} : vector<64x16xf32> to vector<16x16xf32>
    %275 = arith.addf %273, %274 : vector<16x16xf32>
    %c0_376 = arith.constant 0 : index
    %c1_377 = arith.constant 1 : index
    %c0_378 = arith.constant 0 : index
    %c0_379 = arith.constant 0 : index
    %276 = vector.load %arg4[%c0_376, %c1_377, %c0_378, %c0_379] : memref<1x2x16x16xf32, #tpu.memory_space<vmem>>, vector<1x1x16x16xf32>
    %277 = vector.shape_cast %276 : vector<1x1x16x16xf32> to vector<16x16xf32>
    %278 = vector.shape_cast %275 : vector<16x16xf32> to vector<1x1x16x16xf32>
    tpu.vector_store %arg4[%c0_376, %c1_377, %c0_378, %c0_379], %278 {strides = array<i32>} : memref<1x2x16x16xf32, #tpu.memory_space<vmem>>, vector<1x1x16x16xf32>,
    %c12 = arith.constant 12 : index
    %c0_380 = arith.constant 0 : index
    %c0_381 = arith.constant 0 : index
    %279 = vector.load %arg3[%c12, %c0_380, %c0_381] : memref<17x144x16xf32, #tpu.memory_space<vmem>>, vector<1x144x16xf32>
    %280 = vector.shape_cast %279 : vector<1x144x16xf32> to vector<144x16xf32>
    %c0_382 = arith.constant 0 : index
    %c0_383 = arith.constant 0 : index
    %281 = vector.load %arg5[%c0_382, %c0_383] : memref<64x144xf32, #tpu.memory_space<vmem>>, vector<64x144xf32>
    %cst_384 = arith.constant dense<0.000000e+00> : vector<64x16xf32>
    %282 = tpu.matmul %281, %280, %cst_384 {dimension_numbers = #tpu.dot_dimension_numbers<[1], [0], [0], [1], [0, 0, 1, 1], [], []>} : vector<64x144xf32>, vector<144x16xf32>, vector<64x16xf32> -> vector<64x16xf32>
    %c0_385 = arith.constant 0 : index
    %c0_386 = arith.constant 0 : index
    %c0_387 = arith.constant 0 : index
    %c0_388 = arith.constant 0 : index
    %283 = vector.load %arg4[%c0_385, %c0_386, %c0_387, %c0_388] : memref<1x2x16x16xf32, #tpu.memory_space<vmem>>, vector<1x1x16x16xf32>
    %284 = vector.shape_cast %283 : vector<1x1x16x16xf32> to vector<16x16xf32>
    %285 = vector.extract_strided_slice %282 {offsets = [12, 0], sizes = [16, 16], strides = [1, 1]} : vector<64x16xf32> to vector<16x16xf32>
    %286 = arith.addf %284, %285 : vector<16x16xf32>
    %c0_389 = arith.constant 0 : index
    %c0_390 = arith.constant 0 : index
    %c0_391 = arith.constant 0 : index
    %c0_392 = arith.constant 0 : index
    %287 = vector.load %arg4[%c0_389, %c0_390, %c0_391, %c0_392] : memref<1x2x16x16xf32, #tpu.memory_space<vmem>>, vector<1x1x16x16xf32>
    %288 = vector.shape_cast %287 : vector<1x1x16x16xf32> to vector<16x16xf32>
    %289 = vector.shape_cast %286 : vector<16x16xf32> to vector<1x1x16x16xf32>
    tpu.vector_store %arg4[%c0_389, %c0_390, %c0_391, %c0_392], %289 {strides = array<i32>} : memref<1x2x16x16xf32, #tpu.memory_space<vmem>>, vector<1x1x16x16xf32>,
    %c0_393 = arith.constant 0 : index
    %c1_394 = arith.constant 1 : index
    %c0_395 = arith.constant 0 : index
    %c0_396 = arith.constant 0 : index
    %290 = vector.load %arg4[%c0_393, %c1_394, %c0_395, %c0_396] : memref<1x2x16x16xf32, #tpu.memory_space<vmem>>, vector<1x1x16x16xf32>
    %291 = vector.shape_cast %290 : vector<1x1x16x16xf32> to vector<16x16xf32>
    %292 = vector.extract_strided_slice %282 {offsets = [44, 0], sizes = [16, 16], strides = [1, 1]} : vector<64x16xf32> to vector<16x16xf32>
    %293 = arith.addf %291, %292 : vector<16x16xf32>
    %c0_397 = arith.constant 0 : index
    %c1_398 = arith.constant 1 : index
    %c0_399 = arith.constant 0 : index
    %c0_400 = arith.constant 0 : index
    %294 = vector.load %arg4[%c0_397, %c1_398, %c0_399, %c0_400] : memref<1x2x16x16xf32, #tpu.memory_space<vmem>>, vector<1x1x16x16xf32>
    %295 = vector.shape_cast %294 : vector<1x1x16x16xf32> to vector<16x16xf32>
    %296 = vector.shape_cast %293 : vector<16x16xf32> to vector<1x1x16x16xf32>
    tpu.vector_store %arg4[%c0_397, %c1_398, %c0_399, %c0_400], %296 {strides = array<i32>} : memref<1x2x16x16xf32, #tpu.memory_space<vmem>>, vector<1x1x16x16xf32>,
    %c13 = arith.constant 13 : index
    %c0_401 = arith.constant 0 : index
    %c0_402 = arith.constant 0 : index
    %297 = vector.load %arg3[%c13, %c0_401, %c0_402] : memref<17x144x16xf32, #tpu.memory_space<vmem>>, vector<1x144x16xf32>
    %298 = vector.shape_cast %297 : vector<1x144x16xf32> to vector<144x16xf32>
    %c0_403 = arith.constant 0 : index
    %c0_404 = arith.constant 0 : index
    %299 = vector.load %arg5[%c0_403, %c0_404] : memref<64x144xf32, #tpu.memory_space<vmem>>, vector<64x144xf32>
    %cst_405 = arith.constant dense<0.000000e+00> : vector<64x16xf32>
    %300 = tpu.matmul %299, %298, %cst_405 {dimension_numbers = #tpu.dot_dimension_numbers<[1], [0], [0], [1], [0, 0, 1, 1], [], []>} : vector<64x144xf32>, vector<144x16xf32>, vector<64x16xf32> -> vector<64x16xf32>
    %c0_406 = arith.constant 0 : index
    %c0_407 = arith.constant 0 : index
    %c0_408 = arith.constant 0 : index
    %c0_409 = arith.constant 0 : index
    %301 = vector.load %arg4[%c0_406, %c0_407, %c0_408, %c0_409] : memref<1x2x16x16xf32, #tpu.memory_space<vmem>>, vector<1x1x16x16xf32>
    %302 = vector.shape_cast %301 : vector<1x1x16x16xf32> to vector<16x16xf32>
    %303 = vector.extract_strided_slice %300 {offsets = [13, 0], sizes = [16, 16], strides = [1, 1]} : vector<64x16xf32> to vector<16x16xf32>
    %304 = arith.addf %302, %303 : vector<16x16xf32>
    %c0_410 = arith.constant 0 : index
    %c0_411 = arith.constant 0 : index
    %c0_412 = arith.constant 0 : index
    %c0_413 = arith.constant 0 : index
    %305 = vector.load %arg4[%c0_410, %c0_411, %c0_412, %c0_413] : memref<1x2x16x16xf32, #tpu.memory_space<vmem>>, vector<1x1x16x16xf32>
    %306 = vector.shape_cast %305 : vector<1x1x16x16xf32> to vector<16x16xf32>
    %307 = vector.shape_cast %304 : vector<16x16xf32> to vector<1x1x16x16xf32>
    tpu.vector_store %arg4[%c0_410, %c0_411, %c0_412, %c0_413], %307 {strides = array<i32>} : memref<1x2x16x16xf32, #tpu.memory_space<vmem>>, vector<1x1x16x16xf32>,
    %c0_414 = arith.constant 0 : index
    %c1_415 = arith.constant 1 : index
    %c0_416 = arith.constant 0 : index
    %c0_417 = arith.constant 0 : index
    %308 = vector.load %arg4[%c0_414, %c1_415, %c0_416, %c0_417] : memref<1x2x16x16xf32, #tpu.memory_space<vmem>>, vector<1x1x16x16xf32>
    %309 = vector.shape_cast %308 : vector<1x1x16x16xf32> to vector<16x16xf32>
    %310 = vector.extract_strided_slice %300 {offsets = [45, 0], sizes = [16, 16], strides = [1, 1]} : vector<64x16xf32> to vector<16x16xf32>
    %311 = arith.addf %309, %310 : vector<16x16xf32>
    %c0_418 = arith.constant 0 : index
    %c1_419 = arith.constant 1 : index
    %c0_420 = arith.constant 0 : index
    %c0_421 = arith.constant 0 : index
    %312 = vector.load %arg4[%c0_418, %c1_419, %c0_420, %c0_421] : memref<1x2x16x16xf32, #tpu.memory_space<vmem>>, vector<1x1x16x16xf32>
    %313 = vector.shape_cast %312 : vector<1x1x16x16xf32> to vector<16x16xf32>
    %314 = vector.shape_cast %311 : vector<16x16xf32> to vector<1x1x16x16xf32>
    tpu.vector_store %arg4[%c0_418, %c1_419, %c0_420, %c0_421], %314 {strides = array<i32>} : memref<1x2x16x16xf32, #tpu.memory_space<vmem>>, vector<1x1x16x16xf32>,
    %c14 = arith.constant 14 : index
    %c0_422 = arith.constant 0 : index
    %c0_423 = arith.constant 0 : index
    %315 = vector.load %arg3[%c14, %c0_422, %c0_423] : memref<17x144x16xf32, #tpu.memory_space<vmem>>, vector<1x144x16xf32>
    %316 = vector.shape_cast %315 : vector<1x144x16xf32> to vector<144x16xf32>
    %c0_424 = arith.constant 0 : index
    %c0_425 = arith.constant 0 : index
    %317 = vector.load %arg5[%c0_424, %c0_425] : memref<64x144xf32, #tpu.memory_space<vmem>>, vector<64x144xf32>
    %cst_426 = arith.constant dense<0.000000e+00> : vector<64x16xf32>
    %318 = tpu.matmul %317, %316, %cst_426 {dimension_numbers = #tpu.dot_dimension_numbers<[1], [0], [0], [1], [0, 0, 1, 1], [], []>} : vector<64x144xf32>, vector<144x16xf32>, vector<64x16xf32> -> vector<64x16xf32>
    %c0_427 = arith.constant 0 : index
    %c0_428 = arith.constant 0 : index
    %c0_429 = arith.constant 0 : index
    %c0_430 = arith.constant 0 : index
    %319 = vector.load %arg4[%c0_427, %c0_428, %c0_429, %c0_430] : memref<1x2x16x16xf32, #tpu.memory_space<vmem>>, vector<1x1x16x16xf32>
    %320 = vector.shape_cast %319 : vector<1x1x16x16xf32> to vector<16x16xf32>
    %321 = vector.extract_strided_slice %318 {offsets = [14, 0], sizes = [16, 16], strides = [1, 1]} : vector<64x16xf32> to vector<16x16xf32>
    %322 = arith.addf %320, %321 : vector<16x16xf32>
    %c0_431 = arith.constant 0 : index
    %c0_432 = arith.constant 0 : index
    %c0_433 = arith.constant 0 : index
    %c0_434 = arith.constant 0 : index
    %323 = vector.load %arg4[%c0_431, %c0_432, %c0_433, %c0_434] : memref<1x2x16x16xf32, #tpu.memory_space<vmem>>, vector<1x1x16x16xf32>
    %324 = vector.shape_cast %323 : vector<1x1x16x16xf32> to vector<16x16xf32>
    %325 = vector.shape_cast %322 : vector<16x16xf32> to vector<1x1x16x16xf32>
    tpu.vector_store %arg4[%c0_431, %c0_432, %c0_433, %c0_434], %325 {strides = array<i32>} : memref<1x2x16x16xf32, #tpu.memory_space<vmem>>, vector<1x1x16x16xf32>,
    %c0_435 = arith.constant 0 : index
    %c1_436 = arith.constant 1 : index
    %c0_437 = arith.constant 0 : index
    %c0_438 = arith.constant 0 : index
    %326 = vector.load %arg4[%c0_435, %c1_436, %c0_437, %c0_438] : memref<1x2x16x16xf32, #tpu.memory_space<vmem>>, vector<1x1x16x16xf32>
    %327 = vector.shape_cast %326 : vector<1x1x16x16xf32> to vector<16x16xf32>
    %328 = vector.extract_strided_slice %318 {offsets = [46, 0], sizes = [16, 16], strides = [1, 1]} : vector<64x16xf32> to vector<16x16xf32>
    %329 = arith.addf %327, %328 : vector<16x16xf32>
    %c0_439 = arith.constant 0 : index
    %c1_440 = arith.constant 1 : index
    %c0_441 = arith.constant 0 : index
    %c0_442 = arith.constant 0 : index
    %330 = vector.load %arg4[%c0_439, %c1_440, %c0_441, %c0_442] : memref<1x2x16x16xf32, #tpu.memory_space<vmem>>, vector<1x1x16x16xf32>
    %331 = vector.shape_cast %330 : vector<1x1x16x16xf32> to vector<16x16xf32>
    %332 = vector.shape_cast %329 : vector<16x16xf32> to vector<1x1x16x16xf32>
    tpu.vector_store %arg4[%c0_439, %c1_440, %c0_441, %c0_442], %332 {strides = array<i32>} : memref<1x2x16x16xf32, #tpu.memory_space<vmem>>, vector<1x1x16x16xf32>,
    %c15 = arith.constant 15 : index
    %c0_443 = arith.constant 0 : index
    %c0_444 = arith.constant 0 : index
    %333 = vector.load %arg3[%c15, %c0_443, %c0_444] : memref<17x144x16xf32, #tpu.memory_space<vmem>>, vector<1x144x16xf32>
    %334 = vector.shape_cast %333 : vector<1x144x16xf32> to vector<144x16xf32>
    %c0_445 = arith.constant 0 : index
    %c0_446 = arith.constant 0 : index
    %335 = vector.load %arg5[%c0_445, %c0_446] : memref<64x144xf32, #tpu.memory_space<vmem>>, vector<64x144xf32>
    %cst_447 = arith.constant dense<0.000000e+00> : vector<64x16xf32>
    %336 = tpu.matmul %335, %334, %cst_447 {dimension_numbers = #tpu.dot_dimension_numbers<[1], [0], [0], [1], [0, 0, 1, 1], [], []>} : vector<64x144xf32>, vector<144x16xf32>, vector<64x16xf32> -> vector<64x16xf32>
    %c0_448 = arith.constant 0 : index
    %c0_449 = arith.constant 0 : index
    %c0_450 = arith.constant 0 : index
    %c0_451 = arith.constant 0 : index
    %337 = vector.load %arg4[%c0_448, %c0_449, %c0_450, %c0_451] : memref<1x2x16x16xf32, #tpu.memory_space<vmem>>, vector<1x1x16x16xf32>
    %338 = vector.shape_cast %337 : vector<1x1x16x16xf32> to vector<16x16xf32>
    %339 = vector.extract_strided_slice %336 {offsets = [15, 0], sizes = [16, 16], strides = [1, 1]} : vector<64x16xf32> to vector<16x16xf32>
    %340 = arith.addf %338, %339 : vector<16x16xf32>
    %c0_452 = arith.constant 0 : index
    %c0_453 = arith.constant 0 : index
    %c0_454 = arith.constant 0 : index
    %c0_455 = arith.constant 0 : index
    %341 = vector.load %arg4[%c0_452, %c0_453, %c0_454, %c0_455] : memref<1x2x16x16xf32, #tpu.memory_space<vmem>>, vector<1x1x16x16xf32>
    %342 = vector.shape_cast %341 : vector<1x1x16x16xf32> to vector<16x16xf32>
    %343 = vector.shape_cast %340 : vector<16x16xf32> to vector<1x1x16x16xf32>
    tpu.vector_store %arg4[%c0_452, %c0_453, %c0_454, %c0_455], %343 {strides = array<i32>} : memref<1x2x16x16xf32, #tpu.memory_space<vmem>>, vector<1x1x16x16xf32>,
    %c0_456 = arith.constant 0 : index
    %c1_457 = arith.constant 1 : index
    %c0_458 = arith.constant 0 : index
    %c0_459 = arith.constant 0 : index
    %344 = vector.load %arg4[%c0_456, %c1_457, %c0_458, %c0_459] : memref<1x2x16x16xf32, #tpu.memory_space<vmem>>, vector<1x1x16x16xf32>
    %345 = vector.shape_cast %344 : vector<1x1x16x16xf32> to vector<16x16xf32>
    %346 = vector.extract_strided_slice %336 {offsets = [47, 0], sizes = [16, 16], strides = [1, 1]} : vector<64x16xf32> to vector<16x16xf32>
    %347 = arith.addf %345, %346 : vector<16x16xf32>
    %c0_460 = arith.constant 0 : index
    %c1_461 = arith.constant 1 : index
    %c0_462 = arith.constant 0 : index
    %c0_463 = arith.constant 0 : index
    %348 = vector.load %arg4[%c0_460, %c1_461, %c0_462, %c0_463] : memref<1x2x16x16xf32, #tpu.memory_space<vmem>>, vector<1x1x16x16xf32>
    %349 = vector.shape_cast %348 : vector<1x1x16x16xf32> to vector<16x16xf32>
    %350 = vector.shape_cast %347 : vector<16x16xf32> to vector<1x1x16x16xf32>
    tpu.vector_store %arg4[%c0_460, %c1_461, %c0_462, %c0_463], %350 {strides = array<i32>} : memref<1x2x16x16xf32, #tpu.memory_space<vmem>>, vector<1x1x16x16xf32>,
    %c16_464 = arith.constant 16 : index
    %c0_465 = arith.constant 0 : index
    %c0_466 = arith.constant 0 : index
    %351 = vector.load %arg3[%c16_464, %c0_465, %c0_466] : memref<17x144x16xf32, #tpu.memory_space<vmem>>, vector<1x144x16xf32>
    %352 = vector.shape_cast %351 : vector<1x144x16xf32> to vector<144x16xf32>
    %c0_467 = arith.constant 0 : index
    %c0_468 = arith.constant 0 : index
    %353 = vector.load %arg5[%c0_467, %c0_468] : memref<64x144xf32, #tpu.memory_space<vmem>>, vector<64x144xf32>
    %cst_469 = arith.constant dense<0.000000e+00> : vector<64x16xf32>
    %354 = tpu.matmul %353, %352, %cst_469 {dimension_numbers = #tpu.dot_dimension_numbers<[1], [0], [0], [1], [0, 0, 1, 1], [], []>} : vector<64x144xf32>, vector<144x16xf32>, vector<64x16xf32> -> vector<64x16xf32>
    %c0_470 = arith.constant 0 : index
    %c0_471 = arith.constant 0 : index
    %c0_472 = arith.constant 0 : index
    %c0_473 = arith.constant 0 : index
    %355 = vector.load %arg4[%c0_470, %c0_471, %c0_472, %c0_473] : memref<1x2x16x16xf32, #tpu.memory_space<vmem>>, vector<1x1x16x16xf32>
    %356 = vector.shape_cast %355 : vector<1x1x16x16xf32> to vector<16x16xf32>
    %357 = vector.extract_strided_slice %354 {offsets = [16, 0], sizes = [16, 16], strides = [1, 1]} : vector<64x16xf32> to vector<16x16xf32>
    %358 = arith.addf %356, %357 : vector<16x16xf32>
    %c0_474 = arith.constant 0 : index
    %c0_475 = arith.constant 0 : index
    %c0_476 = arith.constant 0 : index
    %c0_477 = arith.constant 0 : index
    %359 = vector.load %arg4[%c0_474, %c0_475, %c0_476, %c0_477] : memref<1x2x16x16xf32, #tpu.memory_space<vmem>>, vector<1x1x16x16xf32>
    %360 = vector.shape_cast %359 : vector<1x1x16x16xf32> to vector<16x16xf32>
    %361 = vector.shape_cast %358 : vector<16x16xf32> to vector<1x1x16x16xf32>
    tpu.vector_store %arg4[%c0_474, %c0_475, %c0_476, %c0_477], %361 {strides = array<i32>} : memref<1x2x16x16xf32, #tpu.memory_space<vmem>>, vector<1x1x16x16xf32>,
    %c0_478 = arith.constant 0 : index
    %c1_479 = arith.constant 1 : index
    %c0_480 = arith.constant 0 : index
    %c0_481 = arith.constant 0 : index
    %362 = vector.load %arg4[%c0_478, %c1_479, %c0_480, %c0_481] : memref<1x2x16x16xf32, #tpu.memory_space<vmem>>, vector<1x1x16x16xf32>
    %363 = vector.shape_cast %362 : vector<1x1x16x16xf32> to vector<16x16xf32>
    %364 = vector.extract_strided_slice %354 {offsets = [48, 0], sizes = [16, 16], strides = [1, 1]} : vector<64x16xf32> to vector<16x16xf32>
    %365 = arith.addf %363, %364 : vector<16x16xf32>
    %c0_482 = arith.constant 0 : index
    %c1_483 = arith.constant 1 : index
    %c0_484 = arith.constant 0 : index
    %c0_485 = arith.constant 0 : index
    %366 = vector.load %arg4[%c0_482, %c1_483, %c0_484, %c0_485] : memref<1x2x16x16xf32, #tpu.memory_space<vmem>>, vector<1x1x16x16xf32>
    %367 = vector.shape_cast %366 : vector<1x1x16x16xf32> to vector<16x16xf32>
    %368 = vector.shape_cast %365 : vector<16x16xf32> to vector<1x1x16x16xf32>
    tpu.vector_store %arg4[%c0_482, %c1_483, %c0_484, %c0_485], %368 {strides = array<i32>} : memref<1x2x16x16xf32, #tpu.memory_space<vmem>>, vector<1x1x16x16xf32>,
    return
  }
  func.func @transform_0(%arg0: i32, %arg1: i32) -> (i32, i32, i32, i32, i32) {
    %c0_i32 = arith.constant 0 : i32
    %c0_i32_0 = arith.constant 0 : i32
    %c0_i32_1 = arith.constant 0 : i32
    %c0_i32_2 = arith.constant 0 : i32
    return %arg0, %c0_i32, %arg1, %c0_i32_0, %c0_i32_1 : i32, i32, i32, i32, i32
  }
  func.func @transform_1(%arg0: i32, %arg1: i32) -> (i32, i32, i32) {
    %c0_i32 = arith.constant 0 : i32
    %c0_i32_0 = arith.constant 0 : i32
    %c0_i32_1 = arith.constant 0 : i32
    %c0_i32_2 = arith.constant 0 : i32
    return %c0_i32, %c0_i32_0, %c0_i32_1 : i32, i32, i32
  }
  func.func @transform_2(%arg0: i32, %arg1: i32) -> (i32, i32, i32, i32) {
    %c0_i32 = arith.constant 0 : i32
    %c0_i32_0 = arith.constant 0 : i32
    %c0_i32_1 = arith.constant 0 : i32
    return %arg0, %arg1, %c0_i32, %c0_i32_0 : i32, i32, i32, i32
  }
}

</mosaic_0001>

<bundles_post_ra>
// kernel: tpu_custom_call.1
= control target key start
LH: loop header
LB: loop body
LE: loop exit
PB: predicated region body
PF: predicated region fallthrough
CT: control target
= control target key end

     0   :  { %s7313_s0 = inlined_call_operand.vmem [shape: f32[2,9,4,16,16], index: 0, kind: input, shape index: {}]   ;;  %s7314_s1 = inlined_call_operand.vmem [shape: f32[17,144,16], index: 1, kind: input, shape index: {}]   ;;  %s7315_s2 = inlined_call_operand.hbm [shape: f32[2,4,16,16], index: 2, kind: output, shape index: {}]  }
   0x1   :  { %7330 = sst [smem:[#allocation7_spill]] %s7313_s0 }
   0x2   :  { %7 = vsyncpa [#allocation5], 0 }
   0x3   :  { %9 = vsyncpa [#allocation5 + $0x1], 0  ;;  %s5131_s9 = smov 0   ;;  %s5133_s10 = smov 0  }
   0x4   :  { %s5135_s11 = smov 0   ;;  %s5137_s12 = smov 0  }
   0x5   :  { %s5139_s13 = smov 0   ;;  %s5141_s14 = smov 0  }
   0x6   :  { %s5143_s15 = smov 0   ;;  %s5145_s16 = smov 0  }
   0x7 LB: > { %s3900_s17 = sadd.s32 4294967295, %s5102_s16   ;;  %s3901_s18 = sadd.s32 4294967294, %s5102_s16   ;;  %s5102_s16 = sphi %s5145_s16, %s15_s16   ;;  %s5098_s15 = sphi %s5143_s15, %s7348_s15   ;;  %s5094_s14 = sphi %s5141_s14, %s7347_s14   ;;  %s5090_s13 = sphi %s5139_s13, %s7346_s13   ;;  %s5086_s12 = sphi %s5137_s12, %s7345_s12   ;;  %s5082_s11 = sphi %s5135_s11, %s7344_s11   ;;  %s5078_s10 = sphi %s5133_s10, %s7343_s10   ;;  %s5074_s9 = sphi %s5131_s9, %s7342_s9  }
   0x8   : > { %s24_s19 = sadd.s32 1, %s5094_s14  ;;  %s27_s20 = sadd.s32 1, %s5098_s15 }
   0x9   : > { %p25_p0 = scmp.ge.s32.totalorder %s24_s19, 2  ;;  %p43_p1 = scmp.ne.s32.totalorder %s5082_s11, %s5078_s10 }
   0xa   : > { %p44_p2 = scmp.eq.s32.totalorder %s5102_s16, 0  ;;  %p96_p5 = scmp.eq.s32.totalorder %s3900_s17, 3 }
   0xb   : > { %s7350_s19 = smov (%p25_p0, %s24_s19), 0  ;;  %s7352_s20 = smov (!%p25_p0, %s27_s20), %s5098_s15 }
   0xc   : > { %s32_s21 = ssub.s32 %s5094_s14, %s7350_s19  ;;  %p5183_p3 = por %p44_p2, %p43_p1 }
   0xd   : > { %p29_p4 = scmp.ge.s32.totalorder %s7352_s20, 2  ;;  %p101_p6 = scmp.ne.s32.totalorder %s5078_s10, %s5074_s9 }
   0xe   : > { %p102_p7 = scmp.eq.s32.totalorder %s3901_s18, 3  ;;  %p5191_p8 = por %p96_p5, %p43_p1 }
   0xf   : > { %s7354_s20 = smov (%p29_p4, %s7352_s20), 0  ;;  %s36_s27 = sadd.s32 1, %s5082_s11 }
  0x10   : > { %p5195_p9 = por %p102_p7, %p101_p6  ;;  %s31_s25 = ssub.s32 %s5098_s15, %s7354_s20 }
  0x11   : > { %s33_s26 = sor.u32 %s32_s21, %s31_s25  ;;  %p3903_p11 = scmp.ge.s32.totalorder %s5102_s16, 4 }
  0x12   : > { %p34_p10 = scmp.eq.s32.totalorder %s33_s26, 0 }
  0x13   : > { %121 = sbr.rel (%p3903_p11) target bundleno = 54 (0x36), region = 20 }
  0x14   : > { %s5203_s28 = scalar_select %p34_p10, %s5082_s11, %s36_s27  }
  0x1a   : > { %124 = sbr.rel (!%p5183_p3) target bundleno = 54 (0x36), region = 24  ;;  %s126_s29 = sand.u32 (%p5183_p3), 1, %s5082_s11  }
  0x1b   : > { %s4921_s30 = smul.u32 (%p5183_p3), 288, %s126_s29  ;;  %s4442_s3 = sshll.u32 (%p5183_p3), %s5094_s14, 2 }
  0x1c   : > { %s4922_s4 = smul.u32 (%p5183_p3), 72, %s5098_s15  ;;  %s7334_s0 = sld [smem:[#allocation7_spill]] (%p5183_p3) }
  0x1d   : > { %s5219_s18 = scalar_lea.vmem (%p5183_p3), [#allocation3], %s4921_s30 }
  0x1e   : > { %s132_s5 = sadd.s32 (%p5183_p3), %s4922_s4, %s4442_s3 }
  0x1f   : > { %s3906_s6 = sshll.u32 (%p5183_p3), %s132_s5, 3 }
  0x22   : > { %s5214_s17 = scalar_lea.vmem %s7334_s0, %s3906_s6 }
  0x23   : > { %v232_v0 = vld [vmem:[%s5214_s17] sm:$0xff]  ;;  %v234_v1 = vld [vmem:[%s5214_s17 + $0x8] sm:$0xff]  ;;  %v236_v2 = vld [vmem:[%s5214_s17 + $0x10] sm:$0xff] }
  0x24   : > { %233 = vst [vmem:[%s5219_s18] sm:$0xff] %v232_v0  ;;  %235 = vst [vmem:[%s5219_s18 + $0x8] sm:$0xff] %v234_v1  ;;  %v238_v3 = vld [vmem:[%s5214_s17 + $0x18] sm:$0xff]  ;;  %v240_v4 = vld [vmem:[%s5214_s17 + $0x40] sm:$0xff] }
  0x25   : > { %237 = vst [vmem:[%s5219_s18 + $0x10] sm:$0xff] %v236_v2  ;;  %v242_v5 = vld [vmem:[%s5214_s17 + $0x48] sm:$0xff]  ;;  %239 = vst [vmem:[%s5219_s18 + $0x18] sm:$0xff] %v238_v3  ;;  %v244_v6 = vld [vmem:[%s5214_s17 + $0x50] sm:$0xff] }
  0x26   : > { %241 = vst [vmem:[%s5219_s18 + $0x20] sm:$0xff] %v240_v4  ;;  %243 = vst [vmem:[%s5219_s18 + $0x28] sm:$0xff] %v242_v5  ;;  %v246_v7 = vld [vmem:[%s5214_s17 + $0x58] sm:$0xff]  ;;  %v248_v8 = vld [vmem:[%s5214_s17 + $0x80] sm:$0xff] }
  0x27   : > { %245 = vst [vmem:[%s5219_s18 + $0x30] sm:$0xff] %v244_v6  ;;  %247 = vst [vmem:[%s5219_s18 + $0x38] sm:$0xff] %v246_v7  ;;  %v250_v9 = vld [vmem:[%s5214_s17 + $0x88] sm:$0xff]  ;;  %v252_v10 = vld [vmem:[%s5214_s17 + $0x90] sm:$0xff] }
  0x28   : > { %249 = vst [vmem:[%s5219_s18 + $0x40] sm:$0xff] %v248_v8  ;;  %v254_v11 = vld [vmem:[%s5214_s17 + $0x98] sm:$0xff]  ;;  %251 = vst [vmem:[%s5219_s18 + $0x48] sm:$0xff] %v250_v9  ;;  %v256_v12 = vld [vmem:[%s5214_s17 + $0xc0] sm:$0xff] }
  0x29   : > { %253 = vst [vmem:[%s5219_s18 + $0x50] sm:$0xff] %v252_v10  ;;  %255 = vst [vmem:[%s5219_s18 + $0x58] sm:$0xff] %v254_v11  ;;  %v258_v13 = vld [vmem:[%s5214_s17 + $0xc8] sm:$0xff]  ;;  %v260_v14 = vld [vmem:[%s5214_s17 + $0xd0] sm:$0xff] }
  0x2a   : > { %257 = vst [vmem:[%s5219_s18 + $0x60] sm:$0xff] %v256_v12  ;;  %259 = vst [vmem:[%s5219_s18 + $0x68] sm:$0xff] %v258_v13  ;;  %v262_v15 = vld [vmem:[%s5214_s17 + $0xd8] sm:$0xff]  ;;  %v264_v16 = vld [vmem:[%s5214_s17 + $0x100] sm:$0xff] }
  0x2b   : > { %261 = vst [vmem:[%s5219_s18 + $0x70] sm:$0xff] %v260_v14  ;;  %v266_v17 = vld [vmem:[%s5214_s17 + $0x108] sm:$0xff]  ;;  %263 = vst [vmem:[%s5219_s18 + $0x78] sm:$0xff] %v262_v15  ;;  %v268_v18 = vld [vmem:[%s5214_s17 + $0x110] sm:$0xff] }
  0x2c   : > { %265 = vst [vmem:[%s5219_s18 + $0x80] sm:$0xff] %v264_v16  ;;  %267 = vst [vmem:[%s5219_s18 + $0x88] sm:$0xff] %v266_v17  ;;  %v270_v19 = vld [vmem:[%s5214_s17 + $0x118] sm:$0xff]  ;;  %v272_v20 = vld [vmem:[%s5214_s17 + $0x140] sm:$0xff] }
  0x2d   : > { %269 = vst [vmem:[%s5219_s18 + $0x90] sm:$0xff] %v268_v18  ;;  %271 = vst [vmem:[%s5219_s18 + $0x98] sm:$0xff] %v270_v19  ;;  %v274_v21 = vld [vmem:[%s5214_s17 + $0x148] sm:$0xff]  ;;  %v276_v22 = vld [vmem:[%s5214_s17 + $0x150] sm:$0xff] }
  0x2e   : > { %273 = vst [vmem:[%s5219_s18 + $0xa0] sm:$0xff] %v272_v20  ;;  %v278_v23 = vld [vmem:[%s5214_s17 + $0x158] sm:$0xff]  ;;  %275 = vst [vmem:[%s5219_s18 + $0xa8] sm:$0xff] %v274_v21  ;;  %v280_v24 = vld [vmem:[%s5214_s17 + $0x180] sm:$0xff] }
  0x2f   : > { %277 = vst [vmem:[%s5219_s18 + $0xb0] sm:$0xff] %v276_v22  ;;  %279 = vst [vmem:[%s5219_s18 + $0xb8] sm:$0xff] %v278_v23  ;;  %v282_v25 = vld [vmem:[%s5214_s17 + $0x188] sm:$0xff]  ;;  %v284_v26 = vld [vmem:[%s5214_s17 + $0x190] sm:$0xff] }
  0x30   : > { %281 = vst [vmem:[%s5219_s18 + $0xc0] sm:$0xff] %v280_v24  ;;  %283 = vst [vmem:[%s5219_s18 + $0xc8] sm:$0xff] %v282_v25  ;;  %v286_v27 = vld [vmem:[%s5214_s17 + $0x198] sm:$0xff]  ;;  %v288_v28 = vld [vmem:[%s5214_s17 + $0x1c0] sm:$0xff] }
  0x31   : > { %285 = vst [vmem:[%s5219_s18 + $0xd0] sm:$0xff] %v284_v26  ;;  %v290_v29 = vld [vmem:[%s5214_s17 + $0x1c8] sm:$0xff]  ;;  %287 = vst [vmem:[%s5219_s18 + $0xd8] sm:$0xff] %v286_v27  ;;  %v292_v30 = vld [vmem:[%s5214_s17 + $0x1d0] sm:$0xff] }
  0x32   : > { %289 = vst [vmem:[%s5219_s18 + $0xe0] sm:$0xff] %v288_v28  ;;  %291 = vst [vmem:[%s5219_s18 + $0xe8] sm:$0xff] %v290_v29  ;;  %v294_v31 = vld [vmem:[%s5214_s17 + $0x1d8] sm:$0xff]  ;;  %v296_v32 = vld [vmem:[%s5214_s17 + $0x200] sm:$0xff] }
  0x33   : > { %293 = vst [vmem:[%s5219_s18 + $0xf0] sm:$0xff] %v292_v30  ;;  %295 = vst [vmem:[%s5219_s18 + $0xf8] sm:$0xff] %v294_v31  ;;  %v298_v33 = vld [vmem:[%s5214_s17 + $0x208] sm:$0xff]  ;;  %v300_v34 = vld [vmem:[%s5214_s17 + $0x210] sm:$0xff] }
  0x34   : > { %297 = vst [vmem:[%s5219_s18 + $0x100] sm:$0xff] %v296_v32  ;;  %v302_v35 = vld [vmem:[%s5214_s17 + $0x218] sm:$0xff]  ;;  %299 = vst [vmem:[%s5219_s18 + $0x108] sm:$0xff] %v298_v33 }
  0x35   : > { %301 = vst [vmem:[%s5219_s18 + $0x110] sm:$0xff] %v300_v34  ;;  %303 = vst [vmem:[%s5219_s18 + $0x118] sm:$0xff] %v302_v35 }
  0x36 PF: > { %p3907_p12 = scmp.ge.s32.totalorder %s5102_s16, 1  ;;  %p308_p13 = scmp.lt.s32.totalorder %s5102_s16, 5 }
  0x38   : > { %p309_p0 = pnand %p3907_p12, %p308_p13 }
  0x39   : > { %s5293_s21 = sand.u32 (!%p309_p0), 1, %s5078_s10   ;;  %v559_v36 = vld [vmem:[%s7314_s1] sm:$0xff] (!%p309_p0)  ;;  %v560_v37 = vld [vmem:[%s7314_s1 + $0x8] sm:$0xff] (!%p309_p0)  ;;  %v3955_v38 = vld [vmem:[%s7314_s1 + $0x90] sm:$0xff] (!%p309_p0)  ;;  %v5104_v39 = vmov (!%p309_p0), 0.0|0.0   ;;  %s7322_s8 = smov (!%p309_p0), 48  }
  0x3a   : > { %312 = sbr.rel (%p309_p0) target bundleno = 744 (0x2e8), region = 62  ;;  %s3908_s4 = sshll.u32 (!%p309_p0), %s5293_s21, 5  ;;  %4444 = vmatprep.subr.bf16.mxu0 (!%p309_p0), %v5104_v39  ;;  %v4445_v40 = vpack.c.bf16 (!%p309_p0), %v560_v37, %v559_v36  ;;  %4471 = vmatprep.subr.bf16.mxu1 (!%p309_p0), %v5104_v39  ;;  %v3956_v41 = vld [vmem:[%s7314_s1 + $0x98] sm:$0xff] (!%p309_p0)  ;;  %v561_v42 = vld [vmem:[%s7314_s1 + $0x10] sm:$0xff] (!%p309_p0)  ;;  %v3957_v45 = vld [vmem:[%s7314_s1 + $0xa0] sm:$0xff] (!%p309_p0)  ;;  %vm339_vm0 = vcmask (!%p309_p0), 130048  }
  0x3b   : > { %s4923_s3 = smul.u32 (!%p309_p0), 288, %s5293_s21  ;;  %v562_v43 = vld [vmem:[%s7314_s1 + $0x18] sm:$0xff] (!%p309_p0)  ;;  %v4472_v44 = vpack.c.bf16 (!%p309_p0), %v3956_v41, %v3955_v38  ;;  %v3958_v46 = vld [vmem:[%s7314_s1 + $0xa8] sm:$0xff] (!%p309_p0)  ;;  %v563_v48 = vld [vmem:[%s7314_s1 + $0x20] sm:$0xff] (!%p309_p0)  ;;  %s7316_s17 = smov (!%p309_p0), 16   ;;  %v5107_v58 = vmov (!%p309_p0), 0.0  }
  0x3c   : > { %4446 = vmatpush1.bf16.msra.mxu0 (!%p309_p0), %v4445_v40  ;;  %v4448_v47 = vpack.c.bf16 (!%p309_p0), %v562_v43, %v561_v42  ;;  %v4475_v51 = vpack.c.bf16 (!%p309_p0), %v3958_v46, %v3957_v45  ;;  %v564_v52 = vld [vmem:[%s7314_s1 + $0x28] sm:$0xff] (!%p309_p0)  ;;  %v3959_v53 = vld [vmem:[%s7314_s1 + $0xb0] sm:$0xff] (!%p309_p0)  ;;  %v3960_v54 = vld [vmem:[%s7314_s1 + $0xb8] sm:$0xff] (!%p309_p0)  ;;  %340 = vst.msk [vmem:[#allocation2 + $0x8] sm:$0xff] (!%p309_p0), %vm339_vm0, %v5107_v58  ;;  %s5356_s26 = scalar_lea.vmem (!%p309_p0), [#allocation4], %s3908_s4  ;;  %s7318_s4 = smov (!%p309_p0), 64  }
  0x3d   : > { %s5326_s5 = scalar_lea.vmem (!%p309_p0), [#allocation3], %s4923_s3  ;;  %4473 = vmatpush1.bf16.msra.mxu1 (!%p309_p0), %v4472_v44  ;;  %4447 = vmatprep.subr.bf16.mxu0 (!%p309_p0), %v5104_v39  ;;  %v4451_v57 = vpack.c.bf16 (!%p309_p0), %v564_v52, %v563_v48  ;;  %338 = vst [vmem:[#allocation2] sm:$0xff] (!%p309_p0), %v5107_v58  ;;  %342 = vst.msk [vmem:[#allocation2 + $0x38] sm:$0xff] (!%p309_p0), %vm339_vm0, %v5107_v58  ;;  %v4478_v59 = vpack.c.bf16 (!%p309_p0), %v3960_v54, %v3959_v53  ;;  %s7324_s27 = smov (!%p309_p0), 32   ;;  %v565_v0 = vld [vmem:[%s7314_s1 + $0x30] sm:$0xff] (!%p309_p0)  ;;  %v566_v1 = vld [vmem:[%s7314_s1 + $0x38] sm:$0xff] (!%p309_p0) }
  0x3e   : > { %v3913_v49 = vld [vmem:[%s5326_s5 + $0x60] sm:$0xff] (!%p309_p0)  ;;  %4474 = vmatprep.subr.bf16.mxu1 (!%p309_p0), %v5104_v39  ;;  %451 = vst.msk [vmem:[#allocation2 + $0x48] sm:$0xff] (!%p309_p0), %vm339_vm0, %v5107_v58  ;;  %453 = vst.msk [vmem:[#allocation2 + $0x78] sm:$0xff] (!%p309_p0), %vm339_vm0, %v5107_v58  ;;  %v3910_v61 = vld [vmem:[%s5326_s5 + $0x28] sm:$0xff] (!%p309_p0)  ;;  %s7320_s29 = smov (!%p309_p0), 80   ;;  %v4454_v2 = vpack.c.bf16 (!%p309_p0), %v566_v1, %v565_v0  ;;  %s7328_s18 = smov (!%p309_p0), 96  }
  0x3f   : > { %v3909_v50 = vld [vmem:[%s5326_s5 + $0x20] sm:$0xff] (!%p309_p0)  ;;  %380 = vrot.lane.b32.xlu1 (!%p309_p0), %v3913_v49, %s7322_s8  ;;  %555 = vst.msk [vmem:[%s5356_s26] sm:$0xff] (!%p309_p0), %vm339_vm0, %v5107_v58  ;;  %556 = vst.msk [vmem:[%s5356_s26 + $0x8] sm:$0xff] (!%p309_p0), %vm339_vm0, %v5107_v58  ;;  %s7336_s22 = smov (!%p309_p0), 64   ;;  %s7338_s25 = smov (!%p309_p0), 16   ;;  %vm358_vm1 = vcmask (!%p309_p0), 261248  }
  0x40   : > { %352 = vrot.lane.b32.xlu0 (!%p309_p0), %v3909_v50, %s7316_s17  ;;  %v3915_v55 = vld [vmem:[%s5326_s5 + $0x80] sm:$0xff] (!%p309_p0)  ;;  %4449 = vmatpush1.bf16.msra.mxu0 (!%p309_p0), %v4448_v47  ;;  %557 = vst.msk [vmem:[%s5356_s26 + $0x10] sm:$0xff] (!%p309_p0), %vm339_vm0, %v5107_v58  ;;  %558 = vst.msk [vmem:[%s5356_s26 + $0x18] sm:$0xff] (!%p309_p0), %vm339_vm0, %v5107_v58  ;;  %s7339_s7 = smov (!%p309_p0), 48   ;;  %s7341_s0 = smov (!%p309_p0), 112   ;;  %vm372_vm2 = vcmask (!%p309_p0), 392448  }
  0x41   : > { %v3911_v56 = vld [vmem:[%s5326_s5 + $0x40] sm:$0xff]  ;;  %4476 = vmatpush1.bf16.msra.mxu1 %v4475_v51  ;;  %4450 = vmatprep.subr.bf16.mxu0 %v5104_v39  ;;  %v3912_v63 = vld [vmem:[%s5326_s5 + $0x48] sm:$0xff]  ;;  %v3963_v9 = vld [vmem:[%s7314_s1 + $0xd0] sm:$0xff]  ;;  %vm386_vm3 = vcmask 523648   ;;  %vm400_vm4 = vcmask 654848   ;;  %vm414_vm5 = vcmask 786048  }
  0x42   : > { %v3917_v60 = vld [vmem:[%s5326_s5 + $0xa0] sm:$0xff]  ;;  %4477 = vmatprep.subr.bf16.mxu1 %v5104_v39  ;;  %v3962_v4 = vld [vmem:[%s7314_s1 + $0xc8] sm:$0xff]  ;;  %v3964_v11 = vld [vmem:[%s7314_s1 + $0xd8] sm:$0xff]  ;;  %vm428_vm6 = vcmask 917248   ;;  %vm442_vm7 = vcmask 1048448   ;;  %vm898_vm8 = vcmask 1046528  }
  0x43   : > { %394 = vrot.lane.b32.xlu1 %v3915_v55, %s7318_s4  ;;  %v3919_v62 = vld [vmem:[%s5326_s5 + $0xc0] sm:$0xff]  ;;  %v568_v7 = vld [vmem:[%s7314_s1 + $0x48] sm:$0xff]  ;;  %v4484_v15 = vpack.c.bf16 %v3964_v11, %v3963_v9  ;;  %v569_v16 = vld [vmem:[%s7314_s1 + $0x50] sm:$0xff]  ;;  %s7326_s4 = smov 112   ;;  %vm1093_vm9 = vcmask 1045504   ;;  %vm1288_vm10 = vcmask 1044480  }
  0x44   : > { %366 = vrot.lane.b32.xlu0 %v3911_v56, %s7324_s27  ;;  %4452 = vmatpush1.bf16.msra.mxu0 %v4451_v57  ;;  %v3961_v3 = vld [vmem:[%s7314_s1 + $0xc0] sm:$0xff]  ;;  %v5411_v12 = vld [vmem:[#allocation2 + $0x8] sm:$0xff]  ;;  %v570_v17 = vld [vmem:[%s7314_s1 + $0x58] sm:$0xff]  ;;  %vm1483_vm11 = vcmask 1043456   ;;  %vm1678_vm12 = vcmask 1042432   ;;  %vm1873_vm13 = vcmask 1041408  }
  0x45   : > { %4479 = vmatpush1.bf16.msra.mxu1 %v4478_v59  ;;  %4453 = vmatprep.subr.bf16.mxu0 %v5104_v39  ;;  %v567_v5 = vld [vmem:[%s7314_s1 + $0x40] sm:$0xff]  ;;  %v4481_v6 = vpack.c.bf16 %v3962_v4, %v3961_v3  ;;  %v3914_v13 = vld [vmem:[%s5326_s5 + $0x68] sm:$0xff]  ;;  %v4460_v23 = vpack.c.bf16 %v570_v17, %v569_v16  ;;  %v3967_v27 = vld [vmem:[%s7314_s1 + $0xf0] sm:$0xff]  ;;  %vm2068_vm14 = vcmask 1040384  }
  0x46   : > { %4480 = vmatprep.subr.bf16.mxu1 %v5104_v39  ;;  %v343_v8 = vld [vmem:[%s5326_s5] sm:$0xff]  ;;  %v4457_v14 = vpack.c.bf16 %v568_v7, %v567_v5  ;;  %v3966_v19 = vld [vmem:[%s7314_s1 + $0xe8] sm:$0xff]  ;;  %3943 = vmatprep.mubr.msk.f32.mxu0 %vm339_vm0, %v5411_v12  ;;  %v3968_v28 = vld [vmem:[%s7314_s1 + $0xf8] sm:$0xff] }
  0x47   : > { %408 = vrot.lane.b32.xlu1 %v3917_v60, %s7320_s29  ;;  %v3921_v10 = vld [vmem:[%s5326_s5 + $0xe0] sm:$0xff]  ;;  %345 = vst.msk [vmem:[#allocation2 + $0x10] sm:$0xff] %vm339_vm0, %v343_v8  ;;  %v344_v20 = vld [vmem:[%s5326_s5 + $0x8] sm:$0xff]  ;;  %3973 = vmatprep.mubr.msk.f32.mxu1 %vm339_vm0, %v5411_v12  ;;  %v3925_v30 = vld [vmem:[%s5326_s5 + $0x10] sm:$0xff]  ;;  %s7335_s29 = smov 80   ;;  %v4490_v35 = vpack.c.bf16 %v3968_v28, %v3967_v27 }
  0x48   : > { %354 = vrot.lane.b32.xlu0 %v3910_v61, %s7316_s17  ;;  %4455 = vmatpush1.bf16.msra.mxu0 %v4454_v2  ;;  %v3965_v18 = vld [vmem:[%s7314_s1 + $0xe0] sm:$0xff]  ;;  %346 = vst.msk [vmem:[#allocation2 + $0x20] sm:$0xff] %vm339_vm0, %v344_v20  ;;  %v3918_v21 = vld [vmem:[%s5326_s5 + $0xa8] sm:$0xff]  ;;  %457 = vst.msk [vmem:[#allocation2 + $0x50] sm:$0xff] %vm339_vm0, %v3925_v30  ;;  %s3799_s17 = scalar_lea.sflag [#allocation5], %s5293_s21 }
  0x49   : > { %4482 = vmatpush1.bf16.msra.mxu1 %v4481_v6  ;;  %4456 = vmatprep.subr.bf16.mxu0 %v5104_v39  ;;  %v3916_v22 = vld [vmem:[%s5326_s5 + $0x88] sm:$0xff]  ;;  %v4487_v24 = vpack.c.bf16 %v3966_v19, %v3965_v18  ;;  %v571_v25 = vld [vmem:[%s7314_s1 + $0x60] sm:$0xff]  ;;  %v573_v36 = vld [vmem:[%s7314_s1 + $0x70] sm:$0xff] }
  0x4a   : > { %4483 = vmatprep.subr.bf16.mxu1 %v5104_v39  ;;  %v572_v26 = vld [vmem:[%s7314_s1 + $0x68] sm:$0xff]  ;;  %v3923_v29 = vld [vmem:[%s5326_s5 + $0x100] sm:$0xff]  ;;  %v3926_v37 = vld [vmem:[%s5326_s5 + $0x18] sm:$0xff] }
  0x4b   : > { %422 = vrot.lane.b32.xlu1 %v3919_v62, %s7328_s18  ;;  %448 = vst.msk [vmem:[#allocation2 + $0x18] sm:$0xff] %vm339_vm0, %v3923_v29  ;;  %v3924_v31 = vld [vmem:[%s5326_s5 + $0x108] sm:$0xff]  ;;  %v4463_v34 = vpack.c.bf16 %v572_v26, %v571_v25  ;;  %v574_v38 = vld [vmem:[%s7314_s1 + $0x78] sm:$0xff]  ;;  %v3969_v40 = vld [vmem:[%s7314_s1 + $0x100] sm:$0xff] }
  0x4c   : > { %368 = vrot.lane.b32.xlu0 %v3912_v63, %s7324_s27  ;;  %4458 = vmatpush1.bf16.msra.mxu0 %v4457_v14  ;;  %v3922_v32 = vld [vmem:[%s5326_s5 + $0xe8] sm:$0xff]  ;;  %449 = vst.msk [vmem:[#allocation2 + $0x28] sm:$0xff] %vm339_vm0, %v3924_v31  ;;  %458 = vst.msk [vmem:[#allocation2 + $0x60] sm:$0xff] %vm339_vm0, %v3926_v37  ;;  %v3929_v42 = vld [vmem:[%s5326_s5 + $0x50] sm:$0xff]  ;;  %v4466_v44 = vpack.c.bf16 %v574_v38, %v573_v36  ;;  %s4438_s27 = sshll.u32 %s5090_s13, 3  ;;  %s3815_s13 = sshll.u32 %s5356_s26, 4  ;;  %s7257_s13 = int_to_ptr.vmem [resolvable:$true] %s3815_s13 }
  0x4d   : > { %4485 = vmatpush1.bf16.msra.mxu1 %v4484_v15  ;;  %4459 = vmatprep.subr.bf16.mxu0 %v5104_v39  ;;  %v3920_v33 = vld [vmem:[%s5326_s5 + $0xc8] sm:$0xff]  ;;  %v3927_v43 = vld [vmem:[%s5326_s5 + $0x30] sm:$0xff]  ;;  %v575_v46 = vld [vmem:[%s7314_s1 + $0x80] sm:$0xff] }
  0x4e   : > { %4486 = vmatprep.subr.bf16.mxu1 %v5104_v39  ;;  %v3970_v41 = vld [vmem:[%s7314_s1 + $0x108] sm:$0xff]  ;;  %v3971_v48 = vld [vmem:[%s7314_s1 + $0x110] sm:$0xff]  ;;  %v3972_v49 = vld [vmem:[%s7314_s1 + $0x118] sm:$0xff] }
  0x4f   : > { %436 = vrot.lane.b32.xlu1 %v3921_v10, %s7326_s4  ;;  %v4493_v45 = vpack.c.bf16 %v3970_v41, %v3969_v40  ;;  %v576_v47 = vld [vmem:[%s7314_s1 + $0x88] sm:$0xff]  ;;  %v3933_v50 = vld [vmem:[%s5326_s5 + $0x90] sm:$0xff]  ;;  %v4496_v53 = vpack.c.bf16 %v3972_v49, %v3971_v48  ;;  %v3985_v55 = vld [vmem:[%s7314_s1 + $0x120] sm:$0xff] }
  0x50   : > { %382 = vrot.lane.b32.xlu0 %v3914_v13, %s7322_s8  ;;  %4461 = vmatpush1.bf16.msra.mxu0 %v4460_v23  ;;  %v3931_v51 = vld [vmem:[%s5326_s5 + $0x70] sm:$0xff]  ;;  %v4469_v52 = vpack.c.bf16 %v576_v47, %v575_v46  ;;  %v3986_v56 = vld [vmem:[%s7314_s1 + $0x128] sm:$0xff]  ;;  %v4016_v59 = vld [vmem:[%s7314_s1 + $0x1b8] sm:$0xff] }
  0x51   : > { %4488 = vmatpush1.bf16.msra.mxu1 %v4487_v24  ;;  %4462 = vmatprep.subr.bf16.mxu0 %v5104_v39  ;;  %v3941_v54 = vld [vmem:[%s5326_s5 + $0x110] sm:$0xff]  ;;  %v3928_v61 = vld [vmem:[%s5326_s5 + $0x38] sm:$0xff]  ;;  %v4499_v63 = vpack.c.bf16 %v3986_v56, %v3985_v55  ;;  %v4017_v3 = vld [vmem:[%s7314_s1 + $0x1c0] sm:$0xff] }
  0x52   : > { %4489 = vmatprep.subr.bf16.mxu1 %v5104_v39  ;;  %553 = vst.msk [vmem:[#allocation2 + $0x58] sm:$0xff] %vm339_vm0, %v3941_v54  ;;  %v4015_v57 = vld [vmem:[%s7314_s1 + $0x1b0] sm:$0xff]  ;;  %v5522_v62 = vld [vmem:[#allocation2 + $0x18] sm:$0xff]  ;;  %v4018_v4 = vld [vmem:[%s7314_s1 + $0x1c8] sm:$0xff] }
  0x53   : > { %410 = vrot.lane.b32.xlu1 %v3918_v21, %s7335_s29  ;;  %v3935_v60 = vld [vmem:[%s5326_s5 + $0xb0] sm:$0xff]  ;;  %v4526_v0 = vpack.c.bf16 %v4016_v59, %v4015_v57  ;;  %v3988_v2 = vld [vmem:[%s7314_s1 + $0x138] sm:$0xff]  ;;  %v4529_v9 = vpack.c.bf16 %v4018_v4, %v4017_v3  ;;  %v3989_v10 = vld [vmem:[%s7314_s1 + $0x140] sm:$0xff] }
  0x54   : > { %396 = vrot.lane.b32.xlu0 %v3916_v22, %s7336_s22  ;;  %4464 = vmatpush1.bf16.msra.mxu0 %v4463_v34  ;;  %v3987_v1 = vld [vmem:[%s7314_s1 + $0x130] sm:$0xff]  ;;  %v3930_v6 = vld [vmem:[%s5326_s5 + $0x58] sm:$0xff]  ;;  %v3990_v11 = vld [vmem:[%s7314_s1 + $0x148] sm:$0xff] }
  0x55   : > { %4491 = vmatpush1.bf16.msra.mxu1 %v4490_v35  ;;  %4465 = vmatprep.subr.bf16.mxu0 %v5104_v39  ;;  %v3937_v5 = vld [vmem:[%s5326_s5 + $0xd0] sm:$0xff]  ;;  %v3942_v7 = vld [vmem:[%s5326_s5 + $0x118] sm:$0xff]  ;;  %v4502_v8 = vpack.c.bf16 %v3988_v2, %v3987_v1  ;;  %v4505_v17 = vpack.c.bf16 %v3990_v11, %v3989_v10  ;;  %v4021_v21 = vld [vmem:[%s7314_s1 + $0x1e0] sm:$0xff] }
  0x56   : > { %4492 = vmatprep.subr.bf16.mxu1 %v5104_v39  ;;  %554 = vst.msk [vmem:[#allocation2 + $0x68] sm:$0xff] %vm339_vm0, %v3942_v7  ;;  %v4019_v13 = vld [vmem:[%s7314_s1 + $0x1d0] sm:$0xff]  ;;  %v4020_v14 = vld [vmem:[%s7314_s1 + $0x1d8] sm:$0xff]  ;;  %v4022_v22 = vld [vmem:[%s7314_s1 + $0x1e8] sm:$0xff] }
  0x57   : > { %438 = vrot.lane.b32.xlu1 %v3922_v32, %s7326_s4  ;;  %s7337_s4 = smov 32   ;;  %v3939_v15 = vld [vmem:[%s5326_s5 + $0xf0] sm:$0xff]  ;;  %v3932_v16 = vld [vmem:[%s5326_s5 + $0x78] sm:$0xff]  ;;  %v4532_v18 = vpack.c.bf16 %v4020_v14, %v4019_v13  ;;  %v4535_v26 = vpack.c.bf16 %v4022_v22, %v4021_v21  ;;  %v3993_v27 = vld [vmem:[%s7314_s1 + $0x160] sm:$0xff] }
  0x58   : > { %424 = vrot.lane.b32.xlu0 %v3920_v33, %s7328_s18  ;;  %4467 = vmatpush1.bf16.msra.mxu0 %v4466_v44  ;;  %s7340_s18 = smov 96   ;;  %v3991_v19 = vld [vmem:[%s7314_s1 + $0x150] sm:$0xff]  ;;  %v3992_v20 = vld [vmem:[%s7314_s1 + $0x158] sm:$0xff]  ;;  %v3994_v28 = vld [vmem:[%s7314_s1 + $0x168] sm:$0xff] }
  0x59   : > { %4494 = vmatpush1.bf16.msra.mxu1 %v4493_v45  ;;  %4468 = vmatprep.subr.bf16.mxu0 %v5104_v39  ;;  %v3934_v23 = vld [vmem:[%s5326_s5 + $0x98] sm:$0xff]  ;;  %v4508_v25 = vpack.c.bf16 %v3992_v20, %v3991_v19  ;;  %v4023_v29 = vld [vmem:[%s7314_s1 + $0x1f0] sm:$0xff]  ;;  %v4511_v33 = vpack.c.bf16 %v3994_v28, %v3993_v27  ;;  %v4025_v37 = vld [vmem:[%s7314_s1 + $0x200] sm:$0xff] }
  0x5a   : > { %4495 = vmatprep.subr.bf16.mxu1 %v5104_v39  ;;  %v3936_v24 = vld [vmem:[%s5326_s5 + $0xb8] sm:$0xff]  ;;  %v3995_v35 = vld [vmem:[%s7314_s1 + $0x170] sm:$0xff]  ;;  %v4026_v38 = vld [vmem:[%s7314_s1 + $0x208] sm:$0xff] }
  0x5b   : > { %477 = vrot.lane.b32.xlu1 %v3929_v42, %s7337_s4  ;;  %v4024_v30 = vld [vmem:[%s7314_s1 + $0x1f8] sm:$0xff]  ;;  %v4541_v41 = vpack.c.bf16 %v4026_v38, %v4025_v37  ;;  %v3997_v42 = vld [vmem:[%s7314_s1 + $0x180] sm:$0xff]  ;;  %v4027_v44 = vld [vmem:[%s7314_s1 + $0x210] sm:$0xff] }
  0x5c   : > { %464 = vrot.lane.b32.xlu0 %v3927_v43, %s7338_s25  ;;  %4470 = vmatpush1.bf16.msra.mxu0 %v4469_v52  ;;  %v3938_v31 = vld [vmem:[%s5326_s5 + $0xd8] sm:$0xff]  ;;  %v4538_v34 = vpack.c.bf16 %v4024_v30, %v4023_v29  ;;  %v3998_v43 = vld [vmem:[%s7314_s1 + $0x188] sm:$0xff]  ;;  %v3999_v48 = vld [vmem:[%s7314_s1 + $0x190] sm:$0xff] }
  0x5d   : > { %4497 = vmatpush1.bf16.msra.mxu1 %v4496_v53  ;;  %4498 = vmatprep.subr.bf16.mxu0 %v5104_v39  ;;  %v3940_v32 = vld [vmem:[%s5326_s5 + $0xf8] sm:$0xff]  ;;  %v4517_v46 = vpack.c.bf16 %v3998_v43, %v3997_v42  ;;  %v4001_v54 = vld [vmem:[%s7314_s1 + $0x1a0] sm:$0xff]  ;;  %v4002_v55 = vld [vmem:[%s7314_s1 + $0x1a8] sm:$0xff]  ;;  %s5113_s5 = smov [#allocation4]  }
  0x5e   : > { %4525 = vmatprep.subr.bf16.mxu1 %v5104_v39  ;;  %v3996_v36 = vld [vmem:[%s7314_s1 + $0x178] sm:$0xff]  ;;  %v4031_v56 = vld [vmem:[%s7314_s1 + $0x230] sm:$0xff]  ;;  %v4523_v59 = vpack.c.bf16 %v4002_v55, %v4001_v54  ;;  %v5676_v10 = vld [vmem:[#allocation2 + $0x28] sm:$0xff] }
  0x5f   : > { %503 = vrot.lane.b32.xlu1 %v3933_v50, %s7336_s22  ;;  %682 = vmatmul.mubr.f32.vlgmr.msra.gmra.mrb[0].mxu0 %v5107_v58  ;;  %v4514_v40 = vpack.c.bf16 %v3996_v36, %v3995_v35  ;;  %v4028_v45 = vld [vmem:[%s7314_s1 + $0x218] sm:$0xff]  ;;  %v4029_v50 = vld [vmem:[%s7314_s1 + $0x220] sm:$0xff]  ;;  %v4046_v38 = vld [vmem:[%s7314_s1 + $0x248] sm:$0xff] }
  0x60   : > { %490 = vrot.lane.b32.xlu0 %v3931_v51, %s7339_s7  ;;  %855 = vmatmul.mubr.f32.vlgmr.msra.gmra.mrb[0].mxu1 %v5107_v58  ;;  %v4544_v47 = vpack.c.bf16 %v4028_v45, %v4027_v44  ;;  %v4000_v49 = vld [vmem:[%s7314_s1 + $0x198] sm:$0xff]  ;;  %v4030_v51 = vld [vmem:[%s7314_s1 + $0x228] sm:$0xff]  ;;  %v4045_v37 = vld [vmem:[%s7314_s1 + $0x240] sm:$0xff] }
  0x61   : > { %3944 = vmatprep.mubr.msk.f32.mxu0 %vm339_vm0, %v5522_v62  ;;  %3974 = vmatprep.mubr.msk.f32.mxu1 %vm339_vm0, %v5522_v62  ;;  %v4520_v52 = vpack.c.bf16 %v4000_v49, %v3999_v48  ;;  %v4547_v53 = vpack.c.bf16 %v4030_v51, %v4029_v50  ;;  %v4032_v57 = vld [vmem:[%s7314_s1 + $0x238] sm:$0xff]  ;;  %v4553_v42 = vpack.c.bf16 %v4046_v38, %v4045_v37  ;;  %v4047_v44 = vld [vmem:[%s7314_s1 + $0x250] sm:$0xff]  ;;  %v4049_v50 = vld [vmem:[%s7314_s1 + $0x260] sm:$0xff] }
  0x62   : > { %4500 = vmatpush1.bf16.msra.mxu0 %v4499_v63  ;;  %4527 = vmatpush1.bf16.msra.mxu1 %v4526_v0  ;;  %v5690_v19 = vld [vmem:[#allocation2 + $0x38] sm:$0xff]  ;;  %v4050_v51 = vld [vmem:[%s7314_s1 + $0x268] sm:$0xff]  ;;  %v4091_v37 = vld [vmem:[%s7314_s1 + $0x350] sm:$0xff] }
  0x63   : > { %516 = vrot.lane.b32.xlu1 %v3935_v60, %s7335_s29  ;;  %4501 = vmatprep.subr.bf16.mxu0 %v5104_v39  ;;  %v4550_v60 = vpack.c.bf16 %v4032_v57, %v4031_v56  ;;  %v5738_v35 = vld [vmem:[#allocation2 + $0x78] sm:$0xff]  ;;  %v4559_v54 = vpack.c.bf16 %v4050_v51, %v4049_v50  ;;  %v4051_v56 = vld [vmem:[%s7314_s1 + $0x270] sm:$0xff]  ;;  %v4138_v50 = vld [vmem:[%s7314_s1 + $0x408] sm:$0xff] }
  0x64   : > { %466 = vrot.lane.b32.xlu0 %v3928_v61, %s7338_s25  ;;  %4528 = vmatprep.subr.bf16.mxu1 %v5104_v39  ;;  %v4048_v45 = vld [vmem:[%s7314_s1 + $0x258] sm:$0xff] }
  0x65   : > { %v4556_v48 = vpack.c.bf16 %v4048_v45, %v4047_v44  ;;  %v4052_v57 = vld [vmem:[%s7314_s1 + $0x278] sm:$0xff]  ;;  %v4135_v44 = vld [vmem:[%s7314_s1 + $0x3f0] sm:$0xff] }
  0x66   : > { %4503 = vmatpush1.bf16.msra.mxu0 %v4502_v8  ;;  %4530 = vmatpush1.bf16.msra.mxu1 %v4529_v9  ;;  %v4092_v38 = vld [vmem:[%s7314_s1 + $0x358] sm:$0xff] }
  0x67   : > { %529 = vrot.lane.b32.xlu1 %v3937_v5, %s7340_s18  ;;  %4504 = vmatprep.subr.bf16.mxu0 %v5104_v39  ;;  %v4136_v45 = vld [vmem:[%s7314_s1 + $0x3f8] sm:$0xff] }
  0x68   : > { %479 = vrot.lane.b32.xlu0 %v3930_v6, %s7337_s4  ;;  %4531 = vmatprep.subr.bf16.mxu1 %v5104_v39  ;;  %s5012_s4 = sshll.u32 %s5113_s5, 4  ;;  %s5013_s4 = int_to_ptr.vmem [resolvable:$false] %s5012_s4 }
  0x69   : > { %s5014_s25 = scalar_lea.vmem %s5013_s4, 1024  ;;  %p5015_p4 = scmp.lt.s32.totalorder %s7257_s13, %s5013_s4 }
  0x6a   : > { %4506 = vmatpush1.bf16.msra.mxu0 %v4505_v17  ;;  %4533 = vmatpush1.bf16.msra.mxu1 %v4532_v18 }
  0x6b   : > { %542 = vrot.lane.b32.xlu1 %v3939_v15, %s7341_s0  ;;  %4507 = vmatprep.subr.bf16.mxu0 %v5104_v39 }
  0x6c   : > { %492 = vrot.lane.b32.xlu0 %v3932_v16, %s7339_s7  ;;  %4534 = vmatprep.subr.bf16.mxu1 %v5104_v39  ;;  %s5008_s7 = scalar_lea.vmem %s7257_s13, 512 }
  0x6d   : > { %p5009_p1 = scmp.ne.s32.totalorder %s7257_s13, %s5008_s7  ;;  %p5016_p5 = scmp.lt.s32.totalorder %s5014_s25, %s5008_s7 }
  0x6e   : > { %4509 = vmatpush1.bf16.msra.mxu0 %v4508_v25  ;;  %4536 = vmatpush1.bf16.msra.mxu1 %v4535_v26  ;;  %v5712_v26 = vld [vmem:[#allocation2 + $0x58] sm:$0xff] }
  0x6f   : > { %518 = vrot.lane.b32.xlu1 %v3936_v24, %s7335_s29  ;;  %4510 = vmatprep.subr.bf16.mxu0 %v5104_v39  ;;  %p5010_p2 = pnand %p5009_p1, %p5191_p8  ;;  %p5017_p6 = por %p5016_p5, %p5015_p4 }
  0x70   : > { %505 = vrot.lane.b32.xlu0 %v3934_v23, %s7336_s22  ;;  %4537 = vmatprep.subr.bf16.mxu1 %v5104_v39  ;;  %v5702_v23 = vld [vmem:[#allocation2 + $0x48] sm:$0xff] }
  0x71   : > { %p5011_p3 = pneg %p5010_p2 }
  0x72   : > { %4512 = vmatpush1.bf16.msra.mxu0 %v4511_v33  ;;  %4539 = vmatpush1.bf16.msra.mxu1 %v4538_v34 }
  0x73   : > { %544 = vrot.lane.b32.xlu1 %v3940_v32, %s7341_s0  ;;  %4513 = vmatprep.subr.bf16.mxu0 %v5104_v39  ;;  %s4443_s0 = sshll.u32 %s5086_s12, 2  ;;  %p5018_p7 = pnand %p5017_p6, %p5011_p3 }
  0x74   : > { %531 = vrot.lane.b32.xlu0 %v3938_v31, %s7340_s18  ;;  %4540 = vmatprep.subr.bf16.mxu1 %v5104_v39  ;;  %v5726_v31 = vld [vmem:[#allocation2 + $0x68] sm:$0xff]  ;;  %s3812_s6 = sadd.s32 %s4443_s0, %s4438_s27 }
  0x75   : > { %s4439_s12 = sshll.u32 %s3812_s6, 7 }
  0x76   : > { %4515 = vmatpush1.bf16.msra.mxu0 %v4514_v40  ;;  %4542 = vmatpush1.bf16.msra.mxu1 %v4541_v41  ;;  %v4075_v40 = vld [vmem:[%s7314_s1 + $0x2d0] sm:$0xff]  ;;  %v4076_v41 = vld [vmem:[%s7314_s1 + $0x2d8] sm:$0xff]  ;;  %s7255_s29 = scalar_lea.hbm %s7315_s2, %s4439_s12 }
  0x77   : > { %4516 = vmatprep.subr.bf16.mxu0 %v5104_v39  ;;  %4543 = vmatprep.subr.bf16.mxu1 %v5104_v39  ;;  %v4580_v43 = vpack.c.bf16 %v4076_v41, %v4075_v40  ;;  %v4604_v41 = vpack.c.bf16 %v4092_v38, %v4091_v37  ;;  %v4121_v37 = vld [vmem:[%s7314_s1 + $0x3e0] sm:$0xff]  ;;  %v4122_v38 = vld [vmem:[%s7314_s1 + $0x3e8] sm:$0xff] }
  0x7a   : > { %4518 = vmatpush1.bf16.msra.mxu0 %v4517_v46  ;;  %4545 = vmatpush1.bf16.msra.mxu1 %v4544_v47  ;;  %v4077_v46 = vld [vmem:[%s7314_s1 + $0x2e0] sm:$0xff]  ;;  %v4078_v47 = vld [vmem:[%s7314_s1 + $0x2e8] sm:$0xff] }
  0x7b   : > { %4519 = vmatprep.subr.bf16.mxu0 %v5104_v39  ;;  %4546 = vmatprep.subr.bf16.mxu1 %v5104_v39  ;;  %v4583_v49 = vpack.c.bf16 %v4078_v47, %v4077_v46  ;;  %v4634_v47 = vpack.c.bf16 %v4136_v45, %v4135_v44 }
  0x7e   : > { %4521 = vmatpush1.bf16.msra.mxu0 %v4520_v52  ;;  %4548 = vmatpush1.bf16.msra.mxu1 %v4547_v53  ;;  %v4079_v52 = vld [vmem:[%s7314_s1 + $0x2f0] sm:$0xff]  ;;  %v4080_v53 = vld [vmem:[%s7314_s1 + $0x2f8] sm:$0xff] }
  0x7f   : > { %4522 = vmatprep.subr.bf16.mxu0 %v5104_v39  ;;  %4549 = vmatprep.subr.bf16.mxu1 %v5104_v39  ;;  %v4586_v55 = vpack.c.bf16 %v4080_v53, %v4079_v52  ;;  %v4109_v53 = vld [vmem:[%s7314_s1 + $0x380] sm:$0xff] }
  0x82   : > { %4524 = vmatpush1.bf16.msra.mxu0 %v4523_v59  ;;  %4551 = vmatpush1.bf16.msra.mxu1 %v4550_v60  ;;  %v4081_v59 = vld [vmem:[%s7314_s1 + $0x300] sm:$0xff]  ;;  %v4082_v60 = vld [vmem:[%s7314_s1 + $0x308] sm:$0xff] }
  0x83   : > { %4552 = vmatprep.subr.bf16.mxu0 %v5104_v39  ;;  %4579 = vmatprep.subr.bf16.mxu1 %v5104_v39 }
  0xb1   : > { %v381_v61 = vpop.permute.xlu1 %380 }
  0xb2   : > { %v353_v63 = vpop.permute.xlu0 %352 }
  0xb3   : > { %359 = vst.msk [vmem:[#allocation2 + $0x10] sm:$0xff] %vm358_vm1, %v353_v63  ;;  %v4589_v63 = vpack.c.bf16 %v4082_v60, %v4081_v59  ;;  %v4112_v59 = vld [vmem:[%s7314_s1 + $0x398] sm:$0xff]  ;;  %v4141_v60 = vld [vmem:[%s7314_s1 + $0x420] sm:$0xff] }
  0xb5   : > { %v395_v0 = vpop.permute.xlu1 %394 }
  0xb6   : > { %v367_v1 = vpop.permute.xlu0 %366 }
  0xb7   : > { %373 = vst.msk [vmem:[#allocation2 + $0x10] sm:$0xff] %vm372_vm2, %v367_v1  ;;  %v4054_v1 = vld [vmem:[%s7314_s1 + $0x288] sm:$0xff] }
  0xb8   : > { %387 = vst.msk [vmem:[#allocation2 + $0x10] sm:$0xff] %vm386_vm3, %v381_v61  ;;  %v4562_v61 = vpack.c.bf16 %v4052_v57, %v4051_v56  ;;  %v4111_v57 = vld [vmem:[%s7314_s1 + $0x390] sm:$0xff] }
  0xb9   : > { %401 = vst.msk [vmem:[#allocation2 + $0x10] sm:$0xff] %vm400_vm4, %v395_v0  ;;  %v409_v2 = vpop.permute.xlu1 %408  ;;  %v4053_v0 = vld [vmem:[%s7314_s1 + $0x280] sm:$0xff] }
  0xba   : > { %v355_v3 = vpop.permute.xlu0 %354  ;;  %415 = vst.msk [vmem:[#allocation2 + $0x10] sm:$0xff] %vm414_vm5, %v409_v2  ;;  %v4083_v2 = vld [vmem:[%s7314_s1 + $0x310] sm:$0xff] }
  0xbb   : > { %360 = vst.msk [vmem:[#allocation2 + $0x20] sm:$0xff] %vm358_vm1, %v355_v3  ;;  %v4084_v3 = vld [vmem:[%s7314_s1 + $0x318] sm:$0xff] }
  0xbd   : > { %v423_v4 = vpop.permute.xlu1 %422 }
  0xbe   : > { %v369_v5 = vpop.permute.xlu0 %368  ;;  %429 = vst.msk [vmem:[#allocation2 + $0x10] sm:$0xff] %vm428_vm6, %v423_v4  ;;  %v4565_v4 = vpack.c.bf16 %v4054_v1, %v4053_v0  ;;  %v4113_v1 = vld [vmem:[%s7314_s1 + $0x3a0] sm:$0xff] }
  0xbf   : > { %374 = vst.msk [vmem:[#allocation2 + $0x20] sm:$0xff] %vm372_vm2, %v369_v5  ;;  %v4592_v5 = vpack.c.bf16 %v4084_v3, %v4083_v2  ;;  %v4114_v2 = vld [vmem:[%s7314_s1 + $0x3a8] sm:$0xff]  ;;  %v4143_v3 = vld [vmem:[%s7314_s1 + $0x430] sm:$0xff] }
  0xc1   : > { %v437_v6 = vpop.permute.xlu1 %436 }
  0xc2   : > { %v383_v7 = vpop.permute.xlu0 %382  ;;  %443 = vst.msk [vmem:[#allocation2 + $0x10] sm:$0xff] %vm442_vm7, %v437_v6  ;;  %v4055_v6 = vld [vmem:[%s7314_s1 + $0x290] sm:$0xff] }
  0xc3   : > { %388 = vst.msk [vmem:[#allocation2 + $0x20] sm:$0xff] %vm386_vm3, %v383_v7  ;;  %v4056_v7 = vld [vmem:[%s7314_s1 + $0x298] sm:$0xff] }
  0xc5   : > { %v411_v8 = vpop.permute.xlu1 %410 }
  0xc6   : > { %v397_v9 = vpop.permute.xlu0 %396 }
  0xc7   : > { %402 = vst.msk [vmem:[#allocation2 + $0x20] sm:$0xff] %vm400_vm4, %v397_v9  ;;  %v4086_v9 = vld [vmem:[%s7314_s1 + $0x328] sm:$0xff] }
  0xc8   : > { %416 = vst.msk [vmem:[#allocation2 + $0x20] sm:$0xff] %vm414_vm5, %v411_v8  ;;  %v4085_v8 = vld [vmem:[%s7314_s1 + $0x320] sm:$0xff] }
  0xc9   : > { %v439_v11 = vpop.permute.xlu1 %438  ;;  %v5678_v14 = vld [vmem:[#allocation2 + $0x10] sm:$0xff] }
  0xca   : > { %v425_v13 = vpop.permute.xlu0 %424  ;;  %687 = vmatmul.mubr.f32.gmra.mrb[2].mxu0 %v5678_v14  ;;  %860 = vmatmul.mubr.f32.gmra.mrb[2].mxu1 %v5678_v14 }
  0xcb   : > { %430 = vst.msk [vmem:[#allocation2 + $0x20] sm:$0xff] %vm428_vm6, %v425_v13  ;;  %3945 = vmatprep.mubr.msk.f32.mxu0 %vm339_vm0, %v5676_v10  ;;  %3975 = vmatprep.mubr.msk.f32.mxu1 %vm339_vm0, %v5676_v10  ;;  %v4595_v13 = vpack.c.bf16 %v4086_v9, %v4085_v8  ;;  %v4115_v8 = vld [vmem:[%s7314_s1 + $0x3b0] sm:$0xff]  ;;  %v4116_v9 = vld [vmem:[%s7314_s1 + $0x3b8] sm:$0xff] }
  0xcc   : > { %444 = vst.msk [vmem:[#allocation2 + $0x20] sm:$0xff] %vm442_vm7, %v439_v11  ;;  %v4568_v11 = vpack.c.bf16 %v4056_v7, %v4055_v6  ;;  %v4619_v6 = vpack.c.bf16 %v4114_v2, %v4113_v1  ;;  %v4199_v1 = vld [vmem:[%s7314_s1 + $0x530] sm:$0xff]  ;;  %v4200_v2 = vld [vmem:[%s7314_s1 + $0x538] sm:$0xff] }
  0xcd   : > { %v478_v15 = vpop.permute.xlu1 %477 }
  0xce   : > { %v465_v16 = vpop.permute.xlu0 %464 }
  0xcf   : > { %470 = vst.msk [vmem:[#allocation2 + $0x50] sm:$0xff] %vm358_vm1, %v465_v16  ;;  %v4058_v16 = vld [vmem:[%s7314_s1 + $0x2a8] sm:$0xff] }
  0xd0   : > { %483 = vst.msk [vmem:[#allocation2 + $0x50] sm:$0xff] %vm372_vm2, %v478_v15  ;;  %v4057_v15 = vld [vmem:[%s7314_s1 + $0x2a0] sm:$0xff] }
  0xd1   : > { %v504_v17 = vpop.permute.xlu1 %503 }
  0xd2   : > { %v491_v18 = vpop.permute.xlu0 %490 }
  0xd3   : > { %496 = vst.msk [vmem:[#allocation2 + $0x50] sm:$0xff] %vm386_vm3, %v491_v18  ;;  %v5693_v20 = vld [vmem:[#allocation2 + $0x20] sm:$0xff]  ;;  %v4088_v18 = vld [vmem:[%s7314_s1 + $0x338] sm:$0xff] }
  0xd4   : > { %509 = vst.msk [vmem:[#allocation2 + $0x50] sm:$0xff] %vm400_vm4, %v504_v17  ;;  %692 = vmatmul.mubr.f32.gmra.mrb[4].mxu0 %v5693_v20  ;;  %865 = vmatmul.mubr.f32.gmra.mrb[4].mxu1 %v5693_v20  ;;  %v4087_v17 = vld [vmem:[%s7314_s1 + $0x330] sm:$0xff] }
  0xd5   : > { %3946 = vmatprep.mubr.msk.f32.mxu0 %vm339_vm0, %v5690_v19  ;;  %3976 = vmatprep.mubr.msk.f32.mxu1 %vm339_vm0, %v5690_v19  ;;  %v517_v21 = vpop.permute.xlu1 %516 }
  0xd6   : > { %v467_v22 = vpop.permute.xlu0 %466  ;;  %522 = vst.msk [vmem:[#allocation2 + $0x50] sm:$0xff] %vm414_vm5, %v517_v21  ;;  %v4571_v21 = vpack.c.bf16 %v4058_v16, %v4057_v15  ;;  %v4622_v15 = vpack.c.bf16 %v4116_v9, %v4115_v8  ;;  %v4202_v8 = vld [vmem:[%s7314_s1 + $0x548] sm:$0xff] }
  0xd7   : > { %471 = vst.msk [vmem:[#allocation2 + $0x60] sm:$0xff] %vm358_vm1, %v467_v22  ;;  %v4598_v22 = vpack.c.bf16 %v4088_v18, %v4087_v17  ;;  %v4117_v17 = vld [vmem:[%s7314_s1 + $0x3c0] sm:$0xff]  ;;  %v4118_v18 = vld [vmem:[%s7314_s1 + $0x3c8] sm:$0xff] }
  0xd8   : > { %696 = vmatmul.mubr.f32.gmra.mrb[6].mxu0 %v5107_v58  ;;  %870 = vmatmul.mubr.f32.gmra.mrb[6].mxu1 %v5107_v58 }
  0xd9   : > { %3947 = vmatprep.mubr.msk.f32.mxu0 %vm339_vm0, %v5702_v23  ;;  %3977 = vmatprep.mubr.msk.f32.mxu1 %vm339_vm0, %v5702_v23  ;;  %v530_v24 = vpop.permute.xlu1 %529 }
  0xda   : > { %v480_v25 = vpop.permute.xlu0 %479  ;;  %535 = vst.msk [vmem:[#allocation2 + $0x50] sm:$0xff] %vm428_vm6, %v530_v24  ;;  %v4059_v24 = vld [vmem:[%s7314_s1 + $0x2b0] sm:$0xff] }
  0xdb   : > { %484 = vst.msk [vmem:[#allocation2 + $0x60] sm:$0xff] %vm372_vm2, %v480_v25  ;;  %v4060_v25 = vld [vmem:[%s7314_s1 + $0x2b8] sm:$0xff] }
  0xdc   : > { %700 = vmatmul.mubr.f32.gmra.mrb[8].mxu0 %v5107_v58  ;;  %874 = vmatmul.mubr.f32.gmra.mrb[8].mxu1 %v5107_v58 }
  0xdd   : > { %3948 = vmatprep.mubr.msk.f32.mxu0 %vm339_vm0, %v5712_v26  ;;  %3978 = vmatprep.mubr.msk.f32.mxu1 %vm339_vm0, %v5712_v26  ;;  %v543_v27 = vpop.permute.xlu1 %542 }
  0xde   : > { %v493_v28 = vpop.permute.xlu0 %492  ;;  %548 = vst.msk [vmem:[#allocation2 + $0x50] sm:$0xff] %vm442_vm7, %v543_v27  ;;  %v4089_v27 = vld [vmem:[%s7314_s1 + $0x340] sm:$0xff] }
  0xdf   : > { %497 = vst.msk [vmem:[#allocation2 + $0x60] sm:$0xff] %vm386_vm3, %v493_v28  ;;  %v4090_v28 = vld [vmem:[%s7314_s1 + $0x348] sm:$0xff] }
  0xe1   : > { %v519_v30 = vpop.permute.xlu1 %518 }
  0xe2   : > { %v506_v29 = vpop.permute.xlu0 %505 }
  0xe3   : > { %510 = vst.msk [vmem:[#allocation2 + $0x60] sm:$0xff] %vm400_vm4, %v506_v29  ;;  %v4574_v29 = vpack.c.bf16 %v4060_v25, %v4059_v24  ;;  %v4625_v24 = vpack.c.bf16 %v4118_v18, %v4117_v17  ;;  %v4175_v17 = vld [vmem:[%s7314_s1 + $0x4d0] sm:$0xff]  ;;  %v4176_v18 = vld [vmem:[%s7314_s1 + $0x4d8] sm:$0xff] }
  0xe4   : > { %523 = vst.msk [vmem:[#allocation2 + $0x60] sm:$0xff] %vm414_vm5, %v519_v30  ;;  %v4601_v30 = vpack.c.bf16 %v4090_v28, %v4089_v27  ;;  %v4119_v27 = vld [vmem:[%s7314_s1 + $0x3d0] sm:$0xff]  ;;  %v4120_v28 = vld [vmem:[%s7314_s1 + $0x3d8] sm:$0xff] }
  0xe5   : > { %v545_v33 = vpop.permute.xlu1 %544  ;;  %v5728_v34 = vld [vmem:[#allocation2 + $0x50] sm:$0xff] }
  0xe6   : > { %v532_v32 = vpop.permute.xlu0 %531  ;;  %705 = vmatmul.mubr.f32.gmra.mrb[10].mxu0 %v5728_v34  ;;  %879 = vmatmul.mubr.f32.gmra.mrb[10].mxu1 %v5728_v34 }
  0xe7   : > { %536 = vst.msk [vmem:[#allocation2 + $0x60] sm:$0xff] %vm428_vm6, %v532_v32  ;;  %3949 = vmatprep.mubr.msk.f32.mxu0 %vm339_vm0, %v5726_v31  ;;  %3979 = vmatprep.mubr.msk.f32.mxu1 %vm339_vm0, %v5726_v31  ;;  %v4061_v32 = vld [vmem:[%s7314_s1 + $0x2c0] sm:$0xff] }
  0xe8   : > { %549 = vst.msk [vmem:[#allocation2 + $0x60] sm:$0xff] %vm442_vm7, %v545_v33  ;;  %v4062_v33 = vld [vmem:[%s7314_s1 + $0x2c8] sm:$0xff] }
  0xe9   : > { %v4577_v40 = vpack.c.bf16 %v4062_v33, %v4061_v32  ;;  %v4628_v32 = vpack.c.bf16 %v4120_v28, %v4119_v27  ;;  %v4178_v27 = vld [vmem:[%s7314_s1 + $0x4e8] sm:$0xff]  ;;  %v4207_v28 = vld [vmem:[%s7314_s1 + $0x570] sm:$0xff] }
  0xef   : > { %v5740_v36 = vld [vmem:[#allocation2 + $0x60] sm:$0xff] }
  0xf0   : > { %710 = vmatmul.mubr.f32.gmra.mrb[12].mxu0 %v5740_v36  ;;  %884 = vmatmul.mubr.f32.gmra.mrb[12].mxu1 %v5740_v36 }
  0xf1   : > { %3950 = vmatprep.mubr.msk.f32.mxu0 %vm339_vm0, %v5738_v35  ;;  %3980 = vmatprep.mubr.msk.f32.mxu1 %vm339_vm0, %v5738_v35 }
  0xf4   : > { %714 = vmatmul.mubr.f32.gmra.mrb[14].mxu0 %v5107_v58  ;;  %889 = vmatmul.mubr.f32.gmra.mrb[14].mxu1 %v5107_v58 }
  0xf5   : > { %4003 = vmatprep.mubr.msk.f32.mxu0 %vm339_vm0, %v5411_v12  ;;  %4033 = vmatprep.mubr.msk.f32.mxu1 %vm339_vm0, %v5411_v12 }
  0xf8   : > { %1050 = vmatmul.mubr.f32.vlgmr.msra.gmra.mrb[16].mxu0 %v5107_v58  ;;  %1245 = vmatmul.mubr.f32.vlgmr.msra.gmra.mrb[16].mxu1 %v5107_v58 }
  0xf9   : > { %4554 = vmatpush1.bf16.msra.mxu0 %v4553_v42  ;;  %4581 = vmatpush1.bf16.msra.mxu1 %v4580_v43  ;;  %v4105_v42 = vld [vmem:[%s7314_s1 + $0x360] sm:$0xff]  ;;  %v4106_v43 = vld [vmem:[%s7314_s1 + $0x368] sm:$0xff] }
  0xfa   : > { %4004 = vmatprep.mubr.msk.f32.mxu0 %vm339_vm0, %v5522_v62  ;;  %4034 = vmatprep.mubr.msk.f32.mxu1 %vm339_vm0, %v5522_v62  ;;  %v4607_v46 = vpack.c.bf16 %v4106_v43, %v4105_v42  ;;  %v718_v42 = vld [vmem:[%s5356_s26] sm:$0xff]  ;;  %v6097_v43 = vld [vmem:[#allocation2 + $0x8] sm:$0xff] }
  0xfb   : > { %4555 = vmatprep.subr.bf16.mxu0 %v5104_v39  ;;  %4582 = vmatprep.subr.bf16.mxu1 %v5104_v39 }
  0xfc   : > { %1055 = vmatmul.mubr.f32.gmra.mrb[18].mxu0 %v5678_v14  ;;  %1250 = vmatmul.mubr.f32.gmra.mrb[18].mxu1 %v5678_v14 }
  0xfd   : > { %4557 = vmatpush1.bf16.msra.mxu0 %v4556_v48  ;;  %4584 = vmatpush1.bf16.msra.mxu1 %v4583_v49  ;;  %v4107_v48 = vld [vmem:[%s7314_s1 + $0x370] sm:$0xff]  ;;  %v4108_v49 = vld [vmem:[%s7314_s1 + $0x378] sm:$0xff] }
  0xfe   : > { %4005 = vmatprep.mubr.msk.f32.mxu0 %vm339_vm0, %v5676_v10  ;;  %4035 = vmatprep.mubr.msk.f32.mxu1 %vm339_vm0, %v5676_v10  ;;  %v4610_v51 = vpack.c.bf16 %v4108_v49, %v4107_v48  ;;  %v4165_v48 = vld [vmem:[%s7314_s1 + $0x480] sm:$0xff] }
  0xff   : > { %4558 = vmatprep.subr.bf16.mxu0 %v5104_v39  ;;  %4585 = vmatprep.subr.bf16.mxu1 %v5104_v39 }
 0x100   : > { %1060 = vmatmul.mubr.f32.gmra.mrb[20].mxu0 %v5693_v20  ;;  %1255 = vmatmul.mubr.f32.gmra.mrb[20].mxu1 %v5693_v20 }
 0x101   : > { %4560 = vmatpush1.bf16.msra.mxu0 %v4559_v54  ;;  %4587 = vmatpush1.bf16.msra.mxu1 %v4586_v55  ;;  %v4110_v54 = vld [vmem:[%s7314_s1 + $0x388] sm:$0xff]  ;;  %v4140_v55 = vld [vmem:[%s7314_s1 + $0x418] sm:$0xff] }
 0x102   : > { %4006 = vmatprep.mubr.msk.f32.mxu0 %vm339_vm0, %v5690_v19  ;;  %4036 = vmatprep.mubr.msk.f32.mxu1 %vm339_vm0, %v5690_v19 }
 0x103   : > { %4561 = vmatprep.subr.bf16.mxu0 %v5104_v39  ;;  %4588 = vmatprep.subr.bf16.mxu1 %v5104_v39 }
 0x104   : > { %1065 = vmatmul.mubr.f32.gmra.mrb[22].mxu0 %v5107_v58  ;;  %1260 = vmatmul.mubr.f32.gmra.mrb[22].mxu1 %v5107_v58 }
 0x105   : > { %4563 = vmatpush1.bf16.msra.mxu0 %v4562_v61  ;;  %4590 = vmatpush1.bf16.msra.mxu1 %v4589_v63  ;;  %v4142_v61 = vld [vmem:[%s7314_s1 + $0x428] sm:$0xff]  ;;  %v4616_v63 = vpack.c.bf16 %v4112_v59, %v4111_v57  ;;  %v6135_v59 = vld [vmem:[#allocation2 + $0x18] sm:$0xff] }
 0x106   : > { %4007 = vmatprep.mubr.msk.f32.mxu0 %vm339_vm0, %v5702_v23  ;;  %4037 = vmatprep.mubr.msk.f32.mxu1 %vm339_vm0, %v5702_v23  ;;  %v4643_v0 = vpack.c.bf16 %v4142_v61, %v4141_v60  ;;  %v4198_v57 = vld [vmem:[%s7314_s1 + $0x528] sm:$0xff] }
 0x107   : > { %4564 = vmatprep.subr.bf16.mxu0 %v5104_v39  ;;  %4591 = vmatprep.subr.bf16.mxu1 %v5104_v39 }
 0x108   : > { %1069 = vmatmul.mubr.f32.gmra.mrb[24].mxu0 %v5107_v58  ;;  %1264 = vmatmul.mubr.f32.gmra.mrb[24].mxu1 %v5107_v58 }
 0x109   : > { %4566 = vmatpush1.bf16.msra.mxu0 %v4565_v4  ;;  %4593 = vmatpush1.bf16.msra.mxu1 %v4592_v5  ;;  %v4144_v4 = vld [vmem:[%s7314_s1 + $0x438] sm:$0xff]  ;;  %v6012_v5 = vld [vmem:[#allocation2] sm:$0xff] }
 0x10a   : > { %4008 = vmatprep.mubr.msk.f32.mxu0 %vm339_vm0, %v5712_v26  ;;  %4038 = vmatprep.mubr.msk.f32.mxu1 %vm339_vm0, %v5712_v26  ;;  %v4646_v7 = vpack.c.bf16 %v4144_v4, %v4143_v3  ;;  %v4694_v4 = vpack.c.bf16 %v4200_v2, %v4199_v1  ;;  %v4231_v2 = vld [vmem:[%s7314_s1 + $0x5d0] sm:$0xff] }
 0x10b   : > { %4567 = vmatprep.subr.bf16.mxu0 %v5104_v39  ;;  %4594 = vmatprep.subr.bf16.mxu1 %v5104_v39 }
 0x10c   : > { %1074 = vmatmul.mubr.f32.gmra.mrb[26].mxu0 %v5728_v34  ;;  %1269 = vmatmul.mubr.f32.gmra.mrb[26].mxu1 %v5728_v34 }
 0x10d   : > { %4569 = vmatpush1.bf16.msra.mxu0 %v4568_v11  ;;  %4596 = vmatpush1.bf16.msra.mxu1 %v4595_v13  ;;  %v4145_v11 = vld [vmem:[%s7314_s1 + $0x440] sm:$0xff]  ;;  %v4146_v13 = vld [vmem:[%s7314_s1 + $0x448] sm:$0xff] }
 0x10e   : > { %4009 = vmatprep.mubr.msk.f32.mxu0 %vm339_vm0, %v5726_v31  ;;  %4039 = vmatprep.mubr.msk.f32.mxu1 %vm339_vm0, %v5726_v31  ;;  %v4649_v16 = vpack.c.bf16 %v4146_v13, %v4145_v11  ;;  %v4173_v11 = vld [vmem:[%s7314_s1 + $0x4c0] sm:$0xff]  ;;  %v4174_v13 = vld [vmem:[%s7314_s1 + $0x4c8] sm:$0xff] }
 0x10f   : > { %4570 = vmatprep.subr.bf16.mxu0 %v5104_v39  ;;  %4597 = vmatprep.subr.bf16.mxu1 %v5104_v39 }
 0x110   : > { %1079 = vmatmul.mubr.f32.gmra.mrb[28].mxu0 %v5740_v36  ;;  %1274 = vmatmul.mubr.f32.gmra.mrb[28].mxu1 %v5740_v36 }
 0x111   : > { %4572 = vmatpush1.bf16.msra.mxu0 %v4571_v21  ;;  %4599 = vmatpush1.bf16.msra.mxu1 %v4598_v22  ;;  %v4147_v21 = vld [vmem:[%s7314_s1 + $0x450] sm:$0xff]  ;;  %v4148_v22 = vld [vmem:[%s7314_s1 + $0x458] sm:$0xff] }
 0x112   : > { %4573 = vmatprep.subr.bf16.mxu0 %v5104_v39  ;;  %4600 = vmatprep.subr.bf16.mxu1 %v5104_v39  ;;  %v4652_v25 = vpack.c.bf16 %v4148_v22, %v4147_v21  ;;  %v4205_v21 = vld [vmem:[%s7314_s1 + $0x560] sm:$0xff]  ;;  %v4206_v22 = vld [vmem:[%s7314_s1 + $0x568] sm:$0xff] }
 0x113   : > { %4010 = vmatprep.mubr.msk.f32.mxu0 %vm339_vm0, %v5738_v35  ;;  %4040 = vmatprep.mubr.msk.f32.mxu1 %vm339_vm0, %v5738_v35 }
 0x114   : > { %1084 = vmatmul.mubr.f32.gmra.mrb[30].mxu0 %v5107_v58  ;;  %1279 = vmatmul.mubr.f32.gmra.mrb[30].mxu1 %v5107_v58 }
 0x115   : > { %4575 = vmatpush1.bf16.msra.mxu0 %v4574_v29  ;;  %4602 = vmatpush1.bf16.msra.mxu1 %v4601_v30  ;;  %v4149_v29 = vld [vmem:[%s7314_s1 + $0x460] sm:$0xff]  ;;  %v4150_v30 = vld [vmem:[%s7314_s1 + $0x468] sm:$0xff] }
 0x116   : > { %4576 = vmatprep.subr.bf16.mxu0 %v5104_v39  ;;  %4603 = vmatprep.subr.bf16.mxu1 %v5104_v39  ;;  %v4655_v33 = vpack.c.bf16 %v4150_v30, %v4149_v29  ;;  %v4208_v29 = vld [vmem:[%s7314_s1 + $0x578] sm:$0xff] }
 0x117   : > { %4063 = vmatprep.mubr.msk.f32.mxu0 %vm339_vm0, %v5411_v12  ;;  %4093 = vmatprep.mubr.msk.f32.mxu1 %vm339_vm0, %v5411_v12  ;;  %v4137_v12 = vld [vmem:[%s7314_s1 + $0x400] sm:$0xff]  ;;  %v4706_v30 = vpack.c.bf16 %v4208_v29, %v4207_v28  ;;  %v4238_v28 = vld [vmem:[%s7314_s1 + $0x608] sm:$0xff]  ;;  %v4267_v29 = vld [vmem:[%s7314_s1 + $0x690] sm:$0xff] }
 0x118   : > { %v4637_v52 = vpack.c.bf16 %v4138_v50, %v4137_v12 }
 0x119   : > { %4578 = vmatpush1.bf16.msra.mxu0 %v4577_v40  ;;  %4605 = vmatpush1.bf16.msra.mxu1 %v4604_v41  ;;  %v4151_v40 = vld [vmem:[%s7314_s1 + $0x470] sm:$0xff]  ;;  %v4152_v41 = vld [vmem:[%s7314_s1 + $0x478] sm:$0xff] }
 0x11a   : > { %4606 = vmatprep.subr.bf16.mxu0 %v5104_v39  ;;  %4633 = vmatprep.subr.bf16.mxu1 %v5104_v39 }
 0x11c   : > { %1440 = vmatmul.mubr.f32.vlgmr.msra.gmra.mrb[32].mxu0 %v5107_v58  ;;  %1635 = vmatmul.mubr.f32.vlgmr.msra.gmra.mrb[32].mxu1 %v5107_v58  ;;  %v4139_v58 = vld [vmem:[%s7314_s1 + $0x410] sm:$0xff] }
 0x11d   : > { %4608 = vmatpush1.bf16.msra.mxu0 %v4607_v46  ;;  %4635 = vmatpush1.bf16.msra.mxu1 %v4634_v47  ;;  %v4640_v56 = vpack.c.bf16 %v4140_v55, %v4139_v58  ;;  %v4631_v46 = vpack.c.bf16 %v4122_v38, %v4121_v37  ;;  %v4658_v47 = vpack.c.bf16 %v4152_v41, %v4151_v40  ;;  %v4167_v55 = vld [vmem:[%s7314_s1 + $0x490] sm:$0xff]  ;;  %v4210_v37 = vld [vmem:[%s7314_s1 + $0x588] sm:$0xff]  ;;  %v4181_v40 = vld [vmem:[%s7314_s1 + $0x500] sm:$0xff] }
 0x11e   : > { %4064 = vmatprep.mubr.msk.f32.mxu0 %vm339_vm0, %v5522_v62  ;;  %4094 = vmatprep.mubr.msk.f32.mxu1 %vm339_vm0, %v5522_v62  ;;  %v4613_v62 = vpack.c.bf16 %v4110_v54, %v4109_v53  ;;  %v4196_v53 = vld [vmem:[%s7314_s1 + $0x518] sm:$0xff]  ;;  %v4182_v41 = vld [vmem:[%s7314_s1 + $0x508] sm:$0xff] }
 0x11f   : > { %4609 = vmatprep.subr.bf16.mxu0 %v5104_v39  ;;  %4636 = vmatprep.subr.bf16.mxu1 %v5104_v39 }
 0x120   : > { %1445 = vmatmul.mubr.f32.gmra.mrb[34].mxu0 %v5678_v14  ;;  %1640 = vmatmul.mubr.f32.gmra.mrb[34].mxu1 %v5678_v14 }
 0x121   : > { %4611 = vmatpush1.bf16.msra.mxu0 %v4610_v51  ;;  %4638 = vmatpush1.bf16.msra.mxu1 %v4637_v52  ;;  %v4166_v51 = vld [vmem:[%s7314_s1 + $0x488] sm:$0xff]  ;;  %v4195_v52 = vld [vmem:[%s7314_s1 + $0x510] sm:$0xff] }
 0x122   : > { %4065 = vmatprep.mubr.msk.f32.mxu0 %vm339_vm0, %v5676_v10  ;;  %4095 = vmatprep.mubr.msk.f32.mxu1 %vm339_vm0, %v5676_v10  ;;  %v4661_v54 = vpack.c.bf16 %v4166_v51, %v4165_v48  ;;  %v4688_v58 = vpack.c.bf16 %v4196_v53, %v4195_v52  ;;  %v4255_v48 = vld [vmem:[%s7314_s1 + $0x630] sm:$0xff]  ;;  %v4228_v52 = vld [vmem:[%s7314_s1 + $0x5b8] sm:$0xff]  ;;  %v4257_v53 = vld [vmem:[%s7314_s1 + $0x640] sm:$0xff] }
 0x123   : > { %4612 = vmatprep.subr.bf16.mxu0 %v5104_v39  ;;  %4639 = vmatprep.subr.bf16.mxu1 %v5104_v39  ;;  %v4227_v51 = vld [vmem:[%s7314_s1 + $0x5b0] sm:$0xff] }
 0x124   : > { %1450 = vmatmul.mubr.f32.gmra.mrb[36].mxu0 %v5693_v20  ;;  %1645 = vmatmul.mubr.f32.gmra.mrb[36].mxu1 %v5693_v20 }
 0x125   : > { %4614 = vmatpush1.bf16.msra.mxu0 %v4613_v62  ;;  %4641 = vmatpush1.bf16.msra.mxu1 %v4640_v56  ;;  %v4168_v62 = vld [vmem:[%s7314_s1 + $0x498] sm:$0xff]  ;;  %v4197_v56 = vld [vmem:[%s7314_s1 + $0x520] sm:$0xff] }
 0x126   : > { %4066 = vmatprep.mubr.msk.f32.mxu0 %vm339_vm0, %v5690_v19  ;;  %4096 = vmatprep.mubr.msk.f32.mxu1 %vm339_vm0, %v5690_v19  ;;  %v4664_v60 = vpack.c.bf16 %v4168_v62, %v4167_v55  ;;  %v4691_v61 = vpack.c.bf16 %v4198_v57, %v4197_v56  ;;  %v4229_v62 = vld [vmem:[%s7314_s1 + $0x5c0] sm:$0xff]  ;;  %v4230_v56 = vld [vmem:[%s7314_s1 + $0x5c8] sm:$0xff]  ;;  %v4259_v57 = vld [vmem:[%s7314_s1 + $0x650] sm:$0xff] }
 0x127   : > { %4615 = vmatprep.subr.bf16.mxu0 %v5104_v39  ;;  %4642 = vmatprep.subr.bf16.mxu1 %v5104_v39 }
 0x128   : > { %1455 = vmatmul.mubr.f32.gmra.mrb[38].mxu0 %v6012_v5  ;;  %1650 = vmatmul.mubr.f32.gmra.mrb[38].mxu1 %v6012_v5 }
 0x129   : > { %4617 = vmatpush1.bf16.msra.mxu0 %v4616_v63  ;;  %4644 = vmatpush1.bf16.msra.mxu1 %v4643_v0  ;;  %v4169_v63 = vld [vmem:[%s7314_s1 + $0x4a0] sm:$0xff]  ;;  %v4170_v0 = vld [vmem:[%s7314_s1 + $0x4a8] sm:$0xff] }
 0x12a   : > { %4067 = vmatprep.mubr.msk.f32.mxu0 %vm339_vm0, %v5702_v23  ;;  %4097 = vmatprep.mubr.msk.f32.mxu1 %vm339_vm0, %v5702_v23  ;;  %v4667_v3 = vpack.c.bf16 %v4170_v0, %v4169_v63  ;;  %v6333_v63 = vld [vmem:[#allocation2 + $0x28] sm:$0xff]  ;;  %v4721_v0 = vpack.c.bf16 %v4230_v56, %v4229_v62  ;;  %v4288_v62 = vld [vmem:[%s7314_s1 + $0x6d8] sm:$0xff]  ;;  %v4317_v56 = vld [vmem:[%s7314_s1 + $0x760] sm:$0xff] }
 0x12b   : > { %4618 = vmatprep.subr.bf16.mxu0 %v5104_v39  ;;  %4645 = vmatprep.subr.bf16.mxu1 %v5104_v39 }
 0x12c   : > { %1459 = vmatmul.mubr.f32.gmra.mrb[40].mxu0 %v6012_v5  ;;  %1654 = vmatmul.mubr.f32.gmra.mrb[40].mxu1 %v6012_v5 }
 0x12d   : > { %4620 = vmatpush1.bf16.msra.mxu0 %v4619_v6  ;;  %4647 = vmatpush1.bf16.msra.mxu1 %v4646_v7  ;;  %v4171_v6 = vld [vmem:[%s7314_s1 + $0x4b0] sm:$0xff]  ;;  %v4172_v7 = vld [vmem:[%s7314_s1 + $0x4b8] sm:$0xff] }
 0x12e   : > { %4068 = vmatprep.mubr.msk.f32.mxu0 %vm339_vm0, %v5712_v26  ;;  %4098 = vmatprep.mubr.msk.f32.mxu1 %vm339_vm0, %v5712_v26 }
 0x12f   : > { %4621 = vmatprep.subr.bf16.mxu0 %v5104_v39  ;;  %4648 = vmatprep.subr.bf16.mxu1 %v5104_v39 }
 0x130   : > { %1464 = vmatmul.mubr.f32.gmra.mrb[42].mxu0 %v5728_v34  ;;  %1659 = vmatmul.mubr.f32.gmra.mrb[42].mxu1 %v5728_v34 }
 0x131   : > { %4623 = vmatpush1.bf16.msra.mxu0 %v4622_v15  ;;  %4650 = vmatpush1.bf16.msra.mxu1 %v4649_v16  ;;  %v4204_v15 = vld [vmem:[%s7314_s1 + $0x558] sm:$0xff] }
 0x132   : > { %4069 = vmatprep.mubr.msk.f32.mxu0 %vm339_vm0, %v5726_v31  ;;  %4099 = vmatprep.mubr.msk.f32.mxu1 %vm339_vm0, %v5726_v31  ;;  %v683_v44 = vpop.f32.mrb[0].mxu0 }
 0x133   : > { %4624 = vmatprep.subr.bf16.mxu0 %v5104_v39  ;;  %4651 = vmatprep.subr.bf16.mxu1 %v5104_v39  ;;  %v6099_v45 = vpop.f32.mrb[0].mxu1  ;;  %v720_v49 = vadd.f32 %v718_v42, %v683_v44  ;;  %v685_v12 = vpop.f32.mrb[1].mxu0  ;;  %v4212_v42 = vld [vmem:[%s7314_s1 + $0x598] sm:$0xff]  ;;  %v4685_v44 = vpack.c.bf16 %v4182_v41, %v4181_v40  ;;  %v4270_v40 = vld [vmem:[%s7314_s1 + $0x6a8] sm:$0xff]  ;;  %v6445_v41 = vld [vmem:[#allocation2 + $0x60] sm:$0xff] }
 0x134   : > { %1469 = vmatmul.mubr.f32.gmra.mrb[44].mxu0 %v5740_v36  ;;  %1664 = vmatmul.mubr.f32.gmra.mrb[44].mxu1 %v5740_v36  ;;  %v858_v50 = vpop.f32.mrb[1].mxu1 }
 0x135   : > { %4626 = vmatpush1.bf16.msra.mxu0 %v4625_v24  ;;  %4653 = vmatpush1.bf16.msra.mxu1 %v4652_v25  ;;  %722 = vst.msk [vmem:[%s5356_s26] sm:$0xff] %vm339_vm0, %v720_v49  ;;  %v4703_v24 = vpack.c.bf16 %v4206_v22, %v4205_v21  ;;  %v4177_v25 = vld [vmem:[%s7314_s1 + $0x4e0] sm:$0xff]  ;;  %v4256_v49 = vld [vmem:[%s7314_s1 + $0x638] sm:$0xff]  ;;  %v4266_v22 = vld [vmem:[%s7314_s1 + $0x688] sm:$0xff] }
 0x136   : > { %4627 = vmatprep.subr.bf16.mxu0 %v5104_v39  ;;  %4654 = vmatprep.subr.bf16.mxu1 %v5104_v39  ;;  %v4742_v50 = vpack.c.bf16 %v4256_v49, %v4255_v48  ;;  %v4265_v21 = vld [vmem:[%s7314_s1 + $0x680] sm:$0xff]  ;;  %v4272_v48 = vld [vmem:[%s7314_s1 + $0x6b8] sm:$0xff] }
 0x137   : > { %4070 = vmatprep.mubr.msk.f32.mxu0 %vm339_vm0, %v5738_v35  ;;  %4100 = vmatprep.mubr.msk.f32.mxu1 %vm339_vm0, %v5738_v35 }
 0x138   : > { %1474 = vmatmul.mubr.f32.gmra.mrb[46].mxu0 %v6012_v5  ;;  %1669 = vmatmul.mubr.f32.gmra.mrb[46].mxu1 %v6012_v5 }
 0x139   : > { %4629 = vmatpush1.bf16.msra.mxu0 %v4628_v32  ;;  %4656 = vmatpush1.bf16.msra.mxu1 %v4655_v33  ;;  %v4179_v32 = vld [vmem:[%s7314_s1 + $0x4f0] sm:$0xff]  ;;  %v4180_v33 = vld [vmem:[%s7314_s1 + $0x4f8] sm:$0xff] }
 0x13a   : > { %4630 = vmatprep.subr.bf16.mxu0 %v5104_v39  ;;  %4657 = vmatprep.subr.bf16.mxu1 %v5104_v39 }
 0x13b   : > { %4123 = vmatprep.mubr.msk.f32.mxu0 %vm339_vm0, %v6097_v43  ;;  %4153 = vmatprep.mubr.msk.f32.mxu1 %vm339_vm0, %v6097_v43 }
 0x13d   : > { %4632 = vmatpush1.bf16.msra.mxu0 %v4631_v46  ;;  %4659 = vmatpush1.bf16.msra.mxu1 %v4658_v47  ;;  %v4225_v47 = vld [vmem:[%s7314_s1 + $0x5a0] sm:$0xff] }
 0x13e   : > { %4660 = vmatprep.subr.bf16.mxu0 %v5104_v39  ;;  %4687 = vmatprep.subr.bf16.mxu1 %v5104_v39 }
 0x140   : > { %1830 = vmatmul.mubr.f32.vlgmr.msra.gmra.mrb[48].mxu0 %v6012_v5  ;;  %2025 = vmatmul.mubr.f32.vlgmr.msra.gmra.mrb[48].mxu1 %v6012_v5 }
 0x141   : > { %4662 = vmatpush1.bf16.msra.mxu0 %v4661_v54  ;;  %4689 = vmatpush1.bf16.msra.mxu1 %v4688_v58  ;;  %v4258_v54 = vld [vmem:[%s7314_s1 + $0x648] sm:$0xff]  ;;  %v4718_v58 = vpack.c.bf16 %v4228_v52, %v4227_v51  ;;  %v4315_v52 = vld [vmem:[%s7314_s1 + $0x750] sm:$0xff] }
 0x142   : > { %4124 = vmatprep.mubr.msk.f32.mxu0 %vm339_vm0, %v6135_v59  ;;  %4154 = vmatprep.mubr.msk.f32.mxu1 %vm339_vm0, %v6135_v59  ;;  %v4745_v55 = vpack.c.bf16 %v4258_v54, %v4257_v53  ;;  %v4286_v51 = vld [vmem:[%s7314_s1 + $0x6c8] sm:$0xff]  ;;  %v4316_v53 = vld [vmem:[%s7314_s1 + $0x758] sm:$0xff] }
 0x143   : > { %4663 = vmatprep.subr.bf16.mxu0 %v5104_v39  ;;  %4690 = vmatprep.subr.bf16.mxu1 %v5104_v39 }
 0x144   : > { %1835 = vmatmul.mubr.f32.gmra.mrb[50].mxu0 %v5678_v14  ;;  %2030 = vmatmul.mubr.f32.gmra.mrb[50].mxu1 %v5678_v14  ;;  %v4201_v14 = vld [vmem:[%s7314_s1 + $0x540] sm:$0xff] }
 0x145   : > { %4665 = vmatpush1.bf16.msra.mxu0 %v4664_v60  ;;  %4692 = vmatpush1.bf16.msra.mxu1 %v4691_v61  ;;  %v4697_v9 = vpack.c.bf16 %v4202_v8, %v4201_v14  ;;  %v4260_v60 = vld [vmem:[%s7314_s1 + $0x658] sm:$0xff]  ;;  %v6329_v61 = vld [vmem:[#allocation2 + $0x10] sm:$0xff] }
 0x146   : > { %4125 = vmatprep.mubr.msk.f32.mxu0 %vm339_vm0, %v5676_v10  ;;  %4155 = vmatprep.mubr.msk.f32.mxu1 %vm339_vm0, %v5676_v10  ;;  %v4670_v10 = vpack.c.bf16 %v4172_v7, %v4171_v6  ;;  %v4748_v1 = vpack.c.bf16 %v4260_v60, %v4259_v57  ;;  %v4262_v6 = vld [vmem:[%s7314_s1 + $0x668] sm:$0xff]  ;;  %v6353_v7 = vld [vmem:[#allocation2 + $0x20] sm:$0xff]  ;;  %v6357_v14 = vld [vmem:[#allocation2 + $0x38] sm:$0xff] }
 0x147   : > { %4666 = vmatprep.subr.bf16.mxu0 %v5104_v39  ;;  %4693 = vmatprep.subr.bf16.mxu1 %v5104_v39  ;;  %v4318_v57 = vld [vmem:[%s7314_s1 + $0x768] sm:$0xff] }
 0x148   : > { %1840 = vmatmul.mubr.f32.gmra.mrb[52].mxu0 %v5693_v20  ;;  %2035 = vmatmul.mubr.f32.gmra.mrb[52].mxu1 %v5693_v20  ;;  %v4203_v20 = vld [vmem:[%s7314_s1 + $0x550] sm:$0xff] }
 0x149   : > { %4668 = vmatpush1.bf16.msra.mxu0 %v4667_v3  ;;  %4695 = vmatpush1.bf16.msra.mxu1 %v4694_v4  ;;  %v4700_v16 = vpack.c.bf16 %v4204_v15, %v4203_v20  ;;  %v4232_v3 = vld [vmem:[%s7314_s1 + $0x5d8] sm:$0xff]  ;;  %v4261_v4 = vld [vmem:[%s7314_s1 + $0x660] sm:$0xff]  ;;  %v6379_v15 = vld [vmem:[#allocation2 + $0x48] sm:$0xff] }
 0x14a   : > { %4126 = vmatprep.mubr.msk.f32.mxu0 %vm339_vm0, %v5690_v19  ;;  %4156 = vmatprep.mubr.msk.f32.mxu1 %vm339_vm0, %v5690_v19  ;;  %v4673_v19 = vpack.c.bf16 %v4174_v13, %v4173_v11  ;;  %v4724_v8 = vpack.c.bf16 %v4232_v3, %v4231_v2  ;;  %v4234_v11 = vld [vmem:[%s7314_s1 + $0x5e8] sm:$0xff]  ;;  %v4263_v13 = vld [vmem:[%s7314_s1 + $0x670] sm:$0xff]  ;;  %v4264_v20 = vld [vmem:[%s7314_s1 + $0x678] sm:$0xff] }
 0x14b   : > { %4669 = vmatprep.subr.bf16.mxu0 %v5104_v39  ;;  %4696 = vmatprep.subr.bf16.mxu1 %v5104_v39  ;;  %v4290_v2 = vld [vmem:[%s7314_s1 + $0x6e8] sm:$0xff]  ;;  %v4319_v3 = vld [vmem:[%s7314_s1 + $0x770] sm:$0xff] }
 0x14c   : > { %1845 = vmatmul.mubr.f32.gmra.mrb[54].mxu0 %v6012_v5  ;;  %2040 = vmatmul.mubr.f32.gmra.mrb[54].mxu1 %v6012_v5 }
 0x14d   : > { %4671 = vmatpush1.bf16.msra.mxu0 %v4670_v10  ;;  %4698 = vmatpush1.bf16.msra.mxu1 %v4697_v9  ;;  %v4751_v10 = vpack.c.bf16 %v4262_v6, %v4261_v4  ;;  %v4233_v9 = vld [vmem:[%s7314_s1 + $0x5e0] sm:$0xff]  ;;  %v4320_v4 = vld [vmem:[%s7314_s1 + $0x778] sm:$0xff] }
 0x14e   : > { %4127 = vmatprep.mubr.msk.f32.mxu0 %vm339_vm0, %v5702_v23  ;;  %4157 = vmatprep.mubr.msk.f32.mxu1 %vm339_vm0, %v5702_v23  ;;  %v4676_v23 = vpack.c.bf16 %v4176_v18, %v4175_v17  ;;  %v4235_v17 = vld [vmem:[%s7314_s1 + $0x5f0] sm:$0xff]  ;;  %v4236_v18 = vld [vmem:[%s7314_s1 + $0x5f8] sm:$0xff] }
 0x14f   : > { %4672 = vmatprep.subr.bf16.mxu0 %v5104_v39  ;;  %4699 = vmatprep.subr.bf16.mxu1 %v5104_v39 }
 0x150   : > { %1849 = vmatmul.mubr.f32.gmra.mrb[56].mxu0 %v6012_v5  ;;  %2044 = vmatmul.mubr.f32.gmra.mrb[56].mxu1 %v6012_v5 }
 0x151   : > { %4674 = vmatpush1.bf16.msra.mxu0 %v4673_v19  ;;  %4701 = vmatpush1.bf16.msra.mxu1 %v4700_v16  ;;  %v4727_v19 = vpack.c.bf16 %v4234_v11, %v4233_v9  ;;  %v4754_v16 = vpack.c.bf16 %v4264_v20, %v4263_v13  ;;  %v4292_v9 = vld [vmem:[%s7314_s1 + $0x6f8] sm:$0xff]  ;;  %v4321_v11 = vld [vmem:[%s7314_s1 + $0x780] sm:$0xff]  ;;  %v4322_v13 = vld [vmem:[%s7314_s1 + $0x788] sm:$0xff] }
 0x152   : > { %4128 = vmatprep.mubr.msk.f32.mxu0 %vm339_vm0, %v5712_v26  ;;  %4158 = vmatprep.mubr.msk.f32.mxu1 %vm339_vm0, %v5712_v26  ;;  %v4679_v26 = vpack.c.bf16 %v4178_v27, %v4177_v25  ;;  %v4757_v25 = vpack.c.bf16 %v4266_v22, %v4265_v21  ;;  %v4237_v27 = vld [vmem:[%s7314_s1 + $0x600] sm:$0xff]  ;;  %v4324_v21 = vld [vmem:[%s7314_s1 + $0x798] sm:$0xff] }
 0x153   : > { %4675 = vmatprep.subr.bf16.mxu0 %v5104_v39  ;;  %4702 = vmatprep.subr.bf16.mxu1 %v5104_v39 }
 0x154   : > { %1854 = vmatmul.mubr.f32.gmra.mrb[58].mxu0 %v5728_v34  ;;  %2049 = vmatmul.mubr.f32.gmra.mrb[58].mxu1 %v5728_v34  ;;  %v4209_v34 = vld [vmem:[%s7314_s1 + $0x580] sm:$0xff] }
 0x155   : > { %4677 = vmatpush1.bf16.msra.mxu0 %v4676_v23  ;;  %4704 = vmatpush1.bf16.msra.mxu1 %v4703_v24  ;;  %v4709_v38 = vpack.c.bf16 %v4210_v37, %v4209_v34  ;;  %v6401_v23 = vld [vmem:[#allocation2 + $0x58] sm:$0xff]  ;;  %v4730_v24 = vpack.c.bf16 %v4236_v18, %v4235_v17  ;;  %v4239_v37 = vld [vmem:[%s7314_s1 + $0x610] sm:$0xff]  ;;  %v4294_v17 = vld [vmem:[%s7314_s1 + $0x708] sm:$0xff] }
 0x156   : > { %4129 = vmatprep.mubr.msk.f32.mxu0 %vm339_vm0, %v5726_v31  ;;  %4159 = vmatprep.mubr.msk.f32.mxu1 %vm339_vm0, %v5726_v31  ;;  %v4682_v31 = vpack.c.bf16 %v4180_v33, %v4179_v32  ;;  %v6425_v32 = vld [vmem:[#allocation2 + $0x68] sm:$0xff]  ;;  %v4733_v33 = vpack.c.bf16 %v4238_v28, %v4237_v27  ;;  %v4323_v18 = vld [vmem:[%s7314_s1 + $0x790] sm:$0xff]  ;;  %v4296_v27 = vld [vmem:[%s7314_s1 + $0x718] sm:$0xff] }
 0x157   : > { %4678 = vmatprep.subr.bf16.mxu0 %v5104_v39  ;;  %4705 = vmatprep.subr.bf16.mxu1 %v5104_v39  ;;  %v4325_v28 = vld [vmem:[%s7314_s1 + $0x7a0] sm:$0xff] }
 0x158   : > { %1859 = vmatmul.mubr.f32.gmra.mrb[60].mxu0 %v5740_v36  ;;  %2054 = vmatmul.mubr.f32.gmra.mrb[60].mxu1 %v5740_v36  ;;  %v4211_v36 = vld [vmem:[%s7314_s1 + $0x590] sm:$0xff] }
 0x159   : > { %4680 = vmatpush1.bf16.msra.mxu0 %v4679_v26  ;;  %4707 = vmatpush1.bf16.msra.mxu1 %v4706_v30  ;;  %v4712_v46 = vpack.c.bf16 %v4212_v42, %v4211_v36  ;;  %v4268_v26 = vld [vmem:[%s7314_s1 + $0x698] sm:$0xff]  ;;  %v6421_v30 = vld [vmem:[#allocation2 + $0x50] sm:$0xff] }
 0x15a   : > { %4681 = vmatprep.subr.bf16.mxu0 %v5104_v39  ;;  %4708 = vmatprep.subr.bf16.mxu1 %v5104_v39  ;;  %v4760_v34 = vpack.c.bf16 %v4268_v26, %v4267_v29  ;;  %v6449_v36 = vld [vmem:[#allocation2 + $0x78] sm:$0xff]  ;;  %v4326_v29 = vld [vmem:[%s7314_s1 + $0x7a8] sm:$0xff] }
 0x15b   : > { %4130 = vmatprep.mubr.msk.f32.mxu0 %vm339_vm0, %v5738_v35  ;;  %4160 = vmatprep.mubr.msk.f32.mxu1 %vm339_vm0, %v5738_v35  ;;  %v4226_v35 = vld [vmem:[%s7314_s1 + $0x5a8] sm:$0xff] }
 0x15c   : > { %1864 = vmatmul.mubr.f32.gmra.mrb[62].mxu0 %v6012_v5  ;;  %2059 = vmatmul.mubr.f32.gmra.mrb[62].mxu1 %v6012_v5  ;;  %v4715_v12 = vpack.c.bf16 %v4226_v35, %v4225_v47  ;;  %v4242_v47 = vld [vmem:[%s7314_s1 + $0x628] sm:$0xff]  ;;  %v4271_v35 = vld [vmem:[%s7314_s1 + $0x6b0] sm:$0xff] }
 0x15d   : > { %4683 = vmatpush1.bf16.msra.mxu0 %v4682_v31  ;;  %4710 = vmatpush1.bf16.msra.mxu1 %v4709_v38  ;;  %v4240_v31 = vld [vmem:[%s7314_s1 + $0x618] sm:$0xff]  ;;  %v4269_v38 = vld [vmem:[%s7314_s1 + $0x6a0] sm:$0xff] }
 0x15e   : > { %4684 = vmatprep.subr.bf16.mxu0 %v5104_v39  ;;  %4711 = vmatprep.subr.bf16.mxu1 %v5104_v39  ;;  %v4736_v42 = vpack.c.bf16 %v4240_v31, %v4239_v37  ;;  %v4298_v37 = vld [vmem:[%s7314_s1 + $0x728] sm:$0xff]  ;;  %v4327_v31 = vld [vmem:[%s7314_s1 + $0x7b0] sm:$0xff] }
 0x15f   : > { %4183 = vmatprep.mubr.msk.f32.mxu0 %vm339_vm0, %v6097_v43  ;;  %4213 = vmatprep.mubr.msk.f32.mxu1 %vm339_vm0, %v6097_v43 }
 0x161   : > { %4686 = vmatpush1.bf16.msra.mxu0 %v4685_v44  ;;  %4713 = vmatpush1.bf16.msra.mxu1 %v4712_v46  ;;  %v4763_v44 = vpack.c.bf16 %v4270_v40, %v4269_v38  ;;  %v4241_v46 = vld [vmem:[%s7314_s1 + $0x620] sm:$0xff]  ;;  %v4328_v38 = vld [vmem:[%s7314_s1 + $0x7b8] sm:$0xff]  ;;  %v719_v40 = vld [vmem:[%s5356_s26 + $0x8] sm:$0xff] }
 0x162   : > { %4714 = vmatprep.subr.bf16.mxu0 %v5104_v39  ;;  %4741 = vmatprep.subr.bf16.mxu1 %v5104_v39  ;;  %v4739_v49 = vpack.c.bf16 %v4242_v47, %v4241_v46  ;;  %v4814_v46 = vpack.c.bf16 %v4328_v38, %v4327_v31  ;;  %v4299_v47 = vld [vmem:[%s7314_s1 + $0x730] sm:$0xff]  ;;  %v4349_v38 = vld [vmem:[%s7314_s1 + $0x800] sm:$0xff] }
 0x163   : > { %v3951_v31 = vld [vmem:[%s5356_s26 + $0x10] sm:$0xff] }
 0x164   : > { %2220 = vmatmul.mubr.f32.vlgmr.msra.gmra.mrb[64].mxu0 %v6012_v5  ;;  %2392 = vmatmul.mubr.f32.vlgmr.msra.gmra.mrb[64].mxu1 %v6012_v5 }
 0x165   : > { %4716 = vmatpush1.bf16.msra.mxu0 %v4715_v12  ;;  %4743 = vmatpush1.bf16.msra.mxu1 %v4742_v50  ;;  %v4766_v12 = vpack.c.bf16 %v4272_v48, %v4271_v35  ;;  %v4285_v50 = vld [vmem:[%s7314_s1 + $0x6c0] sm:$0xff] }
 0x166   : > { %4184 = vmatprep.mubr.msk.f32.mxu0 %vm339_vm0, %v6135_v59  ;;  %4214 = vmatprep.mubr.msk.f32.mxu1 %vm339_vm0, %v6135_v59  ;;  %v4769_v54 = vpack.c.bf16 %v4286_v51, %v4285_v50  ;;  %v893_v51 = vld [vmem:[%s5356_s26] sm:$0xff] }
 0x167   : > { %4717 = vmatprep.subr.bf16.mxu0 %v5104_v39  ;;  %4744 = vmatprep.subr.bf16.mxu1 %v5104_v39 }
 0x168   : > { %2224 = vmatmul.mubr.f32.gmra.mrb[66].mxu0 %v6329_v61  ;;  %2396 = vmatmul.mubr.f32.gmra.mrb[66].mxu1 %v6329_v61 }
 0x169   : > { %4719 = vmatpush1.bf16.msra.mxu0 %v4718_v58  ;;  %4746 = vmatpush1.bf16.msra.mxu1 %v4745_v55  ;;  %v4796_v58 = vpack.c.bf16 %v4316_v53, %v4315_v52  ;;  %v4287_v55 = vld [vmem:[%s7314_s1 + $0x6d0] sm:$0xff] }
 0x16a   : > { %4185 = vmatprep.mubr.msk.f32.mxu0 %vm339_vm0, %v6333_v63  ;;  %4215 = vmatprep.mubr.msk.f32.mxu1 %vm339_vm0, %v6333_v63  ;;  %v4772_v60 = vpack.c.bf16 %v4288_v62, %v4287_v55 }
 0x16b   : > { %4720 = vmatprep.subr.bf16.mxu0 %v5104_v39  ;;  %4747 = vmatprep.subr.bf16.mxu1 %v5104_v39 }
 0x16c   : > { %2229 = vmatmul.mubr.f32.gmra.mrb[68].mxu0 %v6353_v7  ;;  %2401 = vmatmul.mubr.f32.gmra.mrb[68].mxu1 %v6353_v7 }
 0x16d   : > { %4722 = vmatpush1.bf16.msra.mxu0 %v4721_v0  ;;  %4749 = vmatpush1.bf16.msra.mxu1 %v4748_v1  ;;  %v4799_v0 = vpack.c.bf16 %v4318_v57, %v4317_v56  ;;  %v4289_v1 = vld [vmem:[%s7314_s1 + $0x6e0] sm:$0xff] }
 0x16e   : > { %4186 = vmatprep.mubr.msk.f32.mxu0 %vm339_vm0, %v6357_v14  ;;  %4216 = vmatprep.mubr.msk.f32.mxu1 %vm339_vm0, %v6357_v14  ;;  %v4775_v6 = vpack.c.bf16 %v4290_v2, %v4289_v1  ;;  %v4301_v56 = vld [vmem:[%s7314_s1 + $0x740] sm:$0xff]  ;;  %v4332_v1 = vld [vmem:[%s7314_s1 + $0x7d8] sm:$0xff] }
 0x16f   : > { %4723 = vmatprep.subr.bf16.mxu0 %v5104_v39  ;;  %4750 = vmatprep.subr.bf16.mxu1 %v5104_v39 }
 0x170   : > { %2234 = vmatmul.mubr.f32.gmra.mrb[70].mxu0 %v6012_v5  ;;  %2406 = vmatmul.mubr.f32.gmra.mrb[70].mxu1 %v6012_v5 }
 0x171   : > { %4725 = vmatpush1.bf16.msra.mxu0 %v4724_v8  ;;  %4752 = vmatpush1.bf16.msra.mxu1 %v4751_v10  ;;  %v4802_v8 = vpack.c.bf16 %v4320_v4, %v4319_v3  ;;  %v4291_v10 = vld [vmem:[%s7314_s1 + $0x6f0] sm:$0xff]  ;;  %v4345_v4 = vld [vmem:[%s7314_s1 + $0x7e0] sm:$0xff] }
 0x172   : > { %4187 = vmatprep.mubr.msk.f32.mxu0 %vm339_vm0, %v6379_v15  ;;  %4217 = vmatprep.mubr.msk.f32.mxu1 %vm339_vm0, %v6379_v15  ;;  %v4778_v20 = vpack.c.bf16 %v4292_v9, %v4291_v10  ;;  %v4376_v10 = vld [vmem:[%s7314_s1 + $0x878] sm:$0xff] }
 0x173   : > { %4726 = vmatprep.subr.bf16.mxu0 %v5104_v39  ;;  %4753 = vmatprep.subr.bf16.mxu1 %v5104_v39 }
 0x174   : > { %2238 = vmatmul.mubr.f32.gmra.mrb[72].mxu0 %v6012_v5  ;;  %2411 = vmatmul.mubr.f32.gmra.mrb[72].mxu1 %v6012_v5 }
 0x175   : > { %4728 = vmatpush1.bf16.msra.mxu0 %v4727_v19  ;;  %4755 = vmatpush1.bf16.msra.mxu1 %v4754_v16  ;;  %v4805_v19 = vpack.c.bf16 %v4322_v13, %v4321_v11  ;;  %v4293_v16 = vld [vmem:[%s7314_s1 + $0x700] sm:$0xff] }
 0x176   : > { %4188 = vmatprep.mubr.msk.f32.mxu0 %vm339_vm0, %v6401_v23  ;;  %4218 = vmatprep.mubr.msk.f32.mxu1 %vm339_vm0, %v6401_v23  ;;  %v4781_v22 = vpack.c.bf16 %v4294_v17, %v4293_v16 }
 0x177   : > { %4729 = vmatprep.subr.bf16.mxu0 %v5104_v39  ;;  %4756 = vmatprep.subr.bf16.mxu1 %v5104_v39 }
 0x178   : > { %2242 = vmatmul.mubr.f32.gmra.mrb[74].mxu0 %v6421_v30  ;;  %2415 = vmatmul.mubr.f32.gmra.mrb[74].mxu1 %v6421_v30 }
 0x179   : > { %4731 = vmatpush1.bf16.msra.mxu0 %v4730_v24  ;;  %4758 = vmatpush1.bf16.msra.mxu1 %v4757_v25  ;;  %v4808_v24 = vpack.c.bf16 %v4324_v21, %v4323_v18  ;;  %v4295_v25 = vld [vmem:[%s7314_s1 + $0x710] sm:$0xff] }
 0x17a   : > { %4189 = vmatprep.mubr.msk.f32.mxu0 %vm339_vm0, %v6425_v32  ;;  %4219 = vmatprep.mubr.msk.f32.mxu1 %vm339_vm0, %v6425_v32  ;;  %v4784_v26 = vpack.c.bf16 %v4296_v27, %v4295_v25  ;;  %v4347_v21 = vld [vmem:[%s7314_s1 + $0x7f0] sm:$0xff]  ;;  %v4378_v25 = vld [vmem:[%s7314_s1 + $0x888] sm:$0xff] }
 0x17b   : > { %4732 = vmatprep.subr.bf16.mxu0 %v5104_v39  ;;  %4759 = vmatprep.subr.bf16.mxu1 %v5104_v39 }
 0x17c   : > { %2247 = vmatmul.mubr.f32.gmra.mrb[76].mxu0 %v6445_v41  ;;  %2420 = vmatmul.mubr.f32.gmra.mrb[76].mxu1 %v6445_v41 }
 0x17d   : > { %4734 = vmatpush1.bf16.msra.mxu0 %v4733_v33  ;;  %4761 = vmatpush1.bf16.msra.mxu1 %v4760_v34  ;;  %v4811_v33 = vpack.c.bf16 %v4326_v29, %v4325_v28  ;;  %v4297_v34 = vld [vmem:[%s7314_s1 + $0x720] sm:$0xff] }
 0x17e   : > { %4220 = vmatprep.mubr.msk.f32.mxu1 %vm339_vm0, %v6449_v36  ;;  %4735 = vmatprep.subr.bf16.mxu0 %v5104_v39 }
 0x17f   : > { %4762 = vmatprep.subr.bf16.mxu1 %v5104_v39  ;;  %4190 = vmatprep.mubr.msk.f32.mxu0 %vm339_vm0, %v6449_v36 }
 0x180   : > { %2425 = vmatmul.mubr.f32.gmra.mrb[78].mxu1 %v6012_v5  ;;  %2252 = vmatmul.mubr.f32.gmra.mrb[78].mxu0 %v6012_v5 }
 0x181   : > { %4737 = vmatpush1.bf16.msra.mxu0 %v4736_v42  ;;  %4764 = vmatpush1.bf16.msra.mxu1 %v4763_v44  ;;  %v899_v42 = vrot.slane %v6099_v45, 1  ;;  %v4787_v44 = vpack.c.bf16 %v4298_v37, %v4297_v34  ;;  %v4300_v45 = vld [vmem:[%s7314_s1 + $0x738] sm:$0xff] }
 0x182   : > { %4738 = vmatprep.subr.bf16.mxu0 %v5104_v39  ;;  %4765 = vmatprep.subr.bf16.mxu1 %v5104_v39  ;;  %v4790_v55 = vpack.c.bf16 %v4300_v45, %v4299_v47 }
 0x183   : > { %4243 = vmatprep.mubr.msk.f32.mxu0 %vm339_vm0, %v6097_v43  ;;  %4273 = vmatprep.mubr.msk.f32.mxu1 %vm339_vm0, %v6097_v43 }
 0x185   : > { %4740 = vmatpush1.bf16.msra.mxu0 %v4739_v49  ;;  %4767 = vmatpush1.bf16.msra.mxu1 %v4766_v12  ;;  %v4329_v49 = vld [vmem:[%s7314_s1 + $0x7c0] sm:$0xff]  ;;  %v4330_v12 = vld [vmem:[%s7314_s1 + $0x7c8] sm:$0xff] }
 0x186   : > { %4768 = vmatprep.subr.bf16.mxu0 %v5104_v39  ;;  %4795 = vmatprep.subr.bf16.mxu1 %v5104_v39  ;;  %v4817_v62 = vpack.c.bf16 %v4330_v12, %v4329_v49  ;;  %v4351_v49 = vld [vmem:[%s7314_s1 + $0x810] sm:$0xff]  ;;  %v4381_v12 = vld [vmem:[%s7314_s1 + $0x8a0] sm:$0xff] }
 0x188   : > { %2586 = vmatmul.mubr.f32.vlgmr.msra.gmra.mrb[80].mxu0 %v6012_v5  ;;  %2780 = vmatmul.mubr.f32.vlgmr.msra.gmra.mrb[80].mxu1 %v6012_v5 }
 0x189   : > { %4770 = vmatpush1.bf16.msra.mxu0 %v4769_v54  ;;  %4797 = vmatpush1.bf16.msra.mxu1 %v4796_v58 }
 0x18a   : > { %4244 = vmatprep.mubr.msk.f32.mxu0 %vm339_vm0, %v6135_v59  ;;  %4274 = vmatprep.mubr.msk.f32.mxu1 %vm339_vm0, %v6135_v59 }
 0x18b   : > { %4771 = vmatprep.subr.bf16.mxu0 %v5104_v39  ;;  %4798 = vmatprep.subr.bf16.mxu1 %v5104_v39 }
 0x18c   : > { %2590 = vmatmul.mubr.f32.gmra.mrb[82].mxu0 %v6329_v61  ;;  %2784 = vmatmul.mubr.f32.gmra.mrb[82].mxu1 %v6329_v61 }
 0x18d   : > { %4773 = vmatpush1.bf16.msra.mxu0 %v4772_v60  ;;  %4800 = vmatpush1.bf16.msra.mxu1 %v4799_v0  ;;  %v4302_v60 = vld [vmem:[%s7314_s1 + $0x748] sm:$0xff]  ;;  %v4331_v0 = vld [vmem:[%s7314_s1 + $0x7d0] sm:$0xff] }
 0x18e   : > { %4245 = vmatprep.mubr.msk.f32.mxu0 %vm339_vm0, %v6333_v63  ;;  %4275 = vmatprep.mubr.msk.f32.mxu1 %vm339_vm0, %v6333_v63  ;;  %v4793_v2 = vpack.c.bf16 %v4302_v60, %v4301_v56  ;;  %v4820_v3 = vpack.c.bf16 %v4332_v1, %v4331_v0  ;;  %v4356_v1 = vld [vmem:[%s7314_s1 + $0x838] sm:$0xff] }
 0x18f   : > { %4774 = vmatprep.subr.bf16.mxu0 %v5104_v39  ;;  %4801 = vmatprep.subr.bf16.mxu1 %v5104_v39 }
 0x190   : > { %2595 = vmatmul.mubr.f32.gmra.mrb[84].mxu0 %v6353_v7  ;;  %2789 = vmatmul.mubr.f32.gmra.mrb[84].mxu1 %v6353_v7 }
 0x191   : > { %4776 = vmatpush1.bf16.msra.mxu0 %v4775_v6  ;;  %4803 = vmatpush1.bf16.msra.mxu1 %v4802_v8  ;;  %v4346_v6 = vld [vmem:[%s7314_s1 + $0x7e8] sm:$0xff]  ;;  %v4375_v8 = vld [vmem:[%s7314_s1 + $0x870] sm:$0xff] }
 0x192   : > { %4246 = vmatprep.mubr.msk.f32.mxu0 %vm339_vm0, %v6357_v14  ;;  %4276 = vmatprep.mubr.msk.f32.mxu1 %vm339_vm0, %v6357_v14  ;;  %v4823_v17 = vpack.c.bf16 %v4346_v6, %v4345_v4  ;;  %v4850_v18 = vpack.c.bf16 %v4376_v10, %v4375_v8 }
 0x193   : > { %4777 = vmatprep.subr.bf16.mxu0 %v5104_v39  ;;  %4804 = vmatprep.subr.bf16.mxu1 %v5104_v39 }
 0x194   : > { %2600 = vmatmul.mubr.f32.gmra.mrb[86].mxu0 %v6012_v5  ;;  %2794 = vmatmul.mubr.f32.gmra.mrb[86].mxu1 %v6012_v5 }
 0x195   : > { %4779 = vmatpush1.bf16.msra.mxu0 %v4778_v20  ;;  %4806 = vmatpush1.bf16.msra.mxu1 %v4805_v19 }
 0x196   : > { %4247 = vmatprep.mubr.msk.f32.mxu0 %vm339_vm0, %v6379_v15  ;;  %4277 = vmatprep.mubr.msk.f32.mxu1 %vm339_vm0, %v6379_v15 }
 0x197   : > { %4780 = vmatprep.subr.bf16.mxu0 %v5104_v39  ;;  %4807 = vmatprep.subr.bf16.mxu1 %v5104_v39 }
 0x198   : > { %2605 = vmatmul.mubr.f32.gmra.mrb[88].mxu0 %v6012_v5  ;;  %2799 = vmatmul.mubr.f32.gmra.mrb[88].mxu1 %v6012_v5 }
 0x199   : > { %4782 = vmatpush1.bf16.msra.mxu0 %v4781_v22  ;;  %4809 = vmatpush1.bf16.msra.mxu1 %v4808_v24  ;;  %v4377_v24 = vld [vmem:[%s7314_s1 + $0x880] sm:$0xff] }
 0x19a   : > { %4248 = vmatprep.mubr.msk.f32.mxu0 %vm339_vm0, %v6401_v23  ;;  %4278 = vmatprep.mubr.msk.f32.mxu1 %vm339_vm0, %v6401_v23  ;;  %v4853_v37 = vpack.c.bf16 %v4378_v25, %v4377_v24  ;;  %v4390_v24 = vld [vmem:[%s7314_s1 + $0x8e8] sm:$0xff] }
 0x19b   : > { %4783 = vmatprep.subr.bf16.mxu0 %v5104_v39  ;;  %4810 = vmatprep.subr.bf16.mxu1 %v5104_v39 }
 0x19c   : > { %2609 = vmatmul.mubr.f32.gmra.mrb[90].mxu0 %v6421_v30  ;;  %2803 = vmatmul.mubr.f32.gmra.mrb[90].mxu1 %v6421_v30 }
 0x19d   : > { %4785 = vmatpush1.bf16.msra.mxu0 %v4784_v26  ;;  %4812 = vmatpush1.bf16.msra.mxu1 %v4811_v33  ;;  %v688_v35 = vpop.f32.mrb[2].mxu0  ;;  %v861_v48 = vpop.f32.mrb[2].mxu1 }
 0x19e   : > { %4249 = vmatprep.mubr.msk.f32.mxu0 %vm339_vm0, %v6425_v32  ;;  %4279 = vmatprep.mubr.msk.f32.mxu1 %vm339_vm0, %v6425_v32  ;;  %v721_v50 = vadd.f32 %v719_v40, %v688_v35  ;;  %v900_v52 = vrot.slane %v861_v48, 1  ;;  %v690_v53 = vpop.f32.mrb[3].mxu0  ;;  %v863_v54 = vpop.f32.mrb[3].mxu1  ;;  %v4379_v40 = vld [vmem:[%s7314_s1 + $0x890] sm:$0xff] }
 0x19f   : > { %4786 = vmatprep.subr.bf16.mxu0 %v5104_v39  ;;  %4813 = vmatprep.subr.bf16.mxu1 %v5104_v39  ;;  %v4354_v53 = vld [vmem:[%s7314_s1 + $0x828] sm:$0xff]  ;;  %v4384_v54 = vld [vmem:[%s7314_s1 + $0x8b8] sm:$0xff] }
 0x1a0   : > { %2614 = vmatmul.mubr.f32.gmra.mrb[92].mxu0 %v6445_v41  ;;  %2808 = vmatmul.mubr.f32.gmra.mrb[92].mxu1 %v6445_v41  ;;  %723 = vst.msk [vmem:[%s5356_s26 + $0x8] sm:$0xff] %vm339_vm0, %v721_v50  ;;  %v901_v58 = vsel %vm898_vm8, %v899_v42, %v900_v52  ;;  %v4380_v42 = vld [vmem:[%s7314_s1 + $0x898] sm:$0xff]  ;;  %v4382_v50 = vld [vmem:[%s7314_s1 + $0x8a8] sm:$0xff] }
 0x1a1   : > { %4788 = vmatpush1.bf16.msra.mxu0 %v4787_v44  ;;  %4815 = vmatpush1.bf16.msra.mxu1 %v4814_v46  ;;  %v906_v57 = vadd.f32 %v901_v58, %v893_v51  ;;  %v4856_v45 = vpack.c.bf16 %v4380_v42, %v4379_v40  ;;  %v4859_v51 = vpack.c.bf16 %v4382_v50, %v4381_v12  ;;  %v6754_v58 = vld [vmem:[#allocation2] sm:$0xff] }
 0x1a2   : > { %4250 = vmatprep.mubr.msk.f32.mxu0 %vm339_vm0, %v6449_v36  ;;  %4280 = vmatprep.mubr.msk.f32.mxu1 %vm339_vm0, %v6449_v36 }
 0x1a3   : > { %4789 = vmatprep.subr.bf16.mxu0 %v5104_v39  ;;  %4816 = vmatprep.subr.bf16.mxu1 %v5104_v39  ;;  %908 = vst.msk [vmem:[%s5356_s26] sm:$0xff] %vm339_vm0, %v906_v57  ;;  %v4355_v57 = vld [vmem:[%s7314_s1 + $0x830] sm:$0xff] }
 0x1a4   : > { %2619 = vmatmul.mubr.f32.gmra.mrb[94].mxu0 %v6012_v5  ;;  %2813 = vmatmul.mubr.f32.gmra.mrb[94].mxu1 %v6012_v5 }
 0x1a5   : > { %4791 = vmatpush1.bf16.msra.mxu0 %v4790_v55  ;;  %4818 = vmatpush1.bf16.msra.mxu1 %v4817_v62 }
 0x1a6   : > { %4792 = vmatprep.subr.bf16.mxu0 %v5104_v39  ;;  %4819 = vmatprep.subr.bf16.mxu1 %v5104_v39 }
 0x1a7   : > { %v693_v9 = vpop.f32.mrb[4].mxu0  ;;  %v866_v11 = vpop.f32.mrb[4].mxu1  ;;  %4303 = vmatprep.mubr.msk.f32.mxu0 %vm339_vm0, %v6097_v43  ;;  %4333 = vmatprep.mubr.msk.f32.mxu1 %vm339_vm0, %v6097_v43  ;;  %v894_v13 = vld [vmem:[%s5356_s26 + $0x8] sm:$0xff]  ;;  %v4348_v43 = vld [vmem:[%s7314_s1 + $0x7f8] sm:$0xff] }
 0x1a8   : > { %v902_v20 = vrot.slane %v866_v11, 1  ;;  %v694_v19 = vpop.f32.mrb[5].mxu0  ;;  %v868_v16 = vpop.f32.mrb[5].mxu1  ;;  %v4826_v34 = vpack.c.bf16 %v4348_v43, %v4347_v21  ;;  %v4838_v11 = vpack.c.bf16 %v4356_v1, %v4355_v57  ;;  %v4360_v43 = vld [vmem:[%s7314_s1 + $0x858] sm:$0xff] }
 0x1a9   : > { %4794 = vmatpush1.bf16.msra.mxu0 %v4793_v2  ;;  %4821 = vmatpush1.bf16.msra.mxu1 %v4820_v3  ;;  %v4385_v2 = vld [vmem:[%s7314_s1 + $0x8c0] sm:$0xff]  ;;  %v4386_v3 = vld [vmem:[%s7314_s1 + $0x8c8] sm:$0xff] }
 0x1aa   : > { %v903_v22 = vsel %vm898_vm8, %v900_v52, %v902_v20  ;;  %4822 = vmatprep.subr.bf16.mxu0 %v5104_v39  ;;  %4849 = vmatprep.subr.bf16.mxu1 %v5104_v39  ;;  %v4353_v52 = vld [vmem:[%s7314_s1 + $0x820] sm:$0xff]  ;;  %v4358_v16 = vld [vmem:[%s7314_s1 + $0x848] sm:$0xff] }
 0x1ab   : > { %v907_v27 = vadd.f32 %v903_v22, %v894_v13  ;;  %v697_v28 = vpop.f32.mrb[6].mxu0  ;;  %v871_v29 = vpop.f32.mrb[6].mxu1  ;;  %v4835_v62 = vpack.c.bf16 %v4354_v53, %v4353_v52  ;;  %v4865_v13 = vpack.c.bf16 %v4386_v3, %v4385_v2  ;;  %v4357_v20 = vld [vmem:[%s7314_s1 + $0x840] sm:$0xff]  ;;  %v4359_v22 = vld [vmem:[%s7314_s1 + $0x850] sm:$0xff]  ;;  %v4408_v53 = vld [vmem:[%s7314_s1 + $0x918] sm:$0xff] }
 0x1ac   : > { %2974 = vmatmul.mubr.f32.vlgmr.msra.gmra.mrb[96].mxu0 %v6012_v5  ;;  %3168 = vmatmul.mubr.f32.vlgmr.msra.gmra.mrb[96].mxu1 %v6012_v5  ;;  %v698_v26 = vpop.f32.mrb[7].mxu0  ;;  %v872_v33 = vpop.f32.mrb[7].mxu1  ;;  %v4350_v5 = vld [vmem:[%s7314_s1 + $0x808] sm:$0xff]  ;;  %v4407_v52 = vld [vmem:[%s7314_s1 + $0x910] sm:$0xff]  ;;  %v1088_v1 = vld [vmem:[%s5356_s26] sm:$0xff] }
 0x1ad   : > { %909 = vst.msk [vmem:[%s5356_s26 + $0x8] sm:$0xff] %vm339_vm0, %v907_v27  ;;  %4824 = vmatpush1.bf16.msra.mxu0 %v4823_v17  ;;  %4851 = vmatpush1.bf16.msra.mxu1 %v4850_v18  ;;  %v4829_v48 = vpack.c.bf16 %v4350_v5, %v4349_v38  ;;  %v4387_v17 = vld [vmem:[%s7314_s1 + $0x8d0] sm:$0xff]  ;;  %v4388_v18 = vld [vmem:[%s7314_s1 + $0x8d8] sm:$0xff]  ;;  %v4844_v33 = vpack.c.bf16 %v4360_v43, %v4359_v22 }
 0x1ae   : > { %4304 = vmatprep.mubr.msk.f32.mxu0 %vm339_vm0, %v6135_v59  ;;  %4334 = vmatprep.mubr.msk.f32.mxu1 %vm339_vm0, %v6135_v59  ;;  %v4868_v21 = vpack.c.bf16 %v4388_v18, %v4387_v17  ;;  %v4391_v38 = vld [vmem:[%s7314_s1 + $0x8f0] sm:$0xff]  ;;  %v4392_v5 = vld [vmem:[%s7314_s1 + $0x8f8] sm:$0xff] }
 0x1af   : > { %4825 = vmatprep.subr.bf16.mxu0 %v5104_v39  ;;  %4852 = vmatprep.subr.bf16.mxu1 %v5104_v39  ;;  %v701_v44 = vpop.f32.mrb[8].mxu0  ;;  %v875_v46 = vpop.f32.mrb[8].mxu1  ;;  %v4411_v22 = vld [vmem:[%s7314_s1 + $0x930] sm:$0xff]  ;;  %v4412_v43 = vld [vmem:[%s7314_s1 + $0x938] sm:$0xff] }
 0x1b0   : > { %2978 = vmatmul.mubr.f32.gmra.mrb[98].mxu0 %v6329_v61  ;;  %3172 = vmatmul.mubr.f32.gmra.mrb[98].mxu1 %v6329_v61  ;;  %v727_v59 = vadd.f32 %v3951_v31, %v701_v44  ;;  %v703_v47 = vpop.f32.mrb[9].mxu0  ;;  %v877_v35 = vpop.f32.mrb[9].mxu1  ;;  %v4352_v61 = vld [vmem:[%s7314_s1 + $0x818] sm:$0xff]  ;;  %v915_v55 = vrot.slane %v875_v46, 1 }
 0x1b1   : > { %4827 = vmatpush1.bf16.msra.mxu0 %v4826_v34  ;;  %4854 = vmatpush1.bf16.msra.mxu1 %v4853_v37  ;;  %v4361_v37 = vld [vmem:[%s7314_s1 + $0x860] sm:$0xff]  ;;  %v4874_v35 = vpack.c.bf16 %v4392_v5, %v4391_v38 }
 0x1b2   : > { %4305 = vmatprep.mubr.msk.f32.mxu0 %vm339_vm0, %v6333_v63  ;;  %4335 = vmatprep.mubr.msk.f32.mxu1 %vm339_vm0, %v6333_v63  ;;  %3953 = vst.msk [vmem:[%s5356_s26 + $0x10] sm:$0xff] %vm339_vm0, %v727_v59  ;;  %v4832_v63 = vpack.c.bf16 %v4352_v61, %v4351_v49  ;;  %v6847_v59 = vld [vmem:[#allocation2 + $0x8] sm:$0xff] }
 0x1b3   : > { %4828 = vmatprep.subr.bf16.mxu0 %v5104_v39  ;;  %4855 = vmatprep.subr.bf16.mxu1 %v5104_v39 }
 0x1b4   : > { %2983 = vmatmul.mubr.f32.gmra.mrb[100].mxu0 %v6353_v7  ;;  %3177 = vmatmul.mubr.f32.gmra.mrb[100].mxu1 %v6353_v7  ;;  %v4383_v7 = vld [vmem:[%s7314_s1 + $0x8b0] sm:$0xff]  ;;  %v1089_v18 = vld [vmem:[%s5356_s26 + $0x8] sm:$0xff] }
 0x1b5   : > { %4830 = vmatpush1.bf16.msra.mxu0 %v4829_v48  ;;  %4857 = vmatpush1.bf16.msra.mxu1 %v4856_v45  ;;  %v4862_v56 = vpack.c.bf16 %v4384_v54, %v4383_v7  ;;  %v4405_v48 = vld [vmem:[%s7314_s1 + $0x900] sm:$0xff]  ;;  %v4406_v45 = vld [vmem:[%s7314_s1 + $0x908] sm:$0xff] }
 0x1b6   : > { %4306 = vmatprep.mubr.msk.f32.mxu0 %vm339_vm0, %v6357_v14  ;;  %4336 = vmatprep.mubr.msk.f32.mxu1 %vm339_vm0, %v6357_v14  ;;  %v3952_v14 = vld [vmem:[%s5356_s26 + $0x18] sm:$0xff] }
 0x1b7   : > { %4831 = vmatprep.subr.bf16.mxu0 %v5104_v39  ;;  %4858 = vmatprep.subr.bf16.mxu1 %v5104_v39 }
 0x1b8   : > { %2988 = vmatmul.mubr.f32.gmra.mrb[102].mxu0 %v6754_v58  ;;  %3182 = vmatmul.mubr.f32.gmra.mrb[102].mxu1 %v6754_v58 }
 0x1b9   : > { %4833 = vmatpush1.bf16.msra.mxu0 %v4832_v63  ;;  %4860 = vmatpush1.bf16.msra.mxu1 %v4859_v51  ;;  %v706_v60 = vpop.f32.mrb[10].mxu0  ;;  %v880_v0 = vpop.f32.mrb[10].mxu1  ;;  %v3981_v6 = vld [vmem:[%s5356_s26 + $0x10] sm:$0xff]  ;;  %v4877_v63 = vpack.c.bf16 %v4406_v45, %v4405_v48 }
 0x1ba   : > { %4307 = vmatprep.mubr.msk.f32.mxu0 %vm339_vm0, %v6379_v15  ;;  %4337 = vmatprep.mubr.msk.f32.mxu1 %vm339_vm0, %v6379_v15  ;;  %v728_v4 = vadd.f32 %v3952_v14, %v706_v60  ;;  %v916_v8 = vrot.slane %v880_v0, 1  ;;  %v708_v10 = vpop.f32.mrb[11].mxu0  ;;  %v882_v9 = vpop.f32.mrb[11].mxu1  ;;  %v6871_v14 = vld [vmem:[#allocation2 + $0x18] sm:$0xff]  ;;  %v4880_v0 = vpack.c.bf16 %v4408_v53, %v4407_v52 }
 0x1bb   : > { %4834 = vmatprep.subr.bf16.mxu0 %v5104_v39  ;;  %4861 = vmatprep.subr.bf16.mxu1 %v5104_v39 }
 0x1bc   : > { %2993 = vmatmul.mubr.f32.gmra.mrb[104].mxu0 %v6754_v58  ;;  %3187 = vmatmul.mubr.f32.gmra.mrb[104].mxu1 %v6754_v58  ;;  %3954 = vst.msk [vmem:[%s5356_s26 + $0x18] sm:$0xff] %vm339_vm0, %v728_v4  ;;  %v917_v15 = vsel %vm898_vm8, %v915_v55, %v916_v8  ;;  %v4409_v4 = vld [vmem:[%s7314_s1 + $0x920] sm:$0xff] }
 0x1bd   : > { %4836 = vmatpush1.bf16.msra.mxu0 %v4835_v62  ;;  %4863 = vmatpush1.bf16.msra.mxu1 %v4862_v56  ;;  %v922_v19 = vadd.f32 %v3981_v6, %v917_v15  ;;  %v4410_v6 = vld [vmem:[%s7314_s1 + $0x928] sm:$0xff]  ;;  %v6888_v15 = vld [vmem:[#allocation2 + $0x10] sm:$0xff] }
 0x1be   : > { %4308 = vmatprep.mubr.msk.f32.mxu0 %vm339_vm0, %v6401_v23  ;;  %4338 = vmatprep.mubr.msk.f32.mxu1 %vm339_vm0, %v6401_v23  ;;  %v4841_v23 = vpack.c.bf16 %v4358_v16, %v4357_v20  ;;  %v4883_v17 = vpack.c.bf16 %v4410_v6, %v4409_v4 }
 0x1bf   : > { %4837 = vmatprep.subr.bf16.mxu0 %v5104_v39  ;;  %4864 = vmatprep.subr.bf16.mxu1 %v5104_v39  ;;  %3983 = vst.msk [vmem:[%s5356_s26 + $0x10] sm:$0xff] %vm339_vm0, %v922_v19 }
 0x1c0   : > { %2997 = vmatmul.mubr.f32.gmra.mrb[106].mxu0 %v6421_v30  ;;  %3191 = vmatmul.mubr.f32.gmra.mrb[106].mxu1 %v6421_v30  ;;  %v4389_v30 = vld [vmem:[%s7314_s1 + $0x8e0] sm:$0xff] }
 0x1c1   : > { %4839 = vmatpush1.bf16.msra.mxu0 %v4838_v11  ;;  %4866 = vmatpush1.bf16.msra.mxu1 %v4865_v13  ;;  %v4871_v34 = vpack.c.bf16 %v4390_v24, %v4389_v30  ;;  %v6892_v11 = vld [vmem:[#allocation2 + $0x28] sm:$0xff]  ;;  %v6911_v24 = vld [vmem:[#allocation2 + $0x20] sm:$0xff] }
 0x1c2   : > { %4309 = vmatprep.mubr.msk.f32.mxu0 %vm339_vm0, %v6425_v32  ;;  %4339 = vmatprep.mubr.msk.f32.mxu1 %vm339_vm0, %v6425_v32 }
 0x1c3   : > { %v711_v25 = vpop.f32.mrb[12].mxu0  ;;  %v885_v27 = vpop.f32.mrb[12].mxu1  ;;  %4840 = vmatprep.subr.bf16.mxu0 %v5104_v39  ;;  %4867 = vmatprep.subr.bf16.mxu1 %v5104_v39  ;;  %v3982_v28 = vld [vmem:[%s5356_s26 + $0x18] sm:$0xff] }
 0x1c4   : > { %v918_v32 = vrot.slane %v885_v27, 1  ;;  %3002 = vmatmul.mubr.f32.gmra.mrb[108].mxu0 %v6445_v41  ;;  %3196 = vmatmul.mubr.f32.gmra.mrb[108].mxu1 %v6445_v41  ;;  %v712_v29 = vpop.f32.mrb[13].mxu0  ;;  %v887_v26 = vpop.f32.mrb[13].mxu1  ;;  %v4362_v41 = vld [vmem:[%s7314_s1 + $0x868] sm:$0xff]  ;;  %v6915_v27 = vld [vmem:[#allocation2 + $0x38] sm:$0xff] }
 0x1c5   : > { %4842 = vmatpush1.bf16.msra.mxu0 %v4841_v23  ;;  %4869 = vmatpush1.bf16.msra.mxu1 %v4868_v21  ;;  %v4847_v47 = vpack.c.bf16 %v4362_v41, %v4361_v37  ;;  %v4886_v26 = vpack.c.bf16 %v4412_v43, %v4411_v22  ;;  %v6933_v41 = vld [vmem:[#allocation2 + $0x48] sm:$0xff] }
 0x1c6   : > { %v919_v31 = vsel %vm898_vm8, %v916_v8, %v918_v32  ;;  %4310 = vmatprep.mubr.msk.f32.mxu0 %vm339_vm0, %v6449_v36  ;;  %4340 = vmatprep.mubr.msk.f32.mxu1 %vm339_vm0, %v6449_v36 }
 0x1c7   : > { %v923_v40 = vadd.f32 %v3982_v28, %v919_v31  ;;  %v715_v42 = vpop.f32.mrb[14].mxu0  ;;  %4843 = vmatprep.subr.bf16.mxu0 %v5104_v39  ;;  %4870 = vmatprep.subr.bf16.mxu1 %v5104_v39  ;;  %v890_v44 = vpop.f32.mrb[14].mxu1 }
 0x1c8   : > { %3007 = vmatmul.mubr.f32.gmra.mrb[110].mxu0 %v6754_v58  ;;  %3201 = vmatmul.mubr.f32.gmra.mrb[110].mxu1 %v6754_v58  ;;  %v716_v36 = vpop.f32.mrb[15].mxu0  ;;  %v891_v46 = vpop.f32.mrb[15].mxu1 }
 0x1c9   : > { %3984 = vst.msk [vmem:[%s5356_s26 + $0x18] sm:$0xff] %vm339_vm0, %v923_v40  ;;  %4845 = vmatpush1.bf16.msra.mxu0 %v4844_v33  ;;  %4872 = vmatpush1.bf16.msra.mxu1 %v4871_v34  ;;  %v4413_v33 = vld [vmem:[%s7314_s1 + $0x940] sm:$0xff]  ;;  %v4414_v34 = vld [vmem:[%s7314_s1 + $0x948] sm:$0xff] }
 0x1ca   : > { %4846 = vmatprep.subr.bf16.mxu0 %v5104_v39  ;;  %4873 = vmatprep.subr.bf16.mxu1 %v5104_v39  ;;  %v4889_v44 = vpack.c.bf16 %v4414_v34, %v4413_v33 }
 0x1cb   : > { %v1051_v49 = vpop.f32.mrb[16].mxu0  ;;  %v1246_v61 = vpop.f32.mrb[16].mxu1  ;;  %4363 = vmatprep.mubr.msk.f32.mxu0 %vm339_vm0, %v6847_v59  ;;  %4393 = vmatprep.mubr.msk.f32.mxu1 %vm339_vm0, %v6847_v59 }
 0x1cc   : > { %v1053_v12 = vpop.f32.mrb[17].mxu0  ;;  %v1248_v50 = vpop.f32.mrb[17].mxu1  ;;  %v1289_v51 = vrot.slane %v1246_v61, 3  ;;  %v1094_v55 = vrot.slane %v1051_v49, 2  ;;  %v6952_v49 = vld [vmem:[#allocation2 + $0x58] sm:$0xff] }
 0x1cd   : > { %4848 = vmatpush1.bf16.msra.mxu0 %v4847_v47  ;;  %4875 = vmatpush1.bf16.msra.mxu1 %v4874_v35  ;;  %v4415_v47 = vld [vmem:[%s7314_s1 + $0x950] sm:$0xff]  ;;  %v4416_v35 = vld [vmem:[%s7314_s1 + $0x958] sm:$0xff] }
 0x1ce   : > { %4876 = vmatprep.subr.bf16.mxu0 %v5104_v39  ;;  %4903 = vmatprep.subr.bf16.mxu1 %v5104_v39  ;;  %v4892_v53 = vpack.c.bf16 %v4416_v35, %v4415_v47 }
 0x1cf   : > { %v1056_v7 = vpop.f32.mrb[18].mxu0  ;;  %v1251_v54 = vpop.f32.mrb[18].mxu1 }
 0x1d0   : > { %v1095_v62 = vrot.slane %v1056_v7, 2  ;;  %v1290_v56 = vrot.slane %v1251_v54, 3  ;;  %3362 = vmatmul.mubr.f32.vlgmr.msra.gmra.mrb[112].mxu0 %v6754_v58  ;;  %3556 = vmatmul.mubr.f32.vlgmr.msra.gmra.mrb[112].mxu1 %v6754_v58  ;;  %v1058_v57 = vpop.f32.mrb[19].mxu0  ;;  %v1253_v60 = vpop.f32.mrb[19].mxu1  ;;  %v4011_v7 = vld [vmem:[%s5356_s26 + $0x10] sm:$0xff] }
 0x1d1   : > { %4878 = vmatpush1.bf16.msra.mxu0 %v4877_v63  ;;  %4912 = vmatpush1.bf16.msra.mxu1 %v4877_v63 }
 0x1d2   : > { %v1096_v2 = vsel %vm1093_vm9, %v1094_v55, %v1095_v62  ;;  %v1291_v3 = vsel %vm1288_vm10, %v1289_v51, %v1290_v56  ;;  %4364 = vmatprep.mubr.msk.f32.mxu0 %vm339_vm0, %v6871_v14  ;;  %4394 = vmatprep.mubr.msk.f32.mxu1 %vm339_vm0, %v6871_v14 }
 0x1d3   : > { %v1101_v8 = vadd.f32 %v1096_v2, %v1088_v1  ;;  %v1061_v10 = vpop.f32.mrb[20].mxu0  ;;  %v1256_v9 = vpop.f32.mrb[20].mxu1  ;;  %4879 = vmatprep.subr.bf16.mxu0 %v5104_v39  ;;  %4904 = vmatprep.subr.bf16.mxu1 %v5104_v39  ;;  %v6972_v1 = vld [vmem:[#allocation2 + $0x50] sm:$0xff]  ;;  %v6976_v2 = vld [vmem:[#allocation2 + $0x68] sm:$0xff] }
 0x1d4   : > { %v1097_v13 = vrot.slane %v1061_v10, 2  ;;  %v1292_v20 = vrot.slane %v1256_v9, 3  ;;  %3366 = vmatmul.mubr.f32.gmra.mrb[114].mxu0 %v6888_v15  ;;  %3560 = vmatmul.mubr.f32.gmra.mrb[114].mxu1 %v6888_v15  ;;  %v1063_v19 = vpop.f32.mrb[21].mxu0  ;;  %v1258_v16 = vpop.f32.mrb[21].mxu1  ;;  %v4012_v9 = vld [vmem:[%s5356_s26 + $0x18] sm:$0xff] }
 0x1d5   : > { %1103 = vst.msk [vmem:[%s5356_s26] sm:$0xff] %vm339_vm0, %v1101_v8  ;;  %4881 = vmatpush1.bf16.msra.mxu0 %v4880_v0  ;;  %4913 = vmatpush1.bf16.msra.mxu1 %v4880_v0  ;;  %v4419_v19 = vld [vmem:[%s7314_s1 + $0x970] sm:$0xff]  ;;  %v4420_v16 = vld [vmem:[%s7314_s1 + $0x978] sm:$0xff] }
 0x1d6   : > { %v1098_v23 = vsel %vm1093_vm9, %v1095_v62, %v1097_v13  ;;  %v1293_v21 = vsel %vm1288_vm10, %v1290_v56, %v1292_v20  ;;  %4365 = vmatprep.mubr.msk.f32.mxu0 %vm339_vm0, %v6892_v11  ;;  %4395 = vmatprep.mubr.msk.f32.mxu1 %vm339_vm0, %v6892_v11  ;;  %v4417_v62 = vld [vmem:[%s7314_s1 + $0x960] sm:$0xff]  ;;  %v4418_v56 = vld [vmem:[%s7314_s1 + $0x968] sm:$0xff] }
 0x1d7   : > { %v1102_v30 = vadd.f32 %v1098_v23, %v1089_v18  ;;  %4882 = vmatprep.subr.bf16.mxu0 %v5104_v39  ;;  %4905 = vmatprep.subr.bf16.mxu1 %v5104_v39  ;;  %v1066_v25 = vpop.f32.mrb[22].mxu0  ;;  %v1261_v28 = vpop.f32.mrb[22].mxu1  ;;  %v4895_v10 = vpack.c.bf16 %v4418_v56, %v4417_v62  ;;  %v6995_v18 = vld [vmem:[#allocation2 + $0x60] sm:$0xff] }
 0x1d8   : > { %3371 = vmatmul.mubr.f32.gmra.mrb[116].mxu0 %v6911_v24  ;;  %3565 = vmatmul.mubr.f32.gmra.mrb[116].mxu1 %v6911_v24  ;;  %v1067_v32 = vpop.f32.mrb[23].mxu0  ;;  %v1262_v29 = vpop.f32.mrb[23].mxu1  ;;  %v4898_v25 = vpack.c.bf16 %v4420_v16, %v4419_v19  ;;  %v4421_v28 = vld [vmem:[%s7314_s1 + $0x980] sm:$0xff] }
 0x1d9   : > { %1104 = vst.msk [vmem:[%s5356_s26 + $0x8] sm:$0xff] %vm339_vm0, %v1102_v30  ;;  %4884 = vmatpush1.bf16.msra.mxu0 %v4883_v17  ;;  %4914 = vmatpush1.bf16.msra.mxu1 %v4883_v17  ;;  %v4422_v32 = vld [vmem:[%s7314_s1 + $0x988] sm:$0xff] }
 0x1da   : > { %4366 = vmatprep.mubr.msk.f32.mxu0 %vm339_vm0, %v6915_v27  ;;  %4396 = vmatprep.mubr.msk.f32.mxu1 %vm339_vm0, %v6915_v27  ;;  %v4901_v33 = vpack.c.bf16 %v4422_v32, %v4421_v28 }
 0x1db   : > { %4885 = vmatprep.subr.bf16.mxu0 %v5104_v39  ;;  %4906 = vmatprep.subr.bf16.mxu1 %v5104_v39  ;;  %v1070_v37 = vpop.f32.mrb[24].mxu0  ;;  %v1265_v31 = vpop.f32.mrb[24].mxu1 }
 0x1dc   : > { %v1283_v38 = vld [vmem:[%s5356_s26] sm:$0xff]  ;;  %3376 = vmatmul.mubr.f32.gmra.mrb[118].mxu0 %v6754_v58  ;;  %3570 = vmatmul.mubr.f32.gmra.mrb[118].mxu1 %v6754_v58  ;;  %v1072_v5 = vpop.f32.mrb[25].mxu0  ;;  %v1267_v40 = vpop.f32.mrb[25].mxu1  ;;  %v1110_v36 = vrot.slane %v1070_v37, 2  ;;  %v1305_v46 = vrot.slane %v1265_v31, 3 }
 0x1dd   : > { %v1296_v42 = vadd.f32 %v1291_v3, %v1283_v38  ;;  %4887 = vmatpush1.bf16.msra.mxu0 %v4886_v26  ;;  %4915 = vmatpush1.bf16.msra.mxu1 %v4886_v26 }
 0x1de   : > { %4367 = vmatprep.mubr.msk.f32.mxu0 %vm339_vm0, %v6933_v41  ;;  %4397 = vmatprep.mubr.msk.f32.mxu1 %vm339_vm0, %v6933_v41 }
 0x1df   : > { %1298 = vst.msk [vmem:[%s5356_s26] sm:$0xff] %vm339_vm0, %v1296_v42  ;;  %v1075_v48 = vpop.f32.mrb[26].mxu0  ;;  %v1270_v45 = vpop.f32.mrb[26].mxu1  ;;  %4888 = vmatprep.subr.bf16.mxu0 %v5104_v39  ;;  %4907 = vmatprep.subr.bf16.mxu1 %v5104_v39 }
 0x1e0   : > { %v1284_v61 = vld [vmem:[%s5356_s26 + $0x8] sm:$0xff]  ;;  %v1111_v12 = vrot.slane %v1075_v48, 2  ;;  %v1306_v50 = vrot.slane %v1270_v45, 3  ;;  %3381 = vmatmul.mubr.f32.gmra.mrb[120].mxu0 %v6754_v58  ;;  %3575 = vmatmul.mubr.f32.gmra.mrb[120].mxu1 %v6754_v58  ;;  %v1077_v63 = vpop.f32.mrb[27].mxu0  ;;  %v1272_v51 = vpop.f32.mrb[27].mxu1 }
 0x1e1   : > { %v1297_v52 = vadd.f32 %v1293_v21, %v1284_v61  ;;  %4890 = vmatpush1.bf16.msra.mxu0 %v4889_v44  ;;  %4916 = vmatpush1.bf16.msra.mxu1 %v4889_v44  ;;  %v6999_v21 = vld [vmem:[#allocation2 + $0x78] sm:$0xff] }
 0x1e2   : > { %v1112_v54 = vsel %vm1093_vm9, %v1110_v36, %v1111_v12  ;;  %v1307_v55 = vsel %vm1288_vm10, %v1305_v46, %v1306_v50  ;;  %4368 = vmatprep.mubr.msk.f32.mxu0 %vm339_vm0, %v6952_v49  ;;  %4398 = vmatprep.mubr.msk.f32.mxu1 %vm339_vm0, %v6952_v49 }
 0x1e3   : > { %1299 = vst.msk [vmem:[%s5356_s26 + $0x8] sm:$0xff] %vm339_vm0, %v1297_v52  ;;  %v1117_v57 = vadd.f32 %v4011_v7, %v1112_v54  ;;  %v1080_v60 = vpop.f32.mrb[28].mxu0  ;;  %v1275_v0 = vpop.f32.mrb[28].mxu1  ;;  %4891 = vmatprep.subr.bf16.mxu0 %v5104_v39  ;;  %4908 = vmatprep.subr.bf16.mxu1 %v5104_v39 }
 0x1e4   : > { %v1113_v3 = vrot.slane %v1080_v60, 2  ;;  %v1308_v4 = vrot.slane %v1275_v0, 3  ;;  %3385 = vmatmul.mubr.f32.gmra.mrb[122].mxu0 %v6972_v1  ;;  %3579 = vmatmul.mubr.f32.gmra.mrb[122].mxu1 %v6972_v1  ;;  %v1082_v6 = vpop.f32.mrb[29].mxu0  ;;  %v1277_v8 = vpop.f32.mrb[29].mxu1 }
 0x1e5   : > { %4013 = vst.msk [vmem:[%s5356_s26 + $0x10] sm:$0xff] %vm339_vm0, %v1117_v57  ;;  %4893 = vmatpush1.bf16.msra.mxu0 %v4892_v53  ;;  %4917 = vmatpush1.bf16.msra.mxu1 %v4892_v53 }
 0x1e6   : > { %v1114_v13 = vsel %vm1093_vm9, %v1111_v12, %v1113_v3  ;;  %v1309_v20 = vsel %vm1288_vm10, %v1306_v50, %v1308_v4  ;;  %4369 = vmatprep.mubr.msk.f32.mxu0 %vm339_vm0, %v6976_v2  ;;  %4399 = vmatprep.mubr.msk.f32.mxu1 %vm339_vm0, %v6976_v2 }
 0x1e7   : > { %v1118_v17 = vadd.f32 %v4012_v9, %v1114_v13  ;;  %4894 = vmatprep.subr.bf16.mxu0 %v5104_v39  ;;  %4909 = vmatprep.subr.bf16.mxu1 %v5104_v39  ;;  %v1085_v23 = vpop.f32.mrb[30].mxu0  ;;  %v1280_v22 = vpop.f32.mrb[30].mxu1 }
 0x1e8   : > { %3390 = vmatmul.mubr.f32.gmra.mrb[124].mxu0 %v6995_v18  ;;  %3584 = vmatmul.mubr.f32.gmra.mrb[124].mxu1 %v6995_v18  ;;  %v1086_v43 = vpop.f32.mrb[31].mxu0  ;;  %v1281_v30 = vpop.f32.mrb[31].mxu1 }
 0x1e9   : > { %4014 = vst.msk [vmem:[%s5356_s26 + $0x18] sm:$0xff] %vm339_vm0, %v1118_v17  ;;  %4896 = vmatpush1.bf16.msra.mxu0 %v4895_v10  ;;  %4918 = vmatpush1.bf16.msra.mxu1 %v4895_v10 }
 0x1ea   : > { %4370 = vmatprep.mubr.msk.f32.mxu0 %vm339_vm0, %v6999_v21  ;;  %4400 = vmatprep.mubr.msk.f32.mxu1 %vm339_vm0, %v6999_v21 }
 0x1eb   : > { %4897 = vmatprep.subr.bf16.mxu0 %v5104_v39  ;;  %4910 = vmatprep.subr.bf16.mxu1 %v5104_v39 }
 0x1ec   : > { %v4041_v29 = vld [vmem:[%s5356_s26 + $0x10] sm:$0xff]  ;;  %3395 = vmatmul.mubr.f32.gmra.mrb[126].mxu0 %v6754_v58  ;;  %3589 = vmatmul.mubr.f32.gmra.mrb[126].mxu1 %v6754_v58 }
 0x1ed   : > { %v1312_v26 = vadd.f32 %v4041_v29, %v1307_v55  ;;  %4899 = vmatpush1.bf16.msra.mxu0 %v4898_v25  ;;  %4919 = vmatpush1.bf16.msra.mxu1 %v4898_v25 }
 0x1ee   : > { %4900 = vmatprep.subr.bf16.mxu0 %v5104_v39  ;;  %4911 = vmatprep.subr.bf16.mxu1 %v5104_v39 }
 0x1ef   : > { %4043 = vst.msk [vmem:[%s5356_s26 + $0x10] sm:$0xff] %vm339_vm0, %v1312_v26  ;;  %v1441_v34 = vpop.f32.mrb[32].mxu0  ;;  %v1636_v37 = vpop.f32.mrb[32].mxu1  ;;  %4423 = vmatprep.mubr.msk.f32.mxu0 %vm339_vm0, %v6847_v59  ;;  %4427 = vmatprep.mubr.msk.f32.mxu1 %vm339_vm0, %v6933_v41  ;;  %v1478_v41 = vld [vmem:[%s5356_s26] sm:$0xff] }
 0x1f0   : > { %v4042_v31 = vld [vmem:[%s5356_s26 + $0x18] sm:$0xff]  ;;  %v1443_v38 = vpop.f32.mrb[33].mxu0  ;;  %v1638_v5 = vpop.f32.mrb[33].mxu1  ;;  %v1679_v42 = vrot.slane %v1636_v37, 5  ;;  %v1484_v36 = vrot.slane %v1441_v34, 4 }
 0x1f1   : > { %v1313_v40 = vadd.f32 %v4042_v31, %v1309_v20  ;;  %4902 = vmatpush1.bf16.msra.mxu0 %v4901_v33  ;;  %4920 = vmatpush1.bf16.msra.mxu1 %v4901_v33 }
 0x1f3   : > { %4044 = vst.msk [vmem:[%s5356_s26 + $0x18] sm:$0xff] %vm339_vm0, %v1313_v40  ;;  %v1446_v39 = vpop.f32.mrb[34].mxu0  ;;  %v1641_v44 = vpop.f32.mrb[34].mxu1 }
 0x1f4   : > { %v1485_v46 = vrot.slane %v1446_v39, 4  ;;  %v1680_v59 = vrot.slane %v1641_v44, 5  ;;  %v1448_v47 = vpop.f32.mrb[35].mxu0  ;;  %v1643_v35 = vpop.f32.mrb[35].mxu1  ;;  %3750 = vmatmul.mubr.f32.vlgmr.msra.gmra.mrb[128].mxu0 %v6754_v58  ;;  %3768 = vmatmul.mubr.f32.vlgmr.msra.gmra.mrb[128].mxu1 %v6754_v58 }
 0x1f5   : > { %4424 = vmatprep.mubr.msk.f32.mxu0 %vm339_vm0, %v6871_v14  ;;  %4428 = vmatprep.mubr.msk.f32.mxu1 %vm339_vm0, %v6952_v49  ;;  %v1479_v14 = vld [vmem:[%s5356_s26 + $0x8] sm:$0xff] }
 0x1f6   : > { %v1486_v48 = vsel %vm1483_vm11, %v1484_v36, %v1485_v46  ;;  %v1681_v45 = vsel %vm1678_vm12, %v1679_v42, %v1680_v59  ;;  %v4071_v19 = vld [vmem:[%s5356_s26 + $0x10] sm:$0xff] }
 0x1f7   : > { %v1491_v61 = vadd.f32 %v1486_v48, %v1478_v41  ;;  %v1451_v12 = vpop.f32.mrb[36].mxu0  ;;  %v1646_v50 = vpop.f32.mrb[36].mxu1 }
 0x1f8   : > { %v1487_v63 = vrot.slane %v1451_v12, 4  ;;  %v1682_v51 = vrot.slane %v1646_v50, 5  ;;  %v1453_v52 = vpop.f32.mrb[37].mxu0  ;;  %v1648_v53 = vpop.f32.mrb[37].mxu1  ;;  %3754 = vmatmul.mubr.f32.gmra.mrb[130].mxu0 %v6888_v15  ;;  %3772 = vmatmul.mubr.f32.gmra.mrb[130].mxu1 %v6972_v1 }
 0x1f9   : > { %1493 = vst.msk [vmem:[%s5356_s26] sm:$0xff] %vm339_vm0, %v1491_v61  ;;  %4425 = vmatprep.mubr.msk.f32.mxu0 %vm339_vm0, %v6892_v11  ;;  %4429 = vmatprep.mubr.msk.f32.mxu1 %vm339_vm0, %v6976_v2 }
 0x1fa   : > { %v1488_v49 = vsel %vm1483_vm11, %v1485_v46, %v1487_v63  ;;  %v1683_v7 = vsel %vm1678_vm12, %v1680_v59, %v1682_v51  ;;  %v4072_v25 = vld [vmem:[%s5356_s26 + $0x18] sm:$0xff] }
 0x1fb   : > { %v1492_v54 = vadd.f32 %v1488_v49, %v1479_v14  ;;  %v1456_v55 = vpop.f32.mrb[38].mxu0  ;;  %v1651_v62 = vpop.f32.mrb[38].mxu1 }
 0x1fc   : > { %3758 = vmatmul.mubr.f32.gmra.mrb[132].mxu0 %v6911_v24  ;;  %3776 = vmatmul.mubr.f32.gmra.mrb[132].mxu1 %v6995_v18  ;;  %v1457_v15 = vpop.f32.mrb[39].mxu0  ;;  %v1652_v56 = vpop.f32.mrb[39].mxu1 }
 0x1fd   : > { %1494 = vst.msk [vmem:[%s5356_s26 + $0x8] sm:$0xff] %vm339_vm0, %v1492_v54  ;;  %4426 = vmatprep.mubr.msk.f32.mxu0 %vm339_vm0, %v6915_v27  ;;  %4430 = vmatprep.mubr.msk.f32.mxu1 %vm339_vm0, %v6999_v21 }
 0x1ff   : > { %v1460_v11 = vpop.f32.mrb[40].mxu0  ;;  %v1655_v57 = vpop.f32.mrb[40].mxu1 }
 0x200   : > { %v1673_v60 = vld [vmem:[%s5356_s26] sm:$0xff]  ;;  %3763 = vmatmul.mubr.f32.gmra.mrb[134].mxu0 %v6754_v58  ;;  %v1462_v24 = vpop.f32.mrb[41].mxu0  ;;  %v1657_v0 = vpop.f32.mrb[41].mxu1  ;;  %3781 = vmatmul.mubr.f32.gmra.mrb[134].mxu1 %v6754_v58  ;;  %v1500_v2 = vrot.slane %v1460_v11, 4  ;;  %v1695_v3 = vrot.slane %v1655_v57, 5 }
 0x201   : > { %v1686_v1 = vadd.f32 %v1681_v45, %v1673_v60 }
 0x203   : > { %1688 = vst.msk [vmem:[%s5356_s26] sm:$0xff] %vm339_vm0, %v1686_v1  ;;  %v1465_v27 = vpop.f32.mrb[42].mxu0  ;;  %v1660_v4 = vpop.f32.mrb[42].mxu1 }
 0x204   : > { %v1674_v6 = vld [vmem:[%s5356_s26 + $0x8] sm:$0xff]  ;;  %v1501_v8 = vrot.slane %v1465_v27, 4  ;;  %v1696_v10 = vrot.slane %v1660_v4, 5  ;;  %v1467_v9 = vpop.f32.mrb[43].mxu0  ;;  %v1662_v13 = vpop.f32.mrb[43].mxu1 }
 0x205   : > { %v1687_v20 = vadd.f32 %v1683_v7, %v1674_v6 }
 0x206   : > { %v1502_v16 = vsel %vm1483_vm11, %v1500_v2, %v1501_v8  ;;  %v1697_v58 = vsel %vm1678_vm12, %v1695_v3, %v1696_v10 }
 0x207   : > { %1689 = vst.msk [vmem:[%s5356_s26 + $0x8] sm:$0xff] %vm339_vm0, %v1687_v20  ;;  %v1507_v17 = vadd.f32 %v4071_v19, %v1502_v16  ;;  %v1470_v18 = vpop.f32.mrb[44].mxu0  ;;  %v1665_v23 = vpop.f32.mrb[44].mxu1 }
 0x208   : > { %v1503_v21 = vrot.slane %v1470_v18, 4  ;;  %v1698_v22 = vrot.slane %v1665_v23, 5  ;;  %v1472_v43 = vpop.f32.mrb[45].mxu0  ;;  %v1667_v30 = vpop.f32.mrb[45].mxu1 }
 0x209   : > { %4073 = vst.msk [vmem:[%s5356_s26 + $0x10] sm:$0xff] %vm339_vm0, %v1507_v17 }
 0x20a   : > { %v1504_v28 = vsel %vm1483_vm11, %v1501_v8, %v1503_v21  ;;  %v1699_v32 = vsel %vm1678_vm12, %v1696_v10, %v1698_v22  ;;  %v1868_v12 = vld [vmem:[%s5356_s26] sm:$0xff] }
 0x20b   : > { %v1508_v29 = vadd.f32 %v4072_v25, %v1504_v28  ;;  %v1475_v26 = vpop.f32.mrb[46].mxu0  ;;  %v1670_v33 = vpop.f32.mrb[46].mxu1 }
 0x20c   : > { %v1476_v34 = vpop.f32.mrb[47].mxu0  ;;  %v1671_v37 = vpop.f32.mrb[47].mxu1 }
 0x20d   : > { %4074 = vst.msk [vmem:[%s5356_s26 + $0x18] sm:$0xff] %vm339_vm0, %v1508_v29 }
 0x20e   : > { %v1869_v55 = vld [vmem:[%s5356_s26 + $0x8] sm:$0xff] }
 0x210   : > { %v4101_v31 = vld [vmem:[%s5356_s26 + $0x10] sm:$0xff] }
 0x211   : > { %v1702_v38 = vadd.f32 %v4101_v31, %v1697_v58 }
 0x213   : > { %4103 = vst.msk [vmem:[%s5356_s26 + $0x10] sm:$0xff] %vm339_vm0, %v1702_v38  ;;  %v1831_v5 = vpop.f32.mrb[48].mxu0  ;;  %v2026_v40 = vpop.f32.mrb[48].mxu1 }
 0x214   : > { %v4102_v42 = vld [vmem:[%s5356_s26 + $0x18] sm:$0xff]  ;;  %v1833_v39 = vpop.f32.mrb[49].mxu0  ;;  %v2028_v44 = vpop.f32.mrb[49].mxu1  ;;  %v2069_v46 = vrot.slane %v2026_v40, 7  ;;  %v1874_v35 = vrot.slane %v1831_v5, 6 }
 0x215   : > { %v1703_v36 = vadd.f32 %v4102_v42, %v1699_v32 }
 0x217   : > { %4104 = vst.msk [vmem:[%s5356_s26 + $0x18] sm:$0xff] %vm339_vm0, %v1703_v36  ;;  %v1836_v59 = vpop.f32.mrb[50].mxu0  ;;  %v2031_v47 = vpop.f32.mrb[50].mxu1 }
 0x218   : > { %v1875_v41 = vrot.slane %v1836_v59, 6  ;;  %v2070_v48 = vrot.slane %v2031_v47, 7  ;;  %v1838_v45 = vpop.f32.mrb[51].mxu0  ;;  %v2033_v61 = vpop.f32.mrb[51].mxu1 }
 0x21a   : > { %v1876_v50 = vsel %vm1873_vm13, %v1874_v35, %v1875_v41  ;;  %v2071_v63 = vsel %vm2068_vm14, %v2069_v46, %v2070_v48  ;;  %v4131_v18 = vld [vmem:[%s5356_s26 + $0x10] sm:$0xff] }
 0x21b   : > { %v1881_v51 = vadd.f32 %v1876_v50, %v1868_v12  ;;  %v1841_v52 = vpop.f32.mrb[52].mxu0  ;;  %v2036_v53 = vpop.f32.mrb[52].mxu1 }
 0x21c   : > { %v1877_v14 = vrot.slane %v1841_v52, 6  ;;  %v2072_v49 = vrot.slane %v2036_v53, 7  ;;  %v1843_v7 = vpop.f32.mrb[53].mxu0  ;;  %v2038_v54 = vpop.f32.mrb[53].mxu1 }
 0x21d   : > { %1883 = vst.msk [vmem:[%s5356_s26] sm:$0xff] %vm339_vm0, %v1881_v51 }
 0x21e   : > { %v1878_v62 = vsel %vm1873_vm13, %v1875_v41, %v1877_v14  ;;  %v2073_v15 = vsel %vm2068_vm14, %v2070_v48, %v2072_v49  ;;  %v4132_v26 = vld [vmem:[%s5356_s26 + $0x18] sm:$0xff] }
 0x21f   : > { %v1882_v56 = vadd.f32 %v1878_v62, %v1869_v55  ;;  %v1846_v11 = vpop.f32.mrb[54].mxu0  ;;  %v2041_v57 = vpop.f32.mrb[54].mxu1 }
 0x220   : > { %v1847_v60 = vpop.f32.mrb[55].mxu0  ;;  %v2042_v24 = vpop.f32.mrb[55].mxu1 }
 0x221   : > { %1884 = vst.msk [vmem:[%s5356_s26 + $0x8] sm:$0xff] %vm339_vm0, %v1882_v56 }
 0x223   : > { %v1850_v0 = vpop.f32.mrb[56].mxu0  ;;  %v2045_v1 = vpop.f32.mrb[56].mxu1 }
 0x224   : > { %v2063_v2 = vld [vmem:[%s5356_s26] sm:$0xff]  ;;  %v1852_v3 = vpop.f32.mrb[57].mxu0  ;;  %v2047_v27 = vpop.f32.mrb[57].mxu1  ;;  %v1890_v6 = vrot.slane %v1850_v0, 6  ;;  %v2085_v8 = vrot.slane %v2045_v1, 7 }
 0x225   : > { %v2076_v4 = vadd.f32 %v2071_v63, %v2063_v2 }
 0x227   : > { %2078 = vst.msk [vmem:[%s5356_s26] sm:$0xff] %vm339_vm0, %v2076_v4  ;;  %v1855_v10 = vpop.f32.mrb[58].mxu0  ;;  %v2050_v9 = vpop.f32.mrb[58].mxu1 }
 0x228   : > { %v2064_v13 = vld [vmem:[%s5356_s26 + $0x8] sm:$0xff]  ;;  %v1891_v20 = vrot.slane %v1855_v10, 6  ;;  %v2086_v19 = vrot.slane %v2050_v9, 7  ;;  %v1857_v16 = vpop.f32.mrb[59].mxu0  ;;  %v2052_v58 = vpop.f32.mrb[59].mxu1 }
 0x229   : > { %v2077_v17 = vadd.f32 %v2073_v15, %v2064_v13 }
 0x22a   : > { %v1892_v23 = vsel %vm1873_vm13, %v1890_v6, %v1891_v20  ;;  %v2087_v21 = vsel %vm2068_vm14, %v2085_v8, %v2086_v19 }
 0x22b   : > { %2079 = vst.msk [vmem:[%s5356_s26 + $0x8] sm:$0xff] %vm339_vm0, %v2077_v17  ;;  %v1897_v22 = vadd.f32 %v4131_v18, %v1892_v23  ;;  %v1860_v43 = vpop.f32.mrb[60].mxu0  ;;  %v2055_v30 = vpop.f32.mrb[60].mxu1 }
 0x22c   : > { %v1893_v25 = vrot.slane %v1860_v43, 6  ;;  %v2088_v28 = vrot.slane %v2055_v30, 7  ;;  %v1862_v32 = vpop.f32.mrb[61].mxu0  ;;  %v2057_v29 = vpop.f32.mrb[61].mxu1 }
 0x22d   : > { %4133 = vst.msk [vmem:[%s5356_s26 + $0x10] sm:$0xff] %vm339_vm0, %v1897_v22 }
 0x22e   : > { %v1894_v33 = vsel %vm1873_vm13, %v1891_v20, %v1893_v25  ;;  %v2089_v34 = vsel %vm2068_vm14, %v2086_v19, %v2088_v28  ;;  %v2256_v48 = vld [vmem:[%s5356_s26] sm:$0xff] }
 0x22f   : > { %v1898_v37 = vadd.f32 %v4132_v26, %v1894_v33  ;;  %v1865_v31 = vpop.f32.mrb[62].mxu0  ;;  %v2060_v38 = vpop.f32.mrb[62].mxu1 }
 0x230   : > { %v1866_v5 = vpop.f32.mrb[63].mxu0  ;;  %v2061_v40 = vpop.f32.mrb[63].mxu1 }
 0x231   : > { %4134 = vst.msk [vmem:[%s5356_s26 + $0x18] sm:$0xff] %vm339_vm0, %v1898_v37 }
 0x232   : > { %v2257_v51 = vld [vmem:[%s5356_s26 + $0x8] sm:$0xff] }
 0x234   : > { %v4161_v42 = vld [vmem:[%s5356_s26 + $0x10] sm:$0xff] }
 0x235   : > { %v2092_v39 = vadd.f32 %v4161_v42, %v2087_v21 }
 0x237   : > { %4163 = vst.msk [vmem:[%s5356_s26 + $0x10] sm:$0xff] %vm339_vm0, %v2092_v39  ;;  %v2221_v44 = vpop.f32.mrb[64].mxu0  ;;  %v2393_v36 = vpop.f32.mrb[64].mxu1 }
 0x238   : > { %v4162_v46 = vld [vmem:[%s5356_s26 + $0x18] sm:$0xff]  ;;  %v2222_v59 = vpop.f32.mrb[65].mxu0  ;;  %v2394_v47 = vpop.f32.mrb[65].mxu1 }
 0x239   : > { %v2093_v35 = vadd.f32 %v4162_v46, %v2089_v34 }
 0x23b   : > { %4164 = vst.msk [vmem:[%s5356_s26 + $0x18] sm:$0xff] %vm339_vm0, %v2093_v35  ;;  %v2225_v41 = vpop.f32.mrb[66].mxu0  ;;  %v2397_v45 = vpop.f32.mrb[66].mxu1 }
 0x23c   : > { %v2258_v61 = vadd.f32 %v2256_v48, %v2225_v41  ;;  %v2227_v12 = vpop.f32.mrb[67].mxu0  ;;  %v2399_v50 = vpop.f32.mrb[67].mxu1  ;;  %v2435_v53 = vrot.slane %v2397_v45, 1 }
 0x23e   : > { %2260 = vst.msk [vmem:[%s5356_s26] sm:$0xff] %vm339_vm0, %v2258_v61  ;;  %v4191_v10 = vld [vmem:[%s5356_s26 + $0x10] sm:$0xff] }
 0x23f   : > { %v2230_v63 = vpop.f32.mrb[68].mxu0  ;;  %v2402_v52 = vpop.f32.mrb[68].mxu1 }
 0x240   : > { %v2259_v14 = vadd.f32 %v2257_v51, %v2230_v63  ;;  %v2436_v49 = vrot.slane %v2402_v52, 1  ;;  %v2232_v7 = vpop.f32.mrb[69].mxu0  ;;  %v2404_v54 = vpop.f32.mrb[69].mxu1 }
 0x242   : > { %2261 = vst.msk [vmem:[%s5356_s26 + $0x8] sm:$0xff] %vm339_vm0, %v2259_v14  ;;  %v2437_v55 = vsel %vm898_vm8, %v2435_v53, %v2436_v49  ;;  %v4192_v58 = vld [vmem:[%s5356_s26 + $0x18] sm:$0xff] }
 0x243   : > { %v2407_v62 = vpop.f32.mrb[70].mxu1  ;;  %v2235_v15 = vpop.f32.mrb[70].mxu0 }
 0x244   : > { %v2438_v56 = vrot.slane %v2407_v62, 1  ;;  %v2236_v11 = vpop.f32.mrb[71].mxu0  ;;  %v2409_v57 = vpop.f32.mrb[71].mxu1 }
 0x245   : > { %v2430_v60 = vld [vmem:[%s5356_s26] sm:$0xff] }
 0x246   : > { %v2442_v24 = vadd.f32 %v2437_v55, %v2430_v60  ;;  %v2439_v0 = vsel %vm898_vm8, %v2436_v49, %v2438_v56 }
 0x247   : > { %v2239_v1 = vpop.f32.mrb[72].mxu0  ;;  %v2412_v2 = vpop.f32.mrb[72].mxu1 }
 0x248   : > { %2444 = vst.msk [vmem:[%s5356_s26] sm:$0xff] %vm339_vm0, %v2442_v24  ;;  %v2240_v3 = vpop.f32.mrb[73].mxu0  ;;  %v2413_v27 = vpop.f32.mrb[73].mxu1 }
 0x249   : > { %v2431_v4 = vld [vmem:[%s5356_s26 + $0x8] sm:$0xff] }
 0x24a   : > { %v2443_v6 = vadd.f32 %v2439_v0, %v2431_v4 }
 0x24b   : > { %v2243_v8 = vpop.f32.mrb[74].mxu0  ;;  %v2416_v9 = vpop.f32.mrb[74].mxu1 }
 0x24c   : > { %2445 = vst.msk [vmem:[%s5356_s26 + $0x8] sm:$0xff] %vm339_vm0, %v2443_v6  ;;  %v2264_v13 = vadd.f32 %v4191_v10, %v2243_v8  ;;  %v2245_v20 = vpop.f32.mrb[75].mxu0  ;;  %v2418_v19 = vpop.f32.mrb[75].mxu1  ;;  %v2451_v18 = vrot.slane %v2416_v9, 1 }
 0x24e   : > { %4193 = vst.msk [vmem:[%s5356_s26 + $0x10] sm:$0xff] %vm339_vm0, %v2264_v13 }
 0x24f   : > { %v2248_v16 = vpop.f32.mrb[76].mxu0  ;;  %v2421_v17 = vpop.f32.mrb[76].mxu1  ;;  %v2624_v63 = vld [vmem:[%s5356_s26] sm:$0xff] }
 0x250   : > { %v2265_v23 = vadd.f32 %v4192_v58, %v2248_v16  ;;  %v2452_v21 = vrot.slane %v2421_v17, 1  ;;  %v2250_v22 = vpop.f32.mrb[77].mxu0  ;;  %v2423_v43 = vpop.f32.mrb[77].mxu1 }
 0x252   : > { %4194 = vst.msk [vmem:[%s5356_s26 + $0x18] sm:$0xff] %vm339_vm0, %v2265_v23  ;;  %v2453_v30 = vsel %vm898_vm8, %v2451_v18, %v2452_v21 }
 0x253   : > { %v2426_v25 = vpop.f32.mrb[78].mxu1  ;;  %v2253_v28 = vpop.f32.mrb[78].mxu0  ;;  %v2625_v15 = vld [vmem:[%s5356_s26 + $0x8] sm:$0xff] }
 0x254   : > { %v2454_v32 = vrot.slane %v2426_v25, 1  ;;  %v2254_v29 = vpop.f32.mrb[79].mxu0  ;;  %v2428_v26 = vpop.f32.mrb[79].mxu1 }
 0x255   : > { %v4221_v33 = vld [vmem:[%s5356_s26 + $0x10] sm:$0xff] }
 0x256   : > { %v2458_v34 = vadd.f32 %v4221_v33, %v2453_v30  ;;  %v2455_v37 = vsel %vm898_vm8, %v2452_v21, %v2454_v32 }
 0x258   : > { %4223 = vst.msk [vmem:[%s5356_s26 + $0x10] sm:$0xff] %vm339_vm0, %v2458_v34 }
 0x259   : > { %v4222_v31 = vld [vmem:[%s5356_s26 + $0x18] sm:$0xff] }
 0x25a   : > { %v2459_v38 = vadd.f32 %v4222_v31, %v2455_v37 }
 0x25b   : > { %v2587_v5 = vpop.f32.mrb[80].mxu0  ;;  %v2781_v40 = vpop.f32.mrb[80].mxu1 }
 0x25c   : > { %4224 = vst.msk [vmem:[%s5356_s26 + $0x18] sm:$0xff] %vm339_vm0, %v2459_v38  ;;  %v2588_v42 = vpop.f32.mrb[81].mxu0  ;;  %v2782_v39 = vpop.f32.mrb[81].mxu1 }
 0x25f   : > { %v2591_v44 = vpop.f32.mrb[82].mxu0  ;;  %v2785_v36 = vpop.f32.mrb[82].mxu1  ;;  %v4251_v21 = vld [vmem:[%s5356_s26 + $0x10] sm:$0xff] }
 0x260   : > { %v2593_v46 = vpop.f32.mrb[83].mxu0  ;;  %v2787_v59 = vpop.f32.mrb[83].mxu1  ;;  %v2629_v41 = vrot.slane %v2591_v44, 2  ;;  %v2823_v48 = vrot.slane %v2785_v36, 3 }
 0x263   : > { %v2596_v47 = vpop.f32.mrb[84].mxu0  ;;  %v2790_v35 = vpop.f32.mrb[84].mxu1  ;;  %v4252_v34 = vld [vmem:[%s5356_s26 + $0x18] sm:$0xff] }
 0x264   : > { %v2630_v45 = vrot.slane %v2596_v47, 2  ;;  %v2824_v61 = vrot.slane %v2790_v35, 3  ;;  %v2598_v12 = vpop.f32.mrb[85].mxu0  ;;  %v2792_v50 = vpop.f32.mrb[85].mxu1 }
 0x266   : > { %v2631_v51 = vsel %vm1093_vm9, %v2629_v41, %v2630_v45  ;;  %v2825_v52 = vsel %vm1288_vm10, %v2823_v48, %v2824_v61 }
 0x267   : > { %v2636_v53 = vadd.f32 %v2631_v51, %v2624_v63  ;;  %v2601_v14 = vpop.f32.mrb[86].mxu0  ;;  %v2795_v49 = vpop.f32.mrb[86].mxu1 }
 0x268   : > { %v2632_v7 = vrot.slane %v2601_v14, 2  ;;  %v2826_v54 = vrot.slane %v2795_v49, 3  ;;  %v2603_v55 = vpop.f32.mrb[87].mxu0  ;;  %v2797_v62 = vpop.f32.mrb[87].mxu1 }
 0x269   : > { %2638 = vst.msk [vmem:[%s5356_s26] sm:$0xff] %vm339_vm0, %v2636_v53 }
 0x26a   : > { %v2633_v56 = vsel %vm1093_vm9, %v2630_v45, %v2632_v7  ;;  %v2827_v11 = vsel %vm1288_vm10, %v2824_v61, %v2826_v54 }
 0x26b   : > { %v2637_v57 = vadd.f32 %v2633_v56, %v2625_v15  ;;  %v2606_v60 = vpop.f32.mrb[88].mxu0  ;;  %v2800_v24 = vpop.f32.mrb[88].mxu1 }
 0x26c   : > { %v2607_v0 = vpop.f32.mrb[89].mxu0  ;;  %v2801_v1 = vpop.f32.mrb[89].mxu1 }
 0x26d   : > { %2639 = vst.msk [vmem:[%s5356_s26 + $0x8] sm:$0xff] %vm339_vm0, %v2637_v57 }
 0x26f   : > { %v2610_v2 = vpop.f32.mrb[90].mxu0  ;;  %v2804_v3 = vpop.f32.mrb[90].mxu1 }
 0x270   : > { %v2818_v27 = vld [vmem:[%s5356_s26] sm:$0xff]  ;;  %v2612_v4 = vpop.f32.mrb[91].mxu0  ;;  %v2806_v6 = vpop.f32.mrb[91].mxu1  ;;  %v2645_v10 = vrot.slane %v2610_v2, 2  ;;  %v2839_v19 = vrot.slane %v2804_v3, 3 }
 0x271   : > { %v2830_v8 = vadd.f32 %v2825_v52, %v2818_v27 }
 0x273   : > { %2832 = vst.msk [vmem:[%s5356_s26] sm:$0xff] %vm339_vm0, %v2830_v8  ;;  %v2615_v9 = vpop.f32.mrb[92].mxu0  ;;  %v2809_v13 = vpop.f32.mrb[92].mxu1 }
 0x274   : > { %v2819_v20 = vld [vmem:[%s5356_s26 + $0x8] sm:$0xff]  ;;  %v2646_v16 = vrot.slane %v2615_v9, 2  ;;  %v2840_v58 = vrot.slane %v2809_v13, 3  ;;  %v2617_v17 = vpop.f32.mrb[93].mxu0  ;;  %v2811_v18 = vpop.f32.mrb[93].mxu1 }
 0x275   : > { %v2831_v23 = vadd.f32 %v2827_v11, %v2819_v20 }
 0x276   : > { %v2647_v22 = vsel %vm1093_vm9, %v2645_v10, %v2646_v16  ;;  %v2841_v43 = vsel %vm1288_vm10, %v2839_v19, %v2840_v58 }
 0x277   : > { %2833 = vst.msk [vmem:[%s5356_s26 + $0x8] sm:$0xff] %vm339_vm0, %v2831_v23  ;;  %v2652_v30 = vadd.f32 %v4251_v21, %v2647_v22  ;;  %v2620_v25 = vpop.f32.mrb[94].mxu0  ;;  %v2814_v28 = vpop.f32.mrb[94].mxu1 }
 0x278   : > { %v2648_v32 = vrot.slane %v2620_v25, 2  ;;  %v2842_v29 = vrot.slane %v2814_v28, 3  ;;  %v2622_v26 = vpop.f32.mrb[95].mxu0  ;;  %v2816_v33 = vpop.f32.mrb[95].mxu1 }
 0x279   : > { %4253 = vst.msk [vmem:[%s5356_s26 + $0x10] sm:$0xff] %vm339_vm0, %v2652_v30 }
 0x27a   : > { %v2649_v37 = vsel %vm1093_vm9, %v2646_v16, %v2648_v32  ;;  %v2843_v31 = vsel %vm1288_vm10, %v2840_v58, %v2842_v29  ;;  %v3012_v14 = vld [vmem:[%s5356_s26] sm:$0xff] }
 0x27b   : > { %v2653_v38 = vadd.f32 %v4252_v34, %v2649_v37 }
 0x27d   : > { %4254 = vst.msk [vmem:[%s5356_s26 + $0x18] sm:$0xff] %vm339_vm0, %v2653_v38 }
 0x27e   : > { %v3013_v60 = vld [vmem:[%s5356_s26 + $0x8] sm:$0xff] }
 0x27f   : > { %v2975_v5 = vpop.f32.mrb[96].mxu0  ;;  %v3169_v40 = vpop.f32.mrb[96].mxu1 }
 0x280   : > { %v4281_v42 = vld [vmem:[%s5356_s26 + $0x10] sm:$0xff]  ;;  %v2976_v39 = vpop.f32.mrb[97].mxu0  ;;  %v3170_v44 = vpop.f32.mrb[97].mxu1 }
 0x281   : > { %v2846_v36 = vadd.f32 %v4281_v42, %v2841_v43 }
 0x283   : > { %4283 = vst.msk [vmem:[%s5356_s26 + $0x10] sm:$0xff] %vm339_vm0, %v2846_v36  ;;  %v2979_v46 = vpop.f32.mrb[98].mxu0  ;;  %v3173_v59 = vpop.f32.mrb[98].mxu1 }
 0x284   : > { %v4282_v47 = vld [vmem:[%s5356_s26 + $0x18] sm:$0xff]  ;;  %v2981_v35 = vpop.f32.mrb[99].mxu0  ;;  %v3175_v41 = vpop.f32.mrb[99].mxu1  ;;  %v3017_v12 = vrot.slane %v2979_v46, 4  ;;  %v3211_v50 = vrot.slane %v3173_v59, 5 }
 0x285   : > { %v2847_v48 = vadd.f32 %v4282_v47, %v2843_v31 }
 0x287   : > { %4284 = vst.msk [vmem:[%s5356_s26 + $0x18] sm:$0xff] %vm339_vm0, %v2847_v48  ;;  %v2984_v45 = vpop.f32.mrb[100].mxu0  ;;  %v3178_v61 = vpop.f32.mrb[100].mxu1 }
 0x288   : > { %v3018_v63 = vrot.slane %v2984_v45, 4  ;;  %v3212_v51 = vrot.slane %v3178_v61, 5  ;;  %v2986_v52 = vpop.f32.mrb[101].mxu0  ;;  %v3180_v53 = vpop.f32.mrb[101].mxu1 }
 0x28a   : > { %v3019_v49 = vsel %vm1483_vm11, %v3017_v12, %v3018_v63  ;;  %v3213_v7 = vsel %vm1678_vm12, %v3211_v50, %v3212_v51  ;;  %v4311_v25 = vld [vmem:[%s5356_s26 + $0x10] sm:$0xff] }
 0x28b   : > { %v3024_v54 = vadd.f32 %v3019_v49, %v3012_v14  ;;  %v2989_v55 = vpop.f32.mrb[102].mxu0  ;;  %v3183_v62 = vpop.f32.mrb[102].mxu1 }
 0x28c   : > { %v3020_v15 = vrot.slane %v2989_v55, 4  ;;  %v3214_v56 = vrot.slane %v3183_v62, 5  ;;  %v2991_v11 = vpop.f32.mrb[103].mxu0  ;;  %v3185_v57 = vpop.f32.mrb[103].mxu1 }
 0x28d   : > { %3026 = vst.msk [vmem:[%s5356_s26] sm:$0xff] %vm339_vm0, %v3024_v54 }
 0x28e   : > { %v3021_v24 = vsel %vm1483_vm11, %v3018_v63, %v3020_v15  ;;  %v3215_v0 = vsel %vm1678_vm12, %v3212_v51, %v3214_v56  ;;  %v4312_v5 = vld [vmem:[%s5356_s26 + $0x18] sm:$0xff] }
 0x28f   : > { %v3025_v1 = vadd.f32 %v3021_v24, %v3013_v60  ;;  %v2994_v2 = vpop.f32.mrb[104].mxu0  ;;  %v3188_v3 = vpop.f32.mrb[104].mxu1 }
 0x290   : > { %v2995_v27 = vpop.f32.mrb[105].mxu0  ;;  %v3189_v4 = vpop.f32.mrb[105].mxu1 }
 0x291   : > { %3027 = vst.msk [vmem:[%s5356_s26 + $0x8] sm:$0xff] %vm339_vm0, %v3025_v1 }
 0x293   : > { %v2998_v6 = vpop.f32.mrb[106].mxu0  ;;  %v3192_v8 = vpop.f32.mrb[106].mxu1 }
 0x294   : > { %v3206_v10 = vld [vmem:[%s5356_s26] sm:$0xff]  ;;  %v3000_v9 = vpop.f32.mrb[107].mxu0  ;;  %v3194_v13 = vpop.f32.mrb[107].mxu1  ;;  %v3033_v19 = vrot.slane %v2998_v6, 4  ;;  %v3227_v18 = vrot.slane %v3192_v8, 5 }
 0x295   : > { %v3218_v20 = vadd.f32 %v3213_v7, %v3206_v10 }
 0x297   : > { %3220 = vst.msk [vmem:[%s5356_s26] sm:$0xff] %vm339_vm0, %v3218_v20  ;;  %v3003_v16 = vpop.f32.mrb[108].mxu0  ;;  %v3197_v58 = vpop.f32.mrb[108].mxu1 }
 0x298   : > { %v3207_v17 = vld [vmem:[%s5356_s26 + $0x8] sm:$0xff]  ;;  %v3034_v23 = vrot.slane %v3003_v16, 4  ;;  %v3228_v21 = vrot.slane %v3197_v58, 5  ;;  %v3005_v22 = vpop.f32.mrb[109].mxu0  ;;  %v3199_v43 = vpop.f32.mrb[109].mxu1 }
 0x299   : > { %v3219_v30 = vadd.f32 %v3215_v0, %v3207_v17 }
 0x29a   : > { %v3035_v28 = vsel %vm1483_vm11, %v3033_v19, %v3034_v23  ;;  %v3229_v32 = vsel %vm1678_vm12, %v3227_v18, %v3228_v21 }
 0x29b   : > { %3221 = vst.msk [vmem:[%s5356_s26 + $0x8] sm:$0xff] %vm339_vm0, %v3219_v30  ;;  %v3040_v29 = vadd.f32 %v4311_v25, %v3035_v28  ;;  %v3008_v26 = vpop.f32.mrb[110].mxu0  ;;  %v3202_v33 = vpop.f32.mrb[110].mxu1 }
 0x29c   : > { %v3036_v34 = vrot.slane %v3008_v26, 4  ;;  %v3230_v37 = vrot.slane %v3202_v33, 5  ;;  %v3010_v31 = vpop.f32.mrb[111].mxu0  ;;  %v3204_v38 = vpop.f32.mrb[111].mxu1 }
 0x29d   : > { %4313 = vst.msk [vmem:[%s5356_s26 + $0x10] sm:$0xff] %vm339_vm0, %v3040_v29 }
 0x29e   : > { %v3037_v40 = vsel %vm1483_vm11, %v3034_v23, %v3036_v34  ;;  %v3231_v42 = vsel %vm1678_vm12, %v3228_v21, %v3230_v37  ;;  %v3400_v55 = vld [vmem:[%s5356_s26] sm:$0xff] }
 0x29f   : > { %v3041_v39 = vadd.f32 %v4312_v5, %v3037_v40 }
 0x2a1   : > { %4314 = vst.msk [vmem:[%s5356_s26 + $0x18] sm:$0xff] %vm339_vm0, %v3041_v39 }
 0x2a2   : > { %v3401_v2 = vld [vmem:[%s5356_s26 + $0x8] sm:$0xff] }
 0x2a3   : > { %v3363_v44 = vpop.f32.mrb[112].mxu0  ;;  %v3557_v36 = vpop.f32.mrb[112].mxu1 }
 0x2a4   : > { %v4341_v46 = vld [vmem:[%s5356_s26 + $0x10] sm:$0xff]  ;;  %v3364_v59 = vpop.f32.mrb[113].mxu0  ;;  %v3558_v47 = vpop.f32.mrb[113].mxu1 }
 0x2a5   : > { %v3234_v35 = vadd.f32 %v4341_v46, %v3229_v32 }
 0x2a7   : > { %4343 = vst.msk [vmem:[%s5356_s26 + $0x10] sm:$0xff] %vm339_vm0, %v3234_v35  ;;  %v3367_v41 = vpop.f32.mrb[114].mxu0  ;;  %v3561_v48 = vpop.f32.mrb[114].mxu1 }
 0x2a8   : > { %v4342_v45 = vld [vmem:[%s5356_s26 + $0x18] sm:$0xff]  ;;  %v3369_v61 = vpop.f32.mrb[115].mxu0  ;;  %v3563_v12 = vpop.f32.mrb[115].mxu1  ;;  %v3405_v52 = vrot.slane %v3367_v41, 6  ;;  %v3599_v53 = vrot.slane %v3561_v48, 7 }
 0x2a9   : > { %v3235_v50 = vadd.f32 %v4342_v45, %v3231_v42 }
 0x2ab   : > { %4344 = vst.msk [vmem:[%s5356_s26 + $0x18] sm:$0xff] %vm339_vm0, %v3235_v50  ;;  %v3372_v63 = vpop.f32.mrb[116].mxu0  ;;  %v3566_v51 = vpop.f32.mrb[116].mxu1 }
 0x2ac   : > { %v3406_v14 = vrot.slane %v3372_v63, 6  ;;  %v3600_v49 = vrot.slane %v3566_v51, 7  ;;  %v3374_v7 = vpop.f32.mrb[117].mxu0  ;;  %v3568_v54 = vpop.f32.mrb[117].mxu1 }
 0x2ae   : > { %v3407_v62 = vsel %vm1873_vm13, %v3405_v52, %v3406_v14  ;;  %v3601_v15 = vsel %vm2068_vm14, %v3599_v53, %v3600_v49  ;;  %v4371_v26 = vld [vmem:[%s5356_s26 + $0x10] sm:$0xff] }
 0x2af   : > { %v3412_v56 = vadd.f32 %v3407_v62, %v3400_v55  ;;  %v3377_v11 = vpop.f32.mrb[118].mxu0  ;;  %v3571_v57 = vpop.f32.mrb[118].mxu1 }
 0x2b0   : > { %v3408_v60 = vrot.slane %v3377_v11, 6  ;;  %v3602_v24 = vrot.slane %v3571_v57, 7  ;;  %v3379_v0 = vpop.f32.mrb[119].mxu0  ;;  %v3573_v1 = vpop.f32.mrb[119].mxu1 }
 0x2b1   : > { %3414 = vst.msk [vmem:[%s5356_s26] sm:$0xff] %vm339_vm0, %v3412_v56 }
 0x2b2   : > { %v3409_v3 = vsel %vm1873_vm13, %v3406_v14, %v3408_v60  ;;  %v3603_v27 = vsel %vm2068_vm14, %v3600_v49, %v3602_v24  ;;  %v4372_v44 = vld [vmem:[%s5356_s26 + $0x18] sm:$0xff] }
 0x2b3   : > { %v3413_v4 = vadd.f32 %v3409_v3, %v3401_v2  ;;  %v3382_v6 = vpop.f32.mrb[120].mxu0  ;;  %v3576_v8 = vpop.f32.mrb[120].mxu1 }
 0x2b4   : > { %v3383_v10 = vpop.f32.mrb[121].mxu0  ;;  %v3577_v9 = vpop.f32.mrb[121].mxu1 }
 0x2b5   : > { %3415 = vst.msk [vmem:[%s5356_s26 + $0x8] sm:$0xff] %vm339_vm0, %v3413_v4 }
 0x2b7   : > { %v3386_v13 = vpop.f32.mrb[122].mxu0  ;;  %v3580_v20 = vpop.f32.mrb[122].mxu1 }
 0x2b8   : > { %v3594_v19 = vld [vmem:[%s5356_s26] sm:$0xff]  ;;  %v3388_v16 = vpop.f32.mrb[123].mxu0  ;;  %v3582_v58 = vpop.f32.mrb[123].mxu1  ;;  %v3421_v18 = vrot.slane %v3386_v13, 6  ;;  %v3615_v43 = vrot.slane %v3580_v20, 7 }
 0x2b9   : > { %v3606_v17 = vadd.f32 %v3601_v15, %v3594_v19 }
 0x2bb   : > { %3608 = vst.msk [vmem:[%s5356_s26] sm:$0xff] %vm339_vm0, %v3606_v17  ;;  %v3391_v23 = vpop.f32.mrb[124].mxu0  ;;  %v3585_v21 = vpop.f32.mrb[124].mxu1 }
 0x2bc   : > { %v3595_v22 = vld [vmem:[%s5356_s26 + $0x8] sm:$0xff]  ;;  %v3422_v30 = vrot.slane %v3391_v23, 6  ;;  %v3616_v25 = vrot.slane %v3585_v21, 7  ;;  %v3393_v28 = vpop.f32.mrb[125].mxu0  ;;  %v3587_v32 = vpop.f32.mrb[125].mxu1 }
 0x2bd   : > { %v3607_v29 = vadd.f32 %v3603_v27, %v3595_v22 }
 0x2be   : > { %v3423_v33 = vsel %vm1873_vm13, %v3421_v18, %v3422_v30  ;;  %v3617_v34 = vsel %vm2068_vm14, %v3615_v43, %v3616_v25 }
 0x2bf   : > { %3609 = vst.msk [vmem:[%s5356_s26 + $0x8] sm:$0xff] %vm339_vm0, %v3607_v29  ;;  %v3428_v37 = vadd.f32 %v4371_v26, %v3423_v33  ;;  %v3396_v31 = vpop.f32.mrb[126].mxu0  ;;  %v3590_v38 = vpop.f32.mrb[126].mxu1 }
 0x2c0   : > { %v3424_v5 = vrot.slane %v3396_v31, 6  ;;  %v3618_v40 = vrot.slane %v3590_v38, 7  ;;  %v3398_v42 = vpop.f32.mrb[127].mxu0  ;;  %v3592_v39 = vpop.f32.mrb[127].mxu1 }
 0x2c1   : > { %4373 = vst.msk [vmem:[%s5356_s26 + $0x10] sm:$0xff] %vm339_vm0, %v3428_v37 }
 0x2c2   : > { %v3425_v36 = vsel %vm1873_vm13, %v3422_v30, %v3424_v5  ;;  %v3619_v46 = vsel %vm2068_vm14, %v3616_v25, %v3618_v40  ;;  %v3786_v49 = vld [vmem:[%s5356_s26] sm:$0xff] }
 0x2c3   : > { %v3429_v59 = vadd.f32 %v4372_v44, %v3425_v36 }
 0x2c5   : > { %4374 = vst.msk [vmem:[%s5356_s26 + $0x18] sm:$0xff] %vm339_vm0, %v3429_v59 }
 0x2c6   : > { %v3787_v57 = vld [vmem:[%s5356_s26 + $0x8] sm:$0xff] }
 0x2c7   : > { %v3751_v47 = vpop.f32.mrb[128].mxu0  ;;  %v3769_v35 = vpop.f32.mrb[128].mxu1 }
 0x2c8   : > { %v4401_v41 = vld [vmem:[%s5356_s26 + $0x10] sm:$0xff]  ;;  %v3752_v48 = vpop.f32.mrb[129].mxu0  ;;  %v3770_v45 = vpop.f32.mrb[129].mxu1 }
 0x2c9   : > { %v3622_v61 = vadd.f32 %v4401_v41, %v3617_v34 }
 0x2cb   : > { %4403 = vst.msk [vmem:[%s5356_s26 + $0x10] sm:$0xff] %vm339_vm0, %v3622_v61  ;;  %v3755_v12 = vpop.f32.mrb[130].mxu0  ;;  %v3773_v50 = vpop.f32.mrb[130].mxu1 }
 0x2cc   : > { %v4402_v63 = vld [vmem:[%s5356_s26 + $0x18] sm:$0xff]  ;;  %v3756_v51 = vpop.f32.mrb[131].mxu0  ;;  %v3774_v52 = vpop.f32.mrb[131].mxu1 }
 0x2cd   : > { %v3623_v53 = vadd.f32 %v4402_v63, %v3619_v46 }
 0x2cf   : > { %4404 = vst.msk [vmem:[%s5356_s26 + $0x18] sm:$0xff] %vm339_vm0, %v3623_v53  ;;  %v3759_v14 = vpop.f32.mrb[132].mxu0  ;;  %v3777_v7 = vpop.f32.mrb[132].mxu1 }
 0x2d0   : > { %v3788_v54 = vadd.f32 %v3786_v49, %v3759_v14  ;;  %v3761_v55 = vpop.f32.mrb[133].mxu0  ;;  %v3779_v62 = vpop.f32.mrb[133].mxu1 }
 0x2d2   : > { %3790 = vst.msk [vmem:[%s5356_s26] sm:$0xff] %vm339_vm0, %v3788_v54  ;;  %v4431_v15 = vld [vmem:[%s5356_s26 + $0x10] sm:$0xff] }
 0x2d3   : > { %v3794_v56 = vadd.f32 %v4431_v15, %v3777_v7  ;;  %v3764_v11 = vpop.f32.mrb[134].mxu0  ;;  %v3782_v60 = vpop.f32.mrb[134].mxu1 }
 0x2d4   : > { %v3789_v24 = vadd.f32 %v3787_v57, %v3764_v11  ;;  %v3766_v0 = vpop.f32.mrb[135].mxu0  ;;  %v3784_v1 = vpop.f32.mrb[135].mxu1 }
 0x2d5   : > { %4433 = vst.msk [vmem:[%s5356_s26 + $0x10] sm:$0xff] %vm339_vm0, %v3794_v56 }
 0x2d6   : > { %3791 = vst.msk [vmem:[%s5356_s26 + $0x8] sm:$0xff] %vm339_vm0, %v3789_v24  ;;  %v4432_v2 = vld [vmem:[%s5356_s26 + $0x18] sm:$0xff] }
 0x2d7   : > { %v3795_v3 = vadd.f32 %v4432_v2, %v3782_v60 }
 0x2d9   : > { %4434 = vst.msk [vmem:[%s5356_s26 + $0x18] sm:$0xff] %vm339_vm0, %v3795_v3 }
 0x2da   : > { %5021 = shalt.err (!%p5018_p7)
}
 0x2db   : > { %s5022_s26 = scalar_lea.hbm %s7255_s29, 512  ;;  %s5026_s18 = scalar_lea.hbm %s7315_s2, 2048 }
 0x2dc   : > { %p5023_p10 = scmp.ne.s32.totalorder %s7255_s29, %s5022_s26  ;;  %p5027_p13 = scmp.lt.u32.totalorder %s7255_s29, %s7315_s2 }
 0x2dd   : > { %p5028_p0 = scmp.lt.u32.totalorder %s5026_s18, %s5022_s26  ;;  %p5030_p2 = scmp.lt.u32.totalorder %s5022_s26, %s7255_s29 }
 0x2de   : > { %p5024_p11 = pnand %p5023_p10, %p5191_p8 }
 0x2df   : > { %p5029_p1 = por %p5028_p0, %p5027_p13 }
 0x2e0   : > { %p5025_p12 = pneg %p5024_p11 }
 0x2e1   : > { %p5031_p3 = por %p5030_p2, %p5029_p1 }
 0x2e3   : > { %p5032_p4 = pnand %p5031_p3, %p5025_p12 }
 0x2e5   : > { %5035 = shalt.err (!%p5032_p4)
}
 0x2e6   : > { %s5114_s6 = smov 128   ;;  %s5115_s12 = smov 8  }
 0x2e7   : > { %4924 = dma.vmem_to_hbm [thread:$0]  (%p5191_p8), %s7257_s13, 512, %s7255_s29, %s3799_s17, %s5114_s6, %s5114_s6, %s5115_s12  }
 0x2e8 PF: > { %p4930_p5 = scmp.ge.s32.totalorder %s5102_s16, 2  ;;  %s3830_s3 = sand.u32 1, %s5074_s9  }
 0x2e9   : > { %s3831_s22 = scalar_lea.sflag [#allocation5], %s3830_s3 }
 0x2ea   : > { %p4927_p6 = pnand %p4930_p5, %p5195_p9 }
 0x2ec   : > { %5069 = dma.done.wait (!%p4927_p6), %s3831_s22, 512  }
 0x2ed   : > { %5071 = vsyncadd (!%p4927_p6), %s3831_s22, 4294966784  ;;  %s15_s16 = sadd.s32 1, %s5102_s16   ;;  %s7342_s9 = smov %s5078_s10 }
 0x2ee   : > { %p12_p7 = scmp.ge.s32.totalorder %s15_s16, 6   ;;  %s7343_s10 = smov %s5082_s11 }
 0x2ef   : > { %s7344_s11 = smov %s5203_s28  ;;  %s7345_s12 = smov %s5094_s14 }
 0x2f0   : > { %s7346_s13 = smov %s5098_s15  ;;  %s7347_s14 = smov %s7350_s19 }
 0x2f1   : > { %s7348_s15 = smov %s7354_s20  ;;  %14 = sbr.rel (!%p12_p7) target bundleno = 7 (0x7), region = 140 }
 0x2f8   :  { %3836 = vsyncpa [#allocation5], 1 }
 0x2f9   :  { %3838 = vsyncpa [#allocation5 + $0x1], 1 }

// kernel: tpu_custom_call.1
= control target key start
LH: loop header
LB: loop body
LE: loop exit
PB: predicated region body
PF: predicated region fallthrough
CT: control target
= control target key end

     0   :  { %s7313_s0 = inlined_call_operand.vmem [shape: f32[2,9,4,16,16], index: 0, kind: input, shape index: {}]   ;;  %s7314_s1 = inlined_call_operand.vmem [shape: f32[17,144,16], index: 1, kind: input, shape index: {}]   ;;  %s7315_s2 = inlined_call_operand.hbm [shape: f32[2,4,16,16], index: 2, kind: output, shape index: {}]  }
   0x1   :  { %7330 = sst [smem:[#allocation7_spill]] %s7313_s0 }
   0x2   :  { %7 = vsyncpa [#allocation5], 0 }
   0x3   :  { %9 = vsyncpa [#allocation5 + $0x1], 0  ;;  %s5131_s9 = smov 0   ;;  %s5133_s10 = smov 0  }
   0x4   :  { %s5135_s11 = smov 0   ;;  %s5137_s12 = smov 0  }
   0x5   :  { %s5139_s13 = smov 0   ;;  %s5141_s14 = smov 0  }
   0x6   :  { %s5143_s15 = smov 0   ;;  %s5145_s16 = smov 0  }
   0x7 LB: > { %s3900_s17 = sadd.s32 4294967295, %s5102_s16   ;;  %s3901_s18 = sadd.s32 4294967294, %s5102_s16   ;;  %s5102_s16 = sphi %s5145_s16, %s15_s16   ;;  %s5098_s15 = sphi %s5143_s15, %s7348_s15   ;;  %s5094_s14 = sphi %s5141_s14, %s7347_s14   ;;  %s5090_s13 = sphi %s5139_s13, %s7346_s13   ;;  %s5086_s12 = sphi %s5137_s12, %s7345_s12   ;;  %s5082_s11 = sphi %s5135_s11, %s7344_s11   ;;  %s5078_s10 = sphi %s5133_s10, %s7343_s10   ;;  %s5074_s9 = sphi %s5131_s9, %s7342_s9  }
   0x8   : > { %s24_s19 = sadd.s32 1, %s5094_s14  ;;  %s27_s20 = sadd.s32 1, %s5098_s15 }
   0x9   : > { %p25_p0 = scmp.ge.s32.totalorder %s24_s19, 2  ;;  %p43_p1 = scmp.ne.s32.totalorder %s5082_s11, %s5078_s10 }
   0xa   : > { %p44_p2 = scmp.eq.s32.totalorder %s5102_s16, 0  ;;  %p96_p5 = scmp.eq.s32.totalorder %s3900_s17, 3 }
   0xb   : > { %s7350_s19 = smov (%p25_p0, %s24_s19), 0  ;;  %s7352_s20 = smov (!%p25_p0, %s27_s20), %s5098_s15 }
   0xc   : > { %s32_s21 = ssub.s32 %s5094_s14, %s7350_s19  ;;  %p5183_p3 = por %p44_p2, %p43_p1 }
   0xd   : > { %p29_p4 = scmp.ge.s32.totalorder %s7352_s20, 2  ;;  %p101_p6 = scmp.ne.s32.totalorder %s5078_s10, %s5074_s9 }
   0xe   : > { %p102_p7 = scmp.eq.s32.totalorder %s3901_s18, 3  ;;  %p5191_p8 = por %p96_p5, %p43_p1 }
   0xf   : > { %s7354_s20 = smov (%p29_p4, %s7352_s20), 0  ;;  %s36_s27 = sadd.s32 1, %s5082_s11 }
  0x10   : > { %p5195_p9 = por %p102_p7, %p101_p6  ;;  %s31_s25 = ssub.s32 %s5098_s15, %s7354_s20 }
  0x11   : > { %s33_s26 = sor.u32 %s32_s21, %s31_s25  ;;  %p3903_p11 = scmp.ge.s32.totalorder %s5102_s16, 4 }
  0x12   : > { %p34_p10 = scmp.eq.s32.totalorder %s33_s26, 0 }
  0x13   : > { %121 = sbr.rel (%p3903_p11) target bundleno = 54 (0x36), region = 20 }
  0x14   : > { %s5203_s28 = scalar_select %p34_p10, %s5082_s11, %s36_s27  }
  0x1a   : > { %124 = sbr.rel (!%p5183_p3) target bundleno = 54 (0x36), region = 24  ;;  %s126_s29 = sand.u32 (%p5183_p3), 1, %s5082_s11  }
  0x1b   : > { %s4921_s30 = smul.u32 (%p5183_p3), 288, %s126_s29  ;;  %s4442_s3 = sshll.u32 (%p5183_p3), %s5094_s14, 2 }
  0x1c   : > { %s4922_s4 = smul.u32 (%p5183_p3), 72, %s5098_s15  ;;  %s7334_s0 = sld [smem:[#allocation7_spill]] (%p5183_p3) }
  0x1d   : > { %s5219_s18 = scalar_lea.vmem (%p5183_p3), [#allocation3], %s4921_s30 }
  0x1e   : > { %s132_s5 = sadd.s32 (%p5183_p3), %s4922_s4, %s4442_s3 }
  0x1f   : > { %s3906_s6 = sshll.u32 (%p5183_p3), %s132_s5, 3 }
  0x22   : > { %s5214_s17 = scalar_lea.vmem %s7334_s0, %s3906_s6 }
  0x23   : > { %v232_v0 = vld [vmem:[%s5214_s17] sm:$0xff]  ;;  %v234_v1 = vld [vmem:[%s5214_s17 + $0x8] sm:$0xff]  ;;  %v236_v2 = vld [vmem:[%s5214_s17 + $0x10] sm:$0xff] }
  0x24   : > { %233 = vst [vmem:[%s5219_s18] sm:$0xff] %v232_v0  ;;  %235 = vst [vmem:[%s5219_s18 + $0x8] sm:$0xff] %v234_v1  ;;  %v238_v3 = vld [vmem:[%s5214_s17 + $0x18] sm:$0xff]  ;;  %v240_v4 = vld [vmem:[%s5214_s17 + $0x40] sm:$0xff] }
  0x25   : > { %237 = vst [vmem:[%s5219_s18 + $0x10] sm:$0xff] %v236_v2  ;;  %v242_v5 = vld [vmem:[%s5214_s17 + $0x48] sm:$0xff]  ;;  %239 = vst [vmem:[%s5219_s18 + $0x18] sm:$0xff] %v238_v3  ;;  %v244_v6 = vld [vmem:[%s5214_s17 + $0x50] sm:$0xff] }
  0x26   : > { %241 = vst [vmem:[%s5219_s18 + $0x20] sm:$0xff] %v240_v4  ;;  %243 = vst [vmem:[%s5219_s18 + $0x28] sm:$0xff] %v242_v5  ;;  %v246_v7 = vld [vmem:[%s5214_s17 + $0x58] sm:$0xff]  ;;  %v248_v8 = vld [vmem:[%s5214_s17 + $0x80] sm:$0xff] }
  0x27   : > { %245 = vst [vmem:[%s5219_s18 + $0x30] sm:$0xff] %v244_v6  ;;  %247 = vst [vmem:[%s5219_s18 + $0x38] sm:$0xff] %v246_v7  ;;  %v250_v9 = vld [vmem:[%s5214_s17 + $0x88] sm:$0xff]  ;;  %v252_v10 = vld [vmem:[%s5214_s17 + $0x90] sm:$0xff] }
  0x28   : > { %249 = vst [vmem:[%s5219_s18 + $0x40] sm:$0xff] %v248_v8  ;;  %v254_v11 = vld [vmem:[%s5214_s17 + $0x98] sm:$0xff]  ;;  %251 = vst [vmem:[%s5219_s18 + $0x48] sm:$0xff] %v250_v9  ;;  %v256_v12 = vld [vmem:[%s5214_s17 + $0xc0] sm:$0xff] }
  0x29   : > { %253 = vst [vmem:[%s5219_s18 + $0x50] sm:$0xff] %v252_v10  ;;  %255 = vst [vmem:[%s5219_s18 + $0x58] sm:$0xff] %v254_v11  ;;  %v258_v13 = vld [vmem:[%s5214_s17 + $0xc8] sm:$0xff]  ;;  %v260_v14 = vld [vmem:[%s5214_s17 + $0xd0] sm:$0xff] }
  0x2a   : > { %257 = vst [vmem:[%s5219_s18 + $0x60] sm:$0xff] %v256_v12  ;;  %259 = vst [vmem:[%s5219_s18 + $0x68] sm:$0xff] %v258_v13  ;;  %v262_v15 = vld [vmem:[%s5214_s17 + $0xd8] sm:$0xff]  ;;  %v264_v16 = vld [vmem:[%s5214_s17 + $0x100] sm:$0xff] }
  0x2b   : > { %261 = vst [vmem:[%s5219_s18 + $0x70] sm:$0xff] %v260_v14  ;;  %v266_v17 = vld [vmem:[%s5214_s17 + $0x108] sm:$0xff]  ;;  %263 = vst [vmem:[%s5219_s18 + $0x78] sm:$0xff] %v262_v15  ;;  %v268_v18 = vld [vmem:[%s5214_s17 + $0x110] sm:$0xff] }
  0x2c   : > { %265 = vst [vmem:[%s5219_s18 + $0x80] sm:$0xff] %v264_v16  ;;  %267 = vst [vmem:[%s5219_s18 + $0x88] sm:$0xff] %v266_v17  ;;  %v270_v19 = vld [vmem:[%s5214_s17 + $0x118] sm:$0xff]  ;;  %v272_v20 = vld [vmem:[%s5214_s17 + $0x140] sm:$0xff] }
  0x2d   : > { %269 = vst [vmem:[%s5219_s18 + $0x90] sm:$0xff] %v268_v18  ;;  %271 = vst [vmem:[%s5219_s18 + $0x98] sm:$0xff] %v270_v19  ;;  %v274_v21 = vld [vmem:[%s5214_s17 + $0x148] sm:$0xff]  ;;  %v276_v22 = vld [vmem:[%s5214_s17 + $0x150] sm:$0xff] }
  0x2e   : > { %273 = vst [vmem:[%s5219_s18 + $0xa0] sm:$0xff] %v272_v20  ;;  %v278_v23 = vld [vmem:[%s5214_s17 + $0x158] sm:$0xff]  ;;  %275 = vst [vmem:[%s5219_s18 + $0xa8] sm:$0xff] %v274_v21  ;;  %v280_v24 = vld [vmem:[%s5214_s17 + $0x180] sm:$0xff] }
  0x2f   : > { %277 = vst [vmem:[%s5219_s18 + $0xb0] sm:$0xff] %v276_v22  ;;  %279 = vst [vmem:[%s5219_s18 + $0xb8] sm:$0xff] %v278_v23  ;;  %v282_v25 = vld [vmem:[%s5214_s17 + $0x188] sm:$0xff]  ;;  %v284_v26 = vld [vmem:[%s5214_s17 + $0x190] sm:$0xff] }
  0x30   : > { %281 = vst [vmem:[%s5219_s18 + $0xc0] sm:$0xff] %v280_v24  ;;  %283 = vst [vmem:[%s5219_s18 + $0xc8] sm:$0xff] %v282_v25  ;;  %v286_v27 = vld [vmem:[%s5214_s17 + $0x198] sm:$0xff]  ;;  %v288_v28 = vld [vmem:[%s5214_s17 + $0x1c0] sm:$0xff] }
  0x31   : > { %285 = vst [vmem:[%s5219_s18 + $0xd0] sm:$0xff] %v284_v26  ;;  %v290_v29 = vld [vmem:[%s5214_s17 + $0x1c8] sm:$0xff]  ;;  %287 = vst [vmem:[%s5219_s18 + $0xd8] sm:$0xff] %v286_v27  ;;  %v292_v30 = vld [vmem:[%s5214_s17 + $0x1d0] sm:$0xff] }
  0x32   : > { %289 = vst [vmem:[%s5219_s18 + $0xe0] sm:$0xff] %v288_v28  ;;  %291 = vst [vmem:[%s5219_s18 + $0xe8] sm:$0xff] %v290_v29  ;;  %v294_v31 = vld [vmem:[%s5214_s17 + $0x1d8] sm:$0xff]  ;;  %v296_v32 = vld [vmem:[%s5214_s17 + $0x200] sm:$0xff] }
  0x33   : > { %293 = vst [vmem:[%s5219_s18 + $0xf0] sm:$0xff] %v292_v30  ;;  %295 = vst [vmem:[%s5219_s18 + $0xf8] sm:$0xff] %v294_v31  ;;  %v298_v33 = vld [vmem:[%s5214_s17 + $0x208] sm:$0xff]  ;;  %v300_v34 = vld [vmem:[%s5214_s17 + $0x210] sm:$0xff] }
  0x34   : > { %297 = vst [vmem:[%s5219_s18 + $0x100] sm:$0xff] %v296_v32  ;;  %v302_v35 = vld [vmem:[%s5214_s17 + $0x218] sm:$0xff]  ;;  %299 = vst [vmem:[%s5219_s18 + $0x108] sm:$0xff] %v298_v33 }
  0x35   : > { %301 = vst [vmem:[%s5219_s18 + $0x110] sm:$0xff] %v300_v34  ;;  %303 = vst [vmem:[%s5219_s18 + $0x118] sm:$0xff] %v302_v35 }
  0x36 PF: > { %p3907_p12 = scmp.ge.s32.totalorder %s5102_s16, 1  ;;  %p308_p13 = scmp.lt.s32.totalorder %s5102_s16, 5 }
  0x38   : > { %p309_p0 = pnand %p3907_p12, %p308_p13 }
  0x39   : > { %s5293_s21 = sand.u32 (!%p309_p0), 1, %s5078_s10   ;;  %v559_v36 = vld [vmem:[%s7314_s1] sm:$0xff] (!%p309_p0)  ;;  %v560_v37 = vld [vmem:[%s7314_s1 + $0x8] sm:$0xff] (!%p309_p0)  ;;  %v3955_v38 = vld [vmem:[%s7314_s1 + $0x90] sm:$0xff] (!%p309_p0)  ;;  %v5104_v39 = vmov (!%p309_p0), 0.0|0.0   ;;  %s7322_s8 = smov (!%p309_p0), 48  }
  0x3a   : > { %312 = sbr.rel (%p309_p0) target bundleno = 744 (0x2e8), region = 62  ;;  %s3908_s4 = sshll.u32 (!%p309_p0), %s5293_s21, 5  ;;  %4444 = vmatprep.subr.bf16.mxu0 (!%p309_p0), %v5104_v39  ;;  %v4445_v40 = vpack.c.bf16 (!%p309_p0), %v560_v37, %v559_v36  ;;  %4471 = vmatprep.subr.bf16.mxu1 (!%p309_p0), %v5104_v39  ;;  %v3956_v41 = vld [vmem:[%s7314_s1 + $0x98] sm:$0xff] (!%p309_p0)  ;;  %v561_v42 = vld [vmem:[%s7314_s1 + $0x10] sm:$0xff] (!%p309_p0)  ;;  %v3957_v45 = vld [vmem:[%s7314_s1 + $0xa0] sm:$0xff] (!%p309_p0)  ;;  %vm339_vm0 = vcmask (!%p309_p0), 130048  }
  0x3b   : > { %s4923_s3 = smul.u32 (!%p309_p0), 288, %s5293_s21  ;;  %v562_v43 = vld [vmem:[%s7314_s1 + $0x18] sm:$0xff] (!%p309_p0)  ;;  %v4472_v44 = vpack.c.bf16 (!%p309_p0), %v3956_v41, %v3955_v38  ;;  %v3958_v46 = vld [vmem:[%s7314_s1 + $0xa8] sm:$0xff] (!%p309_p0)  ;;  %v563_v48 = vld [vmem:[%s7314_s1 + $0x20] sm:$0xff] (!%p309_p0)  ;;  %s7316_s17 = smov (!%p309_p0), 16   ;;  %v5107_v58 = vmov (!%p309_p0), 0.0  }
  0x3c   : > { %4446 = vmatpush1.bf16.msra.mxu0 (!%p309_p0), %v4445_v40  ;;  %v4448_v47 = vpack.c.bf16 (!%p309_p0), %v562_v43, %v561_v42  ;;  %v4475_v51 = vpack.c.bf16 (!%p309_p0), %v3958_v46, %v3957_v45  ;;  %v564_v52 = vld [vmem:[%s7314_s1 + $0x28] sm:$0xff] (!%p309_p0)  ;;  %v3959_v53 = vld [vmem:[%s7314_s1 + $0xb0] sm:$0xff] (!%p309_p0)  ;;  %v3960_v54 = vld [vmem:[%s7314_s1 + $0xb8] sm:$0xff] (!%p309_p0)  ;;  %340 = vst.msk [vmem:[#allocation2 + $0x8] sm:$0xff] (!%p309_p0), %vm339_vm0, %v5107_v58  ;;  %s5356_s26 = scalar_lea.vmem (!%p309_p0), [#allocation4], %s3908_s4  ;;  %s7318_s4 = smov (!%p309_p0), 64  }
  0x3d   : > { %s5326_s5 = scalar_lea.vmem (!%p309_p0), [#allocation3], %s4923_s3  ;;  %4473 = vmatpush1.bf16.msra.mxu1 (!%p309_p0), %v4472_v44  ;;  %4447 = vmatprep.subr.bf16.mxu0 (!%p309_p0), %v5104_v39  ;;  %v4451_v57 = vpack.c.bf16 (!%p309_p0), %v564_v52, %v563_v48  ;;  %338 = vst [vmem:[#allocation2] sm:$0xff] (!%p309_p0), %v5107_v58  ;;  %342 = vst.msk [vmem:[#allocation2 + $0x38] sm:$0xff] (!%p309_p0), %vm339_vm0, %v5107_v58  ;;  %v4478_v59 = vpack.c.bf16 (!%p309_p0), %v3960_v54, %v3959_v53  ;;  %s7324_s27 = smov (!%p309_p0), 32   ;;  %v565_v0 = vld [vmem:[%s7314_s1 + $0x30] sm:$0xff] (!%p309_p0)  ;;  %v566_v1 = vld [vmem:[%s7314_s1 + $0x38] sm:$0xff] (!%p309_p0) }
  0x3e   : > { %v3913_v49 = vld [vmem:[%s5326_s5 + $0x60] sm:$0xff] (!%p309_p0)  ;;  %4474 = vmatprep.subr.bf16.mxu1 (!%p309_p0), %v5104_v39  ;;  %451 = vst.msk [vmem:[#allocation2 + $0x48] sm:$0xff] (!%p309_p0), %vm339_vm0, %v5107_v58  ;;  %453 = vst.msk [vmem:[#allocation2 + $0x78] sm:$0xff] (!%p309_p0), %vm339_vm0, %v5107_v58  ;;  %v3910_v61 = vld [vmem:[%s5326_s5 + $0x28] sm:$0xff] (!%p309_p0)  ;;  %s7320_s29 = smov (!%p309_p0), 80   ;;  %v4454_v2 = vpack.c.bf16 (!%p309_p0), %v566_v1, %v565_v0  ;;  %s7328_s18 = smov (!%p309_p0), 96  }
  0x3f   : > { %v3909_v50 = vld [vmem:[%s5326_s5 + $0x20] sm:$0xff] (!%p309_p0)  ;;  %380 = vrot.lane.b32.xlu1 (!%p309_p0), %v3913_v49, %s7322_s8  ;;  %555 = vst.msk [vmem:[%s5356_s26] sm:$0xff] (!%p309_p0), %vm339_vm0, %v5107_v58  ;;  %556 = vst.msk [vmem:[%s5356_s26 + $0x8] sm:$0xff] (!%p309_p0), %vm339_vm0, %v5107_v58  ;;  %s7336_s22 = smov (!%p309_p0), 64   ;;  %s7338_s25 = smov (!%p309_p0), 16   ;;  %vm358_vm1 = vcmask (!%p309_p0), 261248  }
  0x40   : > { %352 = vrot.lane.b32.xlu0 (!%p309_p0), %v3909_v50, %s7316_s17  ;;  %v3915_v55 = vld [vmem:[%s5326_s5 + $0x80] sm:$0xff] (!%p309_p0)  ;;  %4449 = vmatpush1.bf16.msra.mxu0 (!%p309_p0), %v4448_v47  ;;  %557 = vst.msk [vmem:[%s5356_s26 + $0x10] sm:$0xff] (!%p309_p0), %vm339_vm0, %v5107_v58  ;;  %558 = vst.msk [vmem:[%s5356_s26 + $0x18] sm:$0xff] (!%p309_p0), %vm339_vm0, %v5107_v58  ;;  %s7339_s7 = smov (!%p309_p0), 48   ;;  %s7341_s0 = smov (!%p309_p0), 112   ;;  %vm372_vm2 = vcmask (!%p309_p0), 392448  }
  0x41   : > { %v3911_v56 = vld [vmem:[%s5326_s5 + $0x40] sm:$0xff]  ;;  %4476 = vmatpush1.bf16.msra.mxu1 %v4475_v51  ;;  %4450 = vmatprep.subr.bf16.mxu0 %v5104_v39  ;;  %v3912_v63 = vld [vmem:[%s5326_s5 + $0x48] sm:$0xff]  ;;  %v3963_v9 = vld [vmem:[%s7314_s1 + $0xd0] sm:$0xff]  ;;  %vm386_vm3 = vcmask 523648   ;;  %vm400_vm4 = vcmask 654848   ;;  %vm414_vm5 = vcmask 786048  }
  0x42   : > { %v3917_v60 = vld [vmem:[%s5326_s5 + $0xa0] sm:$0xff]  ;;  %4477 = vmatprep.subr.bf16.mxu1 %v5104_v39  ;;  %v3962_v4 = vld [vmem:[%s7314_s1 + $0xc8] sm:$0xff]  ;;  %v3964_v11 = vld [vmem:[%s7314_s1 + $0xd8] sm:$0xff]  ;;  %vm428_vm6 = vcmask 917248   ;;  %vm442_vm7 = vcmask 1048448   ;;  %vm898_vm8 = vcmask 1046528  }
  0x43   : > { %394 = vrot.lane.b32.xlu1 %v3915_v55, %s7318_s4  ;;  %v3919_v62 = vld [vmem:[%s5326_s5 + $0xc0] sm:$0xff]  ;;  %v568_v7 = vld [vmem:[%s7314_s1 + $0x48] sm:$0xff]  ;;  %v4484_v15 = vpack.c.bf16 %v3964_v11, %v3963_v9  ;;  %v569_v16 = vld [vmem:[%s7314_s1 + $0x50] sm:$0xff]  ;;  %s7326_s4 = smov 112   ;;  %vm1093_vm9 = vcmask 1045504   ;;  %vm1288_vm10 = vcmask 1044480  }
  0x44   : > { %366 = vrot.lane.b32.xlu0 %v3911_v56, %s7324_s27  ;;  %4452 = vmatpush1.bf16.msra.mxu0 %v4451_v57  ;;  %v3961_v3 = vld [vmem:[%s7314_s1 + $0xc0] sm:$0xff]  ;;  %v5411_v12 = vld [vmem:[#allocation2 + $0x8] sm:$0xff]  ;;  %v570_v17 = vld [vmem:[%s7314_s1 + $0x58] sm:$0xff]  ;;  %vm1483_vm11 = vcmask 1043456   ;;  %vm1678_vm12 = vcmask 1042432   ;;  %vm1873_vm13 = vcmask 1041408  }
  0x45   : > { %4479 = vmatpush1.bf16.msra.mxu1 %v4478_v59  ;;  %4453 = vmatprep.subr.bf16.mxu0 %v5104_v39  ;;  %v567_v5 = vld [vmem:[%s7314_s1 + $0x40] sm:$0xff]  ;;  %v4481_v6 = vpack.c.bf16 %v3962_v4, %v3961_v3  ;;  %v3914_v13 = vld [vmem:[%s5326_s5 + $0x68] sm:$0xff]  ;;  %v4460_v23 = vpack.c.bf16 %v570_v17, %v569_v16  ;;  %v3967_v27 = vld [vmem:[%s7314_s1 + $0xf0] sm:$0xff]  ;;  %vm2068_vm14 = vcmask 1040384  }
  0x46   : > { %4480 = vmatprep.subr.bf16.mxu1 %v5104_v39  ;;  %v343_v8 = vld [vmem:[%s5326_s5] sm:$0xff]  ;;  %v4457_v14 = vpack.c.bf16 %v568_v7, %v567_v5  ;;  %v3966_v19 = vld [vmem:[%s7314_s1 + $0xe8] sm:$0xff]  ;;  %3943 = vmatprep.mubr.msk.f32.mxu0 %vm339_vm0, %v5411_v12  ;;  %v3968_v28 = vld [vmem:[%s7314_s1 + $0xf8] sm:$0xff] }
  0x47   : > { %408 = vrot.lane.b32.xlu1 %v3917_v60, %s7320_s29  ;;  %v3921_v10 = vld [vmem:[%s5326_s5 + $0xe0] sm:$0xff]  ;;  %345 = vst.msk [vmem:[#allocation2 + $0x10] sm:$0xff] %vm339_vm0, %v343_v8  ;;  %v344_v20 = vld [vmem:[%s5326_s5 + $0x8] sm:$0xff]  ;;  %3973 = vmatprep.mubr.msk.f32.mxu1 %vm339_vm0, %v5411_v12  ;;  %v3925_v30 = vld [vmem:[%s5326_s5 + $0x10] sm:$0xff]  ;;  %s7335_s29 = smov 80   ;;  %v4490_v35 = vpack.c.bf16 %v3968_v28, %v3967_v27 }
  0x48   : > { %354 = vrot.lane.b32.xlu0 %v3910_v61, %s7316_s17  ;;  %4455 = vmatpush1.bf16.msra.mxu0 %v4454_v2  ;;  %v3965_v18 = vld [vmem:[%s7314_s1 + $0xe0] sm:$0xff]  ;;  %346 = vst.msk [vmem:[#allocation2 + $0x20] sm:$0xff] %vm339_vm0, %v344_v20  ;;  %v3918_v21 = vld [vmem:[%s5326_s5 + $0xa8] sm:$0xff]  ;;  %457 = vst.msk [vmem:[#allocation2 + $0x50] sm:$0xff] %vm339_vm0, %v3925_v30  ;;  %s3799_s17 = scalar_lea.sflag [#allocation5], %s5293_s21 }
  0x49   : > { %4482 = vmatpush1.bf16.msra.mxu1 %v4481_v6  ;;  %4456 = vmatprep.subr.bf16.mxu0 %v5104_v39  ;;  %v3916_v22 = vld [vmem:[%s5326_s5 + $0x88] sm:$0xff]  ;;  %v4487_v24 = vpack.c.bf16 %v3966_v19, %v3965_v18  ;;  %v571_v25 = vld [vmem:[%s7314_s1 + $0x60] sm:$0xff]  ;;  %v573_v36 = vld [vmem:[%s7314_s1 + $0x70] sm:$0xff] }
  0x4a   : > { %4483 = vmatprep.subr.bf16.mxu1 %v5104_v39  ;;  %v572_v26 = vld [vmem:[%s7314_s1 + $0x68] sm:$0xff]  ;;  %v3923_v29 = vld [vmem:[%s5326_s5 + $0x100] sm:$0xff]  ;;  %v3926_v37 = vld [vmem:[%s5326_s5 + $0x18] sm:$0xff] }
  0x4b   : > { %422 = vrot.lane.b32.xlu1 %v3919_v62, %s7328_s18  ;;  %448 = vst.msk [vmem:[#allocation2 + $0x18] sm:$0xff] %vm339_vm0, %v3923_v29  ;;  %v3924_v31 = vld [vmem:[%s5326_s5 + $0x108] sm:$0xff]  ;;  %v4463_v34 = vpack.c.bf16 %v572_v26, %v571_v25  ;;  %v574_v38 = vld [vmem:[%s7314_s1 + $0x78] sm:$0xff]  ;;  %v3969_v40 = vld [vmem:[%s7314_s1 + $0x100] sm:$0xff] }
  0x4c   : > { %368 = vrot.lane.b32.xlu0 %v3912_v63, %s7324_s27  ;;  %4458 = vmatpush1.bf16.msra.mxu0 %v4457_v14  ;;  %v3922_v32 = vld [vmem:[%s5326_s5 + $0xe8] sm:$0xff]  ;;  %449 = vst.msk [vmem:[#allocation2 + $0x28] sm:$0xff] %vm339_vm0, %v3924_v31  ;;  %458 = vst.msk [vmem:[#allocation2 + $0x60] sm:$0xff] %vm339_vm0, %v3926_v37  ;;  %v3929_v42 = vld [vmem:[%s5326_s5 + $0x50] sm:$0xff]  ;;  %v4466_v44 = vpack.c.bf16 %v574_v38, %v573_v36  ;;  %s4438_s27 = sshll.u32 %s5090_s13, 3  ;;  %s3815_s13 = sshll.u32 %s5356_s26, 4  ;;  %s7257_s13 = int_to_ptr.vmem [resolvable:$true] %s3815_s13 }
  0x4d   : > { %4485 = vmatpush1.bf16.msra.mxu1 %v4484_v15  ;;  %4459 = vmatprep.subr.bf16.mxu0 %v5104_v39  ;;  %v3920_v33 = vld [vmem:[%s5326_s5 + $0xc8] sm:$0xff]  ;;  %v3927_v43 = vld [vmem:[%s5326_s5 + $0x30] sm:$0xff]  ;;  %v575_v46 = vld [vmem:[%s7314_s1 + $0x80] sm:$0xff] }
  0x4e   : > { %4486 = vmatprep.subr.bf16.mxu1 %v5104_v39  ;;  %v3970_v41 = vld [vmem:[%s7314_s1 + $0x108] sm:$0xff]  ;;  %v3971_v48 = vld [vmem:[%s7314_s1 + $0x110] sm:$0xff]  ;;  %v3972_v49 = vld [vmem:[%s7314_s1 + $0x118] sm:$0xff] }
  0x4f   : > { %436 = vrot.lane.b32.xlu1 %v3921_v10, %s7326_s4  ;;  %v4493_v45 = vpack.c.bf16 %v3970_v41, %v3969_v40  ;;  %v576_v47 = vld [vmem:[%s7314_s1 + $0x88] sm:$0xff]  ;;  %v3933_v50 = vld [vmem:[%s5326_s5 + $0x90] sm:$0xff]  ;;  %v4496_v53 = vpack.c.bf16 %v3972_v49, %v3971_v48  ;;  %v3985_v55 = vld [vmem:[%s7314_s1 + $0x120] sm:$0xff] }
  0x50   : > { %382 = vrot.lane.b32.xlu0 %v3914_v13, %s7322_s8  ;;  %4461 = vmatpush1.bf16.msra.mxu0 %v4460_v23  ;;  %v3931_v51 = vld [vmem:[%s5326_s5 + $0x70] sm:$0xff]  ;;  %v4469_v52 = vpack.c.bf16 %v576_v47, %v575_v46  ;;  %v3986_v56 = vld [vmem:[%s7314_s1 + $0x128] sm:$0xff]  ;;  %v4016_v59 = vld [vmem:[%s7314_s1 + $0x1b8] sm:$0xff] }
  0x51   : > { %4488 = vmatpush1.bf16.msra.mxu1 %v4487_v24  ;;  %4462 = vmatprep.subr.bf16.mxu0 %v5104_v39  ;;  %v3941_v54 = vld [vmem:[%s5326_s5 + $0x110] sm:$0xff]  ;;  %v3928_v61 = vld [vmem:[%s5326_s5 + $0x38] sm:$0xff]  ;;  %v4499_v63 = vpack.c.bf16 %v3986_v56, %v3985_v55  ;;  %v4017_v3 = vld [vmem:[%s7314_s1 + $0x1c0] sm:$0xff] }
  0x52   : > { %4489 = vmatprep.subr.bf16.mxu1 %v5104_v39  ;;  %553 = vst.msk [vmem:[#allocation2 + $0x58] sm:$0xff] %vm339_vm0, %v3941_v54  ;;  %v4015_v57 = vld [vmem:[%s7314_s1 + $0x1b0] sm:$0xff]  ;;  %v5522_v62 = vld [vmem:[#allocation2 + $0x18] sm:$0xff]  ;;  %v4018_v4 = vld [vmem:[%s7314_s1 + $0x1c8] sm:$0xff] }
  0x53   : > { %410 = vrot.lane.b32.xlu1 %v3918_v21, %s7335_s29  ;;  %v3935_v60 = vld [vmem:[%s5326_s5 + $0xb0] sm:$0xff]  ;;  %v4526_v0 = vpack.c.bf16 %v4016_v59, %v4015_v57  ;;  %v3988_v2 = vld [vmem:[%s7314_s1 + $0x138] sm:$0xff]  ;;  %v4529_v9 = vpack.c.bf16 %v4018_v4, %v4017_v3  ;;  %v3989_v10 = vld [vmem:[%s7314_s1 + $0x140] sm:$0xff] }
  0x54   : > { %396 = vrot.lane.b32.xlu0 %v3916_v22, %s7336_s22  ;;  %4464 = vmatpush1.bf16.msra.mxu0 %v4463_v34  ;;  %v3987_v1 = vld [vmem:[%s7314_s1 + $0x130] sm:$0xff]  ;;  %v3930_v6 = vld [vmem:[%s5326_s5 + $0x58] sm:$0xff]  ;;  %v3990_v11 = vld [vmem:[%s7314_s1 + $0x148] sm:$0xff] }
  0x55   : > { %4491 = vmatpush1.bf16.msra.mxu1 %v4490_v35  ;;  %4465 = vmatprep.subr.bf16.mxu0 %v5104_v39  ;;  %v3937_v5 = vld [vmem:[%s5326_s5 + $0xd0] sm:$0xff]  ;;  %v3942_v7 = vld [vmem:[%s5326_s5 + $0x118] sm:$0xff]  ;;  %v4502_v8 = vpack.c.bf16 %v3988_v2, %v3987_v1  ;;  %v4505_v17 = vpack.c.bf16 %v3990_v11, %v3989_v10  ;;  %v4021_v21 = vld [vmem:[%s7314_s1 + $0x1e0] sm:$0xff] }
  0x56   : > { %4492 = vmatprep.subr.bf16.mxu1 %v5104_v39  ;;  %554 = vst.msk [vmem:[#allocation2 + $0x68] sm:$0xff] %vm339_vm0, %v3942_v7  ;;  %v4019_v13 = vld [vmem:[%s7314_s1 + $0x1d0] sm:$0xff]  ;;  %v4020_v14 = vld [vmem:[%s7314_s1 + $0x1d8] sm:$0xff]  ;;  %v4022_v22 = vld [vmem:[%s7314_s1 + $0x1e8] sm:$0xff] }
  0x57   : > { %438 = vrot.lane.b32.xlu1 %v3922_v32, %s7326_s4  ;;  %s7337_s4 = smov 32   ;;  %v3939_v15 = vld [vmem:[%s5326_s5 + $0xf0] sm:$0xff]  ;;  %v3932_v16 = vld [vmem:[%s5326_s5 + $0x78] sm:$0xff]  ;;  %v4532_v18 = vpack.c.bf16 %v4020_v14, %v4019_v13  ;;  %v4535_v26 = vpack.c.bf16 %v4022_v22, %v4021_v21  ;;  %v3993_v27 = vld [vmem:[%s7314_s1 + $0x160] sm:$0xff] }
  0x58   : > { %424 = vrot.lane.b32.xlu0 %v3920_v33, %s7328_s18  ;;  %4467 = vmatpush1.bf16.msra.mxu0 %v4466_v44  ;;  %s7340_s18 = smov 96   ;;  %v3991_v19 = vld [vmem:[%s7314_s1 + $0x150] sm:$0xff]  ;;  %v3992_v20 = vld [vmem:[%s7314_s1 + $0x158] sm:$0xff]  ;;  %v3994_v28 = vld [vmem:[%s7314_s1 + $0x168] sm:$0xff] }
  0x59   : > { %4494 = vmatpush1.bf16.msra.mxu1 %v4493_v45  ;;  %4468 = vmatprep.subr.bf16.mxu0 %v5104_v39  ;;  %v3934_v23 = vld [vmem:[%s5326_s5 + $0x98] sm:$0xff]  ;;  %v4508_v25 = vpack.c.bf16 %v3992_v20, %v3991_v19  ;;  %v4023_v29 = vld [vmem:[%s7314_s1 + $0x1f0] sm:$0xff]  ;;  %v4511_v33 = vpack.c.bf16 %v3994_v28, %v3993_v27  ;;  %v4025_v37 = vld [vmem:[%s7314_s1 + $0x200] sm:$0xff] }
  0x5a   : > { %4495 = vmatprep.subr.bf16.mxu1 %v5104_v39  ;;  %v3936_v24 = vld [vmem:[%s5326_s5 + $0xb8] sm:$0xff]  ;;  %v3995_v35 = vld [vmem:[%s7314_s1 + $0x170] sm:$0xff]  ;;  %v4026_v38 = vld [vmem:[%s7314_s1 + $0x208] sm:$0xff] }
  0x5b   : > { %477 = vrot.lane.b32.xlu1 %v3929_v42, %s7337_s4  ;;  %v4024_v30 = vld [vmem:[%s7314_s1 + $0x1f8] sm:$0xff]  ;;  %v4541_v41 = vpack.c.bf16 %v4026_v38, %v4025_v37  ;;  %v3997_v42 = vld [vmem:[%s7314_s1 + $0x180] sm:$0xff]  ;;  %v4027_v44 = vld [vmem:[%s7314_s1 + $0x210] sm:$0xff] }
  0x5c   : > { %464 = vrot.lane.b32.xlu0 %v3927_v43, %s7338_s25  ;;  %4470 = vmatpush1.bf16.msra.mxu0 %v4469_v52  ;;  %v3938_v31 = vld [vmem:[%s5326_s5 + $0xd8] sm:$0xff]  ;;  %v4538_v34 = vpack.c.bf16 %v4024_v30, %v4023_v29  ;;  %v3998_v43 = vld [vmem:[%s7314_s1 + $0x188] sm:$0xff]  ;;  %v3999_v48 = vld [vmem:[%s7314_s1 + $0x190] sm:$0xff] }
  0x5d   : > { %4497 = vmatpush1.bf16.msra.mxu1 %v4496_v53  ;;  %4498 = vmatprep.subr.bf16.mxu0 %v5104_v39  ;;  %v3940_v32 = vld [vmem:[%s5326_s5 + $0xf8] sm:$0xff]  ;;  %v4517_v46 = vpack.c.bf16 %v3998_v43, %v3997_v42  ;;  %v4001_v54 = vld [vmem:[%s7314_s1 + $0x1a0] sm:$0xff]  ;;  %v4002_v55 = vld [vmem:[%s7314_s1 + $0x1a8] sm:$0xff]  ;;  %s5113_s5 = smov [#allocation4]  }
  0x5e   : > { %4525 = vmatprep.subr.bf16.mxu1 %v5104_v39  ;;  %v3996_v36 = vld [vmem:[%s7314_s1 + $0x178] sm:$0xff]  ;;  %v4031_v56 = vld [vmem:[%s7314_s1 + $0x230] sm:$0xff]  ;;  %v4523_v59 = vpack.c.bf16 %v4002_v55, %v4001_v54  ;;  %v5676_v10 = vld [vmem:[#allocation2 + $0x28] sm:$0xff] }
  0x5f   : > { %503 = vrot.lane.b32.xlu1 %v3933_v50, %s7336_s22  ;;  %682 = vmatmul.mubr.f32.vlgmr.msra.gmra.mrb[0].mxu0 %v5107_v58  ;;  %v4514_v40 = vpack.c.bf16 %v3996_v36, %v3995_v35  ;;  %v4028_v45 = vld [vmem:[%s7314_s1 + $0x218] sm:$0xff]  ;;  %v4029_v50 = vld [vmem:[%s7314_s1 + $0x220] sm:$0xff]  ;;  %v4046_v38 = vld [vmem:[%s7314_s1 + $0x248] sm:$0xff] }
  0x60   : > { %490 = vrot.lane.b32.xlu0 %v3931_v51, %s7339_s7  ;;  %855 = vmatmul.mubr.f32.vlgmr.msra.gmra.mrb[0].mxu1 %v5107_v58  ;;  %v4544_v47 = vpack.c.bf16 %v4028_v45, %v4027_v44  ;;  %v4000_v49 = vld [vmem:[%s7314_s1 + $0x198] sm:$0xff]  ;;  %v4030_v51 = vld [vmem:[%s7314_s1 + $0x228] sm:$0xff]  ;;  %v4045_v37 = vld [vmem:[%s7314_s1 + $0x240] sm:$0xff] }
  0x61   : > { %3944 = vmatprep.mubr.msk.f32.mxu0 %vm339_vm0, %v5522_v62  ;;  %3974 = vmatprep.mubr.msk.f32.mxu1 %vm339_vm0, %v5522_v62  ;;  %v4520_v52 = vpack.c.bf16 %v4000_v49, %v3999_v48  ;;  %v4547_v53 = vpack.c.bf16 %v4030_v51, %v4029_v50  ;;  %v4032_v57 = vld [vmem:[%s7314_s1 + $0x238] sm:$0xff]  ;;  %v4553_v42 = vpack.c.bf16 %v4046_v38, %v4045_v37  ;;  %v4047_v44 = vld [vmem:[%s7314_s1 + $0x250] sm:$0xff]  ;;  %v4049_v50 = vld [vmem:[%s7314_s1 + $0x260] sm:$0xff] }
  0x62   : > { %4500 = vmatpush1.bf16.msra.mxu0 %v4499_v63  ;;  %4527 = vmatpush1.bf16.msra.mxu1 %v4526_v0  ;;  %v5690_v19 = vld [vmem:[#allocation2 + $0x38] sm:$0xff]  ;;  %v4050_v51 = vld [vmem:[%s7314_s1 + $0x268] sm:$0xff]  ;;  %v4091_v37 = vld [vmem:[%s7314_s1 + $0x350] sm:$0xff] }
  0x63   : > { %516 = vrot.lane.b32.xlu1 %v3935_v60, %s7335_s29  ;;  %4501 = vmatprep.subr.bf16.mxu0 %v5104_v39  ;;  %v4550_v60 = vpack.c.bf16 %v4032_v57, %v4031_v56  ;;  %v5738_v35 = vld [vmem:[#allocation2 + $0x78] sm:$0xff]  ;;  %v4559_v54 = vpack.c.bf16 %v4050_v51, %v4049_v50  ;;  %v4051_v56 = vld [vmem:[%s7314_s1 + $0x270] sm:$0xff]  ;;  %v4138_v50 = vld [vmem:[%s7314_s1 + $0x408] sm:$0xff] }
  0x64   : > { %466 = vrot.lane.b32.xlu0 %v3928_v61, %s7338_s25  ;;  %4528 = vmatprep.subr.bf16.mxu1 %v5104_v39  ;;  %v4048_v45 = vld [vmem:[%s7314_s1 + $0x258] sm:$0xff] }
  0x65   : > { %v4556_v48 = vpack.c.bf16 %v4048_v45, %v4047_v44  ;;  %v4052_v57 = vld [vmem:[%s7314_s1 + $0x278] sm:$0xff]  ;;  %v4135_v44 = vld [vmem:[%s7314_s1 + $0x3f0] sm:$0xff] }
  0x66   : > { %4503 = vmatpush1.bf16.msra.mxu0 %v4502_v8  ;;  %4530 = vmatpush1.bf16.msra.mxu1 %v4529_v9  ;;  %v4092_v38 = vld [vmem:[%s7314_s1 + $0x358] sm:$0xff] }
  0x67   : > { %529 = vrot.lane.b32.xlu1 %v3937_v5, %s7340_s18  ;;  %4504 = vmatprep.subr.bf16.mxu0 %v5104_v39  ;;  %v4136_v45 = vld [vmem:[%s7314_s1 + $0x3f8] sm:$0xff] }
  0x68   : > { %479 = vrot.lane.b32.xlu0 %v3930_v6, %s7337_s4  ;;  %4531 = vmatprep.subr.bf16.mxu1 %v5104_v39  ;;  %s5012_s4 = sshll.u32 %s5113_s5, 4  ;;  %s5013_s4 = int_to_ptr.vmem [resolvable:$false] %s5012_s4 }
  0x69   : > { %s5014_s25 = scalar_lea.vmem %s5013_s4, 1024  ;;  %p5015_p4 = scmp.lt.s32.totalorder %s7257_s13, %s5013_s4 }
  0x6a   : > { %4506 = vmatpush1.bf16.msra.mxu0 %v4505_v17  ;;  %4533 = vmatpush1.bf16.msra.mxu1 %v4532_v18 }
  0x6b   : > { %542 = vrot.lane.b32.xlu1 %v3939_v15, %s7341_s0  ;;  %4507 = vmatprep.subr.bf16.mxu0 %v5104_v39 }
  0x6c   : > { %492 = vrot.lane.b32.xlu0 %v3932_v16, %s7339_s7  ;;  %4534 = vmatprep.subr.bf16.mxu1 %v5104_v39  ;;  %s5008_s7 = scalar_lea.vmem %s7257_s13, 512 }
  0x6d   : > { %p5009_p1 = scmp.ne.s32.totalorder %s7257_s13, %s5008_s7  ;;  %p5016_p5 = scmp.lt.s32.totalorder %s5014_s25, %s5008_s7 }
  0x6e   : > { %4509 = vmatpush1.bf16.msra.mxu0 %v4508_v25  ;;  %4536 = vmatpush1.bf16.msra.mxu1 %v4535_v26  ;;  %v5712_v26 = vld [vmem:[#allocation2 + $0x58] sm:$0xff] }
  0x6f   : > { %518 = vrot.lane.b32.xlu1 %v3936_v24, %s7335_s29  ;;  %4510 = vmatprep.subr.bf16.mxu0 %v5104_v39  ;;  %p5010_p2 = pnand %p5009_p1, %p5191_p8  ;;  %p5017_p6 = por %p5016_p5, %p5015_p4 }
  0x70   : > { %505 = vrot.lane.b32.xlu0 %v3934_v23, %s7336_s22  ;;  %4537 = vmatprep.subr.bf16.mxu1 %v5104_v39  ;;  %v5702_v23 = vld [vmem:[#allocation2 + $0x48] sm:$0xff] }
  0x71   : > { %p5011_p3 = pneg %p5010_p2 }
  0x72   : > { %4512 = vmatpush1.bf16.msra.mxu0 %v4511_v33  ;;  %4539 = vmatpush1.bf16.msra.mxu1 %v4538_v34 }
  0x73   : > { %544 = vrot.lane.b32.xlu1 %v3940_v32, %s7341_s0  ;;  %4513 = vmatprep.subr.bf16.mxu0 %v5104_v39  ;;  %s4443_s0 = sshll.u32 %s5086_s12, 2  ;;  %p5018_p7 = pnand %p5017_p6, %p5011_p3 }
  0x74   : > { %531 = vrot.lane.b32.xlu0 %v3938_v31, %s7340_s18  ;;  %4540 = vmatprep.subr.bf16.mxu1 %v5104_v39  ;;  %v5726_v31 = vld [vmem:[#allocation2 + $0x68] sm:$0xff]  ;;  %s3812_s6 = sadd.s32 %s4443_s0, %s4438_s27 }
  0x75   : > { %s4439_s12 = sshll.u32 %s3812_s6, 7 }
  0x76   : > { %4515 = vmatpush1.bf16.msra.mxu0 %v4514_v40  ;;  %4542 = vmatpush1.bf16.msra.mxu1 %v4541_v41  ;;  %v4075_v40 = vld [vmem:[%s7314_s1 + $0x2d0] sm:$0xff]  ;;  %v4076_v41 = vld [vmem:[%s7314_s1 + $0x2d8] sm:$0xff]  ;;  %s7255_s29 = scalar_lea.hbm %s7315_s2, %s4439_s12 }
  0x77   : > { %4516 = vmatprep.subr.bf16.mxu0 %v5104_v39  ;;  %4543 = vmatprep.subr.bf16.mxu1 %v5104_v39  ;;  %v4580_v43 = vpack.c.bf16 %v4076_v41, %v4075_v40  ;;  %v4604_v41 = vpack.c.bf16 %v4092_v38, %v4091_v37  ;;  %v4121_v37 = vld [vmem:[%s7314_s1 + $0x3e0] sm:$0xff]  ;;  %v4122_v38 = vld [vmem:[%s7314_s1 + $0x3e8] sm:$0xff] }
  0x7a   : > { %4518 = vmatpush1.bf16.msra.mxu0 %v4517_v46  ;;  %4545 = vmatpush1.bf16.msra.mxu1 %v4544_v47  ;;  %v4077_v46 = vld [vmem:[%s7314_s1 + $0x2e0] sm:$0xff]  ;;  %v4078_v47 = vld [vmem:[%s7314_s1 + $0x2e8] sm:$0xff] }
  0x7b   : > { %4519 = vmatprep.subr.bf16.mxu0 %v5104_v39  ;;  %4546 = vmatprep.subr.bf16.mxu1 %v5104_v39  ;;  %v4583_v49 = vpack.c.bf16 %v4078_v47, %v4077_v46  ;;  %v4634_v47 = vpack.c.bf16 %v4136_v45, %v4135_v44 }
  0x7e   : > { %4521 = vmatpush1.bf16.msra.mxu0 %v4520_v52  ;;  %4548 = vmatpush1.bf16.msra.mxu1 %v4547_v53  ;;  %v4079_v52 = vld [vmem:[%s7314_s1 + $0x2f0] sm:$0xff]  ;;  %v4080_v53 = vld [vmem:[%s7314_s1 + $0x2f8] sm:$0xff] }
  0x7f   : > { %4522 = vmatprep.subr.bf16.mxu0 %v5104_v39  ;;  %4549 = vmatprep.subr.bf16.mxu1 %v5104_v39  ;;  %v4586_v55 = vpack.c.bf16 %v4080_v53, %v4079_v52  ;;  %v4109_v53 = vld [vmem:[%s7314_s1 + $0x380] sm:$0xff] }
  0x82   : > { %4524 = vmatpush1.bf16.msra.mxu0 %v4523_v59  ;;  %4551 = vmatpush1.bf16.msra.mxu1 %v4550_v60  ;;  %v4081_v59 = vld [vmem:[%s7314_s1 + $0x300] sm:$0xff]  ;;  %v4082_v60 = vld [vmem:[%s7314_s1 + $0x308] sm:$0xff] }
  0x83   : > { %4552 = vmatprep.subr.bf16.mxu0 %v5104_v39  ;;  %4579 = vmatprep.subr.bf16.mxu1 %v5104_v39 }
  0xb1   : > { %v381_v61 = vpop.permute.xlu1 %380 }
  0xb2   : > { %v353_v63 = vpop.permute.xlu0 %352 }
  0xb3   : > { %359 = vst.msk [vmem:[#allocation2 + $0x10] sm:$0xff] %vm358_vm1, %v353_v63  ;;  %v4589_v63 = vpack.c.bf16 %v4082_v60, %v4081_v59  ;;  %v4112_v59 = vld [vmem:[%s7314_s1 + $0x398] sm:$0xff]  ;;  %v4141_v60 = vld [vmem:[%s7314_s1 + $0x420] sm:$0xff] }
  0xb5   : > { %v395_v0 = vpop.permute.xlu1 %394 }
  0xb6   : > { %v367_v1 = vpop.permute.xlu0 %366 }
  0xb7   : > { %373 = vst.msk [vmem:[#allocation2 + $0x10] sm:$0xff] %vm372_vm2, %v367_v1  ;;  %v4054_v1 = vld [vmem:[%s7314_s1 + $0x288] sm:$0xff] }
  0xb8   : > { %387 = vst.msk [vmem:[#allocation2 + $0x10] sm:$0xff] %vm386_vm3, %v381_v61  ;;  %v4562_v61 = vpack.c.bf16 %v4052_v57, %v4051_v56  ;;  %v4111_v57 = vld [vmem:[%s7314_s1 + $0x390] sm:$0xff] }
  0xb9   : > { %401 = vst.msk [vmem:[#allocation2 + $0x10] sm:$0xff] %vm400_vm4, %v395_v0  ;;  %v409_v2 = vpop.permute.xlu1 %408  ;;  %v4053_v0 = vld [vmem:[%s7314_s1 + $0x280] sm:$0xff] }
  0xba   : > { %v355_v3 = vpop.permute.xlu0 %354  ;;  %415 = vst.msk [vmem:[#allocation2 + $0x10] sm:$0xff] %vm414_vm5, %v409_v2  ;;  %v4083_v2 = vld [vmem:[%s7314_s1 + $0x310] sm:$0xff] }
  0xbb   : > { %360 = vst.msk [vmem:[#allocation2 + $0x20] sm:$0xff] %vm358_vm1, %v355_v3  ;;  %v4084_v3 = vld [vmem:[%s7314_s1 + $0x318] sm:$0xff] }
  0xbd   : > { %v423_v4 = vpop.permute.xlu1 %422 }
  0xbe   : > { %v369_v5 = vpop.permute.xlu0 %368  ;;  %429 = vst.msk [vmem:[#allocation2 + $0x10] sm:$0xff] %vm428_vm6, %v423_v4  ;;  %v4565_v4 = vpack.c.bf16 %v4054_v1, %v4053_v0  ;;  %v4113_v1 = vld [vmem:[%s7314_s1 + $0x3a0] sm:$0xff] }
  0xbf   : > { %374 = vst.msk [vmem:[#allocation2 + $0x20] sm:$0xff] %vm372_vm2, %v369_v5  ;;  %v4592_v5 = vpack.c.bf16 %v4084_v3, %v4083_v2  ;;  %v4114_v2 = vld [vmem:[%s7314_s1 + $0x3a8] sm:$0xff]  ;;  %v4143_v3 = vld [vmem:[%s7314_s1 + $0x430] sm:$0xff] }
  0xc1   : > { %v437_v6 = vpop.permute.xlu1 %436 }
  0xc2   : > { %v383_v7 = vpop.permute.xlu0 %382  ;;  %443 = vst.msk [vmem:[#allocation2 + $0x10] sm:$0xff] %vm442_vm7, %v437_v6  ;;  %v4055_v6 = vld [vmem:[%s7314_s1 + $0x290] sm:$0xff] }
  0xc3   : > { %388 = vst.msk [vmem:[#allocation2 + $0x20] sm:$0xff] %vm386_vm3, %v383_v7  ;;  %v4056_v7 = vld [vmem:[%s7314_s1 + $0x298] sm:$0xff] }
  0xc5   : > { %v411_v8 = vpop.permute.xlu1 %410 }
  0xc6   : > { %v397_v9 = vpop.permute.xlu0 %396 }
  0xc7   : > { %402 = vst.msk [vmem:[#allocation2 + $0x20] sm:$0xff] %vm400_vm4, %v397_v9  ;;  %v4086_v9 = vld [vmem:[%s7314_s1 + $0x328] sm:$0xff] }
  0xc8   : > { %416 = vst.msk [vmem:[#allocation2 + $0x20] sm:$0xff] %vm414_vm5, %v411_v8  ;;  %v4085_v8 = vld [vmem:[%s7314_s1 + $0x320] sm:$0xff] }
  0xc9   : > { %v439_v11 = vpop.permute.xlu1 %438  ;;  %v5678_v14 = vld [vmem:[#allocation2 + $0x10] sm:$0xff] }
  0xca   : > { %v425_v13 = vpop.permute.xlu0 %424  ;;  %687 = vmatmul.mubr.f32.gmra.mrb[2].mxu0 %v5678_v14  ;;  %860 = vmatmul.mubr.f32.gmra.mrb[2].mxu1 %v5678_v14 }
  0xcb   : > { %430 = vst.msk [vmem:[#allocation2 + $0x20] sm:$0xff] %vm428_vm6, %v425_v13  ;;  %3945 = vmatprep.mubr.msk.f32.mxu0 %vm339_vm0, %v5676_v10  ;;  %3975 = vmatprep.mubr.msk.f32.mxu1 %vm339_vm0, %v5676_v10  ;;  %v4595_v13 = vpack.c.bf16 %v4086_v9, %v4085_v8  ;;  %v4115_v8 = vld [vmem:[%s7314_s1 + $0x3b0] sm:$0xff]  ;;  %v4116_v9 = vld [vmem:[%s7314_s1 + $0x3b8] sm:$0xff] }
  0xcc   : > { %444 = vst.msk [vmem:[#allocation2 + $0x20] sm:$0xff] %vm442_vm7, %v439_v11  ;;  %v4568_v11 = vpack.c.bf16 %v4056_v7, %v4055_v6  ;;  %v4619_v6 = vpack.c.bf16 %v4114_v2, %v4113_v1  ;;  %v4199_v1 = vld [vmem:[%s7314_s1 + $0x530] sm:$0xff]  ;;  %v4200_v2 = vld [vmem:[%s7314_s1 + $0x538] sm:$0xff] }
  0xcd   : > { %v478_v15 = vpop.permute.xlu1 %477 }
  0xce   : > { %v465_v16 = vpop.permute.xlu0 %464 }
  0xcf   : > { %470 = vst.msk [vmem:[#allocation2 + $0x50] sm:$0xff] %vm358_vm1, %v465_v16  ;;  %v4058_v16 = vld [vmem:[%s7314_s1 + $0x2a8] sm:$0xff] }
  0xd0   : > { %483 = vst.msk [vmem:[#allocation2 + $0x50] sm:$0xff] %vm372_vm2, %v478_v15  ;;  %v4057_v15 = vld [vmem:[%s7314_s1 + $0x2a0] sm:$0xff] }
  0xd1   : > { %v504_v17 = vpop.permute.xlu1 %503 }
  0xd2   : > { %v491_v18 = vpop.permute.xlu0 %490 }
  0xd3   : > { %496 = vst.msk [vmem:[#allocation2 + $0x50] sm:$0xff] %vm386_vm3, %v491_v18  ;;  %v5693_v20 = vld [vmem:[#allocation2 + $0x20] sm:$0xff]  ;;  %v4088_v18 = vld [vmem:[%s7314_s1 + $0x338] sm:$0xff] }
  0xd4   : > { %509 = vst.msk [vmem:[#allocation2 + $0x50] sm:$0xff] %vm400_vm4, %v504_v17  ;;  %692 = vmatmul.mubr.f32.gmra.mrb[4].mxu0 %v5693_v20  ;;  %865 = vmatmul.mubr.f32.gmra.mrb[4].mxu1 %v5693_v20  ;;  %v4087_v17 = vld [vmem:[%s7314_s1 + $0x330] sm:$0xff] }
  0xd5   : > { %3946 = vmatprep.mubr.msk.f32.mxu0 %vm339_vm0, %v5690_v19  ;;  %3976 = vmatprep.mubr.msk.f32.mxu1 %vm339_vm0, %v5690_v19  ;;  %v517_v21 = vpop.permute.xlu1 %516 }
  0xd6   : > { %v467_v22 = vpop.permute.xlu0 %466  ;;  %522 = vst.msk [vmem:[#allocation2 + $0x50] sm:$0xff] %vm414_vm5, %v517_v21  ;;  %v4571_v21 = vpack.c.bf16 %v4058_v16, %v4057_v15  ;;  %v4622_v15 = vpack.c.bf16 %v4116_v9, %v4115_v8  ;;  %v4202_v8 = vld [vmem:[%s7314_s1 + $0x548] sm:$0xff] }
  0xd7   : > { %471 = vst.msk [vmem:[#allocation2 + $0x60] sm:$0xff] %vm358_vm1, %v467_v22  ;;  %v4598_v22 = vpack.c.bf16 %v4088_v18, %v4087_v17  ;;  %v4117_v17 = vld [vmem:[%s7314_s1 + $0x3c0] sm:$0xff]  ;;  %v4118_v18 = vld [vmem:[%s7314_s1 + $0x3c8] sm:$0xff] }
  0xd8   : > { %696 = vmatmul.mubr.f32.gmra.mrb[6].mxu0 %v5107_v58  ;;  %870 = vmatmul.mubr.f32.gmra.mrb[6].mxu1 %v5107_v58 }
  0xd9   : > { %3947 = vmatprep.mubr.msk.f32.mxu0 %vm339_vm0, %v5702_v23  ;;  %3977 = vmatprep.mubr.msk.f32.mxu1 %vm339_vm0, %v5702_v23  ;;  %v530_v24 = vpop.permute.xlu1 %529 }
  0xda   : > { %v480_v25 = vpop.permute.xlu0 %479  ;;  %535 = vst.msk [vmem:[#allocation2 + $0x50] sm:$0xff] %vm428_vm6, %v530_v24  ;;  %v4059_v24 = vld [vmem:[%s7314_s1 + $0x2b0] sm:$0xff] }
  0xdb   : > { %484 = vst.msk [vmem:[#allocation2 + $0x60] sm:$0xff] %vm372_vm2, %v480_v25  ;;  %v4060_v25 = vld [vmem:[%s7314_s1 + $0x2b8] sm:$0xff] }
  0xdc   : > { %700 = vmatmul.mubr.f32.gmra.mrb[8].mxu0 %v5107_v58  ;;  %874 = vmatmul.mubr.f32.gmra.mrb[8].mxu1 %v5107_v58 }
  0xdd   : > { %3948 = vmatprep.mubr.msk.f32.mxu0 %vm339_vm0, %v5712_v26  ;;  %3978 = vmatprep.mubr.msk.f32.mxu1 %vm339_vm0, %v5712_v26  ;;  %v543_v27 = vpop.permute.xlu1 %542 }
  0xde   : > { %v493_v28 = vpop.permute.xlu0 %492  ;;  %548 = vst.msk [vmem:[#allocation2 + $0x50] sm:$0xff] %vm442_vm7, %v543_v27  ;;  %v4089_v27 = vld [vmem:[%s7314_s1 + $0x340] sm:$0xff] }
  0xdf   : > { %497 = vst.msk [vmem:[#allocation2 + $0x60] sm:$0xff] %vm386_vm3, %v493_v28  ;;  %v4090_v28 = vld [vmem:[%s7314_s1 + $0x348] sm:$0xff] }
  0xe1   : > { %v519_v30 = vpop.permute.xlu1 %518 }
  0xe2   : > { %v506_v29 = vpop.permute.xlu0 %505 }
  0xe3   : > { %510 = vst.msk [vmem:[#allocation2 + $0x60] sm:$0xff] %vm400_vm4, %v506_v29  ;;  %v4574_v29 = vpack.c.bf16 %v4060_v25, %v4059_v24  ;;  %v4625_v24 = vpack.c.bf16 %v4118_v18, %v4117_v17  ;;  %v4175_v17 = vld [vmem:[%s7314_s1 + $0x4d0] sm:$0xff]  ;;  %v4176_v18 = vld [vmem:[%s7314_s1 + $0x4d8] sm:$0xff] }
  0xe4   : > { %523 = vst.msk [vmem:[#allocation2 + $0x60] sm:$0xff] %vm414_vm5, %v519_v30  ;;  %v4601_v30 = vpack.c.bf16 %v4090_v28, %v4089_v27  ;;  %v4119_v27 = vld [vmem:[%s7314_s1 + $0x3d0] sm:$0xff]  ;;  %v4120_v28 = vld [vmem:[%s7314_s1 + $0x3d8] sm:$0xff] }
  0xe5   : > { %v545_v33 = vpop.permute.xlu1 %544  ;;  %v5728_v34 = vld [vmem:[#allocation2 + $0x50] sm:$0xff] }
  0xe6   : > { %v532_v32 = vpop.permute.xlu0 %531  ;;  %705 = vmatmul.mubr.f32.gmra.mrb[10].mxu0 %v5728_v34  ;;  %879 = vmatmul.mubr.f32.gmra.mrb[10].mxu1 %v5728_v34 }
  0xe7   : > { %536 = vst.msk [vmem:[#allocation2 + $0x60] sm:$0xff] %vm428_vm6, %v532_v32  ;;  %3949 = vmatprep.mubr.msk.f32.mxu0 %vm339_vm0, %v5726_v31  ;;  %3979 = vmatprep.mubr.msk.f32.mxu1 %vm339_vm0, %v5726_v31  ;;  %v4061_v32 = vld [vmem:[%s7314_s1 + $0x2c0] sm:$0xff] }
  0xe8   : > { %549 = vst.msk [vmem:[#allocation2 + $0x60] sm:$0xff] %vm442_vm7, %v545_v33  ;;  %v4062_v33 = vld [vmem:[%s7314_s1 + $0x2c8] sm:$0xff] }
  0xe9   : > { %v4577_v40 = vpack.c.bf16 %v4062_v33, %v4061_v32  ;;  %v4628_v32 = vpack.c.bf16 %v4120_v28, %v4119_v27  ;;  %v4178_v27 = vld [vmem:[%s7314_s1 + $0x4e8] sm:$0xff]  ;;  %v4207_v28 = vld [vmem:[%s7314_s1 + $0x570] sm:$0xff] }
  0xef   : > { %v5740_v36 = vld [vmem:[#allocation2 + $0x60] sm:$0xff] }
  0xf0   : > { %710 = vmatmul.mubr.f32.gmra.mrb[12].mxu0 %v5740_v36  ;;  %884 = vmatmul.mubr.f32.gmra.mrb[12].mxu1 %v5740_v36 }
  0xf1   : > { %3950 = vmatprep.mubr.msk.f32.mxu0 %vm339_vm0, %v5738_v35  ;;  %3980 = vmatprep.mubr.msk.f32.mxu1 %vm339_vm0, %v5738_v35 }
  0xf4   : > { %714 = vmatmul.mubr.f32.gmra.mrb[14].mxu0 %v5107_v58  ;;  %889 = vmatmul.mubr.f32.gmra.mrb[14].mxu1 %v5107_v58 }
  0xf5   : > { %4003 = vmatprep.mubr.msk.f32.mxu0 %vm339_vm0, %v5411_v12  ;;  %4033 = vmatprep.mubr.msk.f32.mxu1 %vm339_vm0, %v5411_v12 }
  0xf8   : > { %1050 = vmatmul.mubr.f32.vlgmr.msra.gmra.mrb[16].mxu0 %v5107_v58  ;;  %1245 = vmatmul.mubr.f32.vlgmr.msra.gmra.mrb[16].mxu1 %v5107_v58 }
  0xf9   : > { %4554 = vmatpush1.bf16.msra.mxu0 %v4553_v42  ;;  %4581 = vmatpush1.bf16.msra.mxu1 %v4580_v43  ;;  %v4105_v42 = vld [vmem:[%s7314_s1 + $0x360] sm:$0xff]  ;;  %v4106_v43 = vld [vmem:[%s7314_s1 + $0x368] sm:$0xff] }
  0xfa   : > { %4004 = vmatprep.mubr.msk.f32.mxu0 %vm339_vm0, %v5522_v62  ;;  %4034 = vmatprep.mubr.msk.f32.mxu1 %vm339_vm0, %v5522_v62  ;;  %v4607_v46 = vpack.c.bf16 %v4106_v43, %v4105_v42  ;;  %v718_v42 = vld [vmem:[%s5356_s26] sm:$0xff]  ;;  %v6097_v43 = vld [vmem:[#allocation2 + $0x8] sm:$0xff] }
  0xfb   : > { %4555 = vmatprep.subr.bf16.mxu0 %v5104_v39  ;;  %4582 = vmatprep.subr.bf16.mxu1 %v5104_v39 }
  0xfc   : > { %1055 = vmatmul.mubr.f32.gmra.mrb[18].mxu0 %v5678_v14  ;;  %1250 = vmatmul.mubr.f32.gmra.mrb[18].mxu1 %v5678_v14 }
  0xfd   : > { %4557 = vmatpush1.bf16.msra.mxu0 %v4556_v48  ;;  %4584 = vmatpush1.bf16.msra.mxu1 %v4583_v49  ;;  %v4107_v48 = vld [vmem:[%s7314_s1 + $0x370] sm:$0xff]  ;;  %v4108_v49 = vld [vmem:[%s7314_s1 + $0x378] sm:$0xff] }
  0xfe   : > { %4005 = vmatprep.mubr.msk.f32.mxu0 %vm339_vm0, %v5676_v10  ;;  %4035 = vmatprep.mubr.msk.f32.mxu1 %vm339_vm0, %v5676_v10  ;;  %v4610_v51 = vpack.c.bf16 %v4108_v49, %v4107_v48  ;;  %v4165_v48 = vld [vmem:[%s7314_s1 + $0x480] sm:$0xff] }
  0xff   : > { %4558 = vmatprep.subr.bf16.mxu0 %v5104_v39  ;;  %4585 = vmatprep.subr.bf16.mxu1 %v5104_v39 }
 0x100   : > { %1060 = vmatmul.mubr.f32.gmra.mrb[20].mxu0 %v5693_v20  ;;  %1255 = vmatmul.mubr.f32.gmra.mrb[20].mxu1 %v5693_v20 }
 0x101   : > { %4560 = vmatpush1.bf16.msra.mxu0 %v4559_v54  ;;  %4587 = vmatpush1.bf16.msra.mxu1 %v4586_v55  ;;  %v4110_v54 = vld [vmem:[%s7314_s1 + $0x388] sm:$0xff]  ;;  %v4140_v55 = vld [vmem:[%s7314_s1 + $0x418] sm:$0xff] }
 0x102   : > { %4006 = vmatprep.mubr.msk.f32.mxu0 %vm339_vm0, %v5690_v19  ;;  %4036 = vmatprep.mubr.msk.f32.mxu1 %vm339_vm0, %v5690_v19 }
 0x103   : > { %4561 = vmatprep.subr.bf16.mxu0 %v5104_v39  ;;  %4588 = vmatprep.subr.bf16.mxu1 %v5104_v39 }
 0x104   : > { %1065 = vmatmul.mubr.f32.gmra.mrb[22].mxu0 %v5107_v58  ;;  %1260 = vmatmul.mubr.f32.gmra.mrb[22].mxu1 %v5107_v58 }
 0x105   : > { %4563 = vmatpush1.bf16.msra.mxu0 %v4562_v61  ;;  %4590 = vmatpush1.bf16.msra.mxu1 %v4589_v63  ;;  %v4142_v61 = vld [vmem:[%s7314_s1 + $0x428] sm:$0xff]  ;;  %v4616_v63 = vpack.c.bf16 %v4112_v59, %v4111_v57  ;;  %v6135_v59 = vld [vmem:[#allocation2 + $0x18] sm:$0xff] }
 0x106   : > { %4007 = vmatprep.mubr.msk.f32.mxu0 %vm339_vm0, %v5702_v23  ;;  %4037 = vmatprep.mubr.msk.f32.mxu1 %vm339_vm0, %v5702_v23  ;;  %v4643_v0 = vpack.c.bf16 %v4142_v61, %v4141_v60  ;;  %v4198_v57 = vld [vmem:[%s7314_s1 + $0x528] sm:$0xff] }
 0x107   : > { %4564 = vmatprep.subr.bf16.mxu0 %v5104_v39  ;;  %4591 = vmatprep.subr.bf16.mxu1 %v5104_v39 }
 0x108   : > { %1069 = vmatmul.mubr.f32.gmra.mrb[24].mxu0 %v5107_v58  ;;  %1264 = vmatmul.mubr.f32.gmra.mrb[24].mxu1 %v5107_v58 }
 0x109   : > { %4566 = vmatpush1.bf16.msra.mxu0 %v4565_v4  ;;  %4593 = vmatpush1.bf16.msra.mxu1 %v4592_v5  ;;  %v4144_v4 = vld [vmem:[%s7314_s1 + $0x438] sm:$0xff]  ;;  %v6012_v5 = vld [vmem:[#allocation2] sm:$0xff] }
 0x10a   : > { %4008 = vmatprep.mubr.msk.f32.mxu0 %vm339_vm0, %v5712_v26  ;;  %4038 = vmatprep.mubr.msk.f32.mxu1 %vm339_vm0, %v5712_v26  ;;  %v4646_v7 = vpack.c.bf16 %v4144_v4, %v4143_v3  ;;  %v4694_v4 = vpack.c.bf16 %v4200_v2, %v4199_v1  ;;  %v4231_v2 = vld [vmem:[%s7314_s1 + $0x5d0] sm:$0xff] }
 0x10b   : > { %4567 = vmatprep.subr.bf16.mxu0 %v5104_v39  ;;  %4594 = vmatprep.subr.bf16.mxu1 %v5104_v39 }
 0x10c   : > { %1074 = vmatmul.mubr.f32.gmra.mrb[26].mxu0 %v5728_v34  ;;  %1269 = vmatmul.mubr.f32.gmra.mrb[26].mxu1 %v5728_v34 }
 0x10d   : > { %4569 = vmatpush1.bf16.msra.mxu0 %v4568_v11  ;;  %4596 = vmatpush1.bf16.msra.mxu1 %v4595_v13  ;;  %v4145_v11 = vld [vmem:[%s7314_s1 + $0x440] sm:$0xff]  ;;  %v4146_v13 = vld [vmem:[%s7314_s1 + $0x448] sm:$0xff] }
 0x10e   : > { %4009 = vmatprep.mubr.msk.f32.mxu0 %vm339_vm0, %v5726_v31  ;;  %4039 = vmatprep.mubr.msk.f32.mxu1 %vm339_vm0, %v5726_v31  ;;  %v4649_v16 = vpack.c.bf16 %v4146_v13, %v4145_v11  ;;  %v4173_v11 = vld [vmem:[%s7314_s1 + $0x4c0] sm:$0xff]  ;;  %v4174_v13 = vld [vmem:[%s7314_s1 + $0x4c8] sm:$0xff] }
 0x10f   : > { %4570 = vmatprep.subr.bf16.mxu0 %v5104_v39  ;;  %4597 = vmatprep.subr.bf16.mxu1 %v5104_v39 }
 0x110   : > { %1079 = vmatmul.mubr.f32.gmra.mrb[28].mxu0 %v5740_v36  ;;  %1274 = vmatmul.mubr.f32.gmra.mrb[28].mxu1 %v5740_v36 }
 0x111   : > { %4572 = vmatpush1.bf16.msra.mxu0 %v4571_v21  ;;  %4599 = vmatpush1.bf16.msra.mxu1 %v4598_v22  ;;  %v4147_v21 = vld [vmem:[%s7314_s1 + $0x450] sm:$0xff]  ;;  %v4148_v22 = vld [vmem:[%s7314_s1 + $0x458] sm:$0xff] }
 0x112   : > { %4573 = vmatprep.subr.bf16.mxu0 %v5104_v39  ;;  %4600 = vmatprep.subr.bf16.mxu1 %v5104_v39  ;;  %v4652_v25 = vpack.c.bf16 %v4148_v22, %v4147_v21  ;;  %v4205_v21 = vld [vmem:[%s7314_s1 + $0x560] sm:$0xff]  ;;  %v4206_v22 = vld [vmem:[%s7314_s1 + $0x568] sm:$0xff] }
 0x113   : > { %4010 = vmatprep.mubr.msk.f32.mxu0 %vm339_vm0, %v5738_v35  ;;  %4040 = vmatprep.mubr.msk.f32.mxu1 %vm339_vm0, %v5738_v35 }
 0x114   : > { %1084 = vmatmul.mubr.f32.gmra.mrb[30].mxu0 %v5107_v58  ;;  %1279 = vmatmul.mubr.f32.gmra.mrb[30].mxu1 %v5107_v58 }
 0x115   : > { %4575 = vmatpush1.bf16.msra.mxu0 %v4574_v29  ;;  %4602 = vmatpush1.bf16.msra.mxu1 %v4601_v30  ;;  %v4149_v29 = vld [vmem:[%s7314_s1 + $0x460] sm:$0xff]  ;;  %v4150_v30 = vld [vmem:[%s7314_s1 + $0x468] sm:$0xff] }
 0x116   : > { %4576 = vmatprep.subr.bf16.mxu0 %v5104_v39  ;;  %4603 = vmatprep.subr.bf16.mxu1 %v5104_v39  ;;  %v4655_v33 = vpack.c.bf16 %v4150_v30, %v4149_v29  ;;  %v4208_v29 = vld [vmem:[%s7314_s1 + $0x578] sm:$0xff] }
 0x117   : > { %4063 = vmatprep.mubr.msk.f32.mxu0 %vm339_vm0, %v5411_v12  ;;  %4093 = vmatprep.mubr.msk.f32.mxu1 %vm339_vm0, %v5411_v12  ;;  %v4137_v12 = vld [vmem:[%s7314_s1 + $0x400] sm:$0xff]  ;;  %v4706_v30 = vpack.c.bf16 %v4208_v29, %v4207_v28  ;;  %v4238_v28 = vld [vmem:[%s7314_s1 + $0x608] sm:$0xff]  ;;  %v4267_v29 = vld [vmem:[%s7314_s1 + $0x690] sm:$0xff] }
 0x118   : > { %v4637_v52 = vpack.c.bf16 %v4138_v50, %v4137_v12 }
 0x119   : > { %4578 = vmatpush1.bf16.msra.mxu0 %v4577_v40  ;;  %4605 = vmatpush1.bf16.msra.mxu1 %v4604_v41  ;;  %v4151_v40 = vld [vmem:[%s7314_s1 + $0x470] sm:$0xff]  ;;  %v4152_v41 = vld [vmem:[%s7314_s1 + $0x478] sm:$0xff] }
 0x11a   : > { %4606 = vmatprep.subr.bf16.mxu0 %v5104_v39  ;;  %4633 = vmatprep.subr.bf16.mxu1 %v5104_v39 }
 0x11c   : > { %1440 = vmatmul.mubr.f32.vlgmr.msra.gmra.mrb[32].mxu0 %v5107_v58  ;;  %1635 = vmatmul.mubr.f32.vlgmr.msra.gmra.mrb[32].mxu1 %v5107_v58  ;;  %v4139_v58 = vld [vmem:[%s7314_s1 + $0x410] sm:$0xff] }
 0x11d   : > { %4608 = vmatpush1.bf16.msra.mxu0 %v4607_v46  ;;  %4635 = vmatpush1.bf16.msra.mxu1 %v4634_v47  ;;  %v4640_v56 = vpack.c.bf16 %v4140_v55, %v4139_v58  ;;  %v4631_v46 = vpack.c.bf16 %v4122_v38, %v4121_v37  ;;  %v4658_v47 = vpack.c.bf16 %v4152_v41, %v4151_v40  ;;  %v4167_v55 = vld [vmem:[%s7314_s1 + $0x490] sm:$0xff]  ;;  %v4210_v37 = vld [vmem:[%s7314_s1 + $0x588] sm:$0xff]  ;;  %v4181_v40 = vld [vmem:[%s7314_s1 + $0x500] sm:$0xff] }
 0x11e   : > { %4064 = vmatprep.mubr.msk.f32.mxu0 %vm339_vm0, %v5522_v62  ;;  %4094 = vmatprep.mubr.msk.f32.mxu1 %vm339_vm0, %v5522_v62  ;;  %v4613_v62 = vpack.c.bf16 %v4110_v54, %v4109_v53  ;;  %v4196_v53 = vld [vmem:[%s7314_s1 + $0x518] sm:$0xff]  ;;  %v4182_v41 = vld [vmem:[%s7314_s1 + $0x508] sm:$0xff] }
 0x11f   : > { %4609 = vmatprep.subr.bf16.mxu0 %v5104_v39  ;;  %4636 = vmatprep.subr.bf16.mxu1 %v5104_v39 }
 0x120   : > { %1445 = vmatmul.mubr.f32.gmra.mrb[34].mxu0 %v5678_v14  ;;  %1640 = vmatmul.mubr.f32.gmra.mrb[34].mxu1 %v5678_v14 }
 0x121   : > { %4611 = vmatpush1.bf16.msra.mxu0 %v4610_v51  ;;  %4638 = vmatpush1.bf16.msra.mxu1 %v4637_v52  ;;  %v4166_v51 = vld [vmem:[%s7314_s1 + $0x488] sm:$0xff]  ;;  %v4195_v52 = vld [vmem:[%s7314_s1 + $0x510] sm:$0xff] }
 0x122   : > { %4065 = vmatprep.mubr.msk.f32.mxu0 %vm339_vm0, %v5676_v10  ;;  %4095 = vmatprep.mubr.msk.f32.mxu1 %vm339_vm0, %v5676_v10  ;;  %v4661_v54 = vpack.c.bf16 %v4166_v51, %v4165_v48  ;;  %v4688_v58 = vpack.c.bf16 %v4196_v53, %v4195_v52  ;;  %v4255_v48 = vld [vmem:[%s7314_s1 + $0x630] sm:$0xff]  ;;  %v4228_v52 = vld [vmem:[%s7314_s1 + $0x5b8] sm:$0xff]  ;;  %v4257_v53 = vld [vmem:[%s7314_s1 + $0x640] sm:$0xff] }
 0x123   : > { %4612 = vmatprep.subr.bf16.mxu0 %v5104_v39  ;;  %4639 = vmatprep.subr.bf16.mxu1 %v5104_v39  ;;  %v4227_v51 = vld [vmem:[%s7314_s1 + $0x5b0] sm:$0xff] }
 0x124   : > { %1450 = vmatmul.mubr.f32.gmra.mrb[36].mxu0 %v5693_v20  ;;  %1645 = vmatmul.mubr.f32.gmra.mrb[36].mxu1 %v5693_v20 }
 0x125   : > { %4614 = vmatpush1.bf16.msra.mxu0 %v4613_v62  ;;  %4641 = vmatpush1.bf16.msra.mxu1 %v4640_v56  ;;  %v4168_v62 = vld [vmem:[%s7314_s1 + $0x498] sm:$0xff]  ;;  %v4197_v56 = vld [vmem:[%s7314_s1 + $0x520] sm:$0xff] }
 0x126   : > { %4066 = vmatprep.mubr.msk.f32.mxu0 %vm339_vm0, %v5690_v19  ;;  %4096 = vmatprep.mubr.msk.f32.mxu1 %vm339_vm0, %v5690_v19  ;;  %v4664_v60 = vpack.c.bf16 %v4168_v62, %v4167_v55  ;;  %v4691_v61 = vpack.c.bf16 %v4198_v57, %v4197_v56  ;;  %v4229_v62 = vld [vmem:[%s7314_s1 + $0x5c0] sm:$0xff]  ;;  %v4230_v56 = vld [vmem:[%s7314_s1 + $0x5c8] sm:$0xff]  ;;  %v4259_v57 = vld [vmem:[%s7314_s1 + $0x650] sm:$0xff] }
 0x127   : > { %4615 = vmatprep.subr.bf16.mxu0 %v5104_v39  ;;  %4642 = vmatprep.subr.bf16.mxu1 %v5104_v39 }
 0x128   : > { %1455 = vmatmul.mubr.f32.gmra.mrb[38].mxu0 %v6012_v5  ;;  %1650 = vmatmul.mubr.f32.gmra.mrb[38].mxu1 %v6012_v5 }
 0x129   : > { %4617 = vmatpush1.bf16.msra.mxu0 %v4616_v63  ;;  %4644 = vmatpush1.bf16.msra.mxu1 %v4643_v0  ;;  %v4169_v63 = vld [vmem:[%s7314_s1 + $0x4a0] sm:$0xff]  ;;  %v4170_v0 = vld [vmem:[%s7314_s1 + $0x4a8] sm:$0xff] }
 0x12a   : > { %4067 = vmatprep.mubr.msk.f32.mxu0 %vm339_vm0, %v5702_v23  ;;  %4097 = vmatprep.mubr.msk.f32.mxu1 %vm339_vm0, %v5702_v23  ;;  %v4667_v3 = vpack.c.bf16 %v4170_v0, %v4169_v63  ;;  %v6333_v63 = vld [vmem:[#allocation2 + $0x28] sm:$0xff]  ;;  %v4721_v0 = vpack.c.bf16 %v4230_v56, %v4229_v62  ;;  %v4288_v62 = vld [vmem:[%s7314_s1 + $0x6d8] sm:$0xff]  ;;  %v4317_v56 = vld [vmem:[%s7314_s1 + $0x760] sm:$0xff] }
 0x12b   : > { %4618 = vmatprep.subr.bf16.mxu0 %v5104_v39  ;;  %4645 = vmatprep.subr.bf16.mxu1 %v5104_v39 }
 0x12c   : > { %1459 = vmatmul.mubr.f32.gmra.mrb[40].mxu0 %v6012_v5  ;;  %1654 = vmatmul.mubr.f32.gmra.mrb[40].mxu1 %v6012_v5 }
 0x12d   : > { %4620 = vmatpush1.bf16.msra.mxu0 %v4619_v6  ;;  %4647 = vmatpush1.bf16.msra.mxu1 %v4646_v7  ;;  %v4171_v6 = vld [vmem:[%s7314_s1 + $0x4b0] sm:$0xff]  ;;  %v4172_v7 = vld [vmem:[%s7314_s1 + $0x4b8] sm:$0xff] }
 0x12e   : > { %4068 = vmatprep.mubr.msk.f32.mxu0 %vm339_vm0, %v5712_v26  ;;  %4098 = vmatprep.mubr.msk.f32.mxu1 %vm339_vm0, %v5712_v26 }
 0x12f   : > { %4621 = vmatprep.subr.bf16.mxu0 %v5104_v39  ;;  %4648 = vmatprep.subr.bf16.mxu1 %v5104_v39 }
 0x130   : > { %1464 = vmatmul.mubr.f32.gmra.mrb[42].mxu0 %v5728_v34  ;;  %1659 = vmatmul.mubr.f32.gmra.mrb[42].mxu1 %v5728_v34 }
 0x131   : > { %4623 = vmatpush1.bf16.msra.mxu0 %v4622_v15  ;;  %4650 = vmatpush1.bf16.msra.mxu1 %v4649_v16  ;;  %v4204_v15 = vld [vmem:[%s7314_s1 + $0x558] sm:$0xff] }
 0x132   : > { %4069 = vmatprep.mubr.msk.f32.mxu0 %vm339_vm0, %v5726_v31  ;;  %4099 = vmatprep.mubr.msk.f32.mxu1 %vm339_vm0, %v5726_v31  ;;  %v683_v44 = vpop.f32.mrb[0].mxu0 }
 0x133   : > { %4624 = vmatprep.subr.bf16.mxu0 %v5104_v39  ;;  %4651 = vmatprep.subr.bf16.mxu1 %v5104_v39  ;;  %v6099_v45 = vpop.f32.mrb[0].mxu1  ;;  %v720_v49 = vadd.f32 %v718_v42, %v683_v44  ;;  %v685_v12 = vpop.f32.mrb[1].mxu0  ;;  %v4212_v42 = vld [vmem:[%s7314_s1 + $0x598] sm:$0xff]  ;;  %v4685_v44 = vpack.c.bf16 %v4182_v41, %v4181_v40  ;;  %v4270_v40 = vld [vmem:[%s7314_s1 + $0x6a8] sm:$0xff]  ;;  %v6445_v41 = vld [vmem:[#allocation2 + $0x60] sm:$0xff] }
 0x134   : > { %1469 = vmatmul.mubr.f32.gmra.mrb[44].mxu0 %v5740_v36  ;;  %1664 = vmatmul.mubr.f32.gmra.mrb[44].mxu1 %v5740_v36  ;;  %v858_v50 = vpop.f32.mrb[1].mxu1 }
 0x135   : > { %4626 = vmatpush1.bf16.msra.mxu0 %v4625_v24  ;;  %4653 = vmatpush1.bf16.msra.mxu1 %v4652_v25  ;;  %722 = vst.msk [vmem:[%s5356_s26] sm:$0xff] %vm339_vm0, %v720_v49  ;;  %v4703_v24 = vpack.c.bf16 %v4206_v22, %v4205_v21  ;;  %v4177_v25 = vld [vmem:[%s7314_s1 + $0x4e0] sm:$0xff]  ;;  %v4256_v49 = vld [vmem:[%s7314_s1 + $0x638] sm:$0xff]  ;;  %v4266_v22 = vld [vmem:[%s7314_s1 + $0x688] sm:$0xff] }
 0x136   : > { %4627 = vmatprep.subr.bf16.mxu0 %v5104_v39  ;;  %4654 = vmatprep.subr.bf16.mxu1 %v5104_v39  ;;  %v4742_v50 = vpack.c.bf16 %v4256_v49, %v4255_v48  ;;  %v4265_v21 = vld [vmem:[%s7314_s1 + $0x680] sm:$0xff]  ;;  %v4272_v48 = vld [vmem:[%s7314_s1 + $0x6b8] sm:$0xff] }
 0x137   : > { %4070 = vmatprep.mubr.msk.f32.mxu0 %vm339_vm0, %v5738_v35  ;;  %4100 = vmatprep.mubr.msk.f32.mxu1 %vm339_vm0, %v5738_v35 }
 0x138   : > { %1474 = vmatmul.mubr.f32.gmra.mrb[46].mxu0 %v6012_v5  ;;  %1669 = vmatmul.mubr.f32.gmra.mrb[46].mxu1 %v6012_v5 }
 0x139   : > { %4629 = vmatpush1.bf16.msra.mxu0 %v4628_v32  ;;  %4656 = vmatpush1.bf16.msra.mxu1 %v4655_v33  ;;  %v4179_v32 = vld [vmem:[%s7314_s1 + $0x4f0] sm:$0xff]  ;;  %v4180_v33 = vld [vmem:[%s7314_s1 + $0x4f8] sm:$0xff] }
 0x13a   : > { %4630 = vmatprep.subr.bf16.mxu0 %v5104_v39  ;;  %4657 = vmatprep.subr.bf16.mxu1 %v5104_v39 }
 0x13b   : > { %4123 = vmatprep.mubr.msk.f32.mxu0 %vm339_vm0, %v6097_v43  ;;  %4153 = vmatprep.mubr.msk.f32.mxu1 %vm339_vm0, %v6097_v43 }
 0x13d   : > { %4632 = vmatpush1.bf16.msra.mxu0 %v4631_v46  ;;  %4659 = vmatpush1.bf16.msra.mxu1 %v4658_v47  ;;  %v4225_v47 = vld [vmem:[%s7314_s1 + $0x5a0] sm:$0xff] }
 0x13e   : > { %4660 = vmatprep.subr.bf16.mxu0 %v5104_v39  ;;  %4687 = vmatprep.subr.bf16.mxu1 %v5104_v39 }
 0x140   : > { %1830 = vmatmul.mubr.f32.vlgmr.msra.gmra.mrb[48].mxu0 %v6012_v5  ;;  %2025 = vmatmul.mubr.f32.vlgmr.msra.gmra.mrb[48].mxu1 %v6012_v5 }
 0x141   : > { %4662 = vmatpush1.bf16.msra.mxu0 %v4661_v54  ;;  %4689 = vmatpush1.bf16.msra.mxu1 %v4688_v58  ;;  %v4258_v54 = vld [vmem:[%s7314_s1 + $0x648] sm:$0xff]  ;;  %v4718_v58 = vpack.c.bf16 %v4228_v52, %v4227_v51  ;;  %v4315_v52 = vld [vmem:[%s7314_s1 + $0x750] sm:$0xff] }
 0x142   : > { %4124 = vmatprep.mubr.msk.f32.mxu0 %vm339_vm0, %v6135_v59  ;;  %4154 = vmatprep.mubr.msk.f32.mxu1 %vm339_vm0, %v6135_v59  ;;  %v4745_v55 = vpack.c.bf16 %v4258_v54, %v4257_v53  ;;  %v4286_v51 = vld [vmem:[%s7314_s1 + $0x6c8] sm:$0xff]  ;;  %v4316_v53 = vld [vmem:[%s7314_s1 + $0x758] sm:$0xff] }
 0x143   : > { %4663 = vmatprep.subr.bf16.mxu0 %v5104_v39  ;;  %4690 = vmatprep.subr.bf16.mxu1 %v5104_v39 }
 0x144   : > { %1835 = vmatmul.mubr.f32.gmra.mrb[50].mxu0 %v5678_v14  ;;  %2030 = vmatmul.mubr.f32.gmra.mrb[50].mxu1 %v5678_v14  ;;  %v4201_v14 = vld [vmem:[%s7314_s1 + $0x540] sm:$0xff] }
 0x145   : > { %4665 = vmatpush1.bf16.msra.mxu0 %v4664_v60  ;;  %4692 = vmatpush1.bf16.msra.mxu1 %v4691_v61  ;;  %v4697_v9 = vpack.c.bf16 %v4202_v8, %v4201_v14  ;;  %v4260_v60 = vld [vmem:[%s7314_s1 + $0x658] sm:$0xff]  ;;  %v6329_v61 = vld [vmem:[#allocation2 + $0x10] sm:$0xff] }
 0x146   : > { %4125 = vmatprep.mubr.msk.f32.mxu0 %vm339_vm0, %v5676_v10  ;;  %4155 = vmatprep.mubr.msk.f32.mxu1 %vm339_vm0, %v5676_v10  ;;  %v4670_v10 = vpack.c.bf16 %v4172_v7, %v4171_v6  ;;  %v4748_v1 = vpack.c.bf16 %v4260_v60, %v4259_v57  ;;  %v4262_v6 = vld [vmem:[%s7314_s1 + $0x668] sm:$0xff]  ;;  %v6353_v7 = vld [vmem:[#allocation2 + $0x20] sm:$0xff]  ;;  %v6357_v14 = vld [vmem:[#allocation2 + $0x38] sm:$0xff] }
 0x147   : > { %4666 = vmatprep.subr.bf16.mxu0 %v5104_v39  ;;  %4693 = vmatprep.subr.bf16.mxu1 %v5104_v39  ;;  %v4318_v57 = vld [vmem:[%s7314_s1 + $0x768] sm:$0xff] }
 0x148   : > { %1840 = vmatmul.mubr.f32.gmra.mrb[52].mxu0 %v5693_v20  ;;  %2035 = vmatmul.mubr.f32.gmra.mrb[52].mxu1 %v5693_v20  ;;  %v4203_v20 = vld [vmem:[%s7314_s1 + $0x550] sm:$0xff] }
 0x149   : > { %4668 = vmatpush1.bf16.msra.mxu0 %v4667_v3  ;;  %4695 = vmatpush1.bf16.msra.mxu1 %v4694_v4  ;;  %v4700_v16 = vpack.c.bf16 %v4204_v15, %v4203_v20  ;;  %v4232_v3 = vld [vmem:[%s7314_s1 + $0x5d8] sm:$0xff]  ;;  %v4261_v4 = vld [vmem:[%s7314_s1 + $0x660] sm:$0xff]  ;;  %v6379_v15 = vld [vmem:[#allocation2 + $0x48] sm:$0xff] }
 0x14a   : > { %4126 = vmatprep.mubr.msk.f32.mxu0 %vm339_vm0, %v5690_v19  ;;  %4156 = vmatprep.mubr.msk.f32.mxu1 %vm339_vm0, %v5690_v19  ;;  %v4673_v19 = vpack.c.bf16 %v4174_v13, %v4173_v11  ;;  %v4724_v8 = vpack.c.bf16 %v4232_v3, %v4231_v2  ;;  %v4234_v11 = vld [vmem:[%s7314_s1 + $0x5e8] sm:$0xff]  ;;  %v4263_v13 = vld [vmem:[%s7314_s1 + $0x670] sm:$0xff]  ;;  %v4264_v20 = vld [vmem:[%s7314_s1 + $0x678] sm:$0xff] }
 0x14b   : > { %4669 = vmatprep.subr.bf16.mxu0 %v5104_v39  ;;  %4696 = vmatprep.subr.bf16.mxu1 %v5104_v39  ;;  %v4290_v2 = vld [vmem:[%s7314_s1 + $0x6e8] sm:$0xff]  ;;  %v4319_v3 = vld [vmem:[%s7314_s1 + $0x770] sm:$0xff] }
 0x14c   : > { %1845 = vmatmul.mubr.f32.gmra.mrb[54].mxu0 %v6012_v5  ;;  %2040 = vmatmul.mubr.f32.gmra.mrb[54].mxu1 %v6012_v5 }
 0x14d   : > { %4671 = vmatpush1.bf16.msra.mxu0 %v4670_v10  ;;  %4698 = vmatpush1.bf16.msra.mxu1 %v4697_v9  ;;  %v4751_v10 = vpack.c.bf16 %v4262_v6, %v4261_v4  ;;  %v4233_v9 = vld [vmem:[%s7314_s1 + $0x5e0] sm:$0xff]  ;;  %v4320_v4 = vld [vmem:[%s7314_s1 + $0x778] sm:$0xff] }
 0x14e   : > { %4127 = vmatprep.mubr.msk.f32.mxu0 %vm339_vm0, %v5702_v23  ;;  %4157 = vmatprep.mubr.msk.f32.mxu1 %vm339_vm0, %v5702_v23  ;;  %v4676_v23 = vpack.c.bf16 %v4176_v18, %v4175_v17  ;;  %v4235_v17 = vld [vmem:[%s7314_s1 + $0x5f0] sm:$0xff]  ;;  %v4236_v18 = vld [vmem:[%s7314_s1 + $0x5f8] sm:$0xff] }
 0x14f   : > { %4672 = vmatprep.subr.bf16.mxu0 %v5104_v39  ;;  %4699 = vmatprep.subr.bf16.mxu1 %v5104_v39 }
 0x150   : > { %1849 = vmatmul.mubr.f32.gmra.mrb[56].mxu0 %v6012_v5  ;;  %2044 = vmatmul.mubr.f32.gmra.mrb[56].mxu1 %v6012_v5 }
 0x151   : > { %4674 = vmatpush1.bf16.msra.mxu0 %v4673_v19  ;;  %4701 = vmatpush1.bf16.msra.mxu1 %v4700_v16  ;;  %v4727_v19 = vpack.c.bf16 %v4234_v11, %v4233_v9  ;;  %v4754_v16 = vpack.c.bf16 %v4264_v20, %v4263_v13  ;;  %v4292_v9 = vld [vmem:[%s7314_s1 + $0x6f8] sm:$0xff]  ;;  %v4321_v11 = vld [vmem:[%s7314_s1 + $0x780] sm:$0xff]  ;;  %v4322_v13 = vld [vmem:[%s7314_s1 + $0x788] sm:$0xff] }
 0x152   : > { %4128 = vmatprep.mubr.msk.f32.mxu0 %vm339_vm0, %v5712_v26  ;;  %4158 = vmatprep.mubr.msk.f32.mxu1 %vm339_vm0, %v5712_v26  ;;  %v4679_v26 = vpack.c.bf16 %v4178_v27, %v4177_v25  ;;  %v4757_v25 = vpack.c.bf16 %v4266_v22, %v4265_v21  ;;  %v4237_v27 = vld [vmem:[%s7314_s1 + $0x600] sm:$0xff]  ;;  %v4324_v21 = vld [vmem:[%s7314_s1 + $0x798] sm:$0xff] }
 0x153   : > { %4675 = vmatprep.subr.bf16.mxu0 %v5104_v39  ;;  %4702 = vmatprep.subr.bf16.mxu1 %v5104_v39 }
 0x154   : > { %1854 = vmatmul.mubr.f32.gmra.mrb[58].mxu0 %v5728_v34  ;;  %2049 = vmatmul.mubr.f32.gmra.mrb[58].mxu1 %v5728_v34  ;;  %v4209_v34 = vld [vmem:[%s7314_s1 + $0x580] sm:$0xff] }
 0x155   : > { %4677 = vmatpush1.bf16.msra.mxu0 %v4676_v23  ;;  %4704 = vmatpush1.bf16.msra.mxu1 %v4703_v24  ;;  %v4709_v38 = vpack.c.bf16 %v4210_v37, %v4209_v34  ;;  %v6401_v23 = vld [vmem:[#allocation2 + $0x58] sm:$0xff]  ;;  %v4730_v24 = vpack.c.bf16 %v4236_v18, %v4235_v17  ;;  %v4239_v37 = vld [vmem:[%s7314_s1 + $0x610] sm:$0xff]  ;;  %v4294_v17 = vld [vmem:[%s7314_s1 + $0x708] sm:$0xff] }
 0x156   : > { %4129 = vmatprep.mubr.msk.f32.mxu0 %vm339_vm0, %v5726_v31  ;;  %4159 = vmatprep.mubr.msk.f32.mxu1 %vm339_vm0, %v5726_v31  ;;  %v4682_v31 = vpack.c.bf16 %v4180_v33, %v4179_v32  ;;  %v6425_v32 = vld [vmem:[#allocation2 + $0x68] sm:$0xff]  ;;  %v4733_v33 = vpack.c.bf16 %v4238_v28, %v4237_v27  ;;  %v4323_v18 = vld [vmem:[%s7314_s1 + $0x790] sm:$0xff]  ;;  %v4296_v27 = vld [vmem:[%s7314_s1 + $0x718] sm:$0xff] }
 0x157   : > { %4678 = vmatprep.subr.bf16.mxu0 %v5104_v39  ;;  %4705 = vmatprep.subr.bf16.mxu1 %v5104_v39  ;;  %v4325_v28 = vld [vmem:[%s7314_s1 + $0x7a0] sm:$0xff] }
 0x158   : > { %1859 = vmatmul.mubr.f32.gmra.mrb[60].mxu0 %v5740_v36  ;;  %2054 = vmatmul.mubr.f32.gmra.mrb[60].mxu1 %v5740_v36  ;;  %v4211_v36 = vld [vmem:[%s7314_s1 + $0x590] sm:$0xff] }
 0x159   : > { %4680 = vmatpush1.bf16.msra.mxu0 %v4679_v26  ;;  %4707 = vmatpush1.bf16.msra.mxu1 %v4706_v30  ;;  %v4712_v46 = vpack.c.bf16 %v4212_v42, %v4211_v36  ;;  %v4268_v26 = vld [vmem:[%s7314_s1 + $0x698] sm:$0xff]  ;;  %v6421_v30 = vld [vmem:[#allocation2 + $0x50] sm:$0xff] }
 0x15a   : > { %4681 = vmatprep.subr.bf16.mxu0 %v5104_v39  ;;  %4708 = vmatprep.subr.bf16.mxu1 %v5104_v39  ;;  %v4760_v34 = vpack.c.bf16 %v4268_v26, %v4267_v29  ;;  %v6449_v36 = vld [vmem:[#allocation2 + $0x78] sm:$0xff]  ;;  %v4326_v29 = vld [vmem:[%s7314_s1 + $0x7a8] sm:$0xff] }
 0x15b   : > { %4130 = vmatprep.mubr.msk.f32.mxu0 %vm339_vm0, %v5738_v35  ;;  %4160 = vmatprep.mubr.msk.f32.mxu1 %vm339_vm0, %v5738_v35  ;;  %v4226_v35 = vld [vmem:[%s7314_s1 + $0x5a8] sm:$0xff] }
 0x15c   : > { %1864 = vmatmul.mubr.f32.gmra.mrb[62].mxu0 %v6012_v5  ;;  %2059 = vmatmul.mubr.f32.gmra.mrb[62].mxu1 %v6012_v5  ;;  %v4715_v12 = vpack.c.bf16 %v4226_v35, %v4225_v47  ;;  %v4242_v47 = vld [vmem:[%s7314_s1 + $0x628] sm:$0xff]  ;;  %v4271_v35 = vld [vmem:[%s7314_s1 + $0x6b0] sm:$0xff] }
 0x15d   : > { %4683 = vmatpush1.bf16.msra.mxu0 %v4682_v31  ;;  %4710 = vmatpush1.bf16.msra.mxu1 %v4709_v38  ;;  %v4240_v31 = vld [vmem:[%s7314_s1 + $0x618] sm:$0xff]  ;;  %v4269_v38 = vld [vmem:[%s7314_s1 + $0x6a0] sm:$0xff] }
 0x15e   : > { %4684 = vmatprep.subr.bf16.mxu0 %v5104_v39  ;;  %4711 = vmatprep.subr.bf16.mxu1 %v5104_v39  ;;  %v4736_v42 = vpack.c.bf16 %v4240_v31, %v4239_v37  ;;  %v4298_v37 = vld [vmem:[%s7314_s1 + $0x728] sm:$0xff]  ;;  %v4327_v31 = vld [vmem:[%s7314_s1 + $0x7b0] sm:$0xff] }
 0x15f   : > { %4183 = vmatprep.mubr.msk.f32.mxu0 %vm339_vm0, %v6097_v43  ;;  %4213 = vmatprep.mubr.msk.f32.mxu1 %vm339_vm0, %v6097_v43 }
 0x161   : > { %4686 = vmatpush1.bf16.msra.mxu0 %v4685_v44  ;;  %4713 = vmatpush1.bf16.msra.mxu1 %v4712_v46  ;;  %v4763_v44 = vpack.c.bf16 %v4270_v40, %v4269_v38  ;;  %v4241_v46 = vld [vmem:[%s7314_s1 + $0x620] sm:$0xff]  ;;  %v4328_v38 = vld [vmem:[%s7314_s1 + $0x7b8] sm:$0xff]  ;;  %v719_v40 = vld [vmem:[%s5356_s26 + $0x8] sm:$0xff] }
 0x162   : > { %4714 = vmatprep.subr.bf16.mxu0 %v5104_v39  ;;  %4741 = vmatprep.subr.bf16.mxu1 %v5104_v39  ;;  %v4739_v49 = vpack.c.bf16 %v4242_v47, %v4241_v46  ;;  %v4814_v46 = vpack.c.bf16 %v4328_v38, %v4327_v31  ;;  %v4299_v47 = vld [vmem:[%s7314_s1 + $0x730] sm:$0xff]  ;;  %v4349_v38 = vld [vmem:[%s7314_s1 + $0x800] sm:$0xff] }
 0x163   : > { %v3951_v31 = vld [vmem:[%s5356_s26 + $0x10] sm:$0xff] }
 0x164   : > { %2220 = vmatmul.mubr.f32.vlgmr.msra.gmra.mrb[64].mxu0 %v6012_v5  ;;  %2392 = vmatmul.mubr.f32.vlgmr.msra.gmra.mrb[64].mxu1 %v6012_v5 }
 0x165   : > { %4716 = vmatpush1.bf16.msra.mxu0 %v4715_v12  ;;  %4743 = vmatpush1.bf16.msra.mxu1 %v4742_v50  ;;  %v4766_v12 = vpack.c.bf16 %v4272_v48, %v4271_v35  ;;  %v4285_v50 = vld [vmem:[%s7314_s1 + $0x6c0] sm:$0xff] }
 0x166   : > { %4184 = vmatprep.mubr.msk.f32.mxu0 %vm339_vm0, %v6135_v59  ;;  %4214 = vmatprep.mubr.msk.f32.mxu1 %vm339_vm0, %v6135_v59  ;;  %v4769_v54 = vpack.c.bf16 %v4286_v51, %v4285_v50  ;;  %v893_v51 = vld [vmem:[%s5356_s26] sm:$0xff] }
 0x167   : > { %4717 = vmatprep.subr.bf16.mxu0 %v5104_v39  ;;  %4744 = vmatprep.subr.bf16.mxu1 %v5104_v39 }
 0x168   : > { %2224 = vmatmul.mubr.f32.gmra.mrb[66].mxu0 %v6329_v61  ;;  %2396 = vmatmul.mubr.f32.gmra.mrb[66].mxu1 %v6329_v61 }
 0x169   : > { %4719 = vmatpush1.bf16.msra.mxu0 %v4718_v58  ;;  %4746 = vmatpush1.bf16.msra.mxu1 %v4745_v55  ;;  %v4796_v58 = vpack.c.bf16 %v4316_v53, %v4315_v52  ;;  %v4287_v55 = vld [vmem:[%s7314_s1 + $0x6d0] sm:$0xff] }
 0x16a   : > { %4185 = vmatprep.mubr.msk.f32.mxu0 %vm339_vm0, %v6333_v63  ;;  %4215 = vmatprep.mubr.msk.f32.mxu1 %vm339_vm0, %v6333_v63  ;;  %v4772_v60 = vpack.c.bf16 %v4288_v62, %v4287_v55 }
 0x16b   : > { %4720 = vmatprep.subr.bf16.mxu0 %v5104_v39  ;;  %4747 = vmatprep.subr.bf16.mxu1 %v5104_v39 }
 0x16c   : > { %2229 = vmatmul.mubr.f32.gmra.mrb[68].mxu0 %v6353_v7  ;;  %2401 = vmatmul.mubr.f32.gmra.mrb[68].mxu1 %v6353_v7 }
 0x16d   : > { %4722 = vmatpush1.bf16.msra.mxu0 %v4721_v0  ;;  %4749 = vmatpush1.bf16.msra.mxu1 %v4748_v1  ;;  %v4799_v0 = vpack.c.bf16 %v4318_v57, %v4317_v56  ;;  %v4289_v1 = vld [vmem:[%s7314_s1 + $0x6e0] sm:$0xff] }
 0x16e   : > { %4186 = vmatprep.mubr.msk.f32.mxu0 %vm339_vm0, %v6357_v14  ;;  %4216 = vmatprep.mubr.msk.f32.mxu1 %vm339_vm0, %v6357_v14  ;;  %v4775_v6 = vpack.c.bf16 %v4290_v2, %v4289_v1  ;;  %v4301_v56 = vld [vmem:[%s7314_s1 + $0x740] sm:$0xff]  ;;  %v4332_v1 = vld [vmem:[%s7314_s1 + $0x7d8] sm:$0xff] }
 0x16f   : > { %4723 = vmatprep.subr.bf16.mxu0 %v5104_v39  ;;  %4750 = vmatprep.subr.bf16.mxu1 %v5104_v39 }
 0x170   : > { %2234 = vmatmul.mubr.f32.gmra.mrb[70].mxu0 %v6012_v5  ;;  %2406 = vmatmul.mubr.f32.gmra.mrb[70].mxu1 %v6012_v5 }
 0x171   : > { %4725 = vmatpush1.bf16.msra.mxu0 %v4724_v8  ;;  %4752 = vmatpush1.bf16.msra.mxu1 %v4751_v10  ;;  %v4802_v8 = vpack.c.bf16 %v4320_v4, %v4319_v3  ;;  %v4291_v10 = vld [vmem:[%s7314_s1 + $0x6f0] sm:$0xff]  ;;  %v4345_v4 = vld [vmem:[%s7314_s1 + $0x7e0] sm:$0xff] }
 0x172   : > { %4187 = vmatprep.mubr.msk.f32.mxu0 %vm339_vm0, %v6379_v15  ;;  %4217 = vmatprep.mubr.msk.f32.mxu1 %vm339_vm0, %v6379_v15  ;;  %v4778_v20 = vpack.c.bf16 %v4292_v9, %v4291_v10  ;;  %v4376_v10 = vld [vmem:[%s7314_s1 + $0x878] sm:$0xff] }
 0x173   : > { %4726 = vmatprep.subr.bf16.mxu0 %v5104_v39  ;;  %4753 = vmatprep.subr.bf16.mxu1 %v5104_v39 }
 0x174   : > { %2238 = vmatmul.mubr.f32.gmra.mrb[72].mxu0 %v6012_v5  ;;  %2411 = vmatmul.mubr.f32.gmra.mrb[72].mxu1 %v6012_v5 }
 0x175   : > { %4728 = vmatpush1.bf16.msra.mxu0 %v4727_v19  ;;  %4755 = vmatpush1.bf16.msra.mxu1 %v4754_v16  ;;  %v4805_v19 = vpack.c.bf16 %v4322_v13, %v4321_v11  ;;  %v4293_v16 = vld [vmem:[%s7314_s1 + $0x700] sm:$0xff] }
 0x176   : > { %4188 = vmatprep.mubr.msk.f32.mxu0 %vm339_vm0, %v6401_v23  ;;  %4218 = vmatprep.mubr.msk.f32.mxu1 %vm339_vm0, %v6401_v23  ;;  %v4781_v22 = vpack.c.bf16 %v4294_v17, %v4293_v16 }
 0x177   : > { %4729 = vmatprep.subr.bf16.mxu0 %v5104_v39  ;;  %4756 = vmatprep.subr.bf16.mxu1 %v5104_v39 }
 0x178   : > { %2242 = vmatmul.mubr.f32.gmra.mrb[74].mxu0 %v6421_v30  ;;  %2415 = vmatmul.mubr.f32.gmra.mrb[74].mxu1 %v6421_v30 }
 0x179   : > { %4731 = vmatpush1.bf16.msra.mxu0 %v4730_v24  ;;  %4758 = vmatpush1.bf16.msra.mxu1 %v4757_v25  ;;  %v4808_v24 = vpack.c.bf16 %v4324_v21, %v4323_v18  ;;  %v4295_v25 = vld [vmem:[%s7314_s1 + $0x710] sm:$0xff] }
 0x17a   : > { %4189 = vmatprep.mubr.msk.f32.mxu0 %vm339_vm0, %v6425_v32  ;;  %4219 = vmatprep.mubr.msk.f32.mxu1 %vm339_vm0, %v6425_v32  ;;  %v4784_v26 = vpack.c.bf16 %v4296_v27, %v4295_v25  ;;  %v4347_v21 = vld [vmem:[%s7314_s1 + $0x7f0] sm:$0xff]  ;;  %v4378_v25 = vld [vmem:[%s7314_s1 + $0x888] sm:$0xff] }
 0x17b   : > { %4732 = vmatprep.subr.bf16.mxu0 %v5104_v39  ;;  %4759 = vmatprep.subr.bf16.mxu1 %v5104_v39 }
 0x17c   : > { %2247 = vmatmul.mubr.f32.gmra.mrb[76].mxu0 %v6445_v41  ;;  %2420 = vmatmul.mubr.f32.gmra.mrb[76].mxu1 %v6445_v41 }
 0x17d   : > { %4734 = vmatpush1.bf16.msra.mxu0 %v4733_v33  ;;  %4761 = vmatpush1.bf16.msra.mxu1 %v4760_v34  ;;  %v4811_v33 = vpack.c.bf16 %v4326_v29, %v4325_v28  ;;  %v4297_v34 = vld [vmem:[%s7314_s1 + $0x720] sm:$0xff] }
 0x17e   : > { %4220 = vmatprep.mubr.msk.f32.mxu1 %vm339_vm0, %v6449_v36  ;;  %4735 = vmatprep.subr.bf16.mxu0 %v5104_v39 }
 0x17f   : > { %4762 = vmatprep.subr.bf16.mxu1 %v5104_v39  ;;  %4190 = vmatprep.mubr.msk.f32.mxu0 %vm339_vm0, %v6449_v36 }
 0x180   : > { %2425 = vmatmul.mubr.f32.gmra.mrb[78].mxu1 %v6012_v5  ;;  %2252 = vmatmul.mubr.f32.gmra.mrb[78].mxu0 %v6012_v5 }
 0x181   : > { %4737 = vmatpush1.bf16.msra.mxu0 %v4736_v42  ;;  %4764 = vmatpush1.bf16.msra.mxu1 %v4763_v44  ;;  %v899_v42 = vrot.slane %v6099_v45, 1  ;;  %v4787_v44 = vpack.c.bf16 %v4298_v37, %v4297_v34  ;;  %v4300_v45 = vld [vmem:[%s7314_s1 + $0x738] sm:$0xff] }
 0x182   : > { %4738 = vmatprep.subr.bf16.mxu0 %v5104_v39  ;;  %4765 = vmatprep.subr.bf16.mxu1 %v5104_v39  ;;  %v4790_v55 = vpack.c.bf16 %v4300_v45, %v4299_v47 }
 0x183   : > { %4243 = vmatprep.mubr.msk.f32.mxu0 %vm339_vm0, %v6097_v43  ;;  %4273 = vmatprep.mubr.msk.f32.mxu1 %vm339_vm0, %v6097_v43 }
 0x185   : > { %4740 = vmatpush1.bf16.msra.mxu0 %v4739_v49  ;;  %4767 = vmatpush1.bf16.msra.mxu1 %v4766_v12  ;;  %v4329_v49 = vld [vmem:[%s7314_s1 + $0x7c0] sm:$0xff]  ;;  %v4330_v12 = vld [vmem:[%s7314_s1 + $0x7c8] sm:$0xff] }
 0x186   : > { %4768 = vmatprep.subr.bf16.mxu0 %v5104_v39  ;;  %4795 = vmatprep.subr.bf16.mxu1 %v5104_v39  ;;  %v4817_v62 = vpack.c.bf16 %v4330_v12, %v4329_v49  ;;  %v4351_v49 = vld [vmem:[%s7314_s1 + $0x810] sm:$0xff]  ;;  %v4381_v12 = vld [vmem:[%s7314_s1 + $0x8a0] sm:$0xff] }
 0x188   : > { %2586 = vmatmul.mubr.f32.vlgmr.msra.gmra.mrb[80].mxu0 %v6012_v5  ;;  %2780 = vmatmul.mubr.f32.vlgmr.msra.gmra.mrb[80].mxu1 %v6012_v5 }
 0x189   : > { %4770 = vmatpush1.bf16.msra.mxu0 %v4769_v54  ;;  %4797 = vmatpush1.bf16.msra.mxu1 %v4796_v58 }
 0x18a   : > { %4244 = vmatprep.mubr.msk.f32.mxu0 %vm339_vm0, %v6135_v59  ;;  %4274 = vmatprep.mubr.msk.f32.mxu1 %vm339_vm0, %v6135_v59 }
 0x18b   : > { %4771 = vmatprep.subr.bf16.mxu0 %v5104_v39  ;;  %4798 = vmatprep.subr.bf16.mxu1 %v5104_v39 }
 0x18c   : > { %2590 = vmatmul.mubr.f32.gmra.mrb[82].mxu0 %v6329_v61  ;;  %2784 = vmatmul.mubr.f32.gmra.mrb[82].mxu1 %v6329_v61 }
 0x18d   : > { %4773 = vmatpush1.bf16.msra.mxu0 %v4772_v60  ;;  %4800 = vmatpush1.bf16.msra.mxu1 %v4799_v0  ;;  %v4302_v60 = vld [vmem:[%s7314_s1 + $0x748] sm:$0xff]  ;;  %v4331_v0 = vld [vmem:[%s7314_s1 + $0x7d0] sm:$0xff] }
 0x18e   : > { %4245 = vmatprep.mubr.msk.f32.mxu0 %vm339_vm0, %v6333_v63  ;;  %4275 = vmatprep.mubr.msk.f32.mxu1 %vm339_vm0, %v6333_v63  ;;  %v4793_v2 = vpack.c.bf16 %v4302_v60, %v4301_v56  ;;  %v4820_v3 = vpack.c.bf16 %v4332_v1, %v4331_v0  ;;  %v4356_v1 = vld [vmem:[%s7314_s1 + $0x838] sm:$0xff] }
 0x18f   : > { %4774 = vmatprep.subr.bf16.mxu0 %v5104_v39  ;;  %4801 = vmatprep.subr.bf16.mxu1 %v5104_v39 }
 0x190   : > { %2595 = vmatmul.mubr.f32.gmra.mrb[84].mxu0 %v6353_v7  ;;  %2789 = vmatmul.mubr.f32.gmra.mrb[84].mxu1 %v6353_v7 }
 0x191   : > { %4776 = vmatpush1.bf16.msra.mxu0 %v4775_v6  ;;  %4803 = vmatpush1.bf16.msra.mxu1 %v4802_v8  ;;  %v4346_v6 = vld [vmem:[%s7314_s1 + $0x7e8] sm:$0xff]  ;;  %v4375_v8 = vld [vmem:[%s7314_s1 + $0x870] sm:$0xff] }
 0x192   : > { %4246 = vmatprep.mubr.msk.f32.mxu0 %vm339_vm0, %v6357_v14  ;;  %4276 = vmatprep.mubr.msk.f32.mxu1 %vm339_vm0, %v6357_v14  ;;  %v4823_v17 = vpack.c.bf16 %v4346_v6, %v4345_v4  ;;  %v4850_v18 = vpack.c.bf16 %v4376_v10, %v4375_v8 }
 0x193   : > { %4777 = vmatprep.subr.bf16.mxu0 %v5104_v39  ;;  %4804 = vmatprep.subr.bf16.mxu1 %v5104_v39 }
 0x194   : > { %2600 = vmatmul.mubr.f32.gmra.mrb[86].mxu0 %v6012_v5  ;;  %2794 = vmatmul.mubr.f32.gmra.mrb[86].mxu1 %v6012_v5 }
 0x195   : > { %4779 = vmatpush1.bf16.msra.mxu0 %v4778_v20  ;;  %4806 = vmatpush1.bf16.msra.mxu1 %v4805_v19 }
 0x196   : > { %4247 = vmatprep.mubr.msk.f32.mxu0 %vm339_vm0, %v6379_v15  ;;  %4277 = vmatprep.mubr.msk.f32.mxu1 %vm339_vm0, %v6379_v15 }
 0x197   : > { %4780 = vmatprep.subr.bf16.mxu0 %v5104_v39  ;;  %4807 = vmatprep.subr.bf16.mxu1 %v5104_v39 }
 0x198   : > { %2605 = vmatmul.mubr.f32.gmra.mrb[88].mxu0 %v6012_v5  ;;  %2799 = vmatmul.mubr.f32.gmra.mrb[88].mxu1 %v6012_v5 }
 0x199   : > { %4782 = vmatpush1.bf16.msra.mxu0 %v4781_v22  ;;  %4809 = vmatpush1.bf16.msra.mxu1 %v4808_v24  ;;  %v4377_v24 = vld [vmem:[%s7314_s1 + $0x880] sm:$0xff] }
 0x19a   : > { %4248 = vmatprep.mubr.msk.f32.mxu0 %vm339_vm0, %v6401_v23  ;;  %4278 = vmatprep.mubr.msk.f32.mxu1 %vm339_vm0, %v6401_v23  ;;  %v4853_v37 = vpack.c.bf16 %v4378_v25, %v4377_v24  ;;  %v4390_v24 = vld [vmem:[%s7314_s1 + $0x8e8] sm:$0xff] }
 0x19b   : > { %4783 = vmatprep.subr.bf16.mxu0 %v5104_v39  ;;  %4810 = vmatprep.subr.bf16.mxu1 %v5104_v39 }
 0x19c   : > { %2609 = vmatmul.mubr.f32.gmra.mrb[90].mxu0 %v6421_v30  ;;  %2803 = vmatmul.mubr.f32.gmra.mrb[90].mxu1 %v6421_v30 }
 0x19d   : > { %4785 = vmatpush1.bf16.msra.mxu0 %v4784_v26  ;;  %4812 = vmatpush1.bf16.msra.mxu1 %v4811_v33  ;;  %v688_v35 = vpop.f32.mrb[2].mxu0  ;;  %v861_v48 = vpop.f32.mrb[2].mxu1 }
 0x19e   : > { %4249 = vmatprep.mubr.msk.f32.mxu0 %vm339_vm0, %v6425_v32  ;;  %4279 = vmatprep.mubr.msk.f32.mxu1 %vm339_vm0, %v6425_v32  ;;  %v721_v50 = vadd.f32 %v719_v40, %v688_v35  ;;  %v900_v52 = vrot.slane %v861_v48, 1  ;;  %v690_v53 = vpop.f32.mrb[3].mxu0  ;;  %v863_v54 = vpop.f32.mrb[3].mxu1  ;;  %v4379_v40 = vld [vmem:[%s7314_s1 + $0x890] sm:$0xff] }
 0x19f   : > { %4786 = vmatprep.subr.bf16.mxu0 %v5104_v39  ;;  %4813 = vmatprep.subr.bf16.mxu1 %v5104_v39  ;;  %v4354_v53 = vld [vmem:[%s7314_s1 + $0x828] sm:$0xff]  ;;  %v4384_v54 = vld [vmem:[%s7314_s1 + $0x8b8] sm:$0xff] }
 0x1a0   : > { %2614 = vmatmul.mubr.f32.gmra.mrb[92].mxu0 %v6445_v41  ;;  %2808 = vmatmul.mubr.f32.gmra.mrb[92].mxu1 %v6445_v41  ;;  %723 = vst.msk [vmem:[%s5356_s26 + $0x8] sm:$0xff] %vm339_vm0, %v721_v50  ;;  %v901_v58 = vsel %vm898_vm8, %v899_v42, %v900_v52  ;;  %v4380_v42 = vld [vmem:[%s7314_s1 + $0x898] sm:$0xff]  ;;  %v4382_v50 = vld [vmem:[%s7314_s1 + $0x8a8] sm:$0xff] }
 0x1a1   : > { %4788 = vmatpush1.bf16.msra.mxu0 %v4787_v44  ;;  %4815 = vmatpush1.bf16.msra.mxu1 %v4814_v46  ;;  %v906_v57 = vadd.f32 %v901_v58, %v893_v51  ;;  %v4856_v45 = vpack.c.bf16 %v4380_v42, %v4379_v40  ;;  %v4859_v51 = vpack.c.bf16 %v4382_v50, %v4381_v12  ;;  %v6754_v58 = vld [vmem:[#allocation2] sm:$0xff] }
 0x1a2   : > { %4250 = vmatprep.mubr.msk.f32.mxu0 %vm339_vm0, %v6449_v36  ;;  %4280 = vmatprep.mubr.msk.f32.mxu1 %vm339_vm0, %v6449_v36 }
 0x1a3   : > { %4789 = vmatprep.subr.bf16.mxu0 %v5104_v39  ;;  %4816 = vmatprep.subr.bf16.mxu1 %v5104_v39  ;;  %908 = vst.msk [vmem:[%s5356_s26] sm:$0xff] %vm339_vm0, %v906_v57  ;;  %v4355_v57 = vld [vmem:[%s7314_s1 + $0x830] sm:$0xff] }
 0x1a4   : > { %2619 = vmatmul.mubr.f32.gmra.mrb[94].mxu0 %v6012_v5  ;;  %2813 = vmatmul.mubr.f32.gmra.mrb[94].mxu1 %v6012_v5 }
 0x1a5   : > { %4791 = vmatpush1.bf16.msra.mxu0 %v4790_v55  ;;  %4818 = vmatpush1.bf16.msra.mxu1 %v4817_v62 }
 0x1a6   : > { %4792 = vmatprep.subr.bf16.mxu0 %v5104_v39  ;;  %4819 = vmatprep.subr.bf16.mxu1 %v5104_v39 }
 0x1a7   : > { %v693_v9 = vpop.f32.mrb[4].mxu0  ;;  %v866_v11 = vpop.f32.mrb[4].mxu1  ;;  %4303 = vmatprep.mubr.msk.f32.mxu0 %vm339_vm0, %v6097_v43  ;;  %4333 = vmatprep.mubr.msk.f32.mxu1 %vm339_vm0, %v6097_v43  ;;  %v894_v13 = vld [vmem:[%s5356_s26 + $0x8] sm:$0xff]  ;;  %v4348_v43 = vld [vmem:[%s7314_s1 + $0x7f8] sm:$0xff] }
 0x1a8   : > { %v902_v20 = vrot.slane %v866_v11, 1  ;;  %v694_v19 = vpop.f32.mrb[5].mxu0  ;;  %v868_v16 = vpop.f32.mrb[5].mxu1  ;;  %v4826_v34 = vpack.c.bf16 %v4348_v43, %v4347_v21  ;;  %v4838_v11 = vpack.c.bf16 %v4356_v1, %v4355_v57  ;;  %v4360_v43 = vld [vmem:[%s7314_s1 + $0x858] sm:$0xff] }
 0x1a9   : > { %4794 = vmatpush1.bf16.msra.mxu0 %v4793_v2  ;;  %4821 = vmatpush1.bf16.msra.mxu1 %v4820_v3  ;;  %v4385_v2 = vld [vmem:[%s7314_s1 + $0x8c0] sm:$0xff]  ;;  %v4386_v3 = vld [vmem:[%s7314_s1 + $0x8c8] sm:$0xff] }
 0x1aa   : > { %v903_v22 = vsel %vm898_vm8, %v900_v52, %v902_v20  ;;  %4822 = vmatprep.subr.bf16.mxu0 %v5104_v39  ;;  %4849 = vmatprep.subr.bf16.mxu1 %v5104_v39  ;;  %v4353_v52 = vld [vmem:[%s7314_s1 + $0x820] sm:$0xff]  ;;  %v4358_v16 = vld [vmem:[%s7314_s1 + $0x848] sm:$0xff] }
 0x1ab   : > { %v907_v27 = vadd.f32 %v903_v22, %v894_v13  ;;  %v697_v28 = vpop.f32.mrb[6].mxu0  ;;  %v871_v29 = vpop.f32.mrb[6].mxu1  ;;  %v4835_v62 = vpack.c.bf16 %v4354_v53, %v4353_v52  ;;  %v4865_v13 = vpack.c.bf16 %v4386_v3, %v4385_v2  ;;  %v4357_v20 = vld [vmem:[%s7314_s1 + $0x840] sm:$0xff]  ;;  %v4359_v22 = vld [vmem:[%s7314_s1 + $0x850] sm:$0xff]  ;;  %v4408_v53 = vld [vmem:[%s7314_s1 + $0x918] sm:$0xff] }
 0x1ac   : > { %2974 = vmatmul.mubr.f32.vlgmr.msra.gmra.mrb[96].mxu0 %v6012_v5  ;;  %3168 = vmatmul.mubr.f32.vlgmr.msra.gmra.mrb[96].mxu1 %v6012_v5  ;;  %v698_v26 = vpop.f32.mrb[7].mxu0  ;;  %v872_v33 = vpop.f32.mrb[7].mxu1  ;;  %v4350_v5 = vld [vmem:[%s7314_s1 + $0x808] sm:$0xff]  ;;  %v4407_v52 = vld [vmem:[%s7314_s1 + $0x910] sm:$0xff]  ;;  %v1088_v1 = vld [vmem:[%s5356_s26] sm:$0xff] }
 0x1ad   : > { %909 = vst.msk [vmem:[%s5356_s26 + $0x8] sm:$0xff] %vm339_vm0, %v907_v27  ;;  %4824 = vmatpush1.bf16.msra.mxu0 %v4823_v17  ;;  %4851 = vmatpush1.bf16.msra.mxu1 %v4850_v18  ;;  %v4829_v48 = vpack.c.bf16 %v4350_v5, %v4349_v38  ;;  %v4387_v17 = vld [vmem:[%s7314_s1 + $0x8d0] sm:$0xff]  ;;  %v4388_v18 = vld [vmem:[%s7314_s1 + $0x8d8] sm:$0xff]  ;;  %v4844_v33 = vpack.c.bf16 %v4360_v43, %v4359_v22 }
 0x1ae   : > { %4304 = vmatprep.mubr.msk.f32.mxu0 %vm339_vm0, %v6135_v59  ;;  %4334 = vmatprep.mubr.msk.f32.mxu1 %vm339_vm0, %v6135_v59  ;;  %v4868_v21 = vpack.c.bf16 %v4388_v18, %v4387_v17  ;;  %v4391_v38 = vld [vmem:[%s7314_s1 + $0x8f0] sm:$0xff]  ;;  %v4392_v5 = vld [vmem:[%s7314_s1 + $0x8f8] sm:$0xff] }
 0x1af   : > { %4825 = vmatprep.subr.bf16.mxu0 %v5104_v39  ;;  %4852 = vmatprep.subr.bf16.mxu1 %v5104_v39  ;;  %v701_v44 = vpop.f32.mrb[8].mxu0  ;;  %v875_v46 = vpop.f32.mrb[8].mxu1  ;;  %v4411_v22 = vld [vmem:[%s7314_s1 + $0x930] sm:$0xff]  ;;  %v4412_v43 = vld [vmem:[%s7314_s1 + $0x938] sm:$0xff] }
 0x1b0   : > { %2978 = vmatmul.mubr.f32.gmra.mrb[98].mxu0 %v6329_v61  ;;  %3172 = vmatmul.mubr.f32.gmra.mrb[98].mxu1 %v6329_v61  ;;  %v727_v59 = vadd.f32 %v3951_v31, %v701_v44  ;;  %v703_v47 = vpop.f32.mrb[9].mxu0  ;;  %v877_v35 = vpop.f32.mrb[9].mxu1  ;;  %v4352_v61 = vld [vmem:[%s7314_s1 + $0x818] sm:$0xff]  ;;  %v915_v55 = vrot.slane %v875_v46, 1 }
 0x1b1   : > { %4827 = vmatpush1.bf16.msra.mxu0 %v4826_v34  ;;  %4854 = vmatpush1.bf16.msra.mxu1 %v4853_v37  ;;  %v4361_v37 = vld [vmem:[%s7314_s1 + $0x860] sm:$0xff]  ;;  %v4874_v35 = vpack.c.bf16 %v4392_v5, %v4391_v38 }
 0x1b2   : > { %4305 = vmatprep.mubr.msk.f32.mxu0 %vm339_vm0, %v6333_v63  ;;  %4335 = vmatprep.mubr.msk.f32.mxu1 %vm339_vm0, %v6333_v63  ;;  %3953 = vst.msk [vmem:[%s5356_s26 + $0x10] sm:$0xff] %vm339_vm0, %v727_v59  ;;  %v4832_v63 = vpack.c.bf16 %v4352_v61, %v4351_v49  ;;  %v6847_v59 = vld [vmem:[#allocation2 + $0x8] sm:$0xff] }
 0x1b3   : > { %4828 = vmatprep.subr.bf16.mxu0 %v5104_v39  ;;  %4855 = vmatprep.subr.bf16.mxu1 %v5104_v39 }
 0x1b4   : > { %2983 = vmatmul.mubr.f32.gmra.mrb[100].mxu0 %v6353_v7  ;;  %3177 = vmatmul.mubr.f32.gmra.mrb[100].mxu1 %v6353_v7  ;;  %v4383_v7 = vld [vmem:[%s7314_s1 + $0x8b0] sm:$0xff]  ;;  %v1089_v18 = vld [vmem:[%s5356_s26 + $0x8] sm:$0xff] }
 0x1b5   : > { %4830 = vmatpush1.bf16.msra.mxu0 %v4829_v48  ;;  %4857 = vmatpush1.bf16.msra.mxu1 %v4856_v45  ;;  %v4862_v56 = vpack.c.bf16 %v4384_v54, %v4383_v7  ;;  %v4405_v48 = vld [vmem:[%s7314_s1 + $0x900] sm:$0xff]  ;;  %v4406_v45 = vld [vmem:[%s7314_s1 + $0x908] sm:$0xff] }
 0x1b6   : > { %4306 = vmatprep.mubr.msk.f32.mxu0 %vm339_vm0, %v6357_v14  ;;  %4336 = vmatprep.mubr.msk.f32.mxu1 %vm339_vm0, %v6357_v14  ;;  %v3952_v14 = vld [vmem:[%s5356_s26 + $0x18] sm:$0xff] }
 0x1b7   : > { %4831 = vmatprep.subr.bf16.mxu0 %v5104_v39  ;;  %4858 = vmatprep.subr.bf16.mxu1 %v5104_v39 }
 0x1b8   : > { %2988 = vmatmul.mubr.f32.gmra.mrb[102].mxu0 %v6754_v58  ;;  %3182 = vmatmul.mubr.f32.gmra.mrb[102].mxu1 %v6754_v58 }
 0x1b9   : > { %4833 = vmatpush1.bf16.msra.mxu0 %v4832_v63  ;;  %4860 = vmatpush1.bf16.msra.mxu1 %v4859_v51  ;;  %v706_v60 = vpop.f32.mrb[10].mxu0  ;;  %v880_v0 = vpop.f32.mrb[10].mxu1  ;;  %v3981_v6 = vld [vmem:[%s5356_s26 + $0x10] sm:$0xff]  ;;  %v4877_v63 = vpack.c.bf16 %v4406_v45, %v4405_v48 }
 0x1ba   : > { %4307 = vmatprep.mubr.msk.f32.mxu0 %vm339_vm0, %v6379_v15  ;;  %4337 = vmatprep.mubr.msk.f32.mxu1 %vm339_vm0, %v6379_v15  ;;  %v728_v4 = vadd.f32 %v3952_v14, %v706_v60  ;;  %v916_v8 = vrot.slane %v880_v0, 1  ;;  %v708_v10 = vpop.f32.mrb[11].mxu0  ;;  %v882_v9 = vpop.f32.mrb[11].mxu1  ;;  %v6871_v14 = vld [vmem:[#allocation2 + $0x18] sm:$0xff]  ;;  %v4880_v0 = vpack.c.bf16 %v4408_v53, %v4407_v52 }
 0x1bb   : > { %4834 = vmatprep.subr.bf16.mxu0 %v5104_v39  ;;  %4861 = vmatprep.subr.bf16.mxu1 %v5104_v39 }
 0x1bc   : > { %2993 = vmatmul.mubr.f32.gmra.mrb[104].mxu0 %v6754_v58  ;;  %3187 = vmatmul.mubr.f32.gmra.mrb[104].mxu1 %v6754_v58  ;;  %3954 = vst.msk [vmem:[%s5356_s26 + $0x18] sm:$0xff] %vm339_vm0, %v728_v4  ;;  %v917_v15 = vsel %vm898_vm8, %v915_v55, %v916_v8  ;;  %v4409_v4 = vld [vmem:[%s7314_s1 + $0x920] sm:$0xff] }
 0x1bd   : > { %4836 = vmatpush1.bf16.msra.mxu0 %v4835_v62  ;;  %4863 = vmatpush1.bf16.msra.mxu1 %v4862_v56  ;;  %v922_v19 = vadd.f32 %v3981_v6, %v917_v15  ;;  %v4410_v6 = vld [vmem:[%s7314_s1 + $0x928] sm:$0xff]  ;;  %v6888_v15 = vld [vmem:[#allocation2 + $0x10] sm:$0xff] }
 0x1be   : > { %4308 = vmatprep.mubr.msk.f32.mxu0 %vm339_vm0, %v6401_v23  ;;  %4338 = vmatprep.mubr.msk.f32.mxu1 %vm339_vm0, %v6401_v23  ;;  %v4841_v23 = vpack.c.bf16 %v4358_v16, %v4357_v20  ;;  %v4883_v17 = vpack.c.bf16 %v4410_v6, %v4409_v4 }
 0x1bf   : > { %4837 = vmatprep.subr.bf16.mxu0 %v5104_v39  ;;  %4864 = vmatprep.subr.bf16.mxu1 %v5104_v39  ;;  %3983 = vst.msk [vmem:[%s5356_s26 + $0x10] sm:$0xff] %vm339_vm0, %v922_v19 }
 0x1c0   : > { %2997 = vmatmul.mubr.f32.gmra.mrb[106].mxu0 %v6421_v30  ;;  %3191 = vmatmul.mubr.f32.gmra.mrb[106].mxu1 %v6421_v30  ;;  %v4389_v30 = vld [vmem:[%s7314_s1 + $0x8e0] sm:$0xff] }
 0x1c1   : > { %4839 = vmatpush1.bf16.msra.mxu0 %v4838_v11  ;;  %4866 = vmatpush1.bf16.msra.mxu1 %v4865_v13  ;;  %v4871_v34 = vpack.c.bf16 %v4390_v24, %v4389_v30  ;;  %v6892_v11 = vld [vmem:[#allocation2 + $0x28] sm:$0xff]  ;;  %v6911_v24 = vld [vmem:[#allocation2 + $0x20] sm:$0xff] }
 0x1c2   : > { %4309 = vmatprep.mubr.msk.f32.mxu0 %vm339_vm0, %v6425_v32  ;;  %4339 = vmatprep.mubr.msk.f32.mxu1 %vm339_vm0, %v6425_v32 }
 0x1c3   : > { %v711_v25 = vpop.f32.mrb[12].mxu0  ;;  %v885_v27 = vpop.f32.mrb[12].mxu1  ;;  %4840 = vmatprep.subr.bf16.mxu0 %v5104_v39  ;;  %4867 = vmatprep.subr.bf16.mxu1 %v5104_v39  ;;  %v3982_v28 = vld [vmem:[%s5356_s26 + $0x18] sm:$0xff] }
 0x1c4   : > { %v918_v32 = vrot.slane %v885_v27, 1  ;;  %3002 = vmatmul.mubr.f32.gmra.mrb[108].mxu0 %v6445_v41  ;;  %3196 = vmatmul.mubr.f32.gmra.mrb[108].mxu1 %v6445_v41  ;;  %v712_v29 = vpop.f32.mrb[13].mxu0  ;;  %v887_v26 = vpop.f32.mrb[13].mxu1  ;;  %v4362_v41 = vld [vmem:[%s7314_s1 + $0x868] sm:$0xff]  ;;  %v6915_v27 = vld [vmem:[#allocation2 + $0x38] sm:$0xff] }
 0x1c5   : > { %4842 = vmatpush1.bf16.msra.mxu0 %v4841_v23  ;;  %4869 = vmatpush1.bf16.msra.mxu1 %v4868_v21  ;;  %v4847_v47 = vpack.c.bf16 %v4362_v41, %v4361_v37  ;;  %v4886_v26 = vpack.c.bf16 %v4412_v43, %v4411_v22  ;;  %v6933_v41 = vld [vmem:[#allocation2 + $0x48] sm:$0xff] }
 0x1c6   : > { %v919_v31 = vsel %vm898_vm8, %v916_v8, %v918_v32  ;;  %4310 = vmatprep.mubr.msk.f32.mxu0 %vm339_vm0, %v6449_v36  ;;  %4340 = vmatprep.mubr.msk.f32.mxu1 %vm339_vm0, %v6449_v36 }
 0x1c7   : > { %v923_v40 = vadd.f32 %v3982_v28, %v919_v31  ;;  %v715_v42 = vpop.f32.mrb[14].mxu0  ;;  %4843 = vmatprep.subr.bf16.mxu0 %v5104_v39  ;;  %4870 = vmatprep.subr.bf16.mxu1 %v5104_v39  ;;  %v890_v44 = vpop.f32.mrb[14].mxu1 }
 0x1c8   : > { %3007 = vmatmul.mubr.f32.gmra.mrb[110].mxu0 %v6754_v58  ;;  %3201 = vmatmul.mubr.f32.gmra.mrb[110].mxu1 %v6754_v58  ;;  %v716_v36 = vpop.f32.mrb[15].mxu0  ;;  %v891_v46 = vpop.f32.mrb[15].mxu1 }
 0x1c9   : > { %3984 = vst.msk [vmem:[%s5356_s26 + $0x18] sm:$0xff] %vm339_vm0, %v923_v40  ;;  %4845 = vmatpush1.bf16.msra.mxu0 %v4844_v33  ;;  %4872 = vmatpush1.bf16.msra.mxu1 %v4871_v34  ;;  %v4413_v33 = vld [vmem:[%s7314_s1 + $0x940] sm:$0xff]  ;;  %v4414_v34 = vld [vmem:[%s7314_s1 + $0x948] sm:$0xff] }
 0x1ca   : > { %4846 = vmatprep.subr.bf16.mxu0 %v5104_v39  ;;  %4873 = vmatprep.subr.bf16.mxu1 %v5104_v39  ;;  %v4889_v44 = vpack.c.bf16 %v4414_v34, %v4413_v33 }
 0x1cb   : > { %v1051_v49 = vpop.f32.mrb[16].mxu0  ;;  %v1246_v61 = vpop.f32.mrb[16].mxu1  ;;  %4363 = vmatprep.mubr.msk.f32.mxu0 %vm339_vm0, %v6847_v59  ;;  %4393 = vmatprep.mubr.msk.f32.mxu1 %vm339_vm0, %v6847_v59 }
 0x1cc   : > { %v1053_v12 = vpop.f32.mrb[17].mxu0  ;;  %v1248_v50 = vpop.f32.mrb[17].mxu1  ;;  %v1289_v51 = vrot.slane %v1246_v61, 3  ;;  %v1094_v55 = vrot.slane %v1051_v49, 2  ;;  %v6952_v49 = vld [vmem:[#allocation2 + $0x58] sm:$0xff] }
 0x1cd   : > { %4848 = vmatpush1.bf16.msra.mxu0 %v4847_v47  ;;  %4875 = vmatpush1.bf16.msra.mxu1 %v4874_v35  ;;  %v4415_v47 = vld [vmem:[%s7314_s1 + $0x950] sm:$0xff]  ;;  %v4416_v35 = vld [vmem:[%s7314_s1 + $0x958] sm:$0xff] }
 0x1ce   : > { %4876 = vmatprep.subr.bf16.mxu0 %v5104_v39  ;;  %4903 = vmatprep.subr.bf16.mxu1 %v5104_v39  ;;  %v4892_v53 = vpack.c.bf16 %v4416_v35, %v4415_v47 }
 0x1cf   : > { %v1056_v7 = vpop.f32.mrb[18].mxu0  ;;  %v1251_v54 = vpop.f32.mrb[18].mxu1 }
 0x1d0   : > { %v1095_v62 = vrot.slane %v1056_v7, 2  ;;  %v1290_v56 = vrot.slane %v1251_v54, 3  ;;  %3362 = vmatmul.mubr.f32.vlgmr.msra.gmra.mrb[112].mxu0 %v6754_v58  ;;  %3556 = vmatmul.mubr.f32.vlgmr.msra.gmra.mrb[112].mxu1 %v6754_v58  ;;  %v1058_v57 = vpop.f32.mrb[19].mxu0  ;;  %v1253_v60 = vpop.f32.mrb[19].mxu1  ;;  %v4011_v7 = vld [vmem:[%s5356_s26 + $0x10] sm:$0xff] }
 0x1d1   : > { %4878 = vmatpush1.bf16.msra.mxu0 %v4877_v63  ;;  %4912 = vmatpush1.bf16.msra.mxu1 %v4877_v63 }
 0x1d2   : > { %v1096_v2 = vsel %vm1093_vm9, %v1094_v55, %v1095_v62  ;;  %v1291_v3 = vsel %vm1288_vm10, %v1289_v51, %v1290_v56  ;;  %4364 = vmatprep.mubr.msk.f32.mxu0 %vm339_vm0, %v6871_v14  ;;  %4394 = vmatprep.mubr.msk.f32.mxu1 %vm339_vm0, %v6871_v14 }
 0x1d3   : > { %v1101_v8 = vadd.f32 %v1096_v2, %v1088_v1  ;;  %v1061_v10 = vpop.f32.mrb[20].mxu0  ;;  %v1256_v9 = vpop.f32.mrb[20].mxu1  ;;  %4879 = vmatprep.subr.bf16.mxu0 %v5104_v39  ;;  %4904 = vmatprep.subr.bf16.mxu1 %v5104_v39  ;;  %v6972_v1 = vld [vmem:[#allocation2 + $0x50] sm:$0xff]  ;;  %v6976_v2 = vld [vmem:[#allocation2 + $0x68] sm:$0xff] }
 0x1d4   : > { %v1097_v13 = vrot.slane %v1061_v10, 2  ;;  %v1292_v20 = vrot.slane %v1256_v9, 3  ;;  %3366 = vmatmul.mubr.f32.gmra.mrb[114].mxu0 %v6888_v15  ;;  %3560 = vmatmul.mubr.f32.gmra.mrb[114].mxu1 %v6888_v15  ;;  %v1063_v19 = vpop.f32.mrb[21].mxu0  ;;  %v1258_v16 = vpop.f32.mrb[21].mxu1  ;;  %v4012_v9 = vld [vmem:[%s5356_s26 + $0x18] sm:$0xff] }
 0x1d5   : > { %1103 = vst.msk [vmem:[%s5356_s26] sm:$0xff] %vm339_vm0, %v1101_v8  ;;  %4881 = vmatpush1.bf16.msra.mxu0 %v4880_v0  ;;  %4913 = vmatpush1.bf16.msra.mxu1 %v4880_v0  ;;  %v4419_v19 = vld [vmem:[%s7314_s1 + $0x970] sm:$0xff]  ;;  %v4420_v16 = vld [vmem:[%s7314_s1 + $0x978] sm:$0xff] }
 0x1d6   : > { %v1098_v23 = vsel %vm1093_vm9, %v1095_v62, %v1097_v13  ;;  %v1293_v21 = vsel %vm1288_vm10, %v1290_v56, %v1292_v20  ;;  %4365 = vmatprep.mubr.msk.f32.mxu0 %vm339_vm0, %v6892_v11  ;;  %4395 = vmatprep.mubr.msk.f32.mxu1 %vm339_vm0, %v6892_v11  ;;  %v4417_v62 = vld [vmem:[%s7314_s1 + $0x960] sm:$0xff]  ;;  %v4418_v56 = vld [vmem:[%s7314_s1 + $0x968] sm:$0xff] }
 0x1d7   : > { %v1102_v30 = vadd.f32 %v1098_v23, %v1089_v18  ;;  %4882 = vmatprep.subr.bf16.mxu0 %v5104_v39  ;;  %4905 = vmatprep.subr.bf16.mxu1 %v5104_v39  ;;  %v1066_v25 = vpop.f32.mrb[22].mxu0  ;;  %v1261_v28 = vpop.f32.mrb[22].mxu1  ;;  %v4895_v10 = vpack.c.bf16 %v4418_v56, %v4417_v62  ;;  %v6995_v18 = vld [vmem:[#allocation2 + $0x60] sm:$0xff] }
 0x1d8   : > { %3371 = vmatmul.mubr.f32.gmra.mrb[116].mxu0 %v6911_v24  ;;  %3565 = vmatmul.mubr.f32.gmra.mrb[116].mxu1 %v6911_v24  ;;  %v1067_v32 = vpop.f32.mrb[23].mxu0  ;;  %v1262_v29 = vpop.f32.mrb[23].mxu1  ;;  %v4898_v25 = vpack.c.bf16 %v4420_v16, %v4419_v19  ;;  %v4421_v28 = vld [vmem:[%s7314_s1 + $0x980] sm:$0xff] }
 0x1d9   : > { %1104 = vst.msk [vmem:[%s5356_s26 + $0x8] sm:$0xff] %vm339_vm0, %v1102_v30  ;;  %4884 = vmatpush1.bf16.msra.mxu0 %v4883_v17  ;;  %4914 = vmatpush1.bf16.msra.mxu1 %v4883_v17  ;;  %v4422_v32 = vld [vmem:[%s7314_s1 + $0x988] sm:$0xff] }
 0x1da   : > { %4366 = vmatprep.mubr.msk.f32.mxu0 %vm339_vm0, %v6915_v27  ;;  %4396 = vmatprep.mubr.msk.f32.mxu1 %vm339_vm0, %v6915_v27  ;;  %v4901_v33 = vpack.c.bf16 %v4422_v32, %v4421_v28 }
 0x1db   : > { %4885 = vmatprep.subr.bf16.mxu0 %v5104_v39  ;;  %4906 = vmatprep.subr.bf16.mxu1 %v5104_v39  ;;  %v1070_v37 = vpop.f32.mrb[24].mxu0  ;;  %v1265_v31 = vpop.f32.mrb[24].mxu1 }
 0x1dc   : > { %v1283_v38 = vld [vmem:[%s5356_s26] sm:$0xff]  ;;  %3376 = vmatmul.mubr.f32.gmra.mrb[118].mxu0 %v6754_v58  ;;  %3570 = vmatmul.mubr.f32.gmra.mrb[118].mxu1 %v6754_v58  ;;  %v1072_v5 = vpop.f32.mrb[25].mxu0  ;;  %v1267_v40 = vpop.f32.mrb[25].mxu1  ;;  %v1110_v36 = vrot.slane %v1070_v37, 2  ;;  %v1305_v46 = vrot.slane %v1265_v31, 3 }
 0x1dd   : > { %v1296_v42 = vadd.f32 %v1291_v3, %v1283_v38  ;;  %4887 = vmatpush1.bf16.msra.mxu0 %v4886_v26  ;;  %4915 = vmatpush1.bf16.msra.mxu1 %v4886_v26 }
 0x1de   : > { %4367 = vmatprep.mubr.msk.f32.mxu0 %vm339_vm0, %v6933_v41  ;;  %4397 = vmatprep.mubr.msk.f32.mxu1 %vm339_vm0, %v6933_v41 }
 0x1df   : > { %1298 = vst.msk [vmem:[%s5356_s26] sm:$0xff] %vm339_vm0, %v1296_v42  ;;  %v1075_v48 = vpop.f32.mrb[26].mxu0  ;;  %v1270_v45 = vpop.f32.mrb[26].mxu1  ;;  %4888 = vmatprep.subr.bf16.mxu0 %v5104_v39  ;;  %4907 = vmatprep.subr.bf16.mxu1 %v5104_v39 }
 0x1e0   : > { %v1284_v61 = vld [vmem:[%s5356_s26 + $0x8] sm:$0xff]  ;;  %v1111_v12 = vrot.slane %v1075_v48, 2  ;;  %v1306_v50 = vrot.slane %v1270_v45, 3  ;;  %3381 = vmatmul.mubr.f32.gmra.mrb[120].mxu0 %v6754_v58  ;;  %3575 = vmatmul.mubr.f32.gmra.mrb[120].mxu1 %v6754_v58  ;;  %v1077_v63 = vpop.f32.mrb[27].mxu0  ;;  %v1272_v51 = vpop.f32.mrb[27].mxu1 }
 0x1e1   : > { %v1297_v52 = vadd.f32 %v1293_v21, %v1284_v61  ;;  %4890 = vmatpush1.bf16.msra.mxu0 %v4889_v44  ;;  %4916 = vmatpush1.bf16.msra.mxu1 %v4889_v44  ;;  %v6999_v21 = vld [vmem:[#allocation2 + $0x78] sm:$0xff] }
 0x1e2   : > { %v1112_v54 = vsel %vm1093_vm9, %v1110_v36, %v1111_v12  ;;  %v1307_v55 = vsel %vm1288_vm10, %v1305_v46, %v1306_v50  ;;  %4368 = vmatprep.mubr.msk.f32.mxu0 %vm339_vm0, %v6952_v49  ;;  %4398 = vmatprep.mubr.msk.f32.mxu1 %vm339_vm0, %v6952_v49 }
 0x1e3   : > { %1299 = vst.msk [vmem:[%s5356_s26 + $0x8] sm:$0xff] %vm339_vm0, %v1297_v52  ;;  %v1117_v57 = vadd.f32 %v4011_v7, %v1112_v54  ;;  %v1080_v60 = vpop.f32.mrb[28].mxu0  ;;  %v1275_v0 = vpop.f32.mrb[28].mxu1  ;;  %4891 = vmatprep.subr.bf16.mxu0 %v5104_v39  ;;  %4908 = vmatprep.subr.bf16.mxu1 %v5104_v39 }
 0x1e4   : > { %v1113_v3 = vrot.slane %v1080_v60, 2  ;;  %v1308_v4 = vrot.slane %v1275_v0, 3  ;;  %3385 = vmatmul.mubr.f32.gmra.mrb[122].mxu0 %v6972_v1  ;;  %3579 = vmatmul.mubr.f32.gmra.mrb[122].mxu1 %v6972_v1  ;;  %v1082_v6 = vpop.f32.mrb[29].mxu0  ;;  %v1277_v8 = vpop.f32.mrb[29].mxu1 }
 0x1e5   : > { %4013 = vst.msk [vmem:[%s5356_s26 + $0x10] sm:$0xff] %vm339_vm0, %v1117_v57  ;;  %4893 = vmatpush1.bf16.msra.mxu0 %v4892_v53  ;;  %4917 = vmatpush1.bf16.msra.mxu1 %v4892_v53 }
 0x1e6   : > { %v1114_v13 = vsel %vm1093_vm9, %v1111_v12, %v1113_v3  ;;  %v1309_v20 = vsel %vm1288_vm10, %v1306_v50, %v1308_v4  ;;  %4369 = vmatprep.mubr.msk.f32.mxu0 %vm339_vm0, %v6976_v2  ;;  %4399 = vmatprep.mubr.msk.f32.mxu1 %vm339_vm0, %v6976_v2 }
 0x1e7   : > { %v1118_v17 = vadd.f32 %v4012_v9, %v1114_v13  ;;  %4894 = vmatprep.subr.bf16.mxu0 %v5104_v39  ;;  %4909 = vmatprep.subr.bf16.mxu1 %v5104_v39  ;;  %v1085_v23 = vpop.f32.mrb[30].mxu0  ;;  %v1280_v22 = vpop.f32.mrb[30].mxu1 }
 0x1e8   : > { %3390 = vmatmul.mubr.f32.gmra.mrb[124].mxu0 %v6995_v18  ;;  %3584 = vmatmul.mubr.f32.gmra.mrb[124].mxu1 %v6995_v18  ;;  %v1086_v43 = vpop.f32.mrb[31].mxu0  ;;  %v1281_v30 = vpop.f32.mrb[31].mxu1 }
 0x1e9   : > { %4014 = vst.msk [vmem:[%s5356_s26 + $0x18] sm:$0xff] %vm339_vm0, %v1118_v17  ;;  %4896 = vmatpush1.bf16.msra.mxu0 %v4895_v10  ;;  %4918 = vmatpush1.bf16.msra.mxu1 %v4895_v10 }
 0x1ea   : > { %4370 = vmatprep.mubr.msk.f32.mxu0 %vm339_vm0, %v6999_v21  ;;  %4400 = vmatprep.mubr.msk.f32.mxu1 %vm339_vm0, %v6999_v21 }
 0x1eb   : > { %4897 = vmatprep.subr.bf16.mxu0 %v5104_v39  ;;  %4910 = vmatprep.subr.bf16.mxu1 %v5104_v39 }
 0x1ec   : > { %v4041_v29 = vld [vmem:[%s5356_s26 + $0x10] sm:$0xff]  ;;  %3395 = vmatmul.mubr.f32.gmra.mrb[126].mxu0 %v6754_v58  ;;  %3589 = vmatmul.mubr.f32.gmra.mrb[126].mxu1 %v6754_v58 }
 0x1ed   : > { %v1312_v26 = vadd.f32 %v4041_v29, %v1307_v55  ;;  %4899 = vmatpush1.bf16.msra.mxu0 %v4898_v25  ;;  %4919 = vmatpush1.bf16.msra.mxu1 %v4898_v25 }
 0x1ee   : > { %4900 = vmatprep.subr.bf16.mxu0 %v5104_v39  ;;  %4911 = vmatprep.subr.bf16.mxu1 %v5104_v39 }
 0x1ef   : > { %4043 = vst.msk [vmem:[%s5356_s26 + $0x10] sm:$0xff] %vm339_vm0, %v1312_v26  ;;  %v1441_v34 = vpop.f32.mrb[32].mxu0  ;;  %v1636_v37 = vpop.f32.mrb[32].mxu1  ;;  %4423 = vmatprep.mubr.msk.f32.mxu0 %vm339_vm0, %v6847_v59  ;;  %4427 = vmatprep.mubr.msk.f32.mxu1 %vm339_vm0, %v6933_v41  ;;  %v1478_v41 = vld [vmem:[%s5356_s26] sm:$0xff] }
 0x1f0   : > { %v4042_v31 = vld [vmem:[%s5356_s26 + $0x18] sm:$0xff]  ;;  %v1443_v38 = vpop.f32.mrb[33].mxu0  ;;  %v1638_v5 = vpop.f32.mrb[33].mxu1  ;;  %v1679_v42 = vrot.slane %v1636_v37, 5  ;;  %v1484_v36 = vrot.slane %v1441_v34, 4 }
 0x1f1   : > { %v1313_v40 = vadd.f32 %v4042_v31, %v1309_v20  ;;  %4902 = vmatpush1.bf16.msra.mxu0 %v4901_v33  ;;  %4920 = vmatpush1.bf16.msra.mxu1 %v4901_v33 }
 0x1f3   : > { %4044 = vst.msk [vmem:[%s5356_s26 + $0x18] sm:$0xff] %vm339_vm0, %v1313_v40  ;;  %v1446_v39 = vpop.f32.mrb[34].mxu0  ;;  %v1641_v44 = vpop.f32.mrb[34].mxu1 }
 0x1f4   : > { %v1485_v46 = vrot.slane %v1446_v39, 4  ;;  %v1680_v59 = vrot.slane %v1641_v44, 5  ;;  %v1448_v47 = vpop.f32.mrb[35].mxu0  ;;  %v1643_v35 = vpop.f32.mrb[35].mxu1  ;;  %3750 = vmatmul.mubr.f32.vlgmr.msra.gmra.mrb[128].mxu0 %v6754_v58  ;;  %3768 = vmatmul.mubr.f32.vlgmr.msra.gmra.mrb[128].mxu1 %v6754_v58 }
 0x1f5   : > { %4424 = vmatprep.mubr.msk.f32.mxu0 %vm339_vm0, %v6871_v14  ;;  %4428 = vmatprep.mubr.msk.f32.mxu1 %vm339_vm0, %v6952_v49  ;;  %v1479_v14 = vld [vmem:[%s5356_s26 + $0x8] sm:$0xff] }
 0x1f6   : > { %v1486_v48 = vsel %vm1483_vm11, %v1484_v36, %v1485_v46  ;;  %v1681_v45 = vsel %vm1678_vm12, %v1679_v42, %v1680_v59  ;;  %v4071_v19 = vld [vmem:[%s5356_s26 + $0x10] sm:$0xff] }
 0x1f7   : > { %v1491_v61 = vadd.f32 %v1486_v48, %v1478_v41  ;;  %v1451_v12 = vpop.f32.mrb[36].mxu0  ;;  %v1646_v50 = vpop.f32.mrb[36].mxu1 }
 0x1f8   : > { %v1487_v63 = vrot.slane %v1451_v12, 4  ;;  %v1682_v51 = vrot.slane %v1646_v50, 5  ;;  %v1453_v52 = vpop.f32.mrb[37].mxu0  ;;  %v1648_v53 = vpop.f32.mrb[37].mxu1  ;;  %3754 = vmatmul.mubr.f32.gmra.mrb[130].mxu0 %v6888_v15  ;;  %3772 = vmatmul.mubr.f32.gmra.mrb[130].mxu1 %v6972_v1 }
 0x1f9   : > { %1493 = vst.msk [vmem:[%s5356_s26] sm:$0xff] %vm339_vm0, %v1491_v61  ;;  %4425 = vmatprep.mubr.msk.f32.mxu0 %vm339_vm0, %v6892_v11  ;;  %4429 = vmatprep.mubr.msk.f32.mxu1 %vm339_vm0, %v6976_v2 }
 0x1fa   : > { %v1488_v49 = vsel %vm1483_vm11, %v1485_v46, %v1487_v63  ;;  %v1683_v7 = vsel %vm1678_vm12, %v1680_v59, %v1682_v51  ;;  %v4072_v25 = vld [vmem:[%s5356_s26 + $0x18] sm:$0xff] }
 0x1fb   : > { %v1492_v54 = vadd.f32 %v1488_v49, %v1479_v14  ;;  %v1456_v55 = vpop.f32.mrb[38].mxu0  ;;  %v1651_v62 = vpop.f32.mrb[38].mxu1 }
 0x1fc   : > { %3758 = vmatmul.mubr.f32.gmra.mrb[132].mxu0 %v6911_v24  ;;  %3776 = vmatmul.mubr.f32.gmra.mrb[132].mxu1 %v6995_v18  ;;  %v1457_v15 = vpop.f32.mrb[39].mxu0  ;;  %v1652_v56 = vpop.f32.mrb[39].mxu1 }
 0x1fd   : > { %1494 = vst.msk [vmem:[%s5356_s26 + $0x8] sm:$0xff] %vm339_vm0, %v1492_v54  ;;  %4426 = vmatprep.mubr.msk.f32.mxu0 %vm339_vm0, %v6915_v27  ;;  %4430 = vmatprep.mubr.msk.f32.mxu1 %vm339_vm0, %v6999_v21 }
 0x1ff   : > { %v1460_v11 = vpop.f32.mrb[40].mxu0  ;;  %v1655_v57 = vpop.f32.mrb[40].mxu1 }
 0x200   : > { %v1673_v60 = vld [vmem:[%s5356_s26] sm:$0xff]  ;;  %3763 = vmatmul.mubr.f32.gmra.mrb[134].mxu0 %v6754_v58  ;;  %v1462_v24 = vpop.f32.mrb[41].mxu0  ;;  %v1657_v0 = vpop.f32.mrb[41].mxu1  ;;  %3781 = vmatmul.mubr.f32.gmra.mrb[134].mxu1 %v6754_v58  ;;  %v1500_v2 = vrot.slane %v1460_v11, 4  ;;  %v1695_v3 = vrot.slane %v1655_v57, 5 }
 0x201   : > { %v1686_v1 = vadd.f32 %v1681_v45, %v1673_v60 }
 0x203   : > { %1688 = vst.msk [vmem:[%s5356_s26] sm:$0xff] %vm339_vm0, %v1686_v1  ;;  %v1465_v27 = vpop.f32.mrb[42].mxu0  ;;  %v1660_v4 = vpop.f32.mrb[42].mxu1 }
 0x204   : > { %v1674_v6 = vld [vmem:[%s5356_s26 + $0x8] sm:$0xff]  ;;  %v1501_v8 = vrot.slane %v1465_v27, 4  ;;  %v1696_v10 = vrot.slane %v1660_v4, 5  ;;  %v1467_v9 = vpop.f32.mrb[43].mxu0  ;;  %v1662_v13 = vpop.f32.mrb[43].mxu1 }
 0x205   : > { %v1687_v20 = vadd.f32 %v1683_v7, %v1674_v6 }
 0x206   : > { %v1502_v16 = vsel %vm1483_vm11, %v1500_v2, %v1501_v8  ;;  %v1697_v58 = vsel %vm1678_vm12, %v1695_v3, %v1696_v10 }
 0x207   : > { %1689 = vst.msk [vmem:[%s5356_s26 + $0x8] sm:$0xff] %vm339_vm0, %v1687_v20  ;;  %v1507_v17 = vadd.f32 %v4071_v19, %v1502_v16  ;;  %v1470_v18 = vpop.f32.mrb[44].mxu0  ;;  %v1665_v23 = vpop.f32.mrb[44].mxu1 }
 0x208   : > { %v1503_v21 = vrot.slane %v1470_v18, 4  ;;  %v1698_v22 = vrot.slane %v1665_v23, 5  ;;  %v1472_v43 = vpop.f32.mrb[45].mxu0  ;;  %v1667_v30 = vpop.f32.mrb[45].mxu1 }
 0x209   : > { %4073 = vst.msk [vmem:[%s5356_s26 + $0x10] sm:$0xff] %vm339_vm0, %v1507_v17 }
 0x20a   : > { %v1504_v28 = vsel %vm1483_vm11, %v1501_v8, %v1503_v21  ;;  %v1699_v32 = vsel %vm1678_vm12, %v1696_v10, %v1698_v22  ;;  %v1868_v12 = vld [vmem:[%s5356_s26] sm:$0xff] }
 0x20b   : > { %v1508_v29 = vadd.f32 %v4072_v25, %v1504_v28  ;;  %v1475_v26 = vpop.f32.mrb[46].mxu0  ;;  %v1670_v33 = vpop.f32.mrb[46].mxu1 }
 0x20c   : > { %v1476_v34 = vpop.f32.mrb[47].mxu0  ;;  %v1671_v37 = vpop.f32.mrb[47].mxu1 }
 0x20d   : > { %4074 = vst.msk [vmem:[%s5356_s26 + $0x18] sm:$0xff] %vm339_vm0, %v1508_v29 }
 0x20e   : > { %v1869_v55 = vld [vmem:[%s5356_s26 + $0x8] sm:$0xff] }
 0x210   : > { %v4101_v31 = vld [vmem:[%s5356_s26 + $0x10] sm:$0xff] }
 0x211   : > { %v1702_v38 = vadd.f32 %v4101_v31, %v1697_v58 }
 0x213   : > { %4103 = vst.msk [vmem:[%s5356_s26 + $0x10] sm:$0xff] %vm339_vm0, %v1702_v38  ;;  %v1831_v5 = vpop.f32.mrb[48].mxu0  ;;  %v2026_v40 = vpop.f32.mrb[48].mxu1 }
 0x214   : > { %v4102_v42 = vld [vmem:[%s5356_s26 + $0x18] sm:$0xff]  ;;  %v1833_v39 = vpop.f32.mrb[49].mxu0  ;;  %v2028_v44 = vpop.f32.mrb[49].mxu1  ;;  %v2069_v46 = vrot.slane %v2026_v40, 7  ;;  %v1874_v35 = vrot.slane %v1831_v5, 6 }
 0x215   : > { %v1703_v36 = vadd.f32 %v4102_v42, %v1699_v32 }
 0x217   : > { %4104 = vst.msk [vmem:[%s5356_s26 + $0x18] sm:$0xff] %vm339_vm0, %v1703_v36  ;;  %v1836_v59 = vpop.f32.mrb[50].mxu0  ;;  %v2031_v47 = vpop.f32.mrb[50].mxu1 }
 0x218   : > { %v1875_v41 = vrot.slane %v1836_v59, 6  ;;  %v2070_v48 = vrot.slane %v2031_v47, 7  ;;  %v1838_v45 = vpop.f32.mrb[51].mxu0  ;;  %v2033_v61 = vpop.f32.mrb[51].mxu1 }
 0x21a   : > { %v1876_v50 = vsel %vm1873_vm13, %v1874_v35, %v1875_v41  ;;  %v2071_v63 = vsel %vm2068_vm14, %v2069_v46, %v2070_v48  ;;  %v4131_v18 = vld [vmem:[%s5356_s26 + $0x10] sm:$0xff] }
 0x21b   : > { %v1881_v51 = vadd.f32 %v1876_v50, %v1868_v12  ;;  %v1841_v52 = vpop.f32.mrb[52].mxu0  ;;  %v2036_v53 = vpop.f32.mrb[52].mxu1 }
 0x21c   : > { %v1877_v14 = vrot.slane %v1841_v52, 6  ;;  %v2072_v49 = vrot.slane %v2036_v53, 7  ;;  %v1843_v7 = vpop.f32.mrb[53].mxu0  ;;  %v2038_v54 = vpop.f32.mrb[53].mxu1 }
 0x21d   : > { %1883 = vst.msk [vmem:[%s5356_s26] sm:$0xff] %vm339_vm0, %v1881_v51 }
 0x21e   : > { %v1878_v62 = vsel %vm1873_vm13, %v1875_v41, %v1877_v14  ;;  %v2073_v15 = vsel %vm2068_vm14, %v2070_v48, %v2072_v49  ;;  %v4132_v26 = vld [vmem:[%s5356_s26 + $0x18] sm:$0xff] }
 0x21f   : > { %v1882_v56 = vadd.f32 %v1878_v62, %v1869_v55  ;;  %v1846_v11 = vpop.f32.mrb[54].mxu0  ;;  %v2041_v57 = vpop.f32.mrb[54].mxu1 }
 0x220   : > { %v1847_v60 = vpop.f32.mrb[55].mxu0  ;;  %v2042_v24 = vpop.f32.mrb[55].mxu1 }
 0x221   : > { %1884 = vst.msk [vmem:[%s5356_s26 + $0x8] sm:$0xff] %vm339_vm0, %v1882_v56 }
 0x223   : > { %v1850_v0 = vpop.f32.mrb[56].mxu0  ;;  %v2045_v1 = vpop.f32.mrb[56].mxu1 }
 0x224   : > { %v2063_v2 = vld [vmem:[%s5356_s26] sm:$0xff]  ;;  %v1852_v3 = vpop.f32.mrb[57].mxu0  ;;  %v2047_v27 = vpop.f32.mrb[57].mxu1  ;;  %v1890_v6 = vrot.slane %v1850_v0, 6  ;;  %v2085_v8 = vrot.slane %v2045_v1, 7 }
 0x225   : > { %v2076_v4 = vadd.f32 %v2071_v63, %v2063_v2 }
 0x227   : > { %2078 = vst.msk [vmem:[%s5356_s26] sm:$0xff] %vm339_vm0, %v2076_v4  ;;  %v1855_v10 = vpop.f32.mrb[58].mxu0  ;;  %v2050_v9 = vpop.f32.mrb[58].mxu1 }
 0x228   : > { %v2064_v13 = vld [vmem:[%s5356_s26 + $0x8] sm:$0xff]  ;;  %v1891_v20 = vrot.slane %v1855_v10, 6  ;;  %v2086_v19 = vrot.slane %v2050_v9, 7  ;;  %v1857_v16 = vpop.f32.mrb[59].mxu0  ;;  %v2052_v58 = vpop.f32.mrb[59].mxu1 }
 0x229   : > { %v2077_v17 = vadd.f32 %v2073_v15, %v2064_v13 }
 0x22a   : > { %v1892_v23 = vsel %vm1873_vm13, %v1890_v6, %v1891_v20  ;;  %v2087_v21 = vsel %vm2068_vm14, %v2085_v8, %v2086_v19 }
 0x22b   : > { %2079 = vst.msk [vmem:[%s5356_s26 + $0x8] sm:$0xff] %vm339_vm0, %v2077_v17  ;;  %v1897_v22 = vadd.f32 %v4131_v18, %v1892_v23  ;;  %v1860_v43 = vpop.f32.mrb[60].mxu0  ;;  %v2055_v30 = vpop.f32.mrb[60].mxu1 }
 0x22c   : > { %v1893_v25 = vrot.slane %v1860_v43, 6  ;;  %v2088_v28 = vrot.slane %v2055_v30, 7  ;;  %v1862_v32 = vpop.f32.mrb[61].mxu0  ;;  %v2057_v29 = vpop.f32.mrb[61].mxu1 }
 0x22d   : > { %4133 = vst.msk [vmem:[%s5356_s26 + $0x10] sm:$0xff] %vm339_vm0, %v1897_v22 }
 0x22e   : > { %v1894_v33 = vsel %vm1873_vm13, %v1891_v20, %v1893_v25  ;;  %v2089_v34 = vsel %vm2068_vm14, %v2086_v19, %v2088_v28  ;;  %v2256_v48 = vld [vmem:[%s5356_s26] sm:$0xff] }
 0x22f   : > { %v1898_v37 = vadd.f32 %v4132_v26, %v1894_v33  ;;  %v1865_v31 = vpop.f32.mrb[62].mxu0  ;;  %v2060_v38 = vpop.f32.mrb[62].mxu1 }
 0x230   : > { %v1866_v5 = vpop.f32.mrb[63].mxu0  ;;  %v2061_v40 = vpop.f32.mrb[63].mxu1 }
 0x231   : > { %4134 = vst.msk [vmem:[%s5356_s26 + $0x18] sm:$0xff] %vm339_vm0, %v1898_v37 }
 0x232   : > { %v2257_v51 = vld [vmem:[%s5356_s26 + $0x8] sm:$0xff] }
 0x234   : > { %v4161_v42 = vld [vmem:[%s5356_s26 + $0x10] sm:$0xff] }
 0x235   : > { %v2092_v39 = vadd.f32 %v4161_v42, %v2087_v21 }
 0x237   : > { %4163 = vst.msk [vmem:[%s5356_s26 + $0x10] sm:$0xff] %vm339_vm0, %v2092_v39  ;;  %v2221_v44 = vpop.f32.mrb[64].mxu0  ;;  %v2393_v36 = vpop.f32.mrb[64].mxu1 }
 0x238   : > { %v4162_v46 = vld [vmem:[%s5356_s26 + $0x18] sm:$0xff]  ;;  %v2222_v59 = vpop.f32.mrb[65].mxu0  ;;  %v2394_v47 = vpop.f32.mrb[65].mxu1 }
 0x239   : > { %v2093_v35 = vadd.f32 %v4162_v46, %v2089_v34 }
 0x23b   : > { %4164 = vst.msk [vmem:[%s5356_s26 + $0x18] sm:$0xff] %vm339_vm0, %v2093_v35  ;;  %v2225_v41 = vpop.f32.mrb[66].mxu0  ;;  %v2397_v45 = vpop.f32.mrb[66].mxu1 }
 0x23c   : > { %v2258_v61 = vadd.f32 %v2256_v48, %v2225_v41  ;;  %v2227_v12 = vpop.f32.mrb[67].mxu0  ;;  %v2399_v50 = vpop.f32.mrb[67].mxu1  ;;  %v2435_v53 = vrot.slane %v2397_v45, 1 }
 0x23e   : > { %2260 = vst.msk [vmem:[%s5356_s26] sm:$0xff] %vm339_vm0, %v2258_v61  ;;  %v4191_v10 = vld [vmem:[%s5356_s26 + $0x10] sm:$0xff] }
 0x23f   : > { %v2230_v63 = vpop.f32.mrb[68].mxu0  ;;  %v2402_v52 = vpop.f32.mrb[68].mxu1 }
 0x240   : > { %v2259_v14 = vadd.f32 %v2257_v51, %v2230_v63  ;;  %v2436_v49 = vrot.slane %v2402_v52, 1  ;;  %v2232_v7 = vpop.f32.mrb[69].mxu0  ;;  %v2404_v54 = vpop.f32.mrb[69].mxu1 }
 0x242   : > { %2261 = vst.msk [vmem:[%s5356_s26 + $0x8] sm:$0xff] %vm339_vm0, %v2259_v14  ;;  %v2437_v55 = vsel %vm898_vm8, %v2435_v53, %v2436_v49  ;;  %v4192_v58 = vld [vmem:[%s5356_s26 + $0x18] sm:$0xff] }
 0x243   : > { %v2407_v62 = vpop.f32.mrb[70].mxu1  ;;  %v2235_v15 = vpop.f32.mrb[70].mxu0 }
 0x244   : > { %v2438_v56 = vrot.slane %v2407_v62, 1  ;;  %v2236_v11 = vpop.f32.mrb[71].mxu0  ;;  %v2409_v57 = vpop.f32.mrb[71].mxu1 }
 0x245   : > { %v2430_v60 = vld [vmem:[%s5356_s26] sm:$0xff] }
 0x246   : > { %v2442_v24 = vadd.f32 %v2437_v55, %v2430_v60  ;;  %v2439_v0 = vsel %vm898_vm8, %v2436_v49, %v2438_v56 }
 0x247   : > { %v2239_v1 = vpop.f32.mrb[72].mxu0  ;;  %v2412_v2 = vpop.f32.mrb[72].mxu1 }
 0x248   : > { %2444 = vst.msk [vmem:[%s5356_s26] sm:$0xff] %vm339_vm0, %v2442_v24  ;;  %v2240_v3 = vpop.f32.mrb[73].mxu0  ;;  %v2413_v27 = vpop.f32.mrb[73].mxu1 }
 0x249   : > { %v2431_v4 = vld [vmem:[%s5356_s26 + $0x8] sm:$0xff] }
 0x24a   : > { %v2443_v6 = vadd.f32 %v2439_v0, %v2431_v4 }
 0x24b   : > { %v2243_v8 = vpop.f32.mrb[74].mxu0  ;;  %v2416_v9 = vpop.f32.mrb[74].mxu1 }
 0x24c   : > { %2445 = vst.msk [vmem:[%s5356_s26 + $0x8] sm:$0xff] %vm339_vm0, %v2443_v6  ;;  %v2264_v13 = vadd.f32 %v4191_v10, %v2243_v8  ;;  %v2245_v20 = vpop.f32.mrb[75].mxu0  ;;  %v2418_v19 = vpop.f32.mrb[75].mxu1  ;;  %v2451_v18 = vrot.slane %v2416_v9, 1 }
 0x24e   : > { %4193 = vst.msk [vmem:[%s5356_s26 + $0x10] sm:$0xff] %vm339_vm0, %v2264_v13 }
 0x24f   : > { %v2248_v16 = vpop.f32.mrb[76].mxu0  ;;  %v2421_v17 = vpop.f32.mrb[76].mxu1  ;;  %v2624_v63 = vld [vmem:[%s5356_s26] sm:$0xff] }
 0x250   : > { %v2265_v23 = vadd.f32 %v4192_v58, %v2248_v16  ;;  %v2452_v21 = vrot.slane %v2421_v17, 1  ;;  %v2250_v22 = vpop.f32.mrb[77].mxu0  ;;  %v2423_v43 = vpop.f32.mrb[77].mxu1 }
 0x252   : > { %4194 = vst.msk [vmem:[%s5356_s26 + $0x18] sm:$0xff] %vm339_vm0, %v2265_v23  ;;  %v2453_v30 = vsel %vm898_vm8, %v2451_v18, %v2452_v21 }
 0x253   : > { %v2426_v25 = vpop.f32.mrb[78].mxu1  ;;  %v2253_v28 = vpop.f32.mrb[78].mxu0  ;;  %v2625_v15 = vld [vmem:[%s5356_s26 + $0x8] sm:$0xff] }
 0x254   : > { %v2454_v32 = vrot.slane %v2426_v25, 1  ;;  %v2254_v29 = vpop.f32.mrb[79].mxu0  ;;  %v2428_v26 = vpop.f32.mrb[79].mxu1 }
 0x255   : > { %v4221_v33 = vld [vmem:[%s5356_s26 + $0x10] sm:$0xff] }
 0x256   : > { %v2458_v34 = vadd.f32 %v4221_v33, %v2453_v30  ;;  %v2455_v37 = vsel %vm898_vm8, %v2452_v21, %v2454_v32 }
 0x258   : > { %4223 = vst.msk [vmem:[%s5356_s26 + $0x10] sm:$0xff] %vm339_vm0, %v2458_v34 }
 0x259   : > { %v4222_v31 = vld [vmem:[%s5356_s26 + $0x18] sm:$0xff] }
 0x25a   : > { %v2459_v38 = vadd.f32 %v4222_v31, %v2455_v37 }
 0x25b   : > { %v2587_v5 = vpop.f32.mrb[80].mxu0  ;;  %v2781_v40 = vpop.f32.mrb[80].mxu1 }
 0x25c   : > { %4224 = vst.msk [vmem:[%s5356_s26 + $0x18] sm:$0xff] %vm339_vm0, %v2459_v38  ;;  %v2588_v42 = vpop.f32.mrb[81].mxu0  ;;  %v2782_v39 = vpop.f32.mrb[81].mxu1 }
 0x25f   : > { %v2591_v44 = vpop.f32.mrb[82].mxu0  ;;  %v2785_v36 = vpop.f32.mrb[82].mxu1  ;;  %v4251_v21 = vld [vmem:[%s5356_s26 + $0x10] sm:$0xff] }
 0x260   : > { %v2593_v46 = vpop.f32.mrb[83].mxu0  ;;  %v2787_v59 = vpop.f32.mrb[83].mxu1  ;;  %v2629_v41 = vrot.slane %v2591_v44, 2  ;;  %v2823_v48 = vrot.slane %v2785_v36, 3 }
 0x263   : > { %v2596_v47 = vpop.f32.mrb[84].mxu0  ;;  %v2790_v35 = vpop.f32.mrb[84].mxu1  ;;  %v4252_v34 = vld [vmem:[%s5356_s26 + $0x18] sm:$0xff] }
 0x264   : > { %v2630_v45 = vrot.slane %v2596_v47, 2  ;;  %v2824_v61 = vrot.slane %v2790_v35, 3  ;;  %v2598_v12 = vpop.f32.mrb[85].mxu0  ;;  %v2792_v50 = vpop.f32.mrb[85].mxu1 }
 0x266   : > { %v2631_v51 = vsel %vm1093_vm9, %v2629_v41, %v2630_v45  ;;  %v2825_v52 = vsel %vm1288_vm10, %v2823_v48, %v2824_v61 }
 0x267   : > { %v2636_v53 = vadd.f32 %v2631_v51, %v2624_v63  ;;  %v2601_v14 = vpop.f32.mrb[86].mxu0  ;;  %v2795_v49 = vpop.f32.mrb[86].mxu1 }
 0x268   : > { %v2632_v7 = vrot.slane %v2601_v14, 2  ;;  %v2826_v54 = vrot.slane %v2795_v49, 3  ;;  %v2603_v55 = vpop.f32.mrb[87].mxu0  ;;  %v2797_v62 = vpop.f32.mrb[87].mxu1 }
 0x269   : > { %2638 = vst.msk [vmem:[%s5356_s26] sm:$0xff] %vm339_vm0, %v2636_v53 }
 0x26a   : > { %v2633_v56 = vsel %vm1093_vm9, %v2630_v45, %v2632_v7  ;;  %v2827_v11 = vsel %vm1288_vm10, %v2824_v61, %v2826_v54 }
 0x26b   : > { %v2637_v57 = vadd.f32 %v2633_v56, %v2625_v15  ;;  %v2606_v60 = vpop.f32.mrb[88].mxu0  ;;  %v2800_v24 = vpop.f32.mrb[88].mxu1 }
 0x26c   : > { %v2607_v0 = vpop.f32.mrb[89].mxu0  ;;  %v2801_v1 = vpop.f32.mrb[89].mxu1 }
 0x26d   : > { %2639 = vst.msk [vmem:[%s5356_s26 + $0x8] sm:$0xff] %vm339_vm0, %v2637_v57 }
 0x26f   : > { %v2610_v2 = vpop.f32.mrb[90].mxu0  ;;  %v2804_v3 = vpop.f32.mrb[90].mxu1 }
 0x270   : > { %v2818_v27 = vld [vmem:[%s5356_s26] sm:$0xff]  ;;  %v2612_v4 = vpop.f32.mrb[91].mxu0  ;;  %v2806_v6 = vpop.f32.mrb[91].mxu1  ;;  %v2645_v10 = vrot.slane %v2610_v2, 2  ;;  %v2839_v19 = vrot.slane %v2804_v3, 3 }
 0x271   : > { %v2830_v8 = vadd.f32 %v2825_v52, %v2818_v27 }
 0x273   : > { %2832 = vst.msk [vmem:[%s5356_s26] sm:$0xff] %vm339_vm0, %v2830_v8  ;;  %v2615_v9 = vpop.f32.mrb[92].mxu0  ;;  %v2809_v13 = vpop.f32.mrb[92].mxu1 }
 0x274   : > { %v2819_v20 = vld [vmem:[%s5356_s26 + $0x8] sm:$0xff]  ;;  %v2646_v16 = vrot.slane %v2615_v9, 2  ;;  %v2840_v58 = vrot.slane %v2809_v13, 3  ;;  %v2617_v17 = vpop.f32.mrb[93].mxu0  ;;  %v2811_v18 = vpop.f32.mrb[93].mxu1 }
 0x275   : > { %v2831_v23 = vadd.f32 %v2827_v11, %v2819_v20 }
 0x276   : > { %v2647_v22 = vsel %vm1093_vm9, %v2645_v10, %v2646_v16  ;;  %v2841_v43 = vsel %vm1288_vm10, %v2839_v19, %v2840_v58 }
 0x277   : > { %2833 = vst.msk [vmem:[%s5356_s26 + $0x8] sm:$0xff] %vm339_vm0, %v2831_v23  ;;  %v2652_v30 = vadd.f32 %v4251_v21, %v2647_v22  ;;  %v2620_v25 = vpop.f32.mrb[94].mxu0  ;;  %v2814_v28 = vpop.f32.mrb[94].mxu1 }
 0x278   : > { %v2648_v32 = vrot.slane %v2620_v25, 2  ;;  %v2842_v29 = vrot.slane %v2814_v28, 3  ;;  %v2622_v26 = vpop.f32.mrb[95].mxu0  ;;  %v2816_v33 = vpop.f32.mrb[95].mxu1 }
 0x279   : > { %4253 = vst.msk [vmem:[%s5356_s26 + $0x10] sm:$0xff] %vm339_vm0, %v2652_v30 }
 0x27a   : > { %v2649_v37 = vsel %vm1093_vm9, %v2646_v16, %v2648_v32  ;;  %v2843_v31 = vsel %vm1288_vm10, %v2840_v58, %v2842_v29  ;;  %v3012_v14 = vld [vmem:[%s5356_s26] sm:$0xff] }
 0x27b   : > { %v2653_v38 = vadd.f32 %v4252_v34, %v2649_v37 }
 0x27d   : > { %4254 = vst.msk [vmem:[%s5356_s26 + $0x18] sm:$0xff] %vm339_vm0, %v2653_v38 }
 0x27e   : > { %v3013_v60 = vld [vmem:[%s5356_s26 + $0x8] sm:$0xff] }
 0x27f   : > { %v2975_v5 = vpop.f32.mrb[96].mxu0  ;;  %v3169_v40 = vpop.f32.mrb[96].mxu1 }
 0x280   : > { %v4281_v42 = vld [vmem:[%s5356_s26 + $0x10] sm:$0xff]  ;;  %v2976_v39 = vpop.f32.mrb[97].mxu0  ;;  %v3170_v44 = vpop.f32.mrb[97].mxu1 }
 0x281   : > { %v2846_v36 = vadd.f32 %v4281_v42, %v2841_v43 }
 0x283   : > { %4283 = vst.msk [vmem:[%s5356_s26 + $0x10] sm:$0xff] %vm339_vm0, %v2846_v36  ;;  %v2979_v46 = vpop.f32.mrb[98].mxu0  ;;  %v3173_v59 = vpop.f32.mrb[98].mxu1 }
 0x284   : > { %v4282_v47 = vld [vmem:[%s5356_s26 + $0x18] sm:$0xff]  ;;  %v2981_v35 = vpop.f32.mrb[99].mxu0  ;;  %v3175_v41 = vpop.f32.mrb[99].mxu1  ;;  %v3017_v12 = vrot.slane %v2979_v46, 4  ;;  %v3211_v50 = vrot.slane %v3173_v59, 5 }
 0x285   : > { %v2847_v48 = vadd.f32 %v4282_v47, %v2843_v31 }
 0x287   : > { %4284 = vst.msk [vmem:[%s5356_s26 + $0x18] sm:$0xff] %vm339_vm0, %v2847_v48  ;;  %v2984_v45 = vpop.f32.mrb[100].mxu0  ;;  %v3178_v61 = vpop.f32.mrb[100].mxu1 }
 0x288   : > { %v3018_v63 = vrot.slane %v2984_v45, 4  ;;  %v3212_v51 = vrot.slane %v3178_v61, 5  ;;  %v2986_v52 = vpop.f32.mrb[101].mxu0  ;;  %v3180_v53 = vpop.f32.mrb[101].mxu1 }
 0x28a   : > { %v3019_v49 = vsel %vm1483_vm11, %v3017_v12, %v3018_v63  ;;  %v3213_v7 = vsel %vm1678_vm12, %v3211_v50, %v3212_v51  ;;  %v4311_v25 = vld [vmem:[%s5356_s26 + $0x10] sm:$0xff] }
 0x28b   : > { %v3024_v54 = vadd.f32 %v3019_v49, %v3012_v14  ;;  %v2989_v55 = vpop.f32.mrb[102].mxu0  ;;  %v3183_v62 = vpop.f32.mrb[102].mxu1 }
 0x28c   : > { %v3020_v15 = vrot.slane %v2989_v55, 4  ;;  %v3214_v56 = vrot.slane %v3183_v62, 5  ;;  %v2991_v11 = vpop.f32.mrb[103].mxu0  ;;  %v3185_v57 = vpop.f32.mrb[103].mxu1 }
 0x28d   : > { %3026 = vst.msk [vmem:[%s5356_s26] sm:$0xff] %vm339_vm0, %v3024_v54 }
 0x28e   : > { %v3021_v24 = vsel %vm1483_vm11, %v3018_v63, %v3020_v15  ;;  %v3215_v0 = vsel %vm1678_vm12, %v3212_v51, %v3214_v56  ;;  %v4312_v5 = vld [vmem:[%s5356_s26 + $0x18] sm:$0xff] }
 0x28f   : > { %v3025_v1 = vadd.f32 %v3021_v24, %v3013_v60  ;;  %v2994_v2 = vpop.f32.mrb[104].mxu0  ;;  %v3188_v3 = vpop.f32.mrb[104].mxu1 }
 0x290   : > { %v2995_v27 = vpop.f32.mrb[105].mxu0  ;;  %v3189_v4 = vpop.f32.mrb[105].mxu1 }
 0x291   : > { %3027 = vst.msk [vmem:[%s5356_s26 + $0x8] sm:$0xff] %vm339_vm0, %v3025_v1 }
 0x293   : > { %v2998_v6 = vpop.f32.mrb[106].mxu0  ;;  %v3192_v8 = vpop.f32.mrb[106].mxu1 }
 0x294   : > { %v3206_v10 = vld [vmem:[%s5356_s26] sm:$0xff]  ;;  %v3000_v9 = vpop.f32.mrb[107].mxu0  ;;  %v3194_v13 = vpop.f32.mrb[107].mxu1  ;;  %v3033_v19 = vrot.slane %v2998_v6, 4  ;;  %v3227_v18 = vrot.slane %v3192_v8, 5 }
 0x295   : > { %v3218_v20 = vadd.f32 %v3213_v7, %v3206_v10 }
 0x297   : > { %3220 = vst.msk [vmem:[%s5356_s26] sm:$0xff] %vm339_vm0, %v3218_v20  ;;  %v3003_v16 = vpop.f32.mrb[108].mxu0  ;;  %v3197_v58 = vpop.f32.mrb[108].mxu1 }
 0x298   : > { %v3207_v17 = vld [vmem:[%s5356_s26 + $0x8] sm:$0xff]  ;;  %v3034_v23 = vrot.slane %v3003_v16, 4  ;;  %v3228_v21 = vrot.slane %v3197_v58, 5  ;;  %v3005_v22 = vpop.f32.mrb[109].mxu0  ;;  %v3199_v43 = vpop.f32.mrb[109].mxu1 }
 0x299   : > { %v3219_v30 = vadd.f32 %v3215_v0, %v3207_v17 }
 0x29a   : > { %v3035_v28 = vsel %vm1483_vm11, %v3033_v19, %v3034_v23  ;;  %v3229_v32 = vsel %vm1678_vm12, %v3227_v18, %v3228_v21 }
 0x29b   : > { %3221 = vst.msk [vmem:[%s5356_s26 + $0x8] sm:$0xff] %vm339_vm0, %v3219_v30  ;;  %v3040_v29 = vadd.f32 %v4311_v25, %v3035_v28  ;;  %v3008_v26 = vpop.f32.mrb[110].mxu0  ;;  %v3202_v33 = vpop.f32.mrb[110].mxu1 }
 0x29c   : > { %v3036_v34 = vrot.slane %v3008_v26, 4  ;;  %v3230_v37 = vrot.slane %v3202_v33, 5  ;;  %v3010_v31 = vpop.f32.mrb[111].mxu0  ;;  %v3204_v38 = vpop.f32.mrb[111].mxu1 }
 0x29d   : > { %4313 = vst.msk [vmem:[%s5356_s26 + $0x10] sm:$0xff] %vm339_vm0, %v3040_v29 }
 0x29e   : > { %v3037_v40 = vsel %vm1483_vm11, %v3034_v23, %v3036_v34  ;;  %v3231_v42 = vsel %vm1678_vm12, %v3228_v21, %v3230_v37  ;;  %v3400_v55 = vld [vmem:[%s5356_s26] sm:$0xff] }
 0x29f   : > { %v3041_v39 = vadd.f32 %v4312_v5, %v3037_v40 }
 0x2a1   : > { %4314 = vst.msk [vmem:[%s5356_s26 + $0x18] sm:$0xff] %vm339_vm0, %v3041_v39 }
 0x2a2   : > { %v3401_v2 = vld [vmem:[%s5356_s26 + $0x8] sm:$0xff] }
 0x2a3   : > { %v3363_v44 = vpop.f32.mrb[112].mxu0  ;;  %v3557_v36 = vpop.f32.mrb[112].mxu1 }
 0x2a4   : > { %v4341_v46 = vld [vmem:[%s5356_s26 + $0x10] sm:$0xff]  ;;  %v3364_v59 = vpop.f32.mrb[113].mxu0  ;;  %v3558_v47 = vpop.f32.mrb[113].mxu1 }
 0x2a5   : > { %v3234_v35 = vadd.f32 %v4341_v46, %v3229_v32 }
 0x2a7   : > { %4343 = vst.msk [vmem:[%s5356_s26 + $0x10] sm:$0xff] %vm339_vm0, %v3234_v35  ;;  %v3367_v41 = vpop.f32.mrb[114].mxu0  ;;  %v3561_v48 = vpop.f32.mrb[114].mxu1 }
 0x2a8   : > { %v4342_v45 = vld [vmem:[%s5356_s26 + $0x18] sm:$0xff]  ;;  %v3369_v61 = vpop.f32.mrb[115].mxu0  ;;  %v3563_v12 = vpop.f32.mrb[115].mxu1  ;;  %v3405_v52 = vrot.slane %v3367_v41, 6  ;;  %v3599_v53 = vrot.slane %v3561_v48, 7 }
 0x2a9   : > { %v3235_v50 = vadd.f32 %v4342_v45, %v3231_v42 }
 0x2ab   : > { %4344 = vst.msk [vmem:[%s5356_s26 + $0x18] sm:$0xff] %vm339_vm0, %v3235_v50  ;;  %v3372_v63 = vpop.f32.mrb[116].mxu0  ;;  %v3566_v51 = vpop.f32.mrb[116].mxu1 }
 0x2ac   : > { %v3406_v14 = vrot.slane %v3372_v63, 6  ;;  %v3600_v49 = vrot.slane %v3566_v51, 7  ;;  %v3374_v7 = vpop.f32.mrb[117].mxu0  ;;  %v3568_v54 = vpop.f32.mrb[117].mxu1 }
 0x2ae   : > { %v3407_v62 = vsel %vm1873_vm13, %v3405_v52, %v3406_v14  ;;  %v3601_v15 = vsel %vm2068_vm14, %v3599_v53, %v3600_v49  ;;  %v4371_v26 = vld [vmem:[%s5356_s26 + $0x10] sm:$0xff] }
 0x2af   : > { %v3412_v56 = vadd.f32 %v3407_v62, %v3400_v55  ;;  %v3377_v11 = vpop.f32.mrb[118].mxu0  ;;  %v3571_v57 = vpop.f32.mrb[118].mxu1 }
 0x2b0   : > { %v3408_v60 = vrot.slane %v3377_v11, 6  ;;  %v3602_v24 = vrot.slane %v3571_v57, 7  ;;  %v3379_v0 = vpop.f32.mrb[119].mxu0  ;;  %v3573_v1 = vpop.f32.mrb[119].mxu1 }
 0x2b1   : > { %3414 = vst.msk [vmem:[%s5356_s26] sm:$0xff] %vm339_vm0, %v3412_v56 }
 0x2b2   : > { %v3409_v3 = vsel %vm1873_vm13, %v3406_v14, %v3408_v60  ;;  %v3603_v27 = vsel %vm2068_vm14, %v3600_v49, %v3602_v24  ;;  %v4372_v44 = vld [vmem:[%s5356_s26 + $0x18] sm:$0xff] }
 0x2b3   : > { %v3413_v4 = vadd.f32 %v3409_v3, %v3401_v2  ;;  %v3382_v6 = vpop.f32.mrb[120].mxu0  ;;  %v3576_v8 = vpop.f32.mrb[120].mxu1 }
 0x2b4   : > { %v3383_v10 = vpop.f32.mrb[121].mxu0  ;;  %v3577_v9 = vpop.f32.mrb[121].mxu1 }
 0x2b5   : > { %3415 = vst.msk [vmem:[%s5356_s26 + $0x8] sm:$0xff] %vm339_vm0, %v3413_v4 }
 0x2b7   : > { %v3386_v13 = vpop.f32.mrb[122].mxu0  ;;  %v3580_v20 = vpop.f32.mrb[122].mxu1 }
 0x2b8   : > { %v3594_v19 = vld [vmem:[%s5356_s26] sm:$0xff]  ;;  %v3388_v16 = vpop.f32.mrb[123].mxu0  ;;  %v3582_v58 = vpop.f32.mrb[123].mxu1  ;;  %v3421_v18 = vrot.slane %v3386_v13, 6  ;;  %v3615_v43 = vrot.slane %v3580_v20, 7 }
 0x2b9   : > { %v3606_v17 = vadd.f32 %v3601_v15, %v3594_v19 }
 0x2bb   : > { %3608 = vst.msk [vmem:[%s5356_s26] sm:$0xff] %vm339_vm0, %v3606_v17  ;;  %v3391_v23 = vpop.f32.mrb[124].mxu0  ;;  %v3585_v21 = vpop.f32.mrb[124].mxu1 }
 0x2bc   : > { %v3595_v22 = vld [vmem:[%s5356_s26 + $0x8] sm:$0xff]  ;;  %v3422_v30 = vrot.slane %v3391_v23, 6  ;;  %v3616_v25 = vrot.slane %v3585_v21, 7  ;;  %v3393_v28 = vpop.f32.mrb[125].mxu0  ;;  %v3587_v32 = vpop.f32.mrb[125].mxu1 }
 0x2bd   : > { %v3607_v29 = vadd.f32 %v3603_v27, %v3595_v22 }
 0x2be   : > { %v3423_v33 = vsel %vm1873_vm13, %v3421_v18, %v3422_v30  ;;  %v3617_v34 = vsel %vm2068_vm14, %v3615_v43, %v3616_v25 }
 0x2bf   : > { %3609 = vst.msk [vmem:[%s5356_s26 + $0x8] sm:$0xff] %vm339_vm0, %v3607_v29  ;;  %v3428_v37 = vadd.f32 %v4371_v26, %v3423_v33  ;;  %v3396_v31 = vpop.f32.mrb[126].mxu0  ;;  %v3590_v38 = vpop.f32.mrb[126].mxu1 }
 0x2c0   : > { %v3424_v5 = vrot.slane %v3396_v31, 6  ;;  %v3618_v40 = vrot.slane %v3590_v38, 7  ;;  %v3398_v42 = vpop.f32.mrb[127].mxu0  ;;  %v3592_v39 = vpop.f32.mrb[127].mxu1 }
 0x2c1   : > { %4373 = vst.msk [vmem:[%s5356_s26 + $0x10] sm:$0xff] %vm339_vm0, %v3428_v37 }
 0x2c2   : > { %v3425_v36 = vsel %vm1873_vm13, %v3422_v30, %v3424_v5  ;;  %v3619_v46 = vsel %vm2068_vm14, %v3616_v25, %v3618_v40  ;;  %v3786_v49 = vld [vmem:[%s5356_s26] sm:$0xff] }
 0x2c3   : > { %v3429_v59 = vadd.f32 %v4372_v44, %v3425_v36 }
 0x2c5   : > { %4374 = vst.msk [vmem:[%s5356_s26 + $0x18] sm:$0xff] %vm339_vm0, %v3429_v59 }
 0x2c6   : > { %v3787_v57 = vld [vmem:[%s5356_s26 + $0x8] sm:$0xff] }
 0x2c7   : > { %v3751_v47 = vpop.f32.mrb[128].mxu0  ;;  %v3769_v35 = vpop.f32.mrb[128].mxu1 }
 0x2c8   : > { %v4401_v41 = vld [vmem:[%s5356_s26 + $0x10] sm:$0xff]  ;;  %v3752_v48 = vpop.f32.mrb[129].mxu0  ;;  %v3770_v45 = vpop.f32.mrb[129].mxu1 }
 0x2c9   : > { %v3622_v61 = vadd.f32 %v4401_v41, %v3617_v34 }
 0x2cb   : > { %4403 = vst.msk [vmem:[%s5356_s26 + $0x10] sm:$0xff] %vm339_vm0, %v3622_v61  ;;  %v3755_v12 = vpop.f32.mrb[130].mxu0  ;;  %v3773_v50 = vpop.f32.mrb[130].mxu1 }
 0x2cc   : > { %v4402_v63 = vld [vmem:[%s5356_s26 + $0x18] sm:$0xff]  ;;  %v3756_v51 = vpop.f32.mrb[131].mxu0  ;;  %v3774_v52 = vpop.f32.mrb[131].mxu1 }
 0x2cd   : > { %v3623_v53 = vadd.f32 %v4402_v63, %v3619_v46 }
 0x2cf   : > { %4404 = vst.msk [vmem:[%s5356_s26 + $0x18] sm:$0xff] %vm339_vm0, %v3623_v53  ;;  %v3759_v14 = vpop.f32.mrb[132].mxu0  ;;  %v3777_v7 = vpop.f32.mrb[132].mxu1 }
 0x2d0   : > { %v3788_v54 = vadd.f32 %v3786_v49, %v3759_v14  ;;  %v3761_v55 = vpop.f32.mrb[133].mxu0  ;;  %v3779_v62 = vpop.f32.mrb[133].mxu1 }
 0x2d2   : > { %3790 = vst.msk [vmem:[%s5356_s26] sm:$0xff] %vm339_vm0, %v3788_v54  ;;  %v4431_v15 = vld [vmem:[%s5356_s26 + $0x10] sm:$0xff] }
 0x2d3   : > { %v3794_v56 = vadd.f32 %v4431_v15, %v3777_v7  ;;  %v3764_v11 = vpop.f32.mrb[134].mxu0  ;;  %v3782_v60 = vpop.f32.mrb[134].mxu1 }
 0x2d4   : > { %v3789_v24 = vadd.f32 %v3787_v57, %v3764_v11  ;;  %v3766_v0 = vpop.f32.mrb[135].mxu0  ;;  %v3784_v1 = vpop.f32.mrb[135].mxu1 }
 0x2d5   : > { %4433 = vst.msk [vmem:[%s5356_s26 + $0x10] sm:$0xff] %vm339_vm0, %v3794_v56 }
 0x2d6   : > { %3791 = vst.msk [vmem:[%s5356_s26 + $0x8] sm:$0xff] %vm339_vm0, %v3789_v24  ;;  %v4432_v2 = vld [vmem:[%s5356_s26 + $0x18] sm:$0xff] }
 0x2d7   : > { %v3795_v3 = vadd.f32 %v4432_v2, %v3782_v60 }
 0x2d9   : > { %4434 = vst.msk [vmem:[%s5356_s26 + $0x18] sm:$0xff] %vm339_vm0, %v3795_v3 }
 0x2da   : > { %5021 = shalt.err (!%p5018_p7)
}
 0x2db   : > { %s5022_s26 = scalar_lea.hbm %s7255_s29, 512  ;;  %s5026_s18 = scalar_lea.hbm %s7315_s2, 2048 }
 0x2dc   : > { %p5023_p10 = scmp.ne.s32.totalorder %s7255_s29, %s5022_s26  ;;  %p5027_p13 = scmp.lt.u32.totalorder %s7255_s29, %s7315_s2 }
 0x2dd   : > { %p5028_p0 = scmp.lt.u32.totalorder %s5026_s18, %s5022_s26  ;;  %p5030_p2 = scmp.lt.u32.totalorder %s5022_s26, %s7255_s29 }
 0x2de   : > { %p5024_p11 = pnand %p5023_p10, %p5191_p8 }
 0x2df   : > { %p5029_p1 = por %p5028_p0, %p5027_p13 }
 0x2e0   : > { %p5025_p12 = pneg %p5024_p11 }
 0x2e1   : > { %p5031_p3 = por %p5030_p2, %p5029_p1 }
 0x2e3   : > { %p5032_p4 = pnand %p5031_p3, %p5025_p12 }
 0x2e5   : > { %5035 = shalt.err (!%p5032_p4)
}
 0x2e6   : > { %s5114_s6 = smov 128   ;;  %s5115_s12 = smov 8  }
 0x2e7   : > { %4924 = dma.vmem_to_hbm [thread:$0]  (%p5191_p8), %s7257_s13, 512, %s7255_s29, %s3799_s17, %s5114_s6, %s5114_s6, %s5115_s12  }
 0x2e8 PF: > { %p4930_p5 = scmp.ge.s32.totalorder %s5102_s16, 2  ;;  %s3830_s3 = sand.u32 1, %s5074_s9  }
 0x2e9   : > { %s3831_s22 = scalar_lea.sflag [#allocation5], %s3830_s3 }
 0x2ea   : > { %p4927_p6 = pnand %p4930_p5, %p5195_p9 }
 0x2ec   : > { %5069 = dma.done.wait (!%p4927_p6), %s3831_s22, 512  }
 0x2ed   : > { %5071 = vsyncadd (!%p4927_p6), %s3831_s22, 4294966784  ;;  %s15_s16 = sadd.s32 1, %s5102_s16   ;;  %s7342_s9 = smov %s5078_s10 }
 0x2ee   : > { %p12_p7 = scmp.ge.s32.totalorder %s15_s16, 6   ;;  %s7343_s10 = smov %s5082_s11 }
 0x2ef   : > { %s7344_s11 = smov %s5203_s28  ;;  %s7345_s12 = smov %s5094_s14 }
 0x2f0   : > { %s7346_s13 = smov %s5098_s15  ;;  %s7347_s14 = smov %s7350_s19 }
 0x2f1   : > { %s7348_s15 = smov %s7354_s20  ;;  %14 = sbr.rel (!%p12_p7) target bundleno = 7 (0x7), region = 140 }
 0x2f8   :  { %3836 = vsyncpa [#allocation5], 1 }
 0x2f9   :  { %3838 = vsyncpa [#allocation5 + $0x1], 1 }

</bundles_post_ra>
